<compile_context>
chip_gen: v6e
topology: v6e:2x2x1
jax: 0.10.0
libtpu: 0.0.40
codegen_flags: <defaults>
</compile_context>

<pallas_src>
import functools

import jax
import jax.numpy as jnp
import numpy as np
from jax.experimental import pallas as pl
from jax.experimental.pallas import tpu as pltpu


# ----------------------------------------------------------------------------
# Fused decoder-layer kernel (one batch element per grid step)
# ----------------------------------------------------------------------------
def _decoder_layer_kernel(
        tgt_ref, qpos_ref, lb_ref, lsc_ref, src_ref, vmask_ref,
        colx_ref, coly_ref,
        w_qk_ref, b_qk_ref, w_v_ref, b_v_ref, w_o_ref, b_o_ref, g2_ref, be2_ref,
        w_val_ref, b_val_ref, w_oa_ref, b_oa_ref,
        w_co_ref, b_co_ref, g1_ref, be1_ref,
        w_f1_ref, b_f1_ref, w_f2_ref, b_f2_ref, g3_ref, be3_ref,
        out_tgt_ref, out_loc_ref,
        *, Lq, D, H, dh, P, L, spatial_shapes, level_start_index):
    """One full decoder layer (self-attn + MSDeformAttn + FFN) for one batch."""
    f32 = jnp.float32
    mdt = w_qk_ref.dtype          # MXU operand dtype (bf16 by default, f32 fallback)
    HLP = H * L * P

    def ln(x, g_ref, b_ref):      # LayerNorm: f32 VPU path (v5e has no bf16 VPU)
        mu = jnp.mean(x, axis=-1, keepdims=True)
        var = jnp.mean((x - mu) ** 2, axis=-1, keepdims=True)
        return (x - mu) * jax.lax.rsqrt(var + 1e-5) * g_ref[...] + b_ref[...]

    def mm(a, w_ref, b_ref):      # bf16 operands, f32 accumulate, f32 bias add
        return jnp.dot(a.astype(mdt), w_ref[...], preferred_element_type=f32) + b_ref[...]

    def softmax_rows(x):
        x = x - jnp.max(x, axis=-1, keepdims=True)
        e = jnp.exp(x)
        return e * pl.reciprocal(jnp.sum(e, axis=-1, keepdims=True), approx=True)

    tgt = tgt_ref[0].astype(f32)                        # (Lq, D)
    qpos = qpos_ref[0].astype(f32)                      # (Lq, D)

    # ---------------- self attention ----------------
    qk = mm(tgt + qpos, w_qk_ref, b_qk_ref)             # (Lq, 2D): [q | k]
    v = mm(tgt, w_v_ref, b_v_ref)                       # (Lq, D)
    scale = 1.0 / (dh ** 0.5)
    heads = []
    # TODO(synk): on v5e, batch the H head matmuls into a single (H,Lq,dh)
    # einsum to avoid sub-128-lane slices feeding tiny-K MXU passes.
    for h in range(H):
        qh = qk[:, h * dh:(h + 1) * dh].astype(mdt)
        kh = qk[:, D + h * dh:D + (h + 1) * dh].astype(mdt)
        vh = v[:, h * dh:(h + 1) * dh].astype(mdt)
        s = jax.lax.dot_general(qh, kh, (((1,), (1,)), ((), ())),
                                preferred_element_type=f32) * scale
        heads.append(jnp.dot(softmax_rows(s).astype(mdt), vh,
                             preferred_element_type=f32))
    attn = jnp.concatenate(heads, axis=1)               # (Lq, D)
    tgt = ln(tgt + mm(attn, w_o_ref, b_o_ref), g2_ref, be2_ref)

    # ---------------- cross attention: MSDeformAttn ----------------
    query = tgt + qpos
    value = mm(src_ref[0], w_val_ref, b_val_ref) * vmask_ref[0]      # (Ls, D) f32
    value = value.astype(mdt)                                        # bf16 for MXU
    off_aw = mm(query, w_oa_ref, b_oa_ref)        # (Lq, 3*HLP): [off_x | off_y | logits]
    loc_px = lb_ref[0] + off_aw[:, :2 * HLP] * lsc_ref[0]            # pixel-space locs
    out_loc_ref[0] = loc_px
    logits = off_aw[:, 2 * HLP:]

    # Slab-wide bilinear precompute: every op below runs on lane-dense (Lq, HLP)
    # planes (was per-(Lq,1) column work -> VALU-bound).
    x = loc_px[:, :HLP]
    y = loc_px[:, HLP:]
    x0 = jnp.floor(x)
    y0 = jnp.floor(y)
    fx = x - x0
    fy = y - y0
    aw = jnp.concatenate([softmax_rows(logits[:, h * L * P:(h + 1) * L * P])
                          for h in range(H)], axis=1)                # (Lq, HLP)
    cwy0 = (1.0 - fy) * aw      # weight of row y0   (attention weight folded in)
    cwy1 = fy * aw              # weight of row y0+1

    colx_all = colx_ref[...]    # (1, Ls) f32 x-coordinate of each flattened src pos
    coly_all = coly_ref[...]    # (1, Ls)
    head_acc = [jnp.zeros((Lq, dh), f32) for _ in range(H)]
    # Level loop outer so the level coordinate grids are sliced once (hoisted
    # out of the head loop).
    for l, (Hl, Wl) in enumerate(spatial_shapes):
        start = level_start_index[l]
        colx = colx_all[:, start:start + Hl * Wl]       # (1, Hl*Wl)
        coly = coly_all[:, start:start + Hl * Wl]
        for h in range(H):
            # Bilinear one-hot gather matrix (grid_sample: bilinear, zeros
            # padding, align_corners=False) built with a 2-wide x band +
            # parity select and a 2-way y-row select per point: half the
            # compare/select passes of the 4-corner form, and out-of-range
            # corners vanish automatically (no clip / validity masks).
            gmat = jnp.zeros((Lq, Hl * Wl), f32)
            for pt in range(P):
                j = (h * L + l) * P + pt
                x0p = x0[:, j:j + 1]
                y0p = y0[:, j:j + 1]
                fxp = fx[:, j:j + 1]
                band = (colx >= x0p) & (colx <= x0p + 1.0)
                wx = jnp.where(colx == x0p, 1.0 - fxp, fxp)
                wy = jnp.where(coly == y0p, cwy0[:, j:j + 1],
                               jnp.where(coly == y0p + 1.0, cwy1[:, j:j + 1], 0.0))
                gmat = gmat + jnp.where(band, wx * wy, 0.0)
            vlh = value[start:start + Hl * Wl, h * dh:(h + 1) * dh]  # (Hl*Wl, dh)
            head_acc[h] = head_acc[h] + jnp.dot(gmat.astype(mdt), vlh,
                                                preferred_element_type=f32)
    ca = jnp.concatenate(head_acc, axis=1)              # (Lq, D)
    tgt = ln(tgt + mm(ca, w_co_ref, b_co_ref), g1_ref, be1_ref)

    # ---------------- FFN ----------------
    hid = jnp.maximum(mm(tgt, w_f1_ref, b_f1_ref), 0.0)
    tgt = ln(tgt + mm(hid, w_f2_ref, b_f2_ref), g3_ref, be3_ref)

    out_tgt_ref[0] = tgt.astype(out_tgt_ref.dtype)


def _batched_spec(shape):
    trailing = tuple(shape[1:])
    zeros = (0,) * len(trailing)
    return pl.BlockSpec((1,) + trailing, lambda b, _z=zeros: (b,) + _z)


def _replicated_spec(shape):
    zeros = (0,) * len(shape)
    return pl.BlockSpec(tuple(shape), lambda b, _z=zeros: _z)


def decoder_layer_fused(weights, tgt, qpos, loc_base, loc_scale, src, vmask,
                        colx, coly, cfg):
    """One decoder layer = one pallas_call, grid over the batch dimension."""
    B, Lq, D = tgt.shape
    H, P = cfg['n_heads'], cfg['n_points']
    shapes = tuple(cfg['spatial_shapes'])
    lsi = tuple(cfg['level_start_index'])
    L = len(shapes)
    dh = D // H
    HLP = H * L * P

    batched = [tgt, qpos, loc_base, loc_scale, src, vmask]
    replicated = [colx, coly] + list(weights)

    # TODO(synk): at real Deformable-DETR sizes (Ls~2e4, D=256) tile src/value
    # along Ls (extra grid axis or pl.ANY + manual per-level DMA), tile Lq so
    # the (Lq, Hl*Wl) gather planes stay small, mark the invariant weight specs
    # pipeline_mode=pl.Buffered(1), and set vmem_limit_bytes explicitly (keep
    # headroom under v7x's 64 MiB).
    in_specs = ([_batched_spec(a.shape) for a in batched]
                + [_replicated_spec(a.shape) for a in replicated])
    out_specs = (_batched_spec((B, Lq, D)), _batched_spec((B, Lq, 2 * HLP)))
    out_shape = (jax.ShapeDtypeStruct((B, Lq, D), tgt.dtype),
                 jax.ShapeDtypeStruct((B, Lq, 2 * HLP), jnp.float32))

    kernel = functools.partial(
        _decoder_layer_kernel, Lq=Lq, D=D, H=H, dh=dh, P=P, L=L,
        spatial_shapes=shapes, level_start_index=lsi)

    new_tgt, loc_px = pl.pallas_call(
        kernel,
        grid=(B,),
        in_specs=in_specs,
        out_specs=out_specs,
        out_shape=out_shape,
        compiler_params=pltpu.CompilerParams(
            dimension_semantics=("parallel",)),   # batches across v7x's 2 TCs
    )(*batched, *replicated)

    # pixel-space [x-block|y-block] -> normalized (B, Lq, H, L, P, 2)
    loc_px = loc_px.reshape(B, Lq, 2, H, L, P)
    norm = jnp.array([[w for (h, w) in shapes], [h for (h, w) in shapes]],
                     jnp.float32)                                   # (2, L)
    loc = (loc_px + 0.5) / norm[None, None, :, None, :, None]
    return new_tgt, jnp.transpose(loc, (0, 1, 3, 4, 5, 2))


# ----------------------------------------------------------------------------
# Host-side preprocessing (hoisted out of the per-layer kernel / jit body)
# ----------------------------------------------------------------------------
def prepare_decoder_params(layers_params, n_heads, n_levels, n_points,
                           use_bf16_matmul=True):
    """Fuse/permute the per-layer weight layouts ONCE, outside the jitted fwd."""
    HLP = n_heads * n_levels * n_points
    mdt = jnp.bfloat16 if use_bf16_matmul else jnp.float32
    # offset columns (h,l,p,c) with c fastest -> [all x | all y] in (h,l,p) order
    perm = np.concatenate([np.arange(HLP) * 2, np.arange(HLP) * 2 + 1])
    out = []
    for p in layers_params:
        def mx(w):
            return jnp.asarray(w, mdt)

        def r1(b):
            return jnp.asarray(b, jnp.float32).reshape(1, -1)

        w_qk = mx(jnp.concatenate([p['sa_wq'], p['sa_wk']], axis=1))
        b_qk = r1(jnp.concatenate([p['sa_bq'], p['sa_bk']]))
        w_oa = mx(jnp.concatenate([p['ca_off_w'][:, perm], p['ca_attn_w']], axis=1))
        b_oa = r1(jnp.concatenate([p['ca_off_b'][perm], p['ca_attn_b']]))
        out.append([
            w_qk, b_qk, mx(p['sa_wv']), r1(p['sa_bv']), mx(p['sa_wo']), r1(p['sa_bo']),
            r1(p['norm2_g']), r1(p['norm2_b']),
            mx(p['ca_val_w']), r1(p['ca_val_b']), w_oa, b_oa,
            mx(p['ca_out_w']), r1(p['ca_out_b']), r1(p['norm1_g']), r1(p['norm1_b']),
            mx(p['ffn_w1']), r1(p['ffn_b1']), mx(p['ffn_w2']), r1(p['ffn_b2']),
            r1(p['norm3_g']), r1(p['norm3_b'])])
    return out


def _level_coord_grids(spatial_shapes):
    """Flattened per-position x / y coordinates, all levels concatenated."""
    xs, ys = [], []
    for (Hl, Wl) in spatial_shapes:
        yy, xx = np.meshgrid(np.arange(Hl), np.arange(Wl), indexing='ij')
        xs.append(xx.reshape(-1))
        ys.append(yy.reshape(-1))
    colx = jnp.asarray(np.concatenate(xs), jnp.float32).reshape(1, -1)
    coly = jnp.asarray(np.concatenate(ys), jnp.float32).reshape(1, -1)
    return colx, coly


def _build_loc_affine_px(rp_input, spatial_shapes, H, P):
    """loc_px = loc_base + offsets * loc_scale, directly in pixel coordinates,
    laid out as (B, Lq, 2*HLP) = [x-block | y-block]; covers 2-d and 4-d refs."""
    B, Lq, L, C = rp_input.shape
    wh = jnp.array([[w, h] for (h, w) in spatial_shapes], jnp.float32)   # (L,2)=(Wl,Hl)
    if C == 2:
        base = rp_input * wh[None, None] - 0.5
        scale = jnp.ones((B, Lq, L, 2), jnp.float32)
    else:  # C == 4:  loc = ref[..., :2] + off / P * ref[..., 2:] * 0.5
        base = rp_input[..., :2] * wh[None, None] - 0.5
        scale = rp_input[..., 2:] * (0.5 / P) * wh[None, None]

    def expand(a):  # (B,Lq,L,2) -> (B,Lq,2*H*L*P), [x-block|y-block], (h,l,p) order
        a = jnp.broadcast_to(a[:, :, None, :, None, :], (B, Lq, H, L, P, 2))
        a = jnp.transpose(a, (0, 1, 5, 2, 3, 4))
        return a.reshape(B, Lq, 2 * H * L * P)

    return expand(base), expand(scale)


# ----------------------------------------------------------------------------
# Decoder forward (matches PyTorch DeformableTransformerDecoder, eval mode)
# ----------------------------------------------------------------------------
def deformable_transformer_decoder_forward(layers_weights, tgt, reference_points, src,
                                           src_spatial_shapes, src_level_start_index,
                                           src_valid_ratios, n_heads, n_points,
                                           query_pos=None, src_padding_mask=None,
                                           return_intermediate=False):
    # TODO(synk): dropout from the PyTorch layers is omitted (eval mode).
    B, Lq, D = tgt.shape
    Ls = src.shape[1]
    shapes = tuple(src_spatial_shapes)
    lsi = tuple(int(s) for s in src_level_start_index)

    if reference_points.shape[-1] == 4:
        vr = jnp.concatenate([src_valid_ratios, src_valid_ratios], axis=-1)
        rp_input = reference_points[:, :, None] * vr[:, None]
    else:
        assert reference_points.shape[-1] == 2
        rp_input = reference_points[:, :, None] * src_valid_ratios[:, None]
    # bbox_embed is None in the reference module => reference points (and hence
    # the sampling-location affine) are identical every layer -> hoisted here.
    loc_base, loc_scale = _build_loc_affine_px(rp_input, shapes, n_heads, n_points)

    if src_padding_mask is None:
        vmask = jnp.ones((B, Ls, 1), jnp.float32)
    else:
        vmask = (1.0 - src_padding_mask.astype(jnp.float32)).reshape(B, Ls, 1)

    qpos = jnp.zeros_like(tgt) if query_pos is None else query_pos
    mdt = layers_weights[0][0].dtype
    src_mm = src.astype(mdt)            # bf16 on the MXU path halves src VMEM/DMA
    colx, coly = _level_coord_grids(shapes)

    cfg = dict(n_heads=n_heads, n_points=n_points,
               spatial_shapes=shapes, level_start_index=lsi)

    output = tgt
    intermediate = []
    intermediate_reference_points = []
    all_sampled_points = []
    for w in layers_weights:
        output, sampled = decoder_layer_fused(w, output, qpos, loc_base, loc_scale,
                                              src_mm, vmask, colx, coly, cfg)
        all_sampled_points.append(sampled)
        if return_intermediate:
            intermediate.append(output)
            intermediate_reference_points.append(reference_points)
    if return_intermediate:
        return jnp.stack(intermediate), jnp.stack(intermediate_reference_points)
    return output, reference_points, all_sampled_points


# ----------------------------------------------------------------------------
# Pure-JAX reference (for correctness check only)
# ----------------------------------------------------------------------------
def _ln_ref(x, g, b):
    mu = jnp.mean(x, axis=-1, keepdims=True)
    var = jnp.mean((x - mu) ** 2, axis=-1, keepdims=True)
    return (x - mu) * jax.lax.rsqrt(var + 1e-5) * g + b


def _bilinear_sample_level_ref(value_l, loc, Hl, Wl):
    B, Hh, _, dh = value_l.shape
    Lq, P = loc.shape[1], loc.shape[3]
    x = loc[..., 0] * Wl - 0.5
    y = loc[..., 1] * Hl - 0.5
    x0 = jnp.floor(x)
    y0 = jnp.floor(y)
    lx1 = x - x0
    lx0 = 1.0 - lx1
    ly1 = y - y0
    ly0 = 1.0 - ly1

    def corner(xc, yc, w):
        xi = xc.astype(jnp.int32)
        yi = yc.astype(jnp.int32)
        valid = ((xi >= 0) & (xi < Wl) & (yi >= 0) & (yi < Hl)).astype(value_l.dtype)
        idx = jnp.clip(yi, 0, Hl - 1) * Wl + jnp.clip(xi, 0, Wl - 1)
        idx_t = jnp.transpose(idx, (0, 2, 1, 3)).reshape(B, Hh, Lq * P)
        g = jnp.take_along_axis(value_l, idx_t[..., None], axis=2)
        g = g.reshape(B, Hh, Lq, P, dh)
        wv = jnp.transpose(w * valid, (0, 2, 1, 3))[..., None]
        return g * wv

    return (corner(x0, y0, lx0 * ly0) + corner(x0 + 1, y0, lx1 * ly0)
            + corner(x0, y0 + 1, lx0 * ly1) + corner(x0 + 1, y0 + 1, lx1 * ly1))


def _ref_layer(p, tgt, query_pos, rp_input, src, shapes, lsi, H, P, src_padding_mask):
    B, Lq, D = tgt.shape
    dh = D // H
    L = len(shapes)
    wp = tgt if query_pos is None else tgt + query_pos
    q = wp @ p['sa_wq'] + p['sa_bq']
    k = wp @ p['sa_wk'] + p['sa_bk']
    v = tgt @ p['sa_wv'] + p['sa_bv']

    def sh(x):
        return x.reshape(B, Lq, H, dh).transpose(0, 2, 1, 3)

    s = jnp.einsum('bhqd,bhkd->bhqk', sh(q), sh(k)) / (dh ** 0.5)
    attn = jnp.einsum('bhqk,bhkd->bhqd', jax.nn.softmax(s, -1), sh(v))
    attn = attn.transpose(0, 2, 1, 3).reshape(B, Lq, D)
    tgt = _ln_ref(tgt + attn @ p['sa_wo'] + p['sa_bo'], p['norm2_g'], p['norm2_b'])

    query = tgt if query_pos is None else tgt + query_pos
    value = src @ p['ca_val_w'] + p['ca_val_b']
    if src_padding_mask is not None:
        value = jnp.where(src_padding_mask[..., None], 0.0, value)
    value = value.reshape(B, -1, H, dh)
    off = (query @ p['ca_off_w'] + p['ca_off_b']).reshape(B, Lq, H, L, P, 2)
    aw = jax.nn.softmax((query @ p['ca_attn_w'] + p['ca_attn_b'])
                        .reshape(B, Lq, H, L * P), -1).reshape(B, Lq, H, L, P)
    if rp_input.shape[-1] == 2:
        normalizer = jnp.array([[w, h] for (h, w) in shapes], jnp.float32)
        loc = (rp_input[:, :, None, :, None, :]
               + off / normalizer[None, None, None, :, None, :])
    else:
        loc = (rp_input[:, :, None, :, None, :2]
               + off / P * rp_input[:, :, None, :, None, 2:] * 0.5)
    sampled_lv = []
    for lid, (Hl, Wl) in enumerate(shapes):
        st = lsi[lid]
        vl = value[:, st:st + Hl * Wl].transpose(0, 2, 1, 3)
        sampled_lv.append(_bilinear_sample_level_ref(vl, loc[:, :, :, lid], Hl, Wl))
    sampled = jnp.stack(sampled_lv, axis=3)                       # (B,H,Lq,L,P,dh)
    agg = jnp.sum(sampled * aw.transpose(0, 2, 1, 3, 4)[..., None], axis=(3, 4))
    agg = agg.transpose(0, 2, 1, 3).reshape(B, Lq, D)
    tgt = _ln_ref(tgt + agg @ p['ca_out_w'] + p['ca_out_b'], p['norm1_g'], p['norm1_b'])
    hid = jax.nn.relu(tgt @ p['ffn_w1'] + p['ffn_b1'])
    tgt = _ln_ref(tgt + hid @ p['ffn_w2'] + p['ffn_b2'], p['norm3_g'], p['norm3_b'])
    return tgt, loc


def _ref_decoder_forward(layers_params, tgt, reference_points, src, shapes, lsi,
                         valid_ratios, n_heads, n_points, query_pos=None,
                         src_padding_mask=None):
    out = tgt
    sampled_all = []
    for p in layers_params:
        if reference_points.shape[-1] == 4:
            vr = jnp.concatenate([valid_ratios, valid_ratios], axis=-1)
            rp_in = reference_points[:, :, None] * vr[:, None]
        else:
            rp_in = reference_points[:, :, None] * valid_ratios[:, None]
        out, loc = _ref_layer(p, out, query_pos, rp_in, src, shapes, lsi,
                              n_heads, n_points, src_padding_mask)
        sampled_all.append(loc)
    return out, reference_points, sampled_all


# ----------------------------------------------------------------------------
# Deterministic parameter init
# ----------------------------------------------------------------------------
def init_params(key, num_layers, D, H, L, P, Dff):
    def dense(k, fan_in, fan_out, scale=0.02):
        kw, kb = jax.random.split(k)
        w = jax.random.normal(kw, (fan_in, fan_out), jnp.float32) * scale
        b = jax.random.normal(kb, (fan_out,), jnp.float32) * 0.01
        return w, b

    layers = []
    for li in range(num_layers):
        k = jax.random.fold_in(key, li)
        ks = jax.random.split(k, 10)
        p = {}
        p['sa_wq'], p['sa_bq'] = dense(ks[0], D, D)
        p['sa_wk'], p['sa_bk'] = dense(ks[1], D, D)
        p['sa_wv'], p['sa_bv'] = dense(ks[2], D, D)
        p['sa_wo'], p['sa_bo'] = dense(ks[3], D, D)
        p['ca_val_w'], p['ca_val_b'] = dense(ks[4], D, D)
        p['ca_off_w'], p['ca_off_b'] = dense(ks[5], D, H * L * P * 2, scale=0.01)
        p['ca_attn_w'], p['ca_attn_b'] = dense(ks[6], D, H * L * P)
        p['ca_out_w'], p['ca_out_b'] = dense(ks[7], D, D)
        p['ffn_w1'], p['ffn_b1'] = dense(ks[8], D, Dff)
        p['ffn_w2'], p['ffn_b2'] = dense(ks[9], Dff, D)
        for n in ('norm1', 'norm2', 'norm3'):
            p[n + '_g'] = jnp.ones((D,), jnp.float32)
            p[n + '_b'] = jnp.zeros((D,), jnp.float32)
        layers.append(p)
    return layers


# ----------------------------------------------------------------------------
if __name__ == "__main__":
    B, Lq, D = 2, 8, 32
    n_heads, n_points = 4, 2
    d_ffn = 64
    num_layers = 2
    spatial_shapes = ((8, 8), (4, 4))           # static per-level (H_l, W_l)
    n_levels = len(spatial_shapes)
    Ls = sum(h * w for (h, w) in spatial_shapes)
    level_start_index = []
    acc = 0
    for (h, w) in spatial_shapes:
        level_start_index.append(acc)
        acc += h * w
    level_start_index = tuple(level_start_index)

    key = jax.random.PRNGKey(0)
    ks = jax.random.split(key, 6)
    tgt = jax.random.normal(ks[0], (B, Lq, D), jnp.float32)
    query_pos = jax.random.normal(ks[1], (B, Lq, D), jnp.float32) * 0.1
    reference_points = jax.random.uniform(ks[2], (B, Lq, 2), jnp.float32)
    src = jax.random.normal(ks[3], (B, Ls, D), jnp.float32)
    src_valid_ratios = jax.random.uniform(ks[4], (B, n_levels, 2), jnp.float32,
                                          minval=0.8, maxval=1.0)
    params = init_params(ks[5], num_layers, D, n_heads, n_levels, n_points, d_ffn)

    # Fused / permuted bf16 weight layouts, prepared once outside the jit.
    prepared = prepare_decoder_params(params, n_heads, n_levels, n_points,
                                      use_bf16_matmul=True)

    fwd = jax.jit(functools.partial(
        deformable_transformer_decoder_forward,
        src_spatial_shapes=spatial_shapes,
        src_level_start_index=level_start_index,
        n_heads=n_heads, n_points=n_points))

    output, ref_pts, all_sampled_points = fwd(
        prepared, tgt, reference_points, src,
        src_valid_ratios=src_valid_ratios, query_pos=query_pos)
    jax.block_until_ready((output, ref_pts, all_sampled_points))

    assert output.shape == (B, Lq, D)
    assert ref_pts.shape == (B, Lq, 2)
    assert len(all_sampled_points) == num_layers
    assert all_sampled_points[0].shape == (B, Lq, n_heads, n_levels, n_points, 2)
    assert bool(jnp.all(jnp.isfinite(output)))

    # Correctness check against a pure-JAX f32 reference of the same math
    # (tolerances account for bf16 MXU operands + approx reciprocal softmax).
    ref_out, _, ref_sampled = _ref_decoder_forward(
        params, tgt, reference_points, src, spatial_shapes, level_start_index,
        src_valid_ratios, n_heads, n_points, query_pos=query_pos)
    np.testing.assert_allclose(np.asarray(output), np.asarray(ref_out),
                               rtol=3e-2, atol=3e-2)
    for got, want in zip(all_sampled_points, ref_sampled):
        np.testing.assert_allclose(np.asarray(got), np.asarray(want),
                                   rtol=5e-3, atol=5e-3)

    print("KERNEL_OK")
</pallas_src>

<mosaic_0001>
module attributes {stable_mosaic.version = 11 : i64} {
  func.func @_decoder_layer_kernel(%arg0: i32, %arg1: memref<1x8x32xf32, #tpu.memory_space<vmem>>, %arg2: memref<1x8x32xf32, #tpu.memory_space<vmem>>, %arg3: memref<1x8x32xf32, #tpu.memory_space<vmem>>, %arg4: memref<1x8x32xf32, #tpu.memory_space<vmem>>, %arg5: memref<1x80x32xbf16, #tpu.memory_space<vmem>>, %arg6: memref<1x80x1xf32, #tpu.memory_space<vmem>>, %arg7: memref<1x80xf32, #tpu.memory_space<vmem>>, %arg8: memref<1x80xf32, #tpu.memory_space<vmem>>, %arg9: memref<32x64xbf16, #tpu.memory_space<vmem>>, %arg10: memref<1x64xf32, #tpu.memory_space<vmem>>, %arg11: memref<32x32xbf16, #tpu.memory_space<vmem>>, %arg12: memref<1x32xf32, #tpu.memory_space<vmem>>, %arg13: memref<32x32xbf16, #tpu.memory_space<vmem>>, %arg14: memref<1x32xf32, #tpu.memory_space<vmem>>, %arg15: memref<1x32xf32, #tpu.memory_space<vmem>>, %arg16: memref<1x32xf32, #tpu.memory_space<vmem>>, %arg17: memref<32x32xbf16, #tpu.memory_space<vmem>>, %arg18: memref<1x32xf32, #tpu.memory_space<vmem>>, %arg19: memref<32x48xbf16, #tpu.memory_space<vmem>>, %arg20: memref<1x48xf32, #tpu.memory_space<vmem>>, %arg21: memref<32x32xbf16, #tpu.memory_space<vmem>>, %arg22: memref<1x32xf32, #tpu.memory_space<vmem>>, %arg23: memref<1x32xf32, #tpu.memory_space<vmem>>, %arg24: memref<1x32xf32, #tpu.memory_space<vmem>>, %arg25: memref<32x64xbf16, #tpu.memory_space<vmem>>, %arg26: memref<1x64xf32, #tpu.memory_space<vmem>>, %arg27: memref<64x32xbf16, #tpu.memory_space<vmem>>, %arg28: memref<1x32xf32, #tpu.memory_space<vmem>>, %arg29: memref<1x32xf32, #tpu.memory_space<vmem>>, %arg30: memref<1x32xf32, #tpu.memory_space<vmem>>, %arg31: memref<1x8x32xf32, #tpu.memory_space<vmem>>, %arg32: memref<1x8x32xf32, #tpu.memory_space<vmem>>) attributes {dimension_semantics = [#tpu.dimension_semantics<parallel>], iteration_bounds = array<i64: 2>, scalar_prefetch = 0 : i64, scratch_operands = 0 : i64, tpu.core_type = #tpu.core_type<tc>, window_params = [{transform_indices = @transform_0, window_bounds = array<i64: 1, 8, 32>}, {transform_indices = @transform_1, window_bounds = array<i64: 1, 8, 32>}, {transform_indices = @transform_2, window_bounds = array<i64: 1, 8, 32>}, {transform_indices = @transform_3, window_bounds = array<i64: 1, 8, 32>}, {transform_indices = @transform_4, window_bounds = array<i64: 1, 80, 32>}, {transform_indices = @transform_5, window_bounds = array<i64: 1, 80, 1>}, {pipeline_mode = #tpu.pipeline_mode<synchronous>, transform_indices = @transform_6, window_bounds = array<i64: 1, 80>}, {pipeline_mode = #tpu.pipeline_mode<synchronous>, transform_indices = @transform_7, window_bounds = array<i64: 1, 80>}, {pipeline_mode = #tpu.pipeline_mode<synchronous>, transform_indices = @transform_8, window_bounds = array<i64: 32, 64>}, {pipeline_mode = #tpu.pipeline_mode<synchronous>, transform_indices = @transform_9, window_bounds = array<i64: 1, 64>}, {pipeline_mode = #tpu.pipeline_mode<synchronous>, transform_indices = @transform_10, window_bounds = array<i64: 32, 32>}, {pipeline_mode = #tpu.pipeline_mode<synchronous>, transform_indices = @transform_11, window_bounds = array<i64: 1, 32>}, {pipeline_mode = #tpu.pipeline_mode<synchronous>, transform_indices = @transform_12, window_bounds = array<i64: 32, 32>}, {pipeline_mode = #tpu.pipeline_mode<synchronous>, transform_indices = @transform_13, window_bounds = array<i64: 1, 32>}, {pipeline_mode = #tpu.pipeline_mode<synchronous>, transform_indices = @transform_14, window_bounds = array<i64: 1, 32>}, {pipeline_mode = #tpu.pipeline_mode<synchronous>, transform_indices = @transform_15, window_bounds = array<i64: 1, 32>}, {pipeline_mode = #tpu.pipeline_mode<synchronous>, transform_indices = @transform_16, window_bounds = array<i64: 32, 32>}, {pipeline_mode = #tpu.pipeline_mode<synchronous>, transform_indices = @transform_17, window_bounds = array<i64: 1, 32>}, {pipeline_mode = #tpu.pipeline_mode<synchronous>, transform_indices = @transform_18, window_bounds = array<i64: 32, 48>}, {pipeline_mode = #tpu.pipeline_mode<synchronous>, transform_indices = @transform_19, window_bounds = array<i64: 1, 48>}, {pipeline_mode = #tpu.pipeline_mode<synchronous>, transform_indices = @transform_20, window_bounds = array<i64: 32, 32>}, {pipeline_mode = #tpu.pipeline_mode<synchronous>, transform_indices = @transform_21, window_bounds = array<i64: 1, 32>}, {pipeline_mode = #tpu.pipeline_mode<synchronous>, transform_indices = @transform_22, window_bounds = array<i64: 1, 32>}, {pipeline_mode = #tpu.pipeline_mode<synchronous>, transform_indices = @transform_23, window_bounds = array<i64: 1, 32>}, {pipeline_mode = #tpu.pipeline_mode<synchronous>, transform_indices = @transform_24, window_bounds = array<i64: 32, 64>}, {pipeline_mode = #tpu.pipeline_mode<synchronous>, transform_indices = @transform_25, window_bounds = array<i64: 1, 64>}, {pipeline_mode = #tpu.pipeline_mode<synchronous>, transform_indices = @transform_26, window_bounds = array<i64: 64, 32>}, {pipeline_mode = #tpu.pipeline_mode<synchronous>, transform_indices = @transform_27, window_bounds = array<i64: 1, 32>}, {pipeline_mode = #tpu.pipeline_mode<synchronous>, transform_indices = @transform_28, window_bounds = array<i64: 1, 32>}, {pipeline_mode = #tpu.pipeline_mode<synchronous>, transform_indices = @transform_29, window_bounds = array<i64: 1, 32>}, {transform_indices = @transform_30, window_bounds = array<i64: 1, 8, 32>}, {transform_indices = @transform_31, window_bounds = array<i64: 1, 8, 32>}]} {
    %c0 = arith.constant 0 : index
    %c0_0 = arith.constant 0 : index
    %c0_1 = arith.constant 0 : index
    %0 = vector.load %arg1[%c0, %c0_0, %c0_1] : memref<1x8x32xf32, #tpu.memory_space<vmem>>, vector<1x8x32xf32>
    %1 = vector.shape_cast %0 : vector<1x8x32xf32> to vector<8x32xf32>
    %c0_2 = arith.constant 0 : index
    %c0_3 = arith.constant 0 : index
    %c0_4 = arith.constant 0 : index
    %2 = vector.load %arg2[%c0_2, %c0_3, %c0_4] : memref<1x8x32xf32, #tpu.memory_space<vmem>>, vector<1x8x32xf32>
    %3 = vector.shape_cast %2 : vector<1x8x32xf32> to vector<8x32xf32>
    %4 = arith.addf %1, %3 : vector<8x32xf32>
    %5 = arith.truncf %4 : vector<8x32xf32> to vector<8x32xbf16>
    %c0_5 = arith.constant 0 : index
    %c0_6 = arith.constant 0 : index
    %6 = vector.load %arg9[%c0_5, %c0_6] : memref<32x64xbf16, #tpu.memory_space<vmem>>, vector<32x64xbf16>
    %cst = arith.constant dense<0.000000e+00> : vector<8x64xf32>
    %7 = tpu.matmul %5, %6, %cst {dimension_numbers = #tpu.dot_dimension_numbers<[1], [0], [0], [1], [0, 0, 1, 1], [], []>} : vector<8x32xbf16>, vector<32x64xbf16>, vector<8x64xf32> -> vector<8x64xf32>
    %c0_7 = arith.constant 0 : index
    %c0_8 = arith.constant 0 : index
    %8 = vector.load %arg10[%c0_7, %c0_8] : memref<1x64xf32, #tpu.memory_space<vmem>>, vector<1x64xf32>
    %9 = vector.broadcast %8 : vector<1x64xf32> to vector<8x64xf32>
    %10 = arith.addf %7, %9 : vector<8x64xf32>
    %11 = arith.truncf %1 : vector<8x32xf32> to vector<8x32xbf16>
    %c0_9 = arith.constant 0 : index
    %c0_10 = arith.constant 0 : index
    %12 = vector.load %arg11[%c0_9, %c0_10] : memref<32x32xbf16, #tpu.memory_space<vmem>>, vector<32x32xbf16>
    %cst_11 = arith.constant dense<0.000000e+00> : vector<8x32xf32>
    %13 = tpu.matmul %11, %12, %cst_11 {dimension_numbers = #tpu.dot_dimension_numbers<[1], [0], [0], [1], [0, 0, 1, 1], [], []>} : vector<8x32xbf16>, vector<32x32xbf16>, vector<8x32xf32> -> vector<8x32xf32>
    %c0_12 = arith.constant 0 : index
    %c0_13 = arith.constant 0 : index
    %14 = vector.load %arg12[%c0_12, %c0_13] : memref<1x32xf32, #tpu.memory_space<vmem>>, vector<1x32xf32>
    %15 = vector.broadcast %14 : vector<1x32xf32> to vector<8x32xf32>
    %16 = arith.addf %13, %15 : vector<8x32xf32>
    %17 = vector.extract_strided_slice %10 {offsets = [0, 0], sizes = [8, 8], strides = [1, 1]} : vector<8x64xf32> to vector<8x8xf32>
    %18 = arith.truncf %17 : vector<8x8xf32> to vector<8x8xbf16>
    %19 = vector.extract_strided_slice %10 {offsets = [0, 32], sizes = [8, 8], strides = [1, 1]} : vector<8x64xf32> to vector<8x8xf32>
    %20 = arith.truncf %19 : vector<8x8xf32> to vector<8x8xbf16>
    %21 = vector.extract_strided_slice %16 {offsets = [0, 0], sizes = [8, 8], strides = [1, 1]} : vector<8x32xf32> to vector<8x8xf32>
    %22 = arith.truncf %21 : vector<8x8xf32> to vector<8x8xbf16>
    %cst_14 = arith.constant dense<0.000000e+00> : vector<8x8xf32>
    %23 = tpu.matmul %18, %20, %cst_14 {dimension_numbers = #tpu.dot_dimension_numbers<[1], [1], [0], [0], [0, 0, 1, 0], [], []>} : vector<8x8xbf16>, vector<8x8xbf16>, vector<8x8xf32> -> vector<8x8xf32>
    %cst_15 = arith.constant 0.353553385 : f32
    %24 = vector.broadcast %cst_15 : f32 to vector<8x8xf32>
    %25 = arith.mulf %23, %24 : vector<8x8xf32>
    %cst_16 = arith.constant dense<0xFF800000> : vector<8xf32>
    %26 = vector.multi_reduction <maximumf>, %25, %cst_16 [1] : vector<8x8xf32> to vector<8xf32>
    %27 = vector.shape_cast %26 : vector<8xf32> to vector<8x1xf32>
    %28 = vector.broadcast %27 : vector<8x1xf32> to vector<8x8xf32>
    %29 = arith.subf %25, %28 : vector<8x8xf32>
    %30 = math.exp %29 : vector<8x8xf32>
    %cst_17 = arith.constant dense<0.000000e+00> : vector<8xf32>
    %31 = vector.multi_reduction <add>, %30, %cst_17 [1] : vector<8x8xf32> to vector<8xf32>
    %32 = vector.shape_cast %31 : vector<8xf32> to vector<8x1xf32>
    %33 = tpu.reciprocal %32 {approx = true} : vector<8x1xf32> -> vector<8x1xf32>
    %34 = vector.broadcast %33 : vector<8x1xf32> to vector<8x8xf32>
    %35 = arith.mulf %30, %34 : vector<8x8xf32>
    %36 = arith.truncf %35 : vector<8x8xf32> to vector<8x8xbf16>
    %cst_18 = arith.constant dense<0.000000e+00> : vector<8x8xf32>
    %37 = tpu.matmul %36, %22, %cst_18 {dimension_numbers = #tpu.dot_dimension_numbers<[1], [0], [0], [1], [0, 0, 1, 1], [], []>} : vector<8x8xbf16>, vector<8x8xbf16>, vector<8x8xf32> -> vector<8x8xf32>
    %38 = vector.extract_strided_slice %10 {offsets = [0, 8], sizes = [8, 8], strides = [1, 1]} : vector<8x64xf32> to vector<8x8xf32>
    %39 = arith.truncf %38 : vector<8x8xf32> to vector<8x8xbf16>
    %40 = vector.extract_strided_slice %10 {offsets = [0, 40], sizes = [8, 8], strides = [1, 1]} : vector<8x64xf32> to vector<8x8xf32>
    %41 = arith.truncf %40 : vector<8x8xf32> to vector<8x8xbf16>
    %42 = vector.extract_strided_slice %16 {offsets = [0, 8], sizes = [8, 8], strides = [1, 1]} : vector<8x32xf32> to vector<8x8xf32>
    %43 = arith.truncf %42 : vector<8x8xf32> to vector<8x8xbf16>
    %cst_19 = arith.constant dense<0.000000e+00> : vector<8x8xf32>
    %44 = tpu.matmul %39, %41, %cst_19 {dimension_numbers = #tpu.dot_dimension_numbers<[1], [1], [0], [0], [0, 0, 1, 0], [], []>} : vector<8x8xbf16>, vector<8x8xbf16>, vector<8x8xf32> -> vector<8x8xf32>
    %cst_20 = arith.constant 0.353553385 : f32
    %45 = vector.broadcast %cst_20 : f32 to vector<8x8xf32>
    %46 = arith.mulf %44, %45 : vector<8x8xf32>
    %cst_21 = arith.constant dense<0xFF800000> : vector<8xf32>
    %47 = vector.multi_reduction <maximumf>, %46, %cst_21 [1] : vector<8x8xf32> to vector<8xf32>
    %48 = vector.shape_cast %47 : vector<8xf32> to vector<8x1xf32>
    %49 = vector.broadcast %48 : vector<8x1xf32> to vector<8x8xf32>
    %50 = arith.subf %46, %49 : vector<8x8xf32>
    %51 = math.exp %50 : vector<8x8xf32>
    %cst_22 = arith.constant dense<0.000000e+00> : vector<8xf32>
    %52 = vector.multi_reduction <add>, %51, %cst_22 [1] : vector<8x8xf32> to vector<8xf32>
    %53 = vector.shape_cast %52 : vector<8xf32> to vector<8x1xf32>
    %54 = tpu.reciprocal %53 {approx = true} : vector<8x1xf32> -> vector<8x1xf32>
    %55 = vector.broadcast %54 : vector<8x1xf32> to vector<8x8xf32>
    %56 = arith.mulf %51, %55 : vector<8x8xf32>
    %57 = arith.truncf %56 : vector<8x8xf32> to vector<8x8xbf16>
    %cst_23 = arith.constant dense<0.000000e+00> : vector<8x8xf32>
    %58 = tpu.matmul %57, %43, %cst_23 {dimension_numbers = #tpu.dot_dimension_numbers<[1], [0], [0], [1], [0, 0, 1, 1], [], []>} : vector<8x8xbf16>, vector<8x8xbf16>, vector<8x8xf32> -> vector<8x8xf32>
    %59 = vector.extract_strided_slice %10 {offsets = [0, 16], sizes = [8, 8], strides = [1, 1]} : vector<8x64xf32> to vector<8x8xf32>
    %60 = arith.truncf %59 : vector<8x8xf32> to vector<8x8xbf16>
    %61 = vector.extract_strided_slice %10 {offsets = [0, 48], sizes = [8, 8], strides = [1, 1]} : vector<8x64xf32> to vector<8x8xf32>
    %62 = arith.truncf %61 : vector<8x8xf32> to vector<8x8xbf16>
    %63 = vector.extract_strided_slice %16 {offsets = [0, 16], sizes = [8, 8], strides = [1, 1]} : vector<8x32xf32> to vector<8x8xf32>
    %64 = arith.truncf %63 : vector<8x8xf32> to vector<8x8xbf16>
    %cst_24 = arith.constant dense<0.000000e+00> : vector<8x8xf32>
    %65 = tpu.matmul %60, %62, %cst_24 {dimension_numbers = #tpu.dot_dimension_numbers<[1], [1], [0], [0], [0, 0, 1, 0], [], []>} : vector<8x8xbf16>, vector<8x8xbf16>, vector<8x8xf32> -> vector<8x8xf32>
    %cst_25 = arith.constant 0.353553385 : f32
    %66 = vector.broadcast %cst_25 : f32 to vector<8x8xf32>
    %67 = arith.mulf %65, %66 : vector<8x8xf32>
    %cst_26 = arith.constant dense<0xFF800000> : vector<8xf32>
    %68 = vector.multi_reduction <maximumf>, %67, %cst_26 [1] : vector<8x8xf32> to vector<8xf32>
    %69 = vector.shape_cast %68 : vector<8xf32> to vector<8x1xf32>
    %70 = vector.broadcast %69 : vector<8x1xf32> to vector<8x8xf32>
    %71 = arith.subf %67, %70 : vector<8x8xf32>
    %72 = math.exp %71 : vector<8x8xf32>
    %cst_27 = arith.constant dense<0.000000e+00> : vector<8xf32>
    %73 = vector.multi_reduction <add>, %72, %cst_27 [1] : vector<8x8xf32> to vector<8xf32>
    %74 = vector.shape_cast %73 : vector<8xf32> to vector<8x1xf32>
    %75 = tpu.reciprocal %74 {approx = true} : vector<8x1xf32> -> vector<8x1xf32>
    %76 = vector.broadcast %75 : vector<8x1xf32> to vector<8x8xf32>
    %77 = arith.mulf %72, %76 : vector<8x8xf32>
    %78 = arith.truncf %77 : vector<8x8xf32> to vector<8x8xbf16>
    %cst_28 = arith.constant dense<0.000000e+00> : vector<8x8xf32>
    %79 = tpu.matmul %78, %64, %cst_28 {dimension_numbers = #tpu.dot_dimension_numbers<[1], [0], [0], [1], [0, 0, 1, 1], [], []>} : vector<8x8xbf16>, vector<8x8xbf16>, vector<8x8xf32> -> vector<8x8xf32>
    %80 = vector.extract_strided_slice %10 {offsets = [0, 24], sizes = [8, 8], strides = [1, 1]} : vector<8x64xf32> to vector<8x8xf32>
    %81 = arith.truncf %80 : vector<8x8xf32> to vector<8x8xbf16>
    %82 = vector.extract_strided_slice %10 {offsets = [0, 56], sizes = [8, 8], strides = [1, 1]} : vector<8x64xf32> to vector<8x8xf32>
    %83 = arith.truncf %82 : vector<8x8xf32> to vector<8x8xbf16>
    %84 = vector.extract_strided_slice %16 {offsets = [0, 24], sizes = [8, 8], strides = [1, 1]} : vector<8x32xf32> to vector<8x8xf32>
    %85 = arith.truncf %84 : vector<8x8xf32> to vector<8x8xbf16>
    %cst_29 = arith.constant dense<0.000000e+00> : vector<8x8xf32>
    %86 = tpu.matmul %81, %83, %cst_29 {dimension_numbers = #tpu.dot_dimension_numbers<[1], [1], [0], [0], [0, 0, 1, 0], [], []>} : vector<8x8xbf16>, vector<8x8xbf16>, vector<8x8xf32> -> vector<8x8xf32>
    %cst_30 = arith.constant 0.353553385 : f32
    %87 = vector.broadcast %cst_30 : f32 to vector<8x8xf32>
    %88 = arith.mulf %86, %87 : vector<8x8xf32>
    %cst_31 = arith.constant dense<0xFF800000> : vector<8xf32>
    %89 = vector.multi_reduction <maximumf>, %88, %cst_31 [1] : vector<8x8xf32> to vector<8xf32>
    %90 = vector.shape_cast %89 : vector<8xf32> to vector<8x1xf32>
    %91 = vector.broadcast %90 : vector<8x1xf32> to vector<8x8xf32>
    %92 = arith.subf %88, %91 : vector<8x8xf32>
    %93 = math.exp %92 : vector<8x8xf32>
    %cst_32 = arith.constant dense<0.000000e+00> : vector<8xf32>
    %94 = vector.multi_reduction <add>, %93, %cst_32 [1] : vector<8x8xf32> to vector<8xf32>
    %95 = vector.shape_cast %94 : vector<8xf32> to vector<8x1xf32>
    %96 = tpu.reciprocal %95 {approx = true} : vector<8x1xf32> -> vector<8x1xf32>
    %97 = vector.broadcast %96 : vector<8x1xf32> to vector<8x8xf32>
    %98 = arith.mulf %93, %97 : vector<8x8xf32>
    %99 = arith.truncf %98 : vector<8x8xf32> to vector<8x8xbf16>
    %cst_33 = arith.constant dense<0.000000e+00> : vector<8x8xf32>
    %100 = tpu.matmul %99, %85, %cst_33 {dimension_numbers = #tpu.dot_dimension_numbers<[1], [0], [0], [1], [0, 0, 1, 1], [], []>} : vector<8x8xbf16>, vector<8x8xbf16>, vector<8x8xf32> -> vector<8x8xf32>
    %101 = tpu.concatenate %37, %58, %79, %100 in 1 : vector<8x8xf32>, vector<8x8xf32>, vector<8x8xf32>, vector<8x8xf32> -> vector<8x32xf32>
    %102 = arith.truncf %101 : vector<8x32xf32> to vector<8x32xbf16>
    %c0_34 = arith.constant 0 : index
    %c0_35 = arith.constant 0 : index
    %103 = vector.load %arg13[%c0_34, %c0_35] : memref<32x32xbf16, #tpu.memory_space<vmem>>, vector<32x32xbf16>
    %cst_36 = arith.constant dense<0.000000e+00> : vector<8x32xf32>
    %104 = tpu.matmul %102, %103, %cst_36 {dimension_numbers = #tpu.dot_dimension_numbers<[1], [0], [0], [1], [0, 0, 1, 1], [], []>} : vector<8x32xbf16>, vector<32x32xbf16>, vector<8x32xf32> -> vector<8x32xf32>
    %c0_37 = arith.constant 0 : index
    %c0_38 = arith.constant 0 : index
    %105 = vector.load %arg14[%c0_37, %c0_38] : memref<1x32xf32, #tpu.memory_space<vmem>>, vector<1x32xf32>
    %106 = vector.broadcast %105 : vector<1x32xf32> to vector<8x32xf32>
    %107 = arith.addf %104, %106 : vector<8x32xf32>
    %108 = arith.addf %1, %107 : vector<8x32xf32>
    %cst_39 = arith.constant dense<0.000000e+00> : vector<8xf32>
    %109 = vector.multi_reduction <add>, %108, %cst_39 [1] : vector<8x32xf32> to vector<8xf32>
    %110 = vector.shape_cast %109 : vector<8xf32> to vector<8x1xf32>
    %cst_40 = arith.constant 3.200000e+01 : f32
    %111 = vector.broadcast %cst_40 : f32 to vector<8x1xf32>
    %112 = arith.divf %110, %111 : vector<8x1xf32>
    %113 = vector.broadcast %112 : vector<8x1xf32> to vector<8x32xf32>
    %114 = arith.subf %108, %113 : vector<8x32xf32>
    %115 = arith.mulf %114, %114 : vector<8x32xf32>
    %cst_41 = arith.constant dense<0.000000e+00> : vector<8xf32>
    %116 = vector.multi_reduction <add>, %115, %cst_41 [1] : vector<8x32xf32> to vector<8xf32>
    %117 = vector.shape_cast %116 : vector<8xf32> to vector<8x1xf32>
    %cst_42 = arith.constant 3.200000e+01 : f32
    %118 = vector.broadcast %cst_42 : f32 to vector<8x1xf32>
    %119 = arith.divf %117, %118 : vector<8x1xf32>
    %120 = vector.broadcast %112 : vector<8x1xf32> to vector<8x32xf32>
    %121 = arith.subf %108, %120 : vector<8x32xf32>
    %cst_43 = arith.constant 9.99999974E-6 : f32
    %122 = vector.broadcast %cst_43 : f32 to vector<8x1xf32>
    %123 = arith.addf %119, %122 : vector<8x1xf32>
    %124 = math.rsqrt %123 : vector<8x1xf32>
    %125 = vector.broadcast %124 : vector<8x1xf32> to vector<8x32xf32>
    %126 = arith.mulf %121, %125 : vector<8x32xf32>
    %c0_44 = arith.constant 0 : index
    %c0_45 = arith.constant 0 : index
    %127 = vector.load %arg15[%c0_44, %c0_45] : memref<1x32xf32, #tpu.memory_space<vmem>>, vector<1x32xf32>
    %128 = vector.broadcast %127 : vector<1x32xf32> to vector<8x32xf32>
    %129 = arith.mulf %126, %128 : vector<8x32xf32>
    %c0_46 = arith.constant 0 : index
    %c0_47 = arith.constant 0 : index
    %130 = vector.load %arg16[%c0_46, %c0_47] : memref<1x32xf32, #tpu.memory_space<vmem>>, vector<1x32xf32>
    %131 = vector.broadcast %130 : vector<1x32xf32> to vector<8x32xf32>
    %132 = arith.addf %129, %131 : vector<8x32xf32>
    %133 = arith.addf %132, %3 : vector<8x32xf32>
    %c0_48 = arith.constant 0 : index
    %c0_49 = arith.constant 0 : index
    %c0_50 = arith.constant 0 : index
    %134 = vector.load %arg5[%c0_48, %c0_49, %c0_50] : memref<1x80x32xbf16, #tpu.memory_space<vmem>>, vector<1x80x32xbf16>
    %135 = vector.shape_cast %134 : vector<1x80x32xbf16> to vector<80x32xbf16>
    %c0_51 = arith.constant 0 : index
    %c0_52 = arith.constant 0 : index
    %136 = vector.load %arg17[%c0_51, %c0_52] : memref<32x32xbf16, #tpu.memory_space<vmem>>, vector<32x32xbf16>
    %cst_53 = arith.constant dense<0.000000e+00> : vector<80x32xf32>
    %137 = tpu.matmul %135, %136, %cst_53 {dimension_numbers = #tpu.dot_dimension_numbers<[1], [0], [0], [1], [0, 0, 1, 1], [], []>} : vector<80x32xbf16>, vector<32x32xbf16>, vector<80x32xf32> -> vector<80x32xf32>
    %c0_54 = arith.constant 0 : index
    %c0_55 = arith.constant 0 : index
    %138 = vector.load %arg18[%c0_54, %c0_55] : memref<1x32xf32, #tpu.memory_space<vmem>>, vector<1x32xf32>
    %139 = vector.broadcast %138 : vector<1x32xf32> to vector<80x32xf32>
    %140 = arith.addf %137, %139 : vector<80x32xf32>
    %c0_56 = arith.constant 0 : index
    %c0_57 = arith.constant 0 : index
    %c0_58 = arith.constant 0 : index
    %141 = vector.load %arg6[%c0_56, %c0_57, %c0_58] : memref<1x80x1xf32, #tpu.memory_space<vmem>>, vector<1x80x1xf32>
    %142 = vector.shape_cast %141 : vector<1x80x1xf32> to vector<80x1xf32>
    %143 = vector.broadcast %142 : vector<80x1xf32> to vector<80x32xf32>
    %144 = arith.mulf %140, %143 : vector<80x32xf32>
    %145 = arith.truncf %144 : vector<80x32xf32> to vector<80x32xbf16>
    %146 = arith.truncf %133 : vector<8x32xf32> to vector<8x32xbf16>
    %c0_59 = arith.constant 0 : index
    %c0_60 = arith.constant 0 : index
    %147 = vector.load %arg19[%c0_59, %c0_60] : memref<32x48xbf16, #tpu.memory_space<vmem>>, vector<32x48xbf16>
    %cst_61 = arith.constant dense<0.000000e+00> : vector<8x48xf32>
    %148 = tpu.matmul %146, %147, %cst_61 {dimension_numbers = #tpu.dot_dimension_numbers<[1], [0], [0], [1], [0, 0, 1, 1], [], []>} : vector<8x32xbf16>, vector<32x48xbf16>, vector<8x48xf32> -> vector<8x48xf32>
    %c0_62 = arith.constant 0 : index
    %c0_63 = arith.constant 0 : index
    %149 = vector.load %arg20[%c0_62, %c0_63] : memref<1x48xf32, #tpu.memory_space<vmem>>, vector<1x48xf32>
    %150 = vector.broadcast %149 : vector<1x48xf32> to vector<8x48xf32>
    %151 = arith.addf %148, %150 : vector<8x48xf32>
    %c0_64 = arith.constant 0 : index
    %c0_65 = arith.constant 0 : index
    %c0_66 = arith.constant 0 : index
    %152 = vector.load %arg3[%c0_64, %c0_65, %c0_66] : memref<1x8x32xf32, #tpu.memory_space<vmem>>, vector<1x8x32xf32>
    %153 = vector.shape_cast %152 : vector<1x8x32xf32> to vector<8x32xf32>
    %154 = vector.extract_strided_slice %151 {offsets = [0, 0], sizes = [8, 32], strides = [1, 1]} : vector<8x48xf32> to vector<8x32xf32>
    %c0_67 = arith.constant 0 : index
    %c0_68 = arith.constant 0 : index
    %c0_69 = arith.constant 0 : index
    %155 = vector.load %arg4[%c0_67, %c0_68, %c0_69] : memref<1x8x32xf32, #tpu.memory_space<vmem>>, vector<1x8x32xf32>
    %156 = vector.shape_cast %155 : vector<1x8x32xf32> to vector<8x32xf32>
    %157 = arith.mulf %154, %156 : vector<8x32xf32>
    %158 = arith.addf %153, %157 : vector<8x32xf32>
    %c0_70 = arith.constant 0 : index
    %c0_71 = arith.constant 0 : index
    %c0_72 = arith.constant 0 : index
    %159 = vector.load %arg32[%c0_70, %c0_71, %c0_72] : memref<1x8x32xf32, #tpu.memory_space<vmem>>, vector<1x8x32xf32>
    %160 = vector.shape_cast %159 : vector<1x8x32xf32> to vector<8x32xf32>
    %161 = vector.shape_cast %158 : vector<8x32xf32> to vector<1x8x32xf32>
    tpu.vector_store %arg32[%c0_70, %c0_71, %c0_72], %161 {strides = array<i32>} : memref<1x8x32xf32, #tpu.memory_space<vmem>>, vector<1x8x32xf32>,
    %162 = vector.extract_strided_slice %151 {offsets = [0, 32], sizes = [8, 16], strides = [1, 1]} : vector<8x48xf32> to vector<8x16xf32>
    %163 = vector.extract_strided_slice %158 {offsets = [0, 0], sizes = [8, 16], strides = [1, 1]} : vector<8x32xf32> to vector<8x16xf32>
    %164 = vector.extract_strided_slice %158 {offsets = [0, 16], sizes = [8, 16], strides = [1, 1]} : vector<8x32xf32> to vector<8x16xf32>
    %165 = math.floor %163 : vector<8x16xf32>
    %166 = math.floor %164 : vector<8x16xf32>
    %167 = arith.subf %163, %165 : vector<8x16xf32>
    %168 = arith.subf %164, %166 : vector<8x16xf32>
    %169 = vector.extract_strided_slice %162 {offsets = [0, 0], sizes = [8, 4], strides = [1, 1]} : vector<8x16xf32> to vector<8x4xf32>
    %cst_73 = arith.constant dense<0xFF800000> : vector<8xf32>
    %170 = vector.multi_reduction <maximumf>, %169, %cst_73 [1] : vector<8x4xf32> to vector<8xf32>
    %171 = vector.shape_cast %170 : vector<8xf32> to vector<8x1xf32>
    %172 = vector.broadcast %171 : vector<8x1xf32> to vector<8x4xf32>
    %173 = arith.subf %169, %172 : vector<8x4xf32>
    %174 = math.exp %173 : vector<8x4xf32>
    %cst_74 = arith.constant dense<0.000000e+00> : vector<8xf32>
    %175 = vector.multi_reduction <add>, %174, %cst_74 [1] : vector<8x4xf32> to vector<8xf32>
    %176 = vector.shape_cast %175 : vector<8xf32> to vector<8x1xf32>
    %177 = tpu.reciprocal %176 {approx = true} : vector<8x1xf32> -> vector<8x1xf32>
    %178 = vector.broadcast %177 : vector<8x1xf32> to vector<8x4xf32>
    %179 = arith.mulf %174, %178 : vector<8x4xf32>
    %180 = vector.extract_strided_slice %162 {offsets = [0, 4], sizes = [8, 4], strides = [1, 1]} : vector<8x16xf32> to vector<8x4xf32>
    %cst_75 = arith.constant dense<0xFF800000> : vector<8xf32>
    %181 = vector.multi_reduction <maximumf>, %180, %cst_75 [1] : vector<8x4xf32> to vector<8xf32>
    %182 = vector.shape_cast %181 : vector<8xf32> to vector<8x1xf32>
    %183 = vector.broadcast %182 : vector<8x1xf32> to vector<8x4xf32>
    %184 = arith.subf %180, %183 : vector<8x4xf32>
    %185 = math.exp %184 : vector<8x4xf32>
    %cst_76 = arith.constant dense<0.000000e+00> : vector<8xf32>
    %186 = vector.multi_reduction <add>, %185, %cst_76 [1] : vector<8x4xf32> to vector<8xf32>
    %187 = vector.shape_cast %186 : vector<8xf32> to vector<8x1xf32>
    %188 = tpu.reciprocal %187 {approx = true} : vector<8x1xf32> -> vector<8x1xf32>
    %189 = vector.broadcast %188 : vector<8x1xf32> to vector<8x4xf32>
    %190 = arith.mulf %185, %189 : vector<8x4xf32>
    %191 = vector.extract_strided_slice %162 {offsets = [0, 8], sizes = [8, 4], strides = [1, 1]} : vector<8x16xf32> to vector<8x4xf32>
    %cst_77 = arith.constant dense<0xFF800000> : vector<8xf32>
    %192 = vector.multi_reduction <maximumf>, %191, %cst_77 [1] : vector<8x4xf32> to vector<8xf32>
    %193 = vector.shape_cast %192 : vector<8xf32> to vector<8x1xf32>
    %194 = vector.broadcast %193 : vector<8x1xf32> to vector<8x4xf32>
    %195 = arith.subf %191, %194 : vector<8x4xf32>
    %196 = math.exp %195 : vector<8x4xf32>
    %cst_78 = arith.constant dense<0.000000e+00> : vector<8xf32>
    %197 = vector.multi_reduction <add>, %196, %cst_78 [1] : vector<8x4xf32> to vector<8xf32>
    %198 = vector.shape_cast %197 : vector<8xf32> to vector<8x1xf32>
    %199 = tpu.reciprocal %198 {approx = true} : vector<8x1xf32> -> vector<8x1xf32>
    %200 = vector.broadcast %199 : vector<8x1xf32> to vector<8x4xf32>
    %201 = arith.mulf %196, %200 : vector<8x4xf32>
    %202 = vector.extract_strided_slice %162 {offsets = [0, 12], sizes = [8, 4], strides = [1, 1]} : vector<8x16xf32> to vector<8x4xf32>
    %cst_79 = arith.constant dense<0xFF800000> : vector<8xf32>
    %203 = vector.multi_reduction <maximumf>, %202, %cst_79 [1] : vector<8x4xf32> to vector<8xf32>
    %204 = vector.shape_cast %203 : vector<8xf32> to vector<8x1xf32>
    %205 = vector.broadcast %204 : vector<8x1xf32> to vector<8x4xf32>
    %206 = arith.subf %202, %205 : vector<8x4xf32>
    %207 = math.exp %206 : vector<8x4xf32>
    %cst_80 = arith.constant dense<0.000000e+00> : vector<8xf32>
    %208 = vector.multi_reduction <add>, %207, %cst_80 [1] : vector<8x4xf32> to vector<8xf32>
    %209 = vector.shape_cast %208 : vector<8xf32> to vector<8x1xf32>
    %210 = tpu.reciprocal %209 {approx = true} : vector<8x1xf32> -> vector<8x1xf32>
    %211 = vector.broadcast %210 : vector<8x1xf32> to vector<8x4xf32>
    %212 = arith.mulf %207, %211 : vector<8x4xf32>
    %213 = tpu.concatenate %179, %190, %201, %212 in 1 : vector<8x4xf32>, vector<8x4xf32>, vector<8x4xf32>, vector<8x4xf32> -> vector<8x16xf32>
    %cst_81 = arith.constant 1.000000e+00 : f32
    %214 = vector.broadcast %cst_81 : f32 to vector<8x16xf32>
    %215 = arith.subf %214, %168 : vector<8x16xf32>
    %216 = arith.mulf %215, %213 : vector<8x16xf32>
    %217 = arith.mulf %168, %213 : vector<8x16xf32>
    %c0_82 = arith.constant 0 : index
    %c0_83 = arith.constant 0 : index
    %218 = vector.load %arg7[%c0_82, %c0_83] : memref<1x80xf32, #tpu.memory_space<vmem>>, vector<1x80xf32>
    %c0_84 = arith.constant 0 : index
    %c0_85 = arith.constant 0 : index
    %219 = vector.load %arg8[%c0_84, %c0_85] : memref<1x80xf32, #tpu.memory_space<vmem>>, vector<1x80xf32>
    %cst_86 = arith.constant 0.000000e+00 : f32
    %220 = vector.broadcast %cst_86 : f32 to vector<8x8xf32>
    %cst_87 = arith.constant 0.000000e+00 : f32
    %221 = vector.broadcast %cst_87 : f32 to vector<8x8xf32>
    %cst_88 = arith.constant 0.000000e+00 : f32
    %222 = vector.broadcast %cst_88 : f32 to vector<8x8xf32>
    %cst_89 = arith.constant 0.000000e+00 : f32
    %223 = vector.broadcast %cst_89 : f32 to vector<8x8xf32>
    %224 = vector.extract_strided_slice %218 {offsets = [0, 0], sizes = [1, 64], strides = [1, 1]} : vector<1x80xf32> to vector<1x64xf32>
    %225 = vector.extract_strided_slice %219 {offsets = [0, 0], sizes = [1, 64], strides = [1, 1]} : vector<1x80xf32> to vector<1x64xf32>
    %cst_90 = arith.constant 0.000000e+00 : f32
    %226 = vector.broadcast %cst_90 : f32 to vector<8x64xf32>
    %227 = vector.extract_strided_slice %165 {offsets = [0, 0], sizes = [8, 1], strides = [1, 1]} : vector<8x16xf32> to vector<8x1xf32>
    %228 = vector.extract_strided_slice %166 {offsets = [0, 0], sizes = [8, 1], strides = [1, 1]} : vector<8x16xf32> to vector<8x1xf32>
    %229 = vector.extract_strided_slice %167 {offsets = [0, 0], sizes = [8, 1], strides = [1, 1]} : vector<8x16xf32> to vector<8x1xf32>
    %230 = vector.broadcast %224 : vector<1x64xf32> to vector<8x64xf32>
    %231 = vector.broadcast %227 : vector<8x1xf32> to vector<8x64xf32>
    %232 = arith.cmpf oge, %230, %231 : vector<8x64xf32>
    %cst_91 = arith.constant 1.000000e+00 : f32
    %233 = vector.broadcast %cst_91 : f32 to vector<8x1xf32>
    %234 = arith.addf %227, %233 : vector<8x1xf32>
    %235 = vector.broadcast %224 : vector<1x64xf32> to vector<8x64xf32>
    %236 = vector.broadcast %234 : vector<8x1xf32> to vector<8x64xf32>
    %237 = arith.cmpf ole, %235, %236 : vector<8x64xf32>
    %238 = arith.andi %232, %237 : vector<8x64xi1>
    %239 = vector.broadcast %224 : vector<1x64xf32> to vector<8x64xf32>
    %240 = vector.broadcast %227 : vector<8x1xf32> to vector<8x64xf32>
    %241 = arith.cmpf oeq, %239, %240 : vector<8x64xf32>
    %cst_92 = arith.constant 1.000000e+00 : f32
    %242 = vector.broadcast %cst_92 : f32 to vector<8x1xf32>
    %243 = arith.subf %242, %229 : vector<8x1xf32>
    %244 = vector.shape_cast %243 : vector<8x1xf32> to vector<8x1xf32>
    %245 = vector.broadcast %244 : vector<8x1xf32> to vector<8x64xf32>
    %246 = vector.shape_cast %229 : vector<8x1xf32> to vector<8x1xf32>
    %247 = vector.broadcast %246 : vector<8x1xf32> to vector<8x64xf32>
    %248 = arith.select %241, %245, %247 : vector<8x64xi1>, vector<8x64xf32>
    %249 = vector.broadcast %225 : vector<1x64xf32> to vector<8x64xf32>
    %250 = vector.broadcast %228 : vector<8x1xf32> to vector<8x64xf32>
    %251 = arith.cmpf oeq, %249, %250 : vector<8x64xf32>
    %252 = vector.extract_strided_slice %216 {offsets = [0, 0], sizes = [8, 1], strides = [1, 1]} : vector<8x16xf32> to vector<8x1xf32>
    %cst_93 = arith.constant 1.000000e+00 : f32
    %253 = vector.broadcast %cst_93 : f32 to vector<8x1xf32>
    %254 = arith.addf %228, %253 : vector<8x1xf32>
    %255 = vector.broadcast %225 : vector<1x64xf32> to vector<8x64xf32>
    %256 = vector.broadcast %254 : vector<8x1xf32> to vector<8x64xf32>
    %257 = arith.cmpf oeq, %255, %256 : vector<8x64xf32>
    %258 = vector.extract_strided_slice %217 {offsets = [0, 0], sizes = [8, 1], strides = [1, 1]} : vector<8x16xf32> to vector<8x1xf32>
    %cst_94 = arith.constant 0.000000e+00 : f32
    %259 = vector.shape_cast %258 : vector<8x1xf32> to vector<8x1xf32>
    %260 = vector.broadcast %259 : vector<8x1xf32> to vector<8x64xf32>
    %261 = vector.broadcast %cst_94 : f32 to vector<8x64xf32>
    %262 = arith.select %257, %260, %261 : vector<8x64xi1>, vector<8x64xf32>
    %263 = vector.shape_cast %252 : vector<8x1xf32> to vector<8x1xf32>
    %264 = vector.broadcast %263 : vector<8x1xf32> to vector<8x64xf32>
    %265 = arith.select %251, %264, %262 : vector<8x64xi1>, vector<8x64xf32>
    %266 = arith.mulf %248, %265 : vector<8x64xf32>
    %cst_95 = arith.constant 0.000000e+00 : f32
    %267 = vector.broadcast %cst_95 : f32 to vector<8x64xf32>
    %268 = arith.select %238, %266, %267 : vector<8x64xi1>, vector<8x64xf32>
    %269 = arith.addf %226, %268 : vector<8x64xf32>
    %270 = vector.extract_strided_slice %165 {offsets = [0, 1], sizes = [8, 1], strides = [1, 1]} : vector<8x16xf32> to vector<8x1xf32>
    %271 = vector.extract_strided_slice %166 {offsets = [0, 1], sizes = [8, 1], strides = [1, 1]} : vector<8x16xf32> to vector<8x1xf32>
    %272 = vector.extract_strided_slice %167 {offsets = [0, 1], sizes = [8, 1], strides = [1, 1]} : vector<8x16xf32> to vector<8x1xf32>
    %273 = vector.broadcast %224 : vector<1x64xf32> to vector<8x64xf32>
    %274 = vector.broadcast %270 : vector<8x1xf32> to vector<8x64xf32>
    %275 = arith.cmpf oge, %273, %274 : vector<8x64xf32>
    %cst_96 = arith.constant 1.000000e+00 : f32
    %276 = vector.broadcast %cst_96 : f32 to vector<8x1xf32>
    %277 = arith.addf %270, %276 : vector<8x1xf32>
    %278 = vector.broadcast %224 : vector<1x64xf32> to vector<8x64xf32>
    %279 = vector.broadcast %277 : vector<8x1xf32> to vector<8x64xf32>
    %280 = arith.cmpf ole, %278, %279 : vector<8x64xf32>
    %281 = arith.andi %275, %280 : vector<8x64xi1>
    %282 = vector.broadcast %224 : vector<1x64xf32> to vector<8x64xf32>
    %283 = vector.broadcast %270 : vector<8x1xf32> to vector<8x64xf32>
    %284 = arith.cmpf oeq, %282, %283 : vector<8x64xf32>
    %cst_97 = arith.constant 1.000000e+00 : f32
    %285 = vector.broadcast %cst_97 : f32 to vector<8x1xf32>
    %286 = arith.subf %285, %272 : vector<8x1xf32>
    %287 = vector.shape_cast %286 : vector<8x1xf32> to vector<8x1xf32>
    %288 = vector.broadcast %287 : vector<8x1xf32> to vector<8x64xf32>
    %289 = vector.shape_cast %272 : vector<8x1xf32> to vector<8x1xf32>
    %290 = vector.broadcast %289 : vector<8x1xf32> to vector<8x64xf32>
    %291 = arith.select %284, %288, %290 : vector<8x64xi1>, vector<8x64xf32>
    %292 = vector.broadcast %225 : vector<1x64xf32> to vector<8x64xf32>
    %293 = vector.broadcast %271 : vector<8x1xf32> to vector<8x64xf32>
    %294 = arith.cmpf oeq, %292, %293 : vector<8x64xf32>
    %295 = vector.extract_strided_slice %216 {offsets = [0, 1], sizes = [8, 1], strides = [1, 1]} : vector<8x16xf32> to vector<8x1xf32>
    %cst_98 = arith.constant 1.000000e+00 : f32
    %296 = vector.broadcast %cst_98 : f32 to vector<8x1xf32>
    %297 = arith.addf %271, %296 : vector<8x1xf32>
    %298 = vector.broadcast %225 : vector<1x64xf32> to vector<8x64xf32>
    %299 = vector.broadcast %297 : vector<8x1xf32> to vector<8x64xf32>
    %300 = arith.cmpf oeq, %298, %299 : vector<8x64xf32>
    %301 = vector.extract_strided_slice %217 {offsets = [0, 1], sizes = [8, 1], strides = [1, 1]} : vector<8x16xf32> to vector<8x1xf32>
    %cst_99 = arith.constant 0.000000e+00 : f32
    %302 = vector.shape_cast %301 : vector<8x1xf32> to vector<8x1xf32>
    %303 = vector.broadcast %302 : vector<8x1xf32> to vector<8x64xf32>
    %304 = vector.broadcast %cst_99 : f32 to vector<8x64xf32>
    %305 = arith.select %300, %303, %304 : vector<8x64xi1>, vector<8x64xf32>
    %306 = vector.shape_cast %295 : vector<8x1xf32> to vector<8x1xf32>
    %307 = vector.broadcast %306 : vector<8x1xf32> to vector<8x64xf32>
    %308 = arith.select %294, %307, %305 : vector<8x64xi1>, vector<8x64xf32>
    %309 = arith.mulf %291, %308 : vector<8x64xf32>
    %cst_100 = arith.constant 0.000000e+00 : f32
    %310 = vector.broadcast %cst_100 : f32 to vector<8x64xf32>
    %311 = arith.select %281, %309, %310 : vector<8x64xi1>, vector<8x64xf32>
    %312 = arith.addf %269, %311 : vector<8x64xf32>
    %313 = vector.extract_strided_slice %145 {offsets = [0, 0], sizes = [64, 8], strides = [1, 1]} : vector<80x32xbf16> to vector<64x8xbf16>
    %314 = arith.truncf %312 : vector<8x64xf32> to vector<8x64xbf16>
    %cst_101 = arith.constant dense<0.000000e+00> : vector<8x8xf32>
    %315 = tpu.matmul %314, %313, %cst_101 {dimension_numbers = #tpu.dot_dimension_numbers<[1], [0], [0], [1], [0, 0, 1, 1], [], []>} : vector<8x64xbf16>, vector<64x8xbf16>, vector<8x8xf32> -> vector<8x8xf32>
    %316 = arith.addf %220, %315 : vector<8x8xf32>
    %cst_102 = arith.constant 0.000000e+00 : f32
    %317 = vector.broadcast %cst_102 : f32 to vector<8x64xf32>
    %318 = vector.extract_strided_slice %165 {offsets = [0, 4], sizes = [8, 1], strides = [1, 1]} : vector<8x16xf32> to vector<8x1xf32>
    %319 = vector.extract_strided_slice %166 {offsets = [0, 4], sizes = [8, 1], strides = [1, 1]} : vector<8x16xf32> to vector<8x1xf32>
    %320 = vector.extract_strided_slice %167 {offsets = [0, 4], sizes = [8, 1], strides = [1, 1]} : vector<8x16xf32> to vector<8x1xf32>
    %321 = vector.broadcast %224 : vector<1x64xf32> to vector<8x64xf32>
    %322 = vector.broadcast %318 : vector<8x1xf32> to vector<8x64xf32>
    %323 = arith.cmpf oge, %321, %322 : vector<8x64xf32>
    %cst_103 = arith.constant 1.000000e+00 : f32
    %324 = vector.broadcast %cst_103 : f32 to vector<8x1xf32>
    %325 = arith.addf %318, %324 : vector<8x1xf32>
    %326 = vector.broadcast %224 : vector<1x64xf32> to vector<8x64xf32>
    %327 = vector.broadcast %325 : vector<8x1xf32> to vector<8x64xf32>
    %328 = arith.cmpf ole, %326, %327 : vector<8x64xf32>
    %329 = arith.andi %323, %328 : vector<8x64xi1>
    %330 = vector.broadcast %224 : vector<1x64xf32> to vector<8x64xf32>
    %331 = vector.broadcast %318 : vector<8x1xf32> to vector<8x64xf32>
    %332 = arith.cmpf oeq, %330, %331 : vector<8x64xf32>
    %cst_104 = arith.constant 1.000000e+00 : f32
    %333 = vector.broadcast %cst_104 : f32 to vector<8x1xf32>
    %334 = arith.subf %333, %320 : vector<8x1xf32>
    %335 = vector.shape_cast %334 : vector<8x1xf32> to vector<8x1xf32>
    %336 = vector.broadcast %335 : vector<8x1xf32> to vector<8x64xf32>
    %337 = vector.shape_cast %320 : vector<8x1xf32> to vector<8x1xf32>
    %338 = vector.broadcast %337 : vector<8x1xf32> to vector<8x64xf32>
    %339 = arith.select %332, %336, %338 : vector<8x64xi1>, vector<8x64xf32>
    %340 = vector.broadcast %225 : vector<1x64xf32> to vector<8x64xf32>
    %341 = vector.broadcast %319 : vector<8x1xf32> to vector<8x64xf32>
    %342 = arith.cmpf oeq, %340, %341 : vector<8x64xf32>
    %343 = vector.extract_strided_slice %216 {offsets = [0, 4], sizes = [8, 1], strides = [1, 1]} : vector<8x16xf32> to vector<8x1xf32>
    %cst_105 = arith.constant 1.000000e+00 : f32
    %344 = vector.broadcast %cst_105 : f32 to vector<8x1xf32>
    %345 = arith.addf %319, %344 : vector<8x1xf32>
    %346 = vector.broadcast %225 : vector<1x64xf32> to vector<8x64xf32>
    %347 = vector.broadcast %345 : vector<8x1xf32> to vector<8x64xf32>
    %348 = arith.cmpf oeq, %346, %347 : vector<8x64xf32>
    %349 = vector.extract_strided_slice %217 {offsets = [0, 4], sizes = [8, 1], strides = [1, 1]} : vector<8x16xf32> to vector<8x1xf32>
    %cst_106 = arith.constant 0.000000e+00 : f32
    %350 = vector.shape_cast %349 : vector<8x1xf32> to vector<8x1xf32>
    %351 = vector.broadcast %350 : vector<8x1xf32> to vector<8x64xf32>
    %352 = vector.broadcast %cst_106 : f32 to vector<8x64xf32>
    %353 = arith.select %348, %351, %352 : vector<8x64xi1>, vector<8x64xf32>
    %354 = vector.shape_cast %343 : vector<8x1xf32> to vector<8x1xf32>
    %355 = vector.broadcast %354 : vector<8x1xf32> to vector<8x64xf32>
    %356 = arith.select %342, %355, %353 : vector<8x64xi1>, vector<8x64xf32>
    %357 = arith.mulf %339, %356 : vector<8x64xf32>
    %cst_107 = arith.constant 0.000000e+00 : f32
    %358 = vector.broadcast %cst_107 : f32 to vector<8x64xf32>
    %359 = arith.select %329, %357, %358 : vector<8x64xi1>, vector<8x64xf32>
    %360 = arith.addf %317, %359 : vector<8x64xf32>
    %361 = vector.extract_strided_slice %165 {offsets = [0, 5], sizes = [8, 1], strides = [1, 1]} : vector<8x16xf32> to vector<8x1xf32>
    %362 = vector.extract_strided_slice %166 {offsets = [0, 5], sizes = [8, 1], strides = [1, 1]} : vector<8x16xf32> to vector<8x1xf32>
    %363 = vector.extract_strided_slice %167 {offsets = [0, 5], sizes = [8, 1], strides = [1, 1]} : vector<8x16xf32> to vector<8x1xf32>
    %364 = vector.broadcast %224 : vector<1x64xf32> to vector<8x64xf32>
    %365 = vector.broadcast %361 : vector<8x1xf32> to vector<8x64xf32>
    %366 = arith.cmpf oge, %364, %365 : vector<8x64xf32>
    %cst_108 = arith.constant 1.000000e+00 : f32
    %367 = vector.broadcast %cst_108 : f32 to vector<8x1xf32>
    %368 = arith.addf %361, %367 : vector<8x1xf32>
    %369 = vector.broadcast %224 : vector<1x64xf32> to vector<8x64xf32>
    %370 = vector.broadcast %368 : vector<8x1xf32> to vector<8x64xf32>
    %371 = arith.cmpf ole, %369, %370 : vector<8x64xf32>
    %372 = arith.andi %366, %371 : vector<8x64xi1>
    %373 = vector.broadcast %224 : vector<1x64xf32> to vector<8x64xf32>
    %374 = vector.broadcast %361 : vector<8x1xf32> to vector<8x64xf32>
    %375 = arith.cmpf oeq, %373, %374 : vector<8x64xf32>
    %cst_109 = arith.constant 1.000000e+00 : f32
    %376 = vector.broadcast %cst_109 : f32 to vector<8x1xf32>
    %377 = arith.subf %376, %363 : vector<8x1xf32>
    %378 = vector.shape_cast %377 : vector<8x1xf32> to vector<8x1xf32>
    %379 = vector.broadcast %378 : vector<8x1xf32> to vector<8x64xf32>
    %380 = vector.shape_cast %363 : vector<8x1xf32> to vector<8x1xf32>
    %381 = vector.broadcast %380 : vector<8x1xf32> to vector<8x64xf32>
    %382 = arith.select %375, %379, %381 : vector<8x64xi1>, vector<8x64xf32>
    %383 = vector.broadcast %225 : vector<1x64xf32> to vector<8x64xf32>
    %384 = vector.broadcast %362 : vector<8x1xf32> to vector<8x64xf32>
    %385 = arith.cmpf oeq, %383, %384 : vector<8x64xf32>
    %386 = vector.extract_strided_slice %216 {offsets = [0, 5], sizes = [8, 1], strides = [1, 1]} : vector<8x16xf32> to vector<8x1xf32>
    %cst_110 = arith.constant 1.000000e+00 : f32
    %387 = vector.broadcast %cst_110 : f32 to vector<8x1xf32>
    %388 = arith.addf %362, %387 : vector<8x1xf32>
    %389 = vector.broadcast %225 : vector<1x64xf32> to vector<8x64xf32>
    %390 = vector.broadcast %388 : vector<8x1xf32> to vector<8x64xf32>
    %391 = arith.cmpf oeq, %389, %390 : vector<8x64xf32>
    %392 = vector.extract_strided_slice %217 {offsets = [0, 5], sizes = [8, 1], strides = [1, 1]} : vector<8x16xf32> to vector<8x1xf32>
    %cst_111 = arith.constant 0.000000e+00 : f32
    %393 = vector.shape_cast %392 : vector<8x1xf32> to vector<8x1xf32>
    %394 = vector.broadcast %393 : vector<8x1xf32> to vector<8x64xf32>
    %395 = vector.broadcast %cst_111 : f32 to vector<8x64xf32>
    %396 = arith.select %391, %394, %395 : vector<8x64xi1>, vector<8x64xf32>
    %397 = vector.shape_cast %386 : vector<8x1xf32> to vector<8x1xf32>
    %398 = vector.broadcast %397 : vector<8x1xf32> to vector<8x64xf32>
    %399 = arith.select %385, %398, %396 : vector<8x64xi1>, vector<8x64xf32>
    %400 = arith.mulf %382, %399 : vector<8x64xf32>
    %cst_112 = arith.constant 0.000000e+00 : f32
    %401 = vector.broadcast %cst_112 : f32 to vector<8x64xf32>
    %402 = arith.select %372, %400, %401 : vector<8x64xi1>, vector<8x64xf32>
    %403 = arith.addf %360, %402 : vector<8x64xf32>
    %404 = vector.extract_strided_slice %145 {offsets = [0, 8], sizes = [64, 8], strides = [1, 1]} : vector<80x32xbf16> to vector<64x8xbf16>
    %405 = arith.truncf %403 : vector<8x64xf32> to vector<8x64xbf16>
    %cst_113 = arith.constant dense<0.000000e+00> : vector<8x8xf32>
    %406 = tpu.matmul %405, %404, %cst_113 {dimension_numbers = #tpu.dot_dimension_numbers<[1], [0], [0], [1], [0, 0, 1, 1], [], []>} : vector<8x64xbf16>, vector<64x8xbf16>, vector<8x8xf32> -> vector<8x8xf32>
    %407 = arith.addf %221, %406 : vector<8x8xf32>
    %cst_114 = arith.constant 0.000000e+00 : f32
    %408 = vector.broadcast %cst_114 : f32 to vector<8x64xf32>
    %409 = vector.extract_strided_slice %165 {offsets = [0, 8], sizes = [8, 1], strides = [1, 1]} : vector<8x16xf32> to vector<8x1xf32>
    %410 = vector.extract_strided_slice %166 {offsets = [0, 8], sizes = [8, 1], strides = [1, 1]} : vector<8x16xf32> to vector<8x1xf32>
    %411 = vector.extract_strided_slice %167 {offsets = [0, 8], sizes = [8, 1], strides = [1, 1]} : vector<8x16xf32> to vector<8x1xf32>
    %412 = vector.broadcast %224 : vector<1x64xf32> to vector<8x64xf32>
    %413 = vector.broadcast %409 : vector<8x1xf32> to vector<8x64xf32>
    %414 = arith.cmpf oge, %412, %413 : vector<8x64xf32>
    %cst_115 = arith.constant 1.000000e+00 : f32
    %415 = vector.broadcast %cst_115 : f32 to vector<8x1xf32>
    %416 = arith.addf %409, %415 : vector<8x1xf32>
    %417 = vector.broadcast %224 : vector<1x64xf32> to vector<8x64xf32>
    %418 = vector.broadcast %416 : vector<8x1xf32> to vector<8x64xf32>
    %419 = arith.cmpf ole, %417, %418 : vector<8x64xf32>
    %420 = arith.andi %414, %419 : vector<8x64xi1>
    %421 = vector.broadcast %224 : vector<1x64xf32> to vector<8x64xf32>
    %422 = vector.broadcast %409 : vector<8x1xf32> to vector<8x64xf32>
    %423 = arith.cmpf oeq, %421, %422 : vector<8x64xf32>
    %cst_116 = arith.constant 1.000000e+00 : f32
    %424 = vector.broadcast %cst_116 : f32 to vector<8x1xf32>
    %425 = arith.subf %424, %411 : vector<8x1xf32>
    %426 = vector.shape_cast %425 : vector<8x1xf32> to vector<8x1xf32>
    %427 = vector.broadcast %426 : vector<8x1xf32> to vector<8x64xf32>
    %428 = vector.shape_cast %411 : vector<8x1xf32> to vector<8x1xf32>
    %429 = vector.broadcast %428 : vector<8x1xf32> to vector<8x64xf32>
    %430 = arith.select %423, %427, %429 : vector<8x64xi1>, vector<8x64xf32>
    %431 = vector.broadcast %225 : vector<1x64xf32> to vector<8x64xf32>
    %432 = vector.broadcast %410 : vector<8x1xf32> to vector<8x64xf32>
    %433 = arith.cmpf oeq, %431, %432 : vector<8x64xf32>
    %434 = vector.extract_strided_slice %216 {offsets = [0, 8], sizes = [8, 1], strides = [1, 1]} : vector<8x16xf32> to vector<8x1xf32>
    %cst_117 = arith.constant 1.000000e+00 : f32
    %435 = vector.broadcast %cst_117 : f32 to vector<8x1xf32>
    %436 = arith.addf %410, %435 : vector<8x1xf32>
    %437 = vector.broadcast %225 : vector<1x64xf32> to vector<8x64xf32>
    %438 = vector.broadcast %436 : vector<8x1xf32> to vector<8x64xf32>
    %439 = arith.cmpf oeq, %437, %438 : vector<8x64xf32>
    %440 = vector.extract_strided_slice %217 {offsets = [0, 8], sizes = [8, 1], strides = [1, 1]} : vector<8x16xf32> to vector<8x1xf32>
    %cst_118 = arith.constant 0.000000e+00 : f32
    %441 = vector.shape_cast %440 : vector<8x1xf32> to vector<8x1xf32>
    %442 = vector.broadcast %441 : vector<8x1xf32> to vector<8x64xf32>
    %443 = vector.broadcast %cst_118 : f32 to vector<8x64xf32>
    %444 = arith.select %439, %442, %443 : vector<8x64xi1>, vector<8x64xf32>
    %445 = vector.shape_cast %434 : vector<8x1xf32> to vector<8x1xf32>
    %446 = vector.broadcast %445 : vector<8x1xf32> to vector<8x64xf32>
    %447 = arith.select %433, %446, %444 : vector<8x64xi1>, vector<8x64xf32>
    %448 = arith.mulf %430, %447 : vector<8x64xf32>
    %cst_119 = arith.constant 0.000000e+00 : f32
    %449 = vector.broadcast %cst_119 : f32 to vector<8x64xf32>
    %450 = arith.select %420, %448, %449 : vector<8x64xi1>, vector<8x64xf32>
    %451 = arith.addf %408, %450 : vector<8x64xf32>
    %452 = vector.extract_strided_slice %165 {offsets = [0, 9], sizes = [8, 1], strides = [1, 1]} : vector<8x16xf32> to vector<8x1xf32>
    %453 = vector.extract_strided_slice %166 {offsets = [0, 9], sizes = [8, 1], strides = [1, 1]} : vector<8x16xf32> to vector<8x1xf32>
    %454 = vector.extract_strided_slice %167 {offsets = [0, 9], sizes = [8, 1], strides = [1, 1]} : vector<8x16xf32> to vector<8x1xf32>
    %455 = vector.broadcast %224 : vector<1x64xf32> to vector<8x64xf32>
    %456 = vector.broadcast %452 : vector<8x1xf32> to vector<8x64xf32>
    %457 = arith.cmpf oge, %455, %456 : vector<8x64xf32>
    %cst_120 = arith.constant 1.000000e+00 : f32
    %458 = vector.broadcast %cst_120 : f32 to vector<8x1xf32>
    %459 = arith.addf %452, %458 : vector<8x1xf32>
    %460 = vector.broadcast %224 : vector<1x64xf32> to vector<8x64xf32>
    %461 = vector.broadcast %459 : vector<8x1xf32> to vector<8x64xf32>
    %462 = arith.cmpf ole, %460, %461 : vector<8x64xf32>
    %463 = arith.andi %457, %462 : vector<8x64xi1>
    %464 = vector.broadcast %224 : vector<1x64xf32> to vector<8x64xf32>
    %465 = vector.broadcast %452 : vector<8x1xf32> to vector<8x64xf32>
    %466 = arith.cmpf oeq, %464, %465 : vector<8x64xf32>
    %cst_121 = arith.constant 1.000000e+00 : f32
    %467 = vector.broadcast %cst_121 : f32 to vector<8x1xf32>
    %468 = arith.subf %467, %454 : vector<8x1xf32>
    %469 = vector.shape_cast %468 : vector<8x1xf32> to vector<8x1xf32>
    %470 = vector.broadcast %469 : vector<8x1xf32> to vector<8x64xf32>
    %471 = vector.shape_cast %454 : vector<8x1xf32> to vector<8x1xf32>
    %472 = vector.broadcast %471 : vector<8x1xf32> to vector<8x64xf32>
    %473 = arith.select %466, %470, %472 : vector<8x64xi1>, vector<8x64xf32>
    %474 = vector.broadcast %225 : vector<1x64xf32> to vector<8x64xf32>
    %475 = vector.broadcast %453 : vector<8x1xf32> to vector<8x64xf32>
    %476 = arith.cmpf oeq, %474, %475 : vector<8x64xf32>
    %477 = vector.extract_strided_slice %216 {offsets = [0, 9], sizes = [8, 1], strides = [1, 1]} : vector<8x16xf32> to vector<8x1xf32>
    %cst_122 = arith.constant 1.000000e+00 : f32
    %478 = vector.broadcast %cst_122 : f32 to vector<8x1xf32>
    %479 = arith.addf %453, %478 : vector<8x1xf32>
    %480 = vector.broadcast %225 : vector<1x64xf32> to vector<8x64xf32>
    %481 = vector.broadcast %479 : vector<8x1xf32> to vector<8x64xf32>
    %482 = arith.cmpf oeq, %480, %481 : vector<8x64xf32>
    %483 = vector.extract_strided_slice %217 {offsets = [0, 9], sizes = [8, 1], strides = [1, 1]} : vector<8x16xf32> to vector<8x1xf32>
    %cst_123 = arith.constant 0.000000e+00 : f32
    %484 = vector.shape_cast %483 : vector<8x1xf32> to vector<8x1xf32>
    %485 = vector.broadcast %484 : vector<8x1xf32> to vector<8x64xf32>
    %486 = vector.broadcast %cst_123 : f32 to vector<8x64xf32>
    %487 = arith.select %482, %485, %486 : vector<8x64xi1>, vector<8x64xf32>
    %488 = vector.shape_cast %477 : vector<8x1xf32> to vector<8x1xf32>
    %489 = vector.broadcast %488 : vector<8x1xf32> to vector<8x64xf32>
    %490 = arith.select %476, %489, %487 : vector<8x64xi1>, vector<8x64xf32>
    %491 = arith.mulf %473, %490 : vector<8x64xf32>
    %cst_124 = arith.constant 0.000000e+00 : f32
    %492 = vector.broadcast %cst_124 : f32 to vector<8x64xf32>
    %493 = arith.select %463, %491, %492 : vector<8x64xi1>, vector<8x64xf32>
    %494 = arith.addf %451, %493 : vector<8x64xf32>
    %495 = vector.extract_strided_slice %145 {offsets = [0, 16], sizes = [64, 8], strides = [1, 1]} : vector<80x32xbf16> to vector<64x8xbf16>
    %496 = arith.truncf %494 : vector<8x64xf32> to vector<8x64xbf16>
    %cst_125 = arith.constant dense<0.000000e+00> : vector<8x8xf32>
    %497 = tpu.matmul %496, %495, %cst_125 {dimension_numbers = #tpu.dot_dimension_numbers<[1], [0], [0], [1], [0, 0, 1, 1], [], []>} : vector<8x64xbf16>, vector<64x8xbf16>, vector<8x8xf32> -> vector<8x8xf32>
    %498 = arith.addf %222, %497 : vector<8x8xf32>
    %cst_126 = arith.constant 0.000000e+00 : f32
    %499 = vector.broadcast %cst_126 : f32 to vector<8x64xf32>
    %500 = vector.extract_strided_slice %165 {offsets = [0, 12], sizes = [8, 1], strides = [1, 1]} : vector<8x16xf32> to vector<8x1xf32>
    %501 = vector.extract_strided_slice %166 {offsets = [0, 12], sizes = [8, 1], strides = [1, 1]} : vector<8x16xf32> to vector<8x1xf32>
    %502 = vector.extract_strided_slice %167 {offsets = [0, 12], sizes = [8, 1], strides = [1, 1]} : vector<8x16xf32> to vector<8x1xf32>
    %503 = vector.broadcast %224 : vector<1x64xf32> to vector<8x64xf32>
    %504 = vector.broadcast %500 : vector<8x1xf32> to vector<8x64xf32>
    %505 = arith.cmpf oge, %503, %504 : vector<8x64xf32>
    %cst_127 = arith.constant 1.000000e+00 : f32
    %506 = vector.broadcast %cst_127 : f32 to vector<8x1xf32>
    %507 = arith.addf %500, %506 : vector<8x1xf32>
    %508 = vector.broadcast %224 : vector<1x64xf32> to vector<8x64xf32>
    %509 = vector.broadcast %507 : vector<8x1xf32> to vector<8x64xf32>
    %510 = arith.cmpf ole, %508, %509 : vector<8x64xf32>
    %511 = arith.andi %505, %510 : vector<8x64xi1>
    %512 = vector.broadcast %224 : vector<1x64xf32> to vector<8x64xf32>
    %513 = vector.broadcast %500 : vector<8x1xf32> to vector<8x64xf32>
    %514 = arith.cmpf oeq, %512, %513 : vector<8x64xf32>
    %cst_128 = arith.constant 1.000000e+00 : f32
    %515 = vector.broadcast %cst_128 : f32 to vector<8x1xf32>
    %516 = arith.subf %515, %502 : vector<8x1xf32>
    %517 = vector.shape_cast %516 : vector<8x1xf32> to vector<8x1xf32>
    %518 = vector.broadcast %517 : vector<8x1xf32> to vector<8x64xf32>
    %519 = vector.shape_cast %502 : vector<8x1xf32> to vector<8x1xf32>
    %520 = vector.broadcast %519 : vector<8x1xf32> to vector<8x64xf32>
    %521 = arith.select %514, %518, %520 : vector<8x64xi1>, vector<8x64xf32>
    %522 = vector.broadcast %225 : vector<1x64xf32> to vector<8x64xf32>
    %523 = vector.broadcast %501 : vector<8x1xf32> to vector<8x64xf32>
    %524 = arith.cmpf oeq, %522, %523 : vector<8x64xf32>
    %525 = vector.extract_strided_slice %216 {offsets = [0, 12], sizes = [8, 1], strides = [1, 1]} : vector<8x16xf32> to vector<8x1xf32>
    %cst_129 = arith.constant 1.000000e+00 : f32
    %526 = vector.broadcast %cst_129 : f32 to vector<8x1xf32>
    %527 = arith.addf %501, %526 : vector<8x1xf32>
    %528 = vector.broadcast %225 : vector<1x64xf32> to vector<8x64xf32>
    %529 = vector.broadcast %527 : vector<8x1xf32> to vector<8x64xf32>
    %530 = arith.cmpf oeq, %528, %529 : vector<8x64xf32>
    %531 = vector.extract_strided_slice %217 {offsets = [0, 12], sizes = [8, 1], strides = [1, 1]} : vector<8x16xf32> to vector<8x1xf32>
    %cst_130 = arith.constant 0.000000e+00 : f32
    %532 = vector.shape_cast %531 : vector<8x1xf32> to vector<8x1xf32>
    %533 = vector.broadcast %532 : vector<8x1xf32> to vector<8x64xf32>
    %534 = vector.broadcast %cst_130 : f32 to vector<8x64xf32>
    %535 = arith.select %530, %533, %534 : vector<8x64xi1>, vector<8x64xf32>
    %536 = vector.shape_cast %525 : vector<8x1xf32> to vector<8x1xf32>
    %537 = vector.broadcast %536 : vector<8x1xf32> to vector<8x64xf32>
    %538 = arith.select %524, %537, %535 : vector<8x64xi1>, vector<8x64xf32>
    %539 = arith.mulf %521, %538 : vector<8x64xf32>
    %cst_131 = arith.constant 0.000000e+00 : f32
    %540 = vector.broadcast %cst_131 : f32 to vector<8x64xf32>
    %541 = arith.select %511, %539, %540 : vector<8x64xi1>, vector<8x64xf32>
    %542 = arith.addf %499, %541 : vector<8x64xf32>
    %543 = vector.extract_strided_slice %165 {offsets = [0, 13], sizes = [8, 1], strides = [1, 1]} : vector<8x16xf32> to vector<8x1xf32>
    %544 = vector.extract_strided_slice %166 {offsets = [0, 13], sizes = [8, 1], strides = [1, 1]} : vector<8x16xf32> to vector<8x1xf32>
    %545 = vector.extract_strided_slice %167 {offsets = [0, 13], sizes = [8, 1], strides = [1, 1]} : vector<8x16xf32> to vector<8x1xf32>
    %546 = vector.broadcast %224 : vector<1x64xf32> to vector<8x64xf32>
    %547 = vector.broadcast %543 : vector<8x1xf32> to vector<8x64xf32>
    %548 = arith.cmpf oge, %546, %547 : vector<8x64xf32>
    %cst_132 = arith.constant 1.000000e+00 : f32
    %549 = vector.broadcast %cst_132 : f32 to vector<8x1xf32>
    %550 = arith.addf %543, %549 : vector<8x1xf32>
    %551 = vector.broadcast %224 : vector<1x64xf32> to vector<8x64xf32>
    %552 = vector.broadcast %550 : vector<8x1xf32> to vector<8x64xf32>
    %553 = arith.cmpf ole, %551, %552 : vector<8x64xf32>
    %554 = arith.andi %548, %553 : vector<8x64xi1>
    %555 = vector.broadcast %224 : vector<1x64xf32> to vector<8x64xf32>
    %556 = vector.broadcast %543 : vector<8x1xf32> to vector<8x64xf32>
    %557 = arith.cmpf oeq, %555, %556 : vector<8x64xf32>
    %cst_133 = arith.constant 1.000000e+00 : f32
    %558 = vector.broadcast %cst_133 : f32 to vector<8x1xf32>
    %559 = arith.subf %558, %545 : vector<8x1xf32>
    %560 = vector.shape_cast %559 : vector<8x1xf32> to vector<8x1xf32>
    %561 = vector.broadcast %560 : vector<8x1xf32> to vector<8x64xf32>
    %562 = vector.shape_cast %545 : vector<8x1xf32> to vector<8x1xf32>
    %563 = vector.broadcast %562 : vector<8x1xf32> to vector<8x64xf32>
    %564 = arith.select %557, %561, %563 : vector<8x64xi1>, vector<8x64xf32>
    %565 = vector.broadcast %225 : vector<1x64xf32> to vector<8x64xf32>
    %566 = vector.broadcast %544 : vector<8x1xf32> to vector<8x64xf32>
    %567 = arith.cmpf oeq, %565, %566 : vector<8x64xf32>
    %568 = vector.extract_strided_slice %216 {offsets = [0, 13], sizes = [8, 1], strides = [1, 1]} : vector<8x16xf32> to vector<8x1xf32>
    %cst_134 = arith.constant 1.000000e+00 : f32
    %569 = vector.broadcast %cst_134 : f32 to vector<8x1xf32>
    %570 = arith.addf %544, %569 : vector<8x1xf32>
    %571 = vector.broadcast %225 : vector<1x64xf32> to vector<8x64xf32>
    %572 = vector.broadcast %570 : vector<8x1xf32> to vector<8x64xf32>
    %573 = arith.cmpf oeq, %571, %572 : vector<8x64xf32>
    %574 = vector.extract_strided_slice %217 {offsets = [0, 13], sizes = [8, 1], strides = [1, 1]} : vector<8x16xf32> to vector<8x1xf32>
    %cst_135 = arith.constant 0.000000e+00 : f32
    %575 = vector.shape_cast %574 : vector<8x1xf32> to vector<8x1xf32>
    %576 = vector.broadcast %575 : vector<8x1xf32> to vector<8x64xf32>
    %577 = vector.broadcast %cst_135 : f32 to vector<8x64xf32>
    %578 = arith.select %573, %576, %577 : vector<8x64xi1>, vector<8x64xf32>
    %579 = vector.shape_cast %568 : vector<8x1xf32> to vector<8x1xf32>
    %580 = vector.broadcast %579 : vector<8x1xf32> to vector<8x64xf32>
    %581 = arith.select %567, %580, %578 : vector<8x64xi1>, vector<8x64xf32>
    %582 = arith.mulf %564, %581 : vector<8x64xf32>
    %cst_136 = arith.constant 0.000000e+00 : f32
    %583 = vector.broadcast %cst_136 : f32 to vector<8x64xf32>
    %584 = arith.select %554, %582, %583 : vector<8x64xi1>, vector<8x64xf32>
    %585 = arith.addf %542, %584 : vector<8x64xf32>
    %586 = vector.extract_strided_slice %145 {offsets = [0, 24], sizes = [64, 8], strides = [1, 1]} : vector<80x32xbf16> to vector<64x8xbf16>
    %587 = arith.truncf %585 : vector<8x64xf32> to vector<8x64xbf16>
    %cst_137 = arith.constant dense<0.000000e+00> : vector<8x8xf32>
    %588 = tpu.matmul %587, %586, %cst_137 {dimension_numbers = #tpu.dot_dimension_numbers<[1], [0], [0], [1], [0, 0, 1, 1], [], []>} : vector<8x64xbf16>, vector<64x8xbf16>, vector<8x8xf32> -> vector<8x8xf32>
    %589 = arith.addf %223, %588 : vector<8x8xf32>
    %590 = vector.extract_strided_slice %218 {offsets = [0, 64], sizes = [1, 16], strides = [1, 1]} : vector<1x80xf32> to vector<1x16xf32>
    %591 = vector.extract_strided_slice %219 {offsets = [0, 64], sizes = [1, 16], strides = [1, 1]} : vector<1x80xf32> to vector<1x16xf32>
    %cst_138 = arith.constant 0.000000e+00 : f32
    %592 = vector.broadcast %cst_138 : f32 to vector<8x16xf32>
    %593 = vector.extract_strided_slice %165 {offsets = [0, 2], sizes = [8, 1], strides = [1, 1]} : vector<8x16xf32> to vector<8x1xf32>
    %594 = vector.extract_strided_slice %166 {offsets = [0, 2], sizes = [8, 1], strides = [1, 1]} : vector<8x16xf32> to vector<8x1xf32>
    %595 = vector.extract_strided_slice %167 {offsets = [0, 2], sizes = [8, 1], strides = [1, 1]} : vector<8x16xf32> to vector<8x1xf32>
    %596 = vector.broadcast %590 : vector<1x16xf32> to vector<8x16xf32>
    %597 = vector.broadcast %593 : vector<8x1xf32> to vector<8x16xf32>
    %598 = arith.cmpf oge, %596, %597 : vector<8x16xf32>
    %cst_139 = arith.constant 1.000000e+00 : f32
    %599 = vector.broadcast %cst_139 : f32 to vector<8x1xf32>
    %600 = arith.addf %593, %599 : vector<8x1xf32>
    %601 = vector.broadcast %590 : vector<1x16xf32> to vector<8x16xf32>
    %602 = vector.broadcast %600 : vector<8x1xf32> to vector<8x16xf32>
    %603 = arith.cmpf ole, %601, %602 : vector<8x16xf32>
    %604 = arith.andi %598, %603 : vector<8x16xi1>
    %605 = vector.broadcast %590 : vector<1x16xf32> to vector<8x16xf32>
    %606 = vector.broadcast %593 : vector<8x1xf32> to vector<8x16xf32>
    %607 = arith.cmpf oeq, %605, %606 : vector<8x16xf32>
    %cst_140 = arith.constant 1.000000e+00 : f32
    %608 = vector.broadcast %cst_140 : f32 to vector<8x1xf32>
    %609 = arith.subf %608, %595 : vector<8x1xf32>
    %610 = vector.shape_cast %609 : vector<8x1xf32> to vector<8x1xf32>
    %611 = vector.broadcast %610 : vector<8x1xf32> to vector<8x16xf32>
    %612 = vector.shape_cast %595 : vector<8x1xf32> to vector<8x1xf32>
    %613 = vector.broadcast %612 : vector<8x1xf32> to vector<8x16xf32>
    %614 = arith.select %607, %611, %613 : vector<8x16xi1>, vector<8x16xf32>
    %615 = vector.broadcast %591 : vector<1x16xf32> to vector<8x16xf32>
    %616 = vector.broadcast %594 : vector<8x1xf32> to vector<8x16xf32>
    %617 = arith.cmpf oeq, %615, %616 : vector<8x16xf32>
    %618 = vector.extract_strided_slice %216 {offsets = [0, 2], sizes = [8, 1], strides = [1, 1]} : vector<8x16xf32> to vector<8x1xf32>
    %cst_141 = arith.constant 1.000000e+00 : f32
    %619 = vector.broadcast %cst_141 : f32 to vector<8x1xf32>
    %620 = arith.addf %594, %619 : vector<8x1xf32>
    %621 = vector.broadcast %591 : vector<1x16xf32> to vector<8x16xf32>
    %622 = vector.broadcast %620 : vector<8x1xf32> to vector<8x16xf32>
    %623 = arith.cmpf oeq, %621, %622 : vector<8x16xf32>
    %624 = vector.extract_strided_slice %217 {offsets = [0, 2], sizes = [8, 1], strides = [1, 1]} : vector<8x16xf32> to vector<8x1xf32>
    %cst_142 = arith.constant 0.000000e+00 : f32
    %625 = vector.shape_cast %624 : vector<8x1xf32> to vector<8x1xf32>
    %626 = vector.broadcast %625 : vector<8x1xf32> to vector<8x16xf32>
    %627 = vector.broadcast %cst_142 : f32 to vector<8x16xf32>
    %628 = arith.select %623, %626, %627 : vector<8x16xi1>, vector<8x16xf32>
    %629 = vector.shape_cast %618 : vector<8x1xf32> to vector<8x1xf32>
    %630 = vector.broadcast %629 : vector<8x1xf32> to vector<8x16xf32>
    %631 = arith.select %617, %630, %628 : vector<8x16xi1>, vector<8x16xf32>
    %632 = arith.mulf %614, %631 : vector<8x16xf32>
    %cst_143 = arith.constant 0.000000e+00 : f32
    %633 = vector.broadcast %cst_143 : f32 to vector<8x16xf32>
    %634 = arith.select %604, %632, %633 : vector<8x16xi1>, vector<8x16xf32>
    %635 = arith.addf %592, %634 : vector<8x16xf32>
    %636 = vector.extract_strided_slice %165 {offsets = [0, 3], sizes = [8, 1], strides = [1, 1]} : vector<8x16xf32> to vector<8x1xf32>
    %637 = vector.extract_strided_slice %166 {offsets = [0, 3], sizes = [8, 1], strides = [1, 1]} : vector<8x16xf32> to vector<8x1xf32>
    %638 = vector.extract_strided_slice %167 {offsets = [0, 3], sizes = [8, 1], strides = [1, 1]} : vector<8x16xf32> to vector<8x1xf32>
    %639 = vector.broadcast %590 : vector<1x16xf32> to vector<8x16xf32>
    %640 = vector.broadcast %636 : vector<8x1xf32> to vector<8x16xf32>
    %641 = arith.cmpf oge, %639, %640 : vector<8x16xf32>
    %cst_144 = arith.constant 1.000000e+00 : f32
    %642 = vector.broadcast %cst_144 : f32 to vector<8x1xf32>
    %643 = arith.addf %636, %642 : vector<8x1xf32>
    %644 = vector.broadcast %590 : vector<1x16xf32> to vector<8x16xf32>
    %645 = vector.broadcast %643 : vector<8x1xf32> to vector<8x16xf32>
    %646 = arith.cmpf ole, %644, %645 : vector<8x16xf32>
    %647 = arith.andi %641, %646 : vector<8x16xi1>
    %648 = vector.broadcast %590 : vector<1x16xf32> to vector<8x16xf32>
    %649 = vector.broadcast %636 : vector<8x1xf32> to vector<8x16xf32>
    %650 = arith.cmpf oeq, %648, %649 : vector<8x16xf32>
    %cst_145 = arith.constant 1.000000e+00 : f32
    %651 = vector.broadcast %cst_145 : f32 to vector<8x1xf32>
    %652 = arith.subf %651, %638 : vector<8x1xf32>
    %653 = vector.shape_cast %652 : vector<8x1xf32> to vector<8x1xf32>
    %654 = vector.broadcast %653 : vector<8x1xf32> to vector<8x16xf32>
    %655 = vector.shape_cast %638 : vector<8x1xf32> to vector<8x1xf32>
    %656 = vector.broadcast %655 : vector<8x1xf32> to vector<8x16xf32>
    %657 = arith.select %650, %654, %656 : vector<8x16xi1>, vector<8x16xf32>
    %658 = vector.broadcast %591 : vector<1x16xf32> to vector<8x16xf32>
    %659 = vector.broadcast %637 : vector<8x1xf32> to vector<8x16xf32>
    %660 = arith.cmpf oeq, %658, %659 : vector<8x16xf32>
    %661 = vector.extract_strided_slice %216 {offsets = [0, 3], sizes = [8, 1], strides = [1, 1]} : vector<8x16xf32> to vector<8x1xf32>
    %cst_146 = arith.constant 1.000000e+00 : f32
    %662 = vector.broadcast %cst_146 : f32 to vector<8x1xf32>
    %663 = arith.addf %637, %662 : vector<8x1xf32>
    %664 = vector.broadcast %591 : vector<1x16xf32> to vector<8x16xf32>
    %665 = vector.broadcast %663 : vector<8x1xf32> to vector<8x16xf32>
    %666 = arith.cmpf oeq, %664, %665 : vector<8x16xf32>
    %667 = vector.extract_strided_slice %217 {offsets = [0, 3], sizes = [8, 1], strides = [1, 1]} : vector<8x16xf32> to vector<8x1xf32>
    %cst_147 = arith.constant 0.000000e+00 : f32
    %668 = vector.shape_cast %667 : vector<8x1xf32> to vector<8x1xf32>
    %669 = vector.broadcast %668 : vector<8x1xf32> to vector<8x16xf32>
    %670 = vector.broadcast %cst_147 : f32 to vector<8x16xf32>
    %671 = arith.select %666, %669, %670 : vector<8x16xi1>, vector<8x16xf32>
    %672 = vector.shape_cast %661 : vector<8x1xf32> to vector<8x1xf32>
    %673 = vector.broadcast %672 : vector<8x1xf32> to vector<8x16xf32>
    %674 = arith.select %660, %673, %671 : vector<8x16xi1>, vector<8x16xf32>
    %675 = arith.mulf %657, %674 : vector<8x16xf32>
    %cst_148 = arith.constant 0.000000e+00 : f32
    %676 = vector.broadcast %cst_148 : f32 to vector<8x16xf32>
    %677 = arith.select %647, %675, %676 : vector<8x16xi1>, vector<8x16xf32>
    %678 = arith.addf %635, %677 : vector<8x16xf32>
    %679 = vector.extract_strided_slice %145 {offsets = [64, 0], sizes = [16, 8], strides = [1, 1]} : vector<80x32xbf16> to vector<16x8xbf16>
    %680 = arith.truncf %678 : vector<8x16xf32> to vector<8x16xbf16>
    %cst_149 = arith.constant dense<0.000000e+00> : vector<8x8xf32>
    %681 = tpu.matmul %680, %679, %cst_149 {dimension_numbers = #tpu.dot_dimension_numbers<[1], [0], [0], [1], [0, 0, 1, 1], [], []>} : vector<8x16xbf16>, vector<16x8xbf16>, vector<8x8xf32> -> vector<8x8xf32>
    %682 = arith.addf %316, %681 : vector<8x8xf32>
    %cst_150 = arith.constant 0.000000e+00 : f32
    %683 = vector.broadcast %cst_150 : f32 to vector<8x16xf32>
    %684 = vector.extract_strided_slice %165 {offsets = [0, 6], sizes = [8, 1], strides = [1, 1]} : vector<8x16xf32> to vector<8x1xf32>
    %685 = vector.extract_strided_slice %166 {offsets = [0, 6], sizes = [8, 1], strides = [1, 1]} : vector<8x16xf32> to vector<8x1xf32>
    %686 = vector.extract_strided_slice %167 {offsets = [0, 6], sizes = [8, 1], strides = [1, 1]} : vector<8x16xf32> to vector<8x1xf32>
    %687 = vector.broadcast %590 : vector<1x16xf32> to vector<8x16xf32>
    %688 = vector.broadcast %684 : vector<8x1xf32> to vector<8x16xf32>
    %689 = arith.cmpf oge, %687, %688 : vector<8x16xf32>
    %cst_151 = arith.constant 1.000000e+00 : f32
    %690 = vector.broadcast %cst_151 : f32 to vector<8x1xf32>
    %691 = arith.addf %684, %690 : vector<8x1xf32>
    %692 = vector.broadcast %590 : vector<1x16xf32> to vector<8x16xf32>
    %693 = vector.broadcast %691 : vector<8x1xf32> to vector<8x16xf32>
    %694 = arith.cmpf ole, %692, %693 : vector<8x16xf32>
    %695 = arith.andi %689, %694 : vector<8x16xi1>
    %696 = vector.broadcast %590 : vector<1x16xf32> to vector<8x16xf32>
    %697 = vector.broadcast %684 : vector<8x1xf32> to vector<8x16xf32>
    %698 = arith.cmpf oeq, %696, %697 : vector<8x16xf32>
    %cst_152 = arith.constant 1.000000e+00 : f32
    %699 = vector.broadcast %cst_152 : f32 to vector<8x1xf32>
    %700 = arith.subf %699, %686 : vector<8x1xf32>
    %701 = vector.shape_cast %700 : vector<8x1xf32> to vector<8x1xf32>
    %702 = vector.broadcast %701 : vector<8x1xf32> to vector<8x16xf32>
    %703 = vector.shape_cast %686 : vector<8x1xf32> to vector<8x1xf32>
    %704 = vector.broadcast %703 : vector<8x1xf32> to vector<8x16xf32>
    %705 = arith.select %698, %702, %704 : vector<8x16xi1>, vector<8x16xf32>
    %706 = vector.broadcast %591 : vector<1x16xf32> to vector<8x16xf32>
    %707 = vector.broadcast %685 : vector<8x1xf32> to vector<8x16xf32>
    %708 = arith.cmpf oeq, %706, %707 : vector<8x16xf32>
    %709 = vector.extract_strided_slice %216 {offsets = [0, 6], sizes = [8, 1], strides = [1, 1]} : vector<8x16xf32> to vector<8x1xf32>
    %cst_153 = arith.constant 1.000000e+00 : f32
    %710 = vector.broadcast %cst_153 : f32 to vector<8x1xf32>
    %711 = arith.addf %685, %710 : vector<8x1xf32>
    %712 = vector.broadcast %591 : vector<1x16xf32> to vector<8x16xf32>
    %713 = vector.broadcast %711 : vector<8x1xf32> to vector<8x16xf32>
    %714 = arith.cmpf oeq, %712, %713 : vector<8x16xf32>
    %715 = vector.extract_strided_slice %217 {offsets = [0, 6], sizes = [8, 1], strides = [1, 1]} : vector<8x16xf32> to vector<8x1xf32>
    %cst_154 = arith.constant 0.000000e+00 : f32
    %716 = vector.shape_cast %715 : vector<8x1xf32> to vector<8x1xf32>
    %717 = vector.broadcast %716 : vector<8x1xf32> to vector<8x16xf32>
    %718 = vector.broadcast %cst_154 : f32 to vector<8x16xf32>
    %719 = arith.select %714, %717, %718 : vector<8x16xi1>, vector<8x16xf32>
    %720 = vector.shape_cast %709 : vector<8x1xf32> to vector<8x1xf32>
    %721 = vector.broadcast %720 : vector<8x1xf32> to vector<8x16xf32>
    %722 = arith.select %708, %721, %719 : vector<8x16xi1>, vector<8x16xf32>
    %723 = arith.mulf %705, %722 : vector<8x16xf32>
    %cst_155 = arith.constant 0.000000e+00 : f32
    %724 = vector.broadcast %cst_155 : f32 to vector<8x16xf32>
    %725 = arith.select %695, %723, %724 : vector<8x16xi1>, vector<8x16xf32>
    %726 = arith.addf %683, %725 : vector<8x16xf32>
    %727 = vector.extract_strided_slice %165 {offsets = [0, 7], sizes = [8, 1], strides = [1, 1]} : vector<8x16xf32> to vector<8x1xf32>
    %728 = vector.extract_strided_slice %166 {offsets = [0, 7], sizes = [8, 1], strides = [1, 1]} : vector<8x16xf32> to vector<8x1xf32>
    %729 = vector.extract_strided_slice %167 {offsets = [0, 7], sizes = [8, 1], strides = [1, 1]} : vector<8x16xf32> to vector<8x1xf32>
    %730 = vector.broadcast %590 : vector<1x16xf32> to vector<8x16xf32>
    %731 = vector.broadcast %727 : vector<8x1xf32> to vector<8x16xf32>
    %732 = arith.cmpf oge, %730, %731 : vector<8x16xf32>
    %cst_156 = arith.constant 1.000000e+00 : f32
    %733 = vector.broadcast %cst_156 : f32 to vector<8x1xf32>
    %734 = arith.addf %727, %733 : vector<8x1xf32>
    %735 = vector.broadcast %590 : vector<1x16xf32> to vector<8x16xf32>
    %736 = vector.broadcast %734 : vector<8x1xf32> to vector<8x16xf32>
    %737 = arith.cmpf ole, %735, %736 : vector<8x16xf32>
    %738 = arith.andi %732, %737 : vector<8x16xi1>
    %739 = vector.broadcast %590 : vector<1x16xf32> to vector<8x16xf32>
    %740 = vector.broadcast %727 : vector<8x1xf32> to vector<8x16xf32>
    %741 = arith.cmpf oeq, %739, %740 : vector<8x16xf32>
    %cst_157 = arith.constant 1.000000e+00 : f32
    %742 = vector.broadcast %cst_157 : f32 to vector<8x1xf32>
    %743 = arith.subf %742, %729 : vector<8x1xf32>
    %744 = vector.shape_cast %743 : vector<8x1xf32> to vector<8x1xf32>
    %745 = vector.broadcast %744 : vector<8x1xf32> to vector<8x16xf32>
    %746 = vector.shape_cast %729 : vector<8x1xf32> to vector<8x1xf32>
    %747 = vector.broadcast %746 : vector<8x1xf32> to vector<8x16xf32>
    %748 = arith.select %741, %745, %747 : vector<8x16xi1>, vector<8x16xf32>
    %749 = vector.broadcast %591 : vector<1x16xf32> to vector<8x16xf32>
    %750 = vector.broadcast %728 : vector<8x1xf32> to vector<8x16xf32>
    %751 = arith.cmpf oeq, %749, %750 : vector<8x16xf32>
    %752 = vector.extract_strided_slice %216 {offsets = [0, 7], sizes = [8, 1], strides = [1, 1]} : vector<8x16xf32> to vector<8x1xf32>
    %cst_158 = arith.constant 1.000000e+00 : f32
    %753 = vector.broadcast %cst_158 : f32 to vector<8x1xf32>
    %754 = arith.addf %728, %753 : vector<8x1xf32>
    %755 = vector.broadcast %591 : vector<1x16xf32> to vector<8x16xf32>
    %756 = vector.broadcast %754 : vector<8x1xf32> to vector<8x16xf32>
    %757 = arith.cmpf oeq, %755, %756 : vector<8x16xf32>
    %758 = vector.extract_strided_slice %217 {offsets = [0, 7], sizes = [8, 1], strides = [1, 1]} : vector<8x16xf32> to vector<8x1xf32>
    %cst_159 = arith.constant 0.000000e+00 : f32
    %759 = vector.shape_cast %758 : vector<8x1xf32> to vector<8x1xf32>
    %760 = vector.broadcast %759 : vector<8x1xf32> to vector<8x16xf32>
    %761 = vector.broadcast %cst_159 : f32 to vector<8x16xf32>
    %762 = arith.select %757, %760, %761 : vector<8x16xi1>, vector<8x16xf32>
    %763 = vector.shape_cast %752 : vector<8x1xf32> to vector<8x1xf32>
    %764 = vector.broadcast %763 : vector<8x1xf32> to vector<8x16xf32>
    %765 = arith.select %751, %764, %762 : vector<8x16xi1>, vector<8x16xf32>
    %766 = arith.mulf %748, %765 : vector<8x16xf32>
    %cst_160 = arith.constant 0.000000e+00 : f32
    %767 = vector.broadcast %cst_160 : f32 to vector<8x16xf32>
    %768 = arith.select %738, %766, %767 : vector<8x16xi1>, vector<8x16xf32>
    %769 = arith.addf %726, %768 : vector<8x16xf32>
    %770 = vector.extract_strided_slice %145 {offsets = [64, 8], sizes = [16, 8], strides = [1, 1]} : vector<80x32xbf16> to vector<16x8xbf16>
    %771 = arith.truncf %769 : vector<8x16xf32> to vector<8x16xbf16>
    %cst_161 = arith.constant dense<0.000000e+00> : vector<8x8xf32>
    %772 = tpu.matmul %771, %770, %cst_161 {dimension_numbers = #tpu.dot_dimension_numbers<[1], [0], [0], [1], [0, 0, 1, 1], [], []>} : vector<8x16xbf16>, vector<16x8xbf16>, vector<8x8xf32> -> vector<8x8xf32>
    %773 = arith.addf %407, %772 : vector<8x8xf32>
    %cst_162 = arith.constant 0.000000e+00 : f32
    %774 = vector.broadcast %cst_162 : f32 to vector<8x16xf32>
    %775 = vector.extract_strided_slice %165 {offsets = [0, 10], sizes = [8, 1], strides = [1, 1]} : vector<8x16xf32> to vector<8x1xf32>
    %776 = vector.extract_strided_slice %166 {offsets = [0, 10], sizes = [8, 1], strides = [1, 1]} : vector<8x16xf32> to vector<8x1xf32>
    %777 = vector.extract_strided_slice %167 {offsets = [0, 10], sizes = [8, 1], strides = [1, 1]} : vector<8x16xf32> to vector<8x1xf32>
    %778 = vector.broadcast %590 : vector<1x16xf32> to vector<8x16xf32>
    %779 = vector.broadcast %775 : vector<8x1xf32> to vector<8x16xf32>
    %780 = arith.cmpf oge, %778, %779 : vector<8x16xf32>
    %cst_163 = arith.constant 1.000000e+00 : f32
    %781 = vector.broadcast %cst_163 : f32 to vector<8x1xf32>
    %782 = arith.addf %775, %781 : vector<8x1xf32>
    %783 = vector.broadcast %590 : vector<1x16xf32> to vector<8x16xf32>
    %784 = vector.broadcast %782 : vector<8x1xf32> to vector<8x16xf32>
    %785 = arith.cmpf ole, %783, %784 : vector<8x16xf32>
    %786 = arith.andi %780, %785 : vector<8x16xi1>
    %787 = vector.broadcast %590 : vector<1x16xf32> to vector<8x16xf32>
    %788 = vector.broadcast %775 : vector<8x1xf32> to vector<8x16xf32>
    %789 = arith.cmpf oeq, %787, %788 : vector<8x16xf32>
    %cst_164 = arith.constant 1.000000e+00 : f32
    %790 = vector.broadcast %cst_164 : f32 to vector<8x1xf32>
    %791 = arith.subf %790, %777 : vector<8x1xf32>
    %792 = vector.shape_cast %791 : vector<8x1xf32> to vector<8x1xf32>
    %793 = vector.broadcast %792 : vector<8x1xf32> to vector<8x16xf32>
    %794 = vector.shape_cast %777 : vector<8x1xf32> to vector<8x1xf32>
    %795 = vector.broadcast %794 : vector<8x1xf32> to vector<8x16xf32>
    %796 = arith.select %789, %793, %795 : vector<8x16xi1>, vector<8x16xf32>
    %797 = vector.broadcast %591 : vector<1x16xf32> to vector<8x16xf32>
    %798 = vector.broadcast %776 : vector<8x1xf32> to vector<8x16xf32>
    %799 = arith.cmpf oeq, %797, %798 : vector<8x16xf32>
    %800 = vector.extract_strided_slice %216 {offsets = [0, 10], sizes = [8, 1], strides = [1, 1]} : vector<8x16xf32> to vector<8x1xf32>
    %cst_165 = arith.constant 1.000000e+00 : f32
    %801 = vector.broadcast %cst_165 : f32 to vector<8x1xf32>
    %802 = arith.addf %776, %801 : vector<8x1xf32>
    %803 = vector.broadcast %591 : vector<1x16xf32> to vector<8x16xf32>
    %804 = vector.broadcast %802 : vector<8x1xf32> to vector<8x16xf32>
    %805 = arith.cmpf oeq, %803, %804 : vector<8x16xf32>
    %806 = vector.extract_strided_slice %217 {offsets = [0, 10], sizes = [8, 1], strides = [1, 1]} : vector<8x16xf32> to vector<8x1xf32>
    %cst_166 = arith.constant 0.000000e+00 : f32
    %807 = vector.shape_cast %806 : vector<8x1xf32> to vector<8x1xf32>
    %808 = vector.broadcast %807 : vector<8x1xf32> to vector<8x16xf32>
    %809 = vector.broadcast %cst_166 : f32 to vector<8x16xf32>
    %810 = arith.select %805, %808, %809 : vector<8x16xi1>, vector<8x16xf32>
    %811 = vector.shape_cast %800 : vector<8x1xf32> to vector<8x1xf32>
    %812 = vector.broadcast %811 : vector<8x1xf32> to vector<8x16xf32>
    %813 = arith.select %799, %812, %810 : vector<8x16xi1>, vector<8x16xf32>
    %814 = arith.mulf %796, %813 : vector<8x16xf32>
    %cst_167 = arith.constant 0.000000e+00 : f32
    %815 = vector.broadcast %cst_167 : f32 to vector<8x16xf32>
    %816 = arith.select %786, %814, %815 : vector<8x16xi1>, vector<8x16xf32>
    %817 = arith.addf %774, %816 : vector<8x16xf32>
    %818 = vector.extract_strided_slice %165 {offsets = [0, 11], sizes = [8, 1], strides = [1, 1]} : vector<8x16xf32> to vector<8x1xf32>
    %819 = vector.extract_strided_slice %166 {offsets = [0, 11], sizes = [8, 1], strides = [1, 1]} : vector<8x16xf32> to vector<8x1xf32>
    %820 = vector.extract_strided_slice %167 {offsets = [0, 11], sizes = [8, 1], strides = [1, 1]} : vector<8x16xf32> to vector<8x1xf32>
    %821 = vector.broadcast %590 : vector<1x16xf32> to vector<8x16xf32>
    %822 = vector.broadcast %818 : vector<8x1xf32> to vector<8x16xf32>
    %823 = arith.cmpf oge, %821, %822 : vector<8x16xf32>
    %cst_168 = arith.constant 1.000000e+00 : f32
    %824 = vector.broadcast %cst_168 : f32 to vector<8x1xf32>
    %825 = arith.addf %818, %824 : vector<8x1xf32>
    %826 = vector.broadcast %590 : vector<1x16xf32> to vector<8x16xf32>
    %827 = vector.broadcast %825 : vector<8x1xf32> to vector<8x16xf32>
    %828 = arith.cmpf ole, %826, %827 : vector<8x16xf32>
    %829 = arith.andi %823, %828 : vector<8x16xi1>
    %830 = vector.broadcast %590 : vector<1x16xf32> to vector<8x16xf32>
    %831 = vector.broadcast %818 : vector<8x1xf32> to vector<8x16xf32>
    %832 = arith.cmpf oeq, %830, %831 : vector<8x16xf32>
    %cst_169 = arith.constant 1.000000e+00 : f32
    %833 = vector.broadcast %cst_169 : f32 to vector<8x1xf32>
    %834 = arith.subf %833, %820 : vector<8x1xf32>
    %835 = vector.shape_cast %834 : vector<8x1xf32> to vector<8x1xf32>
    %836 = vector.broadcast %835 : vector<8x1xf32> to vector<8x16xf32>
    %837 = vector.shape_cast %820 : vector<8x1xf32> to vector<8x1xf32>
    %838 = vector.broadcast %837 : vector<8x1xf32> to vector<8x16xf32>
    %839 = arith.select %832, %836, %838 : vector<8x16xi1>, vector<8x16xf32>
    %840 = vector.broadcast %591 : vector<1x16xf32> to vector<8x16xf32>
    %841 = vector.broadcast %819 : vector<8x1xf32> to vector<8x16xf32>
    %842 = arith.cmpf oeq, %840, %841 : vector<8x16xf32>
    %843 = vector.extract_strided_slice %216 {offsets = [0, 11], sizes = [8, 1], strides = [1, 1]} : vector<8x16xf32> to vector<8x1xf32>
    %cst_170 = arith.constant 1.000000e+00 : f32
    %844 = vector.broadcast %cst_170 : f32 to vector<8x1xf32>
    %845 = arith.addf %819, %844 : vector<8x1xf32>
    %846 = vector.broadcast %591 : vector<1x16xf32> to vector<8x16xf32>
    %847 = vector.broadcast %845 : vector<8x1xf32> to vector<8x16xf32>
    %848 = arith.cmpf oeq, %846, %847 : vector<8x16xf32>
    %849 = vector.extract_strided_slice %217 {offsets = [0, 11], sizes = [8, 1], strides = [1, 1]} : vector<8x16xf32> to vector<8x1xf32>
    %cst_171 = arith.constant 0.000000e+00 : f32
    %850 = vector.shape_cast %849 : vector<8x1xf32> to vector<8x1xf32>
    %851 = vector.broadcast %850 : vector<8x1xf32> to vector<8x16xf32>
    %852 = vector.broadcast %cst_171 : f32 to vector<8x16xf32>
    %853 = arith.select %848, %851, %852 : vector<8x16xi1>, vector<8x16xf32>
    %854 = vector.shape_cast %843 : vector<8x1xf32> to vector<8x1xf32>
    %855 = vector.broadcast %854 : vector<8x1xf32> to vector<8x16xf32>
    %856 = arith.select %842, %855, %853 : vector<8x16xi1>, vector<8x16xf32>
    %857 = arith.mulf %839, %856 : vector<8x16xf32>
    %cst_172 = arith.constant 0.000000e+00 : f32
    %858 = vector.broadcast %cst_172 : f32 to vector<8x16xf32>
    %859 = arith.select %829, %857, %858 : vector<8x16xi1>, vector<8x16xf32>
    %860 = arith.addf %817, %859 : vector<8x16xf32>
    %861 = vector.extract_strided_slice %145 {offsets = [64, 16], sizes = [16, 8], strides = [1, 1]} : vector<80x32xbf16> to vector<16x8xbf16>
    %862 = arith.truncf %860 : vector<8x16xf32> to vector<8x16xbf16>
    %cst_173 = arith.constant dense<0.000000e+00> : vector<8x8xf32>
    %863 = tpu.matmul %862, %861, %cst_173 {dimension_numbers = #tpu.dot_dimension_numbers<[1], [0], [0], [1], [0, 0, 1, 1], [], []>} : vector<8x16xbf16>, vector<16x8xbf16>, vector<8x8xf32> -> vector<8x8xf32>
    %864 = arith.addf %498, %863 : vector<8x8xf32>
    %cst_174 = arith.constant 0.000000e+00 : f32
    %865 = vector.broadcast %cst_174 : f32 to vector<8x16xf32>
    %866 = vector.extract_strided_slice %165 {offsets = [0, 14], sizes = [8, 1], strides = [1, 1]} : vector<8x16xf32> to vector<8x1xf32>
    %867 = vector.extract_strided_slice %166 {offsets = [0, 14], sizes = [8, 1], strides = [1, 1]} : vector<8x16xf32> to vector<8x1xf32>
    %868 = vector.extract_strided_slice %167 {offsets = [0, 14], sizes = [8, 1], strides = [1, 1]} : vector<8x16xf32> to vector<8x1xf32>
    %869 = vector.broadcast %590 : vector<1x16xf32> to vector<8x16xf32>
    %870 = vector.broadcast %866 : vector<8x1xf32> to vector<8x16xf32>
    %871 = arith.cmpf oge, %869, %870 : vector<8x16xf32>
    %cst_175 = arith.constant 1.000000e+00 : f32
    %872 = vector.broadcast %cst_175 : f32 to vector<8x1xf32>
    %873 = arith.addf %866, %872 : vector<8x1xf32>
    %874 = vector.broadcast %590 : vector<1x16xf32> to vector<8x16xf32>
    %875 = vector.broadcast %873 : vector<8x1xf32> to vector<8x16xf32>
    %876 = arith.cmpf ole, %874, %875 : vector<8x16xf32>
    %877 = arith.andi %871, %876 : vector<8x16xi1>
    %878 = vector.broadcast %590 : vector<1x16xf32> to vector<8x16xf32>
    %879 = vector.broadcast %866 : vector<8x1xf32> to vector<8x16xf32>
    %880 = arith.cmpf oeq, %878, %879 : vector<8x16xf32>
    %cst_176 = arith.constant 1.000000e+00 : f32
    %881 = vector.broadcast %cst_176 : f32 to vector<8x1xf32>
    %882 = arith.subf %881, %868 : vector<8x1xf32>
    %883 = vector.shape_cast %882 : vector<8x1xf32> to vector<8x1xf32>
    %884 = vector.broadcast %883 : vector<8x1xf32> to vector<8x16xf32>
    %885 = vector.shape_cast %868 : vector<8x1xf32> to vector<8x1xf32>
    %886 = vector.broadcast %885 : vector<8x1xf32> to vector<8x16xf32>
    %887 = arith.select %880, %884, %886 : vector<8x16xi1>, vector<8x16xf32>
    %888 = vector.broadcast %591 : vector<1x16xf32> to vector<8x16xf32>
    %889 = vector.broadcast %867 : vector<8x1xf32> to vector<8x16xf32>
    %890 = arith.cmpf oeq, %888, %889 : vector<8x16xf32>
    %891 = vector.extract_strided_slice %216 {offsets = [0, 14], sizes = [8, 1], strides = [1, 1]} : vector<8x16xf32> to vector<8x1xf32>
    %cst_177 = arith.constant 1.000000e+00 : f32
    %892 = vector.broadcast %cst_177 : f32 to vector<8x1xf32>
    %893 = arith.addf %867, %892 : vector<8x1xf32>
    %894 = vector.broadcast %591 : vector<1x16xf32> to vector<8x16xf32>
    %895 = vector.broadcast %893 : vector<8x1xf32> to vector<8x16xf32>
    %896 = arith.cmpf oeq, %894, %895 : vector<8x16xf32>
    %897 = vector.extract_strided_slice %217 {offsets = [0, 14], sizes = [8, 1], strides = [1, 1]} : vector<8x16xf32> to vector<8x1xf32>
    %cst_178 = arith.constant 0.000000e+00 : f32
    %898 = vector.shape_cast %897 : vector<8x1xf32> to vector<8x1xf32>
    %899 = vector.broadcast %898 : vector<8x1xf32> to vector<8x16xf32>
    %900 = vector.broadcast %cst_178 : f32 to vector<8x16xf32>
    %901 = arith.select %896, %899, %900 : vector<8x16xi1>, vector<8x16xf32>
    %902 = vector.shape_cast %891 : vector<8x1xf32> to vector<8x1xf32>
    %903 = vector.broadcast %902 : vector<8x1xf32> to vector<8x16xf32>
    %904 = arith.select %890, %903, %901 : vector<8x16xi1>, vector<8x16xf32>
    %905 = arith.mulf %887, %904 : vector<8x16xf32>
    %cst_179 = arith.constant 0.000000e+00 : f32
    %906 = vector.broadcast %cst_179 : f32 to vector<8x16xf32>
    %907 = arith.select %877, %905, %906 : vector<8x16xi1>, vector<8x16xf32>
    %908 = arith.addf %865, %907 : vector<8x16xf32>
    %909 = vector.extract_strided_slice %165 {offsets = [0, 15], sizes = [8, 1], strides = [1, 1]} : vector<8x16xf32> to vector<8x1xf32>
    %910 = vector.extract_strided_slice %166 {offsets = [0, 15], sizes = [8, 1], strides = [1, 1]} : vector<8x16xf32> to vector<8x1xf32>
    %911 = vector.extract_strided_slice %167 {offsets = [0, 15], sizes = [8, 1], strides = [1, 1]} : vector<8x16xf32> to vector<8x1xf32>
    %912 = vector.broadcast %590 : vector<1x16xf32> to vector<8x16xf32>
    %913 = vector.broadcast %909 : vector<8x1xf32> to vector<8x16xf32>
    %914 = arith.cmpf oge, %912, %913 : vector<8x16xf32>
    %cst_180 = arith.constant 1.000000e+00 : f32
    %915 = vector.broadcast %cst_180 : f32 to vector<8x1xf32>
    %916 = arith.addf %909, %915 : vector<8x1xf32>
    %917 = vector.broadcast %590 : vector<1x16xf32> to vector<8x16xf32>
    %918 = vector.broadcast %916 : vector<8x1xf32> to vector<8x16xf32>
    %919 = arith.cmpf ole, %917, %918 : vector<8x16xf32>
    %920 = arith.andi %914, %919 : vector<8x16xi1>
    %921 = vector.broadcast %590 : vector<1x16xf32> to vector<8x16xf32>
    %922 = vector.broadcast %909 : vector<8x1xf32> to vector<8x16xf32>
    %923 = arith.cmpf oeq, %921, %922 : vector<8x16xf32>
    %cst_181 = arith.constant 1.000000e+00 : f32
    %924 = vector.broadcast %cst_181 : f32 to vector<8x1xf32>
    %925 = arith.subf %924, %911 : vector<8x1xf32>
    %926 = vector.shape_cast %925 : vector<8x1xf32> to vector<8x1xf32>
    %927 = vector.broadcast %926 : vector<8x1xf32> to vector<8x16xf32>
    %928 = vector.shape_cast %911 : vector<8x1xf32> to vector<8x1xf32>
    %929 = vector.broadcast %928 : vector<8x1xf32> to vector<8x16xf32>
    %930 = arith.select %923, %927, %929 : vector<8x16xi1>, vector<8x16xf32>
    %931 = vector.broadcast %591 : vector<1x16xf32> to vector<8x16xf32>
    %932 = vector.broadcast %910 : vector<8x1xf32> to vector<8x16xf32>
    %933 = arith.cmpf oeq, %931, %932 : vector<8x16xf32>
    %934 = vector.extract_strided_slice %216 {offsets = [0, 15], sizes = [8, 1], strides = [1, 1]} : vector<8x16xf32> to vector<8x1xf32>
    %cst_182 = arith.constant 1.000000e+00 : f32
    %935 = vector.broadcast %cst_182 : f32 to vector<8x1xf32>
    %936 = arith.addf %910, %935 : vector<8x1xf32>
    %937 = vector.broadcast %591 : vector<1x16xf32> to vector<8x16xf32>
    %938 = vector.broadcast %936 : vector<8x1xf32> to vector<8x16xf32>
    %939 = arith.cmpf oeq, %937, %938 : vector<8x16xf32>
    %940 = vector.extract_strided_slice %217 {offsets = [0, 15], sizes = [8, 1], strides = [1, 1]} : vector<8x16xf32> to vector<8x1xf32>
    %cst_183 = arith.constant 0.000000e+00 : f32
    %941 = vector.shape_cast %940 : vector<8x1xf32> to vector<8x1xf32>
    %942 = vector.broadcast %941 : vector<8x1xf32> to vector<8x16xf32>
    %943 = vector.broadcast %cst_183 : f32 to vector<8x16xf32>
    %944 = arith.select %939, %942, %943 : vector<8x16xi1>, vector<8x16xf32>
    %945 = vector.shape_cast %934 : vector<8x1xf32> to vector<8x1xf32>
    %946 = vector.broadcast %945 : vector<8x1xf32> to vector<8x16xf32>
    %947 = arith.select %933, %946, %944 : vector<8x16xi1>, vector<8x16xf32>
    %948 = arith.mulf %930, %947 : vector<8x16xf32>
    %cst_184 = arith.constant 0.000000e+00 : f32
    %949 = vector.broadcast %cst_184 : f32 to vector<8x16xf32>
    %950 = arith.select %920, %948, %949 : vector<8x16xi1>, vector<8x16xf32>
    %951 = arith.addf %908, %950 : vector<8x16xf32>
    %952 = vector.extract_strided_slice %145 {offsets = [64, 24], sizes = [16, 8], strides = [1, 1]} : vector<80x32xbf16> to vector<16x8xbf16>
    %953 = arith.truncf %951 : vector<8x16xf32> to vector<8x16xbf16>
    %cst_185 = arith.constant dense<0.000000e+00> : vector<8x8xf32>
    %954 = tpu.matmul %953, %952, %cst_185 {dimension_numbers = #tpu.dot_dimension_numbers<[1], [0], [0], [1], [0, 0, 1, 1], [], []>} : vector<8x16xbf16>, vector<16x8xbf16>, vector<8x8xf32> -> vector<8x8xf32>
    %955 = arith.addf %589, %954 : vector<8x8xf32>
    %956 = tpu.concatenate %682, %773, %864, %955 in 1 : vector<8x8xf32>, vector<8x8xf32>, vector<8x8xf32>, vector<8x8xf32> -> vector<8x32xf32>
    %957 = arith.truncf %956 : vector<8x32xf32> to vector<8x32xbf16>
    %c0_186 = arith.constant 0 : index
    %c0_187 = arith.constant 0 : index
    %958 = vector.load %arg21[%c0_186, %c0_187] : memref<32x32xbf16, #tpu.memory_space<vmem>>, vector<32x32xbf16>
    %cst_188 = arith.constant dense<0.000000e+00> : vector<8x32xf32>
    %959 = tpu.matmul %957, %958, %cst_188 {dimension_numbers = #tpu.dot_dimension_numbers<[1], [0], [0], [1], [0, 0, 1, 1], [], []>} : vector<8x32xbf16>, vector<32x32xbf16>, vector<8x32xf32> -> vector<8x32xf32>
    %c0_189 = arith.constant 0 : index
    %c0_190 = arith.constant 0 : index
    %960 = vector.load %arg22[%c0_189, %c0_190] : memref<1x32xf32, #tpu.memory_space<vmem>>, vector<1x32xf32>
    %961 = vector.broadcast %960 : vector<1x32xf32> to vector<8x32xf32>
    %962 = arith.addf %959, %961 : vector<8x32xf32>
    %963 = arith.addf %132, %962 : vector<8x32xf32>
    %cst_191 = arith.constant dense<0.000000e+00> : vector<8xf32>
    %964 = vector.multi_reduction <add>, %963, %cst_191 [1] : vector<8x32xf32> to vector<8xf32>
    %965 = vector.shape_cast %964 : vector<8xf32> to vector<8x1xf32>
    %cst_192 = arith.constant 3.200000e+01 : f32
    %966 = vector.broadcast %cst_192 : f32 to vector<8x1xf32>
    %967 = arith.divf %965, %966 : vector<8x1xf32>
    %968 = vector.broadcast %967 : vector<8x1xf32> to vector<8x32xf32>
    %969 = arith.subf %963, %968 : vector<8x32xf32>
    %970 = arith.mulf %969, %969 : vector<8x32xf32>
    %cst_193 = arith.constant dense<0.000000e+00> : vector<8xf32>
    %971 = vector.multi_reduction <add>, %970, %cst_193 [1] : vector<8x32xf32> to vector<8xf32>
    %972 = vector.shape_cast %971 : vector<8xf32> to vector<8x1xf32>
    %cst_194 = arith.constant 3.200000e+01 : f32
    %973 = vector.broadcast %cst_194 : f32 to vector<8x1xf32>
    %974 = arith.divf %972, %973 : vector<8x1xf32>
    %975 = vector.broadcast %967 : vector<8x1xf32> to vector<8x32xf32>
    %976 = arith.subf %963, %975 : vector<8x32xf32>
    %cst_195 = arith.constant 9.99999974E-6 : f32
    %977 = vector.broadcast %cst_195 : f32 to vector<8x1xf32>
    %978 = arith.addf %974, %977 : vector<8x1xf32>
    %979 = math.rsqrt %978 : vector<8x1xf32>
    %980 = vector.broadcast %979 : vector<8x1xf32> to vector<8x32xf32>
    %981 = arith.mulf %976, %980 : vector<8x32xf32>
    %c0_196 = arith.constant 0 : index
    %c0_197 = arith.constant 0 : index
    %982 = vector.load %arg23[%c0_196, %c0_197] : memref<1x32xf32, #tpu.memory_space<vmem>>, vector<1x32xf32>
    %983 = vector.broadcast %982 : vector<1x32xf32> to vector<8x32xf32>
    %984 = arith.mulf %981, %983 : vector<8x32xf32>
    %c0_198 = arith.constant 0 : index
    %c0_199 = arith.constant 0 : index
    %985 = vector.load %arg24[%c0_198, %c0_199] : memref<1x32xf32, #tpu.memory_space<vmem>>, vector<1x32xf32>
    %986 = vector.broadcast %985 : vector<1x32xf32> to vector<8x32xf32>
    %987 = arith.addf %984, %986 : vector<8x32xf32>
    %988 = arith.truncf %987 : vector<8x32xf32> to vector<8x32xbf16>
    %c0_200 = arith.constant 0 : index
    %c0_201 = arith.constant 0 : index
    %989 = vector.load %arg25[%c0_200, %c0_201] : memref<32x64xbf16, #tpu.memory_space<vmem>>, vector<32x64xbf16>
    %cst_202 = arith.constant dense<0.000000e+00> : vector<8x64xf32>
    %990 = tpu.matmul %988, %989, %cst_202 {dimension_numbers = #tpu.dot_dimension_numbers<[1], [0], [0], [1], [0, 0, 1, 1], [], []>} : vector<8x32xbf16>, vector<32x64xbf16>, vector<8x64xf32> -> vector<8x64xf32>
    %c0_203 = arith.constant 0 : index
    %c0_204 = arith.constant 0 : index
    %991 = vector.load %arg26[%c0_203, %c0_204] : memref<1x64xf32, #tpu.memory_space<vmem>>, vector<1x64xf32>
    %992 = vector.broadcast %991 : vector<1x64xf32> to vector<8x64xf32>
    %993 = arith.addf %990, %992 : vector<8x64xf32>
    %cst_205 = arith.constant 0.000000e+00 : f32
    %994 = vector.broadcast %cst_205 : f32 to vector<8x64xf32>
    %995 = arith.maximumf %993, %994 : vector<8x64xf32>
    %996 = arith.truncf %995 : vector<8x64xf32> to vector<8x64xbf16>
    %c0_206 = arith.constant 0 : index
    %c0_207 = arith.constant 0 : index
    %997 = vector.load %arg27[%c0_206, %c0_207] : memref<64x32xbf16, #tpu.memory_space<vmem>>, vector<64x32xbf16>
    %cst_208 = arith.constant dense<0.000000e+00> : vector<8x32xf32>
    %998 = tpu.matmul %996, %997, %cst_208 {dimension_numbers = #tpu.dot_dimension_numbers<[1], [0], [0], [1], [0, 0, 1, 1], [], []>} : vector<8x64xbf16>, vector<64x32xbf16>, vector<8x32xf32> -> vector<8x32xf32>
    %c0_209 = arith.constant 0 : index
    %c0_210 = arith.constant 0 : index
    %999 = vector.load %arg28[%c0_209, %c0_210] : memref<1x32xf32, #tpu.memory_space<vmem>>, vector<1x32xf32>
    %1000 = vector.broadcast %999 : vector<1x32xf32> to vector<8x32xf32>
    %1001 = arith.addf %998, %1000 : vector<8x32xf32>
    %1002 = arith.addf %987, %1001 : vector<8x32xf32>
    %cst_211 = arith.constant dense<0.000000e+00> : vector<8xf32>
    %1003 = vector.multi_reduction <add>, %1002, %cst_211 [1] : vector<8x32xf32> to vector<8xf32>
    %1004 = vector.shape_cast %1003 : vector<8xf32> to vector<8x1xf32>
    %cst_212 = arith.constant 3.200000e+01 : f32
    %1005 = vector.broadcast %cst_212 : f32 to vector<8x1xf32>
    %1006 = arith.divf %1004, %1005 : vector<8x1xf32>
    %1007 = vector.broadcast %1006 : vector<8x1xf32> to vector<8x32xf32>
    %1008 = arith.subf %1002, %1007 : vector<8x32xf32>
    %1009 = arith.mulf %1008, %1008 : vector<8x32xf32>
    %cst_213 = arith.constant dense<0.000000e+00> : vector<8xf32>
    %1010 = vector.multi_reduction <add>, %1009, %cst_213 [1] : vector<8x32xf32> to vector<8xf32>
    %1011 = vector.shape_cast %1010 : vector<8xf32> to vector<8x1xf32>
    %cst_214 = arith.constant 3.200000e+01 : f32
    %1012 = vector.broadcast %cst_214 : f32 to vector<8x1xf32>
    %1013 = arith.divf %1011, %1012 : vector<8x1xf32>
    %1014 = vector.broadcast %1006 : vector<8x1xf32> to vector<8x32xf32>
    %1015 = arith.subf %1002, %1014 : vector<8x32xf32>
    %cst_215 = arith.constant 9.99999974E-6 : f32
    %1016 = vector.broadcast %cst_215 : f32 to vector<8x1xf32>
    %1017 = arith.addf %1013, %1016 : vector<8x1xf32>
    %1018 = math.rsqrt %1017 : vector<8x1xf32>
    %1019 = vector.broadcast %1018 : vector<8x1xf32> to vector<8x32xf32>
    %1020 = arith.mulf %1015, %1019 : vector<8x32xf32>
    %c0_216 = arith.constant 0 : index
    %c0_217 = arith.constant 0 : index
    %1021 = vector.load %arg29[%c0_216, %c0_217] : memref<1x32xf32, #tpu.memory_space<vmem>>, vector<1x32xf32>
    %1022 = vector.broadcast %1021 : vector<1x32xf32> to vector<8x32xf32>
    %1023 = arith.mulf %1020, %1022 : vector<8x32xf32>
    %c0_218 = arith.constant 0 : index
    %c0_219 = arith.constant 0 : index
    %1024 = vector.load %arg30[%c0_218, %c0_219] : memref<1x32xf32, #tpu.memory_space<vmem>>, vector<1x32xf32>
    %1025 = vector.broadcast %1024 : vector<1x32xf32> to vector<8x32xf32>
    %1026 = arith.addf %1023, %1025 : vector<8x32xf32>
    %c0_220 = arith.constant 0 : index
    %c0_221 = arith.constant 0 : index
    %c0_222 = arith.constant 0 : index
    %1027 = vector.load %arg31[%c0_220, %c0_221, %c0_222] : memref<1x8x32xf32, #tpu.memory_space<vmem>>, vector<1x8x32xf32>
    %1028 = vector.shape_cast %1027 : vector<1x8x32xf32> to vector<8x32xf32>
    %1029 = vector.shape_cast %1026 : vector<8x32xf32> to vector<1x8x32xf32>
    tpu.vector_store %arg31[%c0_220, %c0_221, %c0_222], %1029 {strides = array<i32>} : memref<1x8x32xf32, #tpu.memory_space<vmem>>, vector<1x8x32xf32>,
    return
  }
  func.func @transform_0(%arg0: i32) -> (i32, i32, i32) {
    %c0_i32 = arith.constant 0 : i32
    %c0_i32_0 = arith.constant 0 : i32
    %c0_i32_1 = arith.constant 0 : i32
    return %arg0, %c0_i32, %c0_i32_0 : i32, i32, i32
  }
  func.func @transform_1(%arg0: i32) -> (i32, i32, i32) {
    %c0_i32 = arith.constant 0 : i32
    %c0_i32_0 = arith.constant 0 : i32
    %c0_i32_1 = arith.constant 0 : i32
    return %arg0, %c0_i32, %c0_i32_0 : i32, i32, i32
  }
  func.func @transform_2(%arg0: i32) -> (i32, i32, i32) {
    %c0_i32 = arith.constant 0 : i32
    %c0_i32_0 = arith.constant 0 : i32
    %c0_i32_1 = arith.constant 0 : i32
    return %arg0, %c0_i32, %c0_i32_0 : i32, i32, i32
  }
  func.func @transform_3(%arg0: i32) -> (i32, i32, i32) {
    %c0_i32 = arith.constant 0 : i32
    %c0_i32_0 = arith.constant 0 : i32
    %c0_i32_1 = arith.constant 0 : i32
    return %arg0, %c0_i32, %c0_i32_0 : i32, i32, i32
  }
  func.func @transform_4(%arg0: i32) -> (i32, i32, i32) {
    %c0_i32 = arith.constant 0 : i32
    %c0_i32_0 = arith.constant 0 : i32
    %c0_i32_1 = arith.constant 0 : i32
    return %arg0, %c0_i32, %c0_i32_0 : i32, i32, i32
  }
  func.func @transform_5(%arg0: i32) -> (i32, i32, i32) {
    %c0_i32 = arith.constant 0 : i32
    %c0_i32_0 = arith.constant 0 : i32
    %c0_i32_1 = arith.constant 0 : i32
    return %arg0, %c0_i32, %c0_i32_0 : i32, i32, i32
  }
  func.func @transform_6(%arg0: i32) -> (i32, i32) {
    %c0_i32 = arith.constant 0 : i32
    %c0_i32_0 = arith.constant 0 : i32
    %c0_i32_1 = arith.constant 0 : i32
    return %c0_i32, %c0_i32_0 : i32, i32
  }
  func.func @transform_7(%arg0: i32) -> (i32, i32) {
    %c0_i32 = arith.constant 0 : i32
    %c0_i32_0 = arith.constant 0 : i32
    %c0_i32_1 = arith.constant 0 : i32
    return %c0_i32, %c0_i32_0 : i32, i32
  }
  func.func @transform_8(%arg0: i32) -> (i32, i32) {
    %c0_i32 = arith.constant 0 : i32
    %c0_i32_0 = arith.constant 0 : i32
    %c0_i32_1 = arith.constant 0 : i32
    return %c0_i32, %c0_i32_0 : i32, i32
  }
  func.func @transform_9(%arg0: i32) -> (i32, i32) {
    %c0_i32 = arith.constant 0 : i32
    %c0_i32_0 = arith.constant 0 : i32
    %c0_i32_1 = arith.constant 0 : i32
    return %c0_i32, %c0_i32_0 : i32, i32
  }
  func.func @transform_10(%arg0: i32) -> (i32, i32) {
    %c0_i32 = arith.constant 0 : i32
    %c0_i32_0 = arith.constant 0 : i32
    %c0_i32_1 = arith.constant 0 : i32
    return %c0_i32, %c0_i32_0 : i32, i32
  }
  func.func @transform_11(%arg0: i32) -> (i32, i32) {
    %c0_i32 = arith.constant 0 : i32
    %c0_i32_0 = arith.constant 0 : i32
    %c0_i32_1 = arith.constant 0 : i32
    return %c0_i32, %c0_i32_0 : i32, i32
  }
  func.func @transform_12(%arg0: i32) -> (i32, i32) {
    %c0_i32 = arith.constant 0 : i32
    %c0_i32_0 = arith.constant 0 : i32
    %c0_i32_1 = arith.constant 0 : i32
    return %c0_i32, %c0_i32_0 : i32, i32
  }
  func.func @transform_13(%arg0: i32) -> (i32, i32) {
    %c0_i32 = arith.constant 0 : i32
    %c0_i32_0 = arith.constant 0 : i32
    %c0_i32_1 = arith.constant 0 : i32
    return %c0_i32, %c0_i32_0 : i32, i32
  }
  func.func @transform_14(%arg0: i32) -> (i32, i32) {
    %c0_i32 = arith.constant 0 : i32
    %c0_i32_0 = arith.constant 0 : i32
    %c0_i32_1 = arith.constant 0 : i32
    return %c0_i32, %c0_i32_0 : i32, i32
  }
  func.func @transform_15(%arg0: i32) -> (i32, i32) {
    %c0_i32 = arith.constant 0 : i32
    %c0_i32_0 = arith.constant 0 : i32
    %c0_i32_1 = arith.constant 0 : i32
    return %c0_i32, %c0_i32_0 : i32, i32
  }
  func.func @transform_16(%arg0: i32) -> (i32, i32) {
    %c0_i32 = arith.constant 0 : i32
    %c0_i32_0 = arith.constant 0 : i32
    %c0_i32_1 = arith.constant 0 : i32
    return %c0_i32, %c0_i32_0 : i32, i32
  }
  func.func @transform_17(%arg0: i32) -> (i32, i32) {
    %c0_i32 = arith.constant 0 : i32
    %c0_i32_0 = arith.constant 0 : i32
    %c0_i32_1 = arith.constant 0 : i32
    return %c0_i32, %c0_i32_0 : i32, i32
  }
  func.func @transform_18(%arg0: i32) -> (i32, i32) {
    %c0_i32 = arith.constant 0 : i32
    %c0_i32_0 = arith.constant 0 : i32
    %c0_i32_1 = arith.constant 0 : i32
    return %c0_i32, %c0_i32_0 : i32, i32
  }
  func.func @transform_19(%arg0: i32) -> (i32, i32) {
    %c0_i32 = arith.constant 0 : i32
    %c0_i32_0 = arith.constant 0 : i32
    %c0_i32_1 = arith.constant 0 : i32
    return %c0_i32, %c0_i32_0 : i32, i32
  }
  func.func @transform_20(%arg0: i32) -> (i32, i32) {
    %c0_i32 = arith.constant 0 : i32
    %c0_i32_0 = arith.constant 0 : i32
    %c0_i32_1 = arith.constant 0 : i32
    return %c0_i32, %c0_i32_0 : i32, i32
  }
  func.func @transform_21(%arg0: i32) -> (i32, i32) {
    %c0_i32 = arith.constant 0 : i32
    %c0_i32_0 = arith.constant 0 : i32
    %c0_i32_1 = arith.constant 0 : i32
    return %c0_i32, %c0_i32_0 : i32, i32
  }
  func.func @transform_22(%arg0: i32) -> (i32, i32) {
    %c0_i32 = arith.constant 0 : i32
    %c0_i32_0 = arith.constant 0 : i32
    %c0_i32_1 = arith.constant 0 : i32
    return %c0_i32, %c0_i32_0 : i32, i32
  }
  func.func @transform_23(%arg0: i32) -> (i32, i32) {
    %c0_i32 = arith.constant 0 : i32
    %c0_i32_0 = arith.constant 0 : i32
    %c0_i32_1 = arith.constant 0 : i32
    return %c0_i32, %c0_i32_0 : i32, i32
  }
  func.func @transform_24(%arg0: i32) -> (i32, i32) {
    %c0_i32 = arith.constant 0 : i32
    %c0_i32_0 = arith.constant 0 : i32
    %c0_i32_1 = arith.constant 0 : i32
    return %c0_i32, %c0_i32_0 : i32, i32
  }
  func.func @transform_25(%arg0: i32) -> (i32, i32) {
    %c0_i32 = arith.constant 0 : i32
    %c0_i32_0 = arith.constant 0 : i32
    %c0_i32_1 = arith.constant 0 : i32
    return %c0_i32, %c0_i32_0 : i32, i32
  }
  func.func @transform_26(%arg0: i32) -> (i32, i32) {
    %c0_i32 = arith.constant 0 : i32
    %c0_i32_0 = arith.constant 0 : i32
    %c0_i32_1 = arith.constant 0 : i32
    return %c0_i32, %c0_i32_0 : i32, i32
  }
  func.func @transform_27(%arg0: i32) -> (i32, i32) {
    %c0_i32 = arith.constant 0 : i32
    %c0_i32_0 = arith.constant 0 : i32
    %c0_i32_1 = arith.constant 0 : i32
    return %c0_i32, %c0_i32_0 : i32, i32
  }
  func.func @transform_28(%arg0: i32) -> (i32, i32) {
    %c0_i32 = arith.constant 0 : i32
    %c0_i32_0 = arith.constant 0 : i32
    %c0_i32_1 = arith.constant 0 : i32
    return %c0_i32, %c0_i32_0 : i32, i32
  }
  func.func @transform_29(%arg0: i32) -> (i32, i32) {
    %c0_i32 = arith.constant 0 : i32
    %c0_i32_0 = arith.constant 0 : i32
    %c0_i32_1 = arith.constant 0 : i32
    return %c0_i32, %c0_i32_0 : i32, i32
  }
  func.func @transform_30(%arg0: i32) -> (i32, i32, i32) {
    %c0_i32 = arith.constant 0 : i32
    %c0_i32_0 = arith.constant 0 : i32
    %c0_i32_1 = arith.constant 0 : i32
    return %arg0, %c0_i32, %c0_i32_0 : i32, i32, i32
  }
  func.func @transform_31(%arg0: i32) -> (i32, i32, i32) {
    %c0_i32 = arith.constant 0 : i32
    %c0_i32_0 = arith.constant 0 : i32
    %c0_i32_1 = arith.constant 0 : i32
    return %arg0, %c0_i32, %c0_i32_0 : i32, i32, i32
  }
}

module attributes {stable_mosaic.version = 11 : i64} {
  func.func @_decoder_layer_kernel(%arg0: i32, %arg1: memref<1x8x32xf32, #tpu.memory_space<vmem>>, %arg2: memref<1x8x32xf32, #tpu.memory_space<vmem>>, %arg3: memref<1x8x32xf32, #tpu.memory_space<vmem>>, %arg4: memref<1x8x32xf32, #tpu.memory_space<vmem>>, %arg5: memref<1x80x32xbf16, #tpu.memory_space<vmem>>, %arg6: memref<1x80x1xf32, #tpu.memory_space<vmem>>, %arg7: memref<1x80xf32, #tpu.memory_space<vmem>>, %arg8: memref<1x80xf32, #tpu.memory_space<vmem>>, %arg9: memref<32x64xbf16, #tpu.memory_space<vmem>>, %arg10: memref<1x64xf32, #tpu.memory_space<vmem>>, %arg11: memref<32x32xbf16, #tpu.memory_space<vmem>>, %arg12: memref<1x32xf32, #tpu.memory_space<vmem>>, %arg13: memref<32x32xbf16, #tpu.memory_space<vmem>>, %arg14: memref<1x32xf32, #tpu.memory_space<vmem>>, %arg15: memref<1x32xf32, #tpu.memory_space<vmem>>, %arg16: memref<1x32xf32, #tpu.memory_space<vmem>>, %arg17: memref<32x32xbf16, #tpu.memory_space<vmem>>, %arg18: memref<1x32xf32, #tpu.memory_space<vmem>>, %arg19: memref<32x48xbf16, #tpu.memory_space<vmem>>, %arg20: memref<1x48xf32, #tpu.memory_space<vmem>>, %arg21: memref<32x32xbf16, #tpu.memory_space<vmem>>, %arg22: memref<1x32xf32, #tpu.memory_space<vmem>>, %arg23: memref<1x32xf32, #tpu.memory_space<vmem>>, %arg24: memref<1x32xf32, #tpu.memory_space<vmem>>, %arg25: memref<32x64xbf16, #tpu.memory_space<vmem>>, %arg26: memref<1x64xf32, #tpu.memory_space<vmem>>, %arg27: memref<64x32xbf16, #tpu.memory_space<vmem>>, %arg28: memref<1x32xf32, #tpu.memory_space<vmem>>, %arg29: memref<1x32xf32, #tpu.memory_space<vmem>>, %arg30: memref<1x32xf32, #tpu.memory_space<vmem>>, %arg31: memref<1x8x32xf32, #tpu.memory_space<vmem>>, %arg32: memref<1x8x32xf32, #tpu.memory_space<vmem>>) attributes {dimension_semantics = [#tpu.dimension_semantics<parallel>], iteration_bounds = array<i64: 2>, scalar_prefetch = 0 : i64, scratch_operands = 0 : i64, tpu.core_type = #tpu.core_type<tc>, window_params = [{transform_indices = @transform_0, window_bounds = array<i64: 1, 8, 32>}, {transform_indices = @transform_1, window_bounds = array<i64: 1, 8, 32>}, {transform_indices = @transform_2, window_bounds = array<i64: 1, 8, 32>}, {transform_indices = @transform_3, window_bounds = array<i64: 1, 8, 32>}, {transform_indices = @transform_4, window_bounds = array<i64: 1, 80, 32>}, {transform_indices = @transform_5, window_bounds = array<i64: 1, 80, 1>}, {pipeline_mode = #tpu.pipeline_mode<synchronous>, transform_indices = @transform_6, window_bounds = array<i64: 1, 80>}, {pipeline_mode = #tpu.pipeline_mode<synchronous>, transform_indices = @transform_7, window_bounds = array<i64: 1, 80>}, {pipeline_mode = #tpu.pipeline_mode<synchronous>, transform_indices = @transform_8, window_bounds = array<i64: 32, 64>}, {pipeline_mode = #tpu.pipeline_mode<synchronous>, transform_indices = @transform_9, window_bounds = array<i64: 1, 64>}, {pipeline_mode = #tpu.pipeline_mode<synchronous>, transform_indices = @transform_10, window_bounds = array<i64: 32, 32>}, {pipeline_mode = #tpu.pipeline_mode<synchronous>, transform_indices = @transform_11, window_bounds = array<i64: 1, 32>}, {pipeline_mode = #tpu.pipeline_mode<synchronous>, transform_indices = @transform_12, window_bounds = array<i64: 32, 32>}, {pipeline_mode = #tpu.pipeline_mode<synchronous>, transform_indices = @transform_13, window_bounds = array<i64: 1, 32>}, {pipeline_mode = #tpu.pipeline_mode<synchronous>, transform_indices = @transform_14, window_bounds = array<i64: 1, 32>}, {pipeline_mode = #tpu.pipeline_mode<synchronous>, transform_indices = @transform_15, window_bounds = array<i64: 1, 32>}, {pipeline_mode = #tpu.pipeline_mode<synchronous>, transform_indices = @transform_16, window_bounds = array<i64: 32, 32>}, {pipeline_mode = #tpu.pipeline_mode<synchronous>, transform_indices = @transform_17, window_bounds = array<i64: 1, 32>}, {pipeline_mode = #tpu.pipeline_mode<synchronous>, transform_indices = @transform_18, window_bounds = array<i64: 32, 48>}, {pipeline_mode = #tpu.pipeline_mode<synchronous>, transform_indices = @transform_19, window_bounds = array<i64: 1, 48>}, {pipeline_mode = #tpu.pipeline_mode<synchronous>, transform_indices = @transform_20, window_bounds = array<i64: 32, 32>}, {pipeline_mode = #tpu.pipeline_mode<synchronous>, transform_indices = @transform_21, window_bounds = array<i64: 1, 32>}, {pipeline_mode = #tpu.pipeline_mode<synchronous>, transform_indices = @transform_22, window_bounds = array<i64: 1, 32>}, {pipeline_mode = #tpu.pipeline_mode<synchronous>, transform_indices = @transform_23, window_bounds = array<i64: 1, 32>}, {pipeline_mode = #tpu.pipeline_mode<synchronous>, transform_indices = @transform_24, window_bounds = array<i64: 32, 64>}, {pipeline_mode = #tpu.pipeline_mode<synchronous>, transform_indices = @transform_25, window_bounds = array<i64: 1, 64>}, {pipeline_mode = #tpu.pipeline_mode<synchronous>, transform_indices = @transform_26, window_bounds = array<i64: 64, 32>}, {pipeline_mode = #tpu.pipeline_mode<synchronous>, transform_indices = @transform_27, window_bounds = array<i64: 1, 32>}, {pipeline_mode = #tpu.pipeline_mode<synchronous>, transform_indices = @transform_28, window_bounds = array<i64: 1, 32>}, {pipeline_mode = #tpu.pipeline_mode<synchronous>, transform_indices = @transform_29, window_bounds = array<i64: 1, 32>}, {transform_indices = @transform_30, window_bounds = array<i64: 1, 8, 32>}, {transform_indices = @transform_31, window_bounds = array<i64: 1, 8, 32>}]} {
    %c0 = arith.constant 0 : index
    %c0_0 = arith.constant 0 : index
    %c0_1 = arith.constant 0 : index
    %0 = vector.load %arg1[%c0, %c0_0, %c0_1] : memref<1x8x32xf32, #tpu.memory_space<vmem>>, vector<1x8x32xf32>
    %1 = vector.shape_cast %0 : vector<1x8x32xf32> to vector<8x32xf32>
    %c0_2 = arith.constant 0 : index
    %c0_3 = arith.constant 0 : index
    %c0_4 = arith.constant 0 : index
    %2 = vector.load %arg2[%c0_2, %c0_3, %c0_4] : memref<1x8x32xf32, #tpu.memory_space<vmem>>, vector<1x8x32xf32>
    %3 = vector.shape_cast %2 : vector<1x8x32xf32> to vector<8x32xf32>
    %4 = arith.addf %1, %3 : vector<8x32xf32>
    %5 = arith.truncf %4 : vector<8x32xf32> to vector<8x32xbf16>
    %c0_5 = arith.constant 0 : index
    %c0_6 = arith.constant 0 : index
    %6 = vector.load %arg9[%c0_5, %c0_6] : memref<32x64xbf16, #tpu.memory_space<vmem>>, vector<32x64xbf16>
    %cst = arith.constant dense<0.000000e+00> : vector<8x64xf32>
    %7 = tpu.matmul %5, %6, %cst {dimension_numbers = #tpu.dot_dimension_numbers<[1], [0], [0], [1], [0, 0, 1, 1], [], []>} : vector<8x32xbf16>, vector<32x64xbf16>, vector<8x64xf32> -> vector<8x64xf32>
    %c0_7 = arith.constant 0 : index
    %c0_8 = arith.constant 0 : index
    %8 = vector.load %arg10[%c0_7, %c0_8] : memref<1x64xf32, #tpu.memory_space<vmem>>, vector<1x64xf32>
    %9 = vector.broadcast %8 : vector<1x64xf32> to vector<8x64xf32>
    %10 = arith.addf %7, %9 : vector<8x64xf32>
    %11 = arith.truncf %1 : vector<8x32xf32> to vector<8x32xbf16>
    %c0_9 = arith.constant 0 : index
    %c0_10 = arith.constant 0 : index
    %12 = vector.load %arg11[%c0_9, %c0_10] : memref<32x32xbf16, #tpu.memory_space<vmem>>, vector<32x32xbf16>
    %cst_11 = arith.constant dense<0.000000e+00> : vector<8x32xf32>
    %13 = tpu.matmul %11, %12, %cst_11 {dimension_numbers = #tpu.dot_dimension_numbers<[1], [0], [0], [1], [0, 0, 1, 1], [], []>} : vector<8x32xbf16>, vector<32x32xbf16>, vector<8x32xf32> -> vector<8x32xf32>
    %c0_12 = arith.constant 0 : index
    %c0_13 = arith.constant 0 : index
    %14 = vector.load %arg12[%c0_12, %c0_13] : memref<1x32xf32, #tpu.memory_space<vmem>>, vector<1x32xf32>
    %15 = vector.broadcast %14 : vector<1x32xf32> to vector<8x32xf32>
    %16 = arith.addf %13, %15 : vector<8x32xf32>
    %17 = vector.extract_strided_slice %10 {offsets = [0, 0], sizes = [8, 8], strides = [1, 1]} : vector<8x64xf32> to vector<8x8xf32>
    %18 = arith.truncf %17 : vector<8x8xf32> to vector<8x8xbf16>
    %19 = vector.extract_strided_slice %10 {offsets = [0, 32], sizes = [8, 8], strides = [1, 1]} : vector<8x64xf32> to vector<8x8xf32>
    %20 = arith.truncf %19 : vector<8x8xf32> to vector<8x8xbf16>
    %21 = vector.extract_strided_slice %16 {offsets = [0, 0], sizes = [8, 8], strides = [1, 1]} : vector<8x32xf32> to vector<8x8xf32>
    %22 = arith.truncf %21 : vector<8x8xf32> to vector<8x8xbf16>
    %cst_14 = arith.constant dense<0.000000e+00> : vector<8x8xf32>
    %23 = tpu.matmul %18, %20, %cst_14 {dimension_numbers = #tpu.dot_dimension_numbers<[1], [1], [0], [0], [0, 0, 1, 0], [], []>} : vector<8x8xbf16>, vector<8x8xbf16>, vector<8x8xf32> -> vector<8x8xf32>
    %cst_15 = arith.constant 0.353553385 : f32
    %24 = vector.broadcast %cst_15 : f32 to vector<8x8xf32>
    %25 = arith.mulf %23, %24 : vector<8x8xf32>
    %cst_16 = arith.constant dense<0xFF800000> : vector<8xf32>
    %26 = vector.multi_reduction <maximumf>, %25, %cst_16 [1] : vector<8x8xf32> to vector<8xf32>
    %27 = vector.shape_cast %26 : vector<8xf32> to vector<8x1xf32>
    %28 = vector.broadcast %27 : vector<8x1xf32> to vector<8x8xf32>
    %29 = arith.subf %25, %28 : vector<8x8xf32>
    %30 = math.exp %29 : vector<8x8xf32>
    %cst_17 = arith.constant dense<0.000000e+00> : vector<8xf32>
    %31 = vector.multi_reduction <add>, %30, %cst_17 [1] : vector<8x8xf32> to vector<8xf32>
    %32 = vector.shape_cast %31 : vector<8xf32> to vector<8x1xf32>
    %33 = tpu.reciprocal %32 {approx = true} : vector<8x1xf32> -> vector<8x1xf32>
    %34 = vector.broadcast %33 : vector<8x1xf32> to vector<8x8xf32>
    %35 = arith.mulf %30, %34 : vector<8x8xf32>
    %36 = arith.truncf %35 : vector<8x8xf32> to vector<8x8xbf16>
    %cst_18 = arith.constant dense<0.000000e+00> : vector<8x8xf32>
    %37 = tpu.matmul %36, %22, %cst_18 {dimension_numbers = #tpu.dot_dimension_numbers<[1], [0], [0], [1], [0, 0, 1, 1], [], []>} : vector<8x8xbf16>, vector<8x8xbf16>, vector<8x8xf32> -> vector<8x8xf32>
    %38 = vector.extract_strided_slice %10 {offsets = [0, 8], sizes = [8, 8], strides = [1, 1]} : vector<8x64xf32> to vector<8x8xf32>
    %39 = arith.truncf %38 : vector<8x8xf32> to vector<8x8xbf16>
    %40 = vector.extract_strided_slice %10 {offsets = [0, 40], sizes = [8, 8], strides = [1, 1]} : vector<8x64xf32> to vector<8x8xf32>
    %41 = arith.truncf %40 : vector<8x8xf32> to vector<8x8xbf16>
    %42 = vector.extract_strided_slice %16 {offsets = [0, 8], sizes = [8, 8], strides = [1, 1]} : vector<8x32xf32> to vector<8x8xf32>
    %43 = arith.truncf %42 : vector<8x8xf32> to vector<8x8xbf16>
    %cst_19 = arith.constant dense<0.000000e+00> : vector<8x8xf32>
    %44 = tpu.matmul %39, %41, %cst_19 {dimension_numbers = #tpu.dot_dimension_numbers<[1], [1], [0], [0], [0, 0, 1, 0], [], []>} : vector<8x8xbf16>, vector<8x8xbf16>, vector<8x8xf32> -> vector<8x8xf32>
    %cst_20 = arith.constant 0.353553385 : f32
    %45 = vector.broadcast %cst_20 : f32 to vector<8x8xf32>
    %46 = arith.mulf %44, %45 : vector<8x8xf32>
    %cst_21 = arith.constant dense<0xFF800000> : vector<8xf32>
    %47 = vector.multi_reduction <maximumf>, %46, %cst_21 [1] : vector<8x8xf32> to vector<8xf32>
    %48 = vector.shape_cast %47 : vector<8xf32> to vector<8x1xf32>
    %49 = vector.broadcast %48 : vector<8x1xf32> to vector<8x8xf32>
    %50 = arith.subf %46, %49 : vector<8x8xf32>
    %51 = math.exp %50 : vector<8x8xf32>
    %cst_22 = arith.constant dense<0.000000e+00> : vector<8xf32>
    %52 = vector.multi_reduction <add>, %51, %cst_22 [1] : vector<8x8xf32> to vector<8xf32>
    %53 = vector.shape_cast %52 : vector<8xf32> to vector<8x1xf32>
    %54 = tpu.reciprocal %53 {approx = true} : vector<8x1xf32> -> vector<8x1xf32>
    %55 = vector.broadcast %54 : vector<8x1xf32> to vector<8x8xf32>
    %56 = arith.mulf %51, %55 : vector<8x8xf32>
    %57 = arith.truncf %56 : vector<8x8xf32> to vector<8x8xbf16>
    %cst_23 = arith.constant dense<0.000000e+00> : vector<8x8xf32>
    %58 = tpu.matmul %57, %43, %cst_23 {dimension_numbers = #tpu.dot_dimension_numbers<[1], [0], [0], [1], [0, 0, 1, 1], [], []>} : vector<8x8xbf16>, vector<8x8xbf16>, vector<8x8xf32> -> vector<8x8xf32>
    %59 = vector.extract_strided_slice %10 {offsets = [0, 16], sizes = [8, 8], strides = [1, 1]} : vector<8x64xf32> to vector<8x8xf32>
    %60 = arith.truncf %59 : vector<8x8xf32> to vector<8x8xbf16>
    %61 = vector.extract_strided_slice %10 {offsets = [0, 48], sizes = [8, 8], strides = [1, 1]} : vector<8x64xf32> to vector<8x8xf32>
    %62 = arith.truncf %61 : vector<8x8xf32> to vector<8x8xbf16>
    %63 = vector.extract_strided_slice %16 {offsets = [0, 16], sizes = [8, 8], strides = [1, 1]} : vector<8x32xf32> to vector<8x8xf32>
    %64 = arith.truncf %63 : vector<8x8xf32> to vector<8x8xbf16>
    %cst_24 = arith.constant dense<0.000000e+00> : vector<8x8xf32>
    %65 = tpu.matmul %60, %62, %cst_24 {dimension_numbers = #tpu.dot_dimension_numbers<[1], [1], [0], [0], [0, 0, 1, 0], [], []>} : vector<8x8xbf16>, vector<8x8xbf16>, vector<8x8xf32> -> vector<8x8xf32>
    %cst_25 = arith.constant 0.353553385 : f32
    %66 = vector.broadcast %cst_25 : f32 to vector<8x8xf32>
    %67 = arith.mulf %65, %66 : vector<8x8xf32>
    %cst_26 = arith.constant dense<0xFF800000> : vector<8xf32>
    %68 = vector.multi_reduction <maximumf>, %67, %cst_26 [1] : vector<8x8xf32> to vector<8xf32>
    %69 = vector.shape_cast %68 : vector<8xf32> to vector<8x1xf32>
    %70 = vector.broadcast %69 : vector<8x1xf32> to vector<8x8xf32>
    %71 = arith.subf %67, %70 : vector<8x8xf32>
    %72 = math.exp %71 : vector<8x8xf32>
    %cst_27 = arith.constant dense<0.000000e+00> : vector<8xf32>
    %73 = vector.multi_reduction <add>, %72, %cst_27 [1] : vector<8x8xf32> to vector<8xf32>
    %74 = vector.shape_cast %73 : vector<8xf32> to vector<8x1xf32>
    %75 = tpu.reciprocal %74 {approx = true} : vector<8x1xf32> -> vector<8x1xf32>
    %76 = vector.broadcast %75 : vector<8x1xf32> to vector<8x8xf32>
    %77 = arith.mulf %72, %76 : vector<8x8xf32>
    %78 = arith.truncf %77 : vector<8x8xf32> to vector<8x8xbf16>
    %cst_28 = arith.constant dense<0.000000e+00> : vector<8x8xf32>
    %79 = tpu.matmul %78, %64, %cst_28 {dimension_numbers = #tpu.dot_dimension_numbers<[1], [0], [0], [1], [0, 0, 1, 1], [], []>} : vector<8x8xbf16>, vector<8x8xbf16>, vector<8x8xf32> -> vector<8x8xf32>
    %80 = vector.extract_strided_slice %10 {offsets = [0, 24], sizes = [8, 8], strides = [1, 1]} : vector<8x64xf32> to vector<8x8xf32>
    %81 = arith.truncf %80 : vector<8x8xf32> to vector<8x8xbf16>
    %82 = vector.extract_strided_slice %10 {offsets = [0, 56], sizes = [8, 8], strides = [1, 1]} : vector<8x64xf32> to vector<8x8xf32>
    %83 = arith.truncf %82 : vector<8x8xf32> to vector<8x8xbf16>
    %84 = vector.extract_strided_slice %16 {offsets = [0, 24], sizes = [8, 8], strides = [1, 1]} : vector<8x32xf32> to vector<8x8xf32>
    %85 = arith.truncf %84 : vector<8x8xf32> to vector<8x8xbf16>
    %cst_29 = arith.constant dense<0.000000e+00> : vector<8x8xf32>
    %86 = tpu.matmul %81, %83, %cst_29 {dimension_numbers = #tpu.dot_dimension_numbers<[1], [1], [0], [0], [0, 0, 1, 0], [], []>} : vector<8x8xbf16>, vector<8x8xbf16>, vector<8x8xf32> -> vector<8x8xf32>
    %cst_30 = arith.constant 0.353553385 : f32
    %87 = vector.broadcast %cst_30 : f32 to vector<8x8xf32>
    %88 = arith.mulf %86, %87 : vector<8x8xf32>
    %cst_31 = arith.constant dense<0xFF800000> : vector<8xf32>
    %89 = vector.multi_reduction <maximumf>, %88, %cst_31 [1] : vector<8x8xf32> to vector<8xf32>
    %90 = vector.shape_cast %89 : vector<8xf32> to vector<8x1xf32>
    %91 = vector.broadcast %90 : vector<8x1xf32> to vector<8x8xf32>
    %92 = arith.subf %88, %91 : vector<8x8xf32>
    %93 = math.exp %92 : vector<8x8xf32>
    %cst_32 = arith.constant dense<0.000000e+00> : vector<8xf32>
    %94 = vector.multi_reduction <add>, %93, %cst_32 [1] : vector<8x8xf32> to vector<8xf32>
    %95 = vector.shape_cast %94 : vector<8xf32> to vector<8x1xf32>
    %96 = tpu.reciprocal %95 {approx = true} : vector<8x1xf32> -> vector<8x1xf32>
    %97 = vector.broadcast %96 : vector<8x1xf32> to vector<8x8xf32>
    %98 = arith.mulf %93, %97 : vector<8x8xf32>
    %99 = arith.truncf %98 : vector<8x8xf32> to vector<8x8xbf16>
    %cst_33 = arith.constant dense<0.000000e+00> : vector<8x8xf32>
    %100 = tpu.matmul %99, %85, %cst_33 {dimension_numbers = #tpu.dot_dimension_numbers<[1], [0], [0], [1], [0, 0, 1, 1], [], []>} : vector<8x8xbf16>, vector<8x8xbf16>, vector<8x8xf32> -> vector<8x8xf32>
    %101 = tpu.concatenate %37, %58, %79, %100 in 1 : vector<8x8xf32>, vector<8x8xf32>, vector<8x8xf32>, vector<8x8xf32> -> vector<8x32xf32>
    %102 = arith.truncf %101 : vector<8x32xf32> to vector<8x32xbf16>
    %c0_34 = arith.constant 0 : index
    %c0_35 = arith.constant 0 : index
    %103 = vector.load %arg13[%c0_34, %c0_35] : memref<32x32xbf16, #tpu.memory_space<vmem>>, vector<32x32xbf16>
    %cst_36 = arith.constant dense<0.000000e+00> : vector<8x32xf32>
    %104 = tpu.matmul %102, %103, %cst_36 {dimension_numbers = #tpu.dot_dimension_numbers<[1], [0], [0], [1], [0, 0, 1, 1], [], []>} : vector<8x32xbf16>, vector<32x32xbf16>, vector<8x32xf32> -> vector<8x32xf32>
    %c0_37 = arith.constant 0 : index
    %c0_38 = arith.constant 0 : index
    %105 = vector.load %arg14[%c0_37, %c0_38] : memref<1x32xf32, #tpu.memory_space<vmem>>, vector<1x32xf32>
    %106 = vector.broadcast %105 : vector<1x32xf32> to vector<8x32xf32>
    %107 = arith.addf %104, %106 : vector<8x32xf32>
    %108 = arith.addf %1, %107 : vector<8x32xf32>
    %cst_39 = arith.constant dense<0.000000e+00> : vector<8xf32>
    %109 = vector.multi_reduction <add>, %108, %cst_39 [1] : vector<8x32xf32> to vector<8xf32>
    %110 = vector.shape_cast %109 : vector<8xf32> to vector<8x1xf32>
    %cst_40 = arith.constant 3.200000e+01 : f32
    %111 = vector.broadcast %cst_40 : f32 to vector<8x1xf32>
    %112 = arith.divf %110, %111 : vector<8x1xf32>
    %113 = vector.broadcast %112 : vector<8x1xf32> to vector<8x32xf32>
    %114 = arith.subf %108, %113 : vector<8x32xf32>
    %115 = arith.mulf %114, %114 : vector<8x32xf32>
    %cst_41 = arith.constant dense<0.000000e+00> : vector<8xf32>
    %116 = vector.multi_reduction <add>, %115, %cst_41 [1] : vector<8x32xf32> to vector<8xf32>
    %117 = vector.shape_cast %116 : vector<8xf32> to vector<8x1xf32>
    %cst_42 = arith.constant 3.200000e+01 : f32
    %118 = vector.broadcast %cst_42 : f32 to vector<8x1xf32>
    %119 = arith.divf %117, %118 : vector<8x1xf32>
    %120 = vector.broadcast %112 : vector<8x1xf32> to vector<8x32xf32>
    %121 = arith.subf %108, %120 : vector<8x32xf32>
    %cst_43 = arith.constant 9.99999974E-6 : f32
    %122 = vector.broadcast %cst_43 : f32 to vector<8x1xf32>
    %123 = arith.addf %119, %122 : vector<8x1xf32>
    %124 = math.rsqrt %123 : vector<8x1xf32>
    %125 = vector.broadcast %124 : vector<8x1xf32> to vector<8x32xf32>
    %126 = arith.mulf %121, %125 : vector<8x32xf32>
    %c0_44 = arith.constant 0 : index
    %c0_45 = arith.constant 0 : index
    %127 = vector.load %arg15[%c0_44, %c0_45] : memref<1x32xf32, #tpu.memory_space<vmem>>, vector<1x32xf32>
    %128 = vector.broadcast %127 : vector<1x32xf32> to vector<8x32xf32>
    %129 = arith.mulf %126, %128 : vector<8x32xf32>
    %c0_46 = arith.constant 0 : index
    %c0_47 = arith.constant 0 : index
    %130 = vector.load %arg16[%c0_46, %c0_47] : memref<1x32xf32, #tpu.memory_space<vmem>>, vector<1x32xf32>
    %131 = vector.broadcast %130 : vector<1x32xf32> to vector<8x32xf32>
    %132 = arith.addf %129, %131 : vector<8x32xf32>
    %133 = arith.addf %132, %3 : vector<8x32xf32>
    %c0_48 = arith.constant 0 : index
    %c0_49 = arith.constant 0 : index
    %c0_50 = arith.constant 0 : index
    %134 = vector.load %arg5[%c0_48, %c0_49, %c0_50] : memref<1x80x32xbf16, #tpu.memory_space<vmem>>, vector<1x80x32xbf16>
    %135 = vector.shape_cast %134 : vector<1x80x32xbf16> to vector<80x32xbf16>
    %c0_51 = arith.constant 0 : index
    %c0_52 = arith.constant 0 : index
    %136 = vector.load %arg17[%c0_51, %c0_52] : memref<32x32xbf16, #tpu.memory_space<vmem>>, vector<32x32xbf16>
    %cst_53 = arith.constant dense<0.000000e+00> : vector<80x32xf32>
    %137 = tpu.matmul %135, %136, %cst_53 {dimension_numbers = #tpu.dot_dimension_numbers<[1], [0], [0], [1], [0, 0, 1, 1], [], []>} : vector<80x32xbf16>, vector<32x32xbf16>, vector<80x32xf32> -> vector<80x32xf32>
    %c0_54 = arith.constant 0 : index
    %c0_55 = arith.constant 0 : index
    %138 = vector.load %arg18[%c0_54, %c0_55] : memref<1x32xf32, #tpu.memory_space<vmem>>, vector<1x32xf32>
    %139 = vector.broadcast %138 : vector<1x32xf32> to vector<80x32xf32>
    %140 = arith.addf %137, %139 : vector<80x32xf32>
    %c0_56 = arith.constant 0 : index
    %c0_57 = arith.constant 0 : index
    %c0_58 = arith.constant 0 : index
    %141 = vector.load %arg6[%c0_56, %c0_57, %c0_58] : memref<1x80x1xf32, #tpu.memory_space<vmem>>, vector<1x80x1xf32>
    %142 = vector.shape_cast %141 : vector<1x80x1xf32> to vector<80x1xf32>
    %143 = vector.broadcast %142 : vector<80x1xf32> to vector<80x32xf32>
    %144 = arith.mulf %140, %143 : vector<80x32xf32>
    %145 = arith.truncf %144 : vector<80x32xf32> to vector<80x32xbf16>
    %146 = arith.truncf %133 : vector<8x32xf32> to vector<8x32xbf16>
    %c0_59 = arith.constant 0 : index
    %c0_60 = arith.constant 0 : index
    %147 = vector.load %arg19[%c0_59, %c0_60] : memref<32x48xbf16, #tpu.memory_space<vmem>>, vector<32x48xbf16>
    %cst_61 = arith.constant dense<0.000000e+00> : vector<8x48xf32>
    %148 = tpu.matmul %146, %147, %cst_61 {dimension_numbers = #tpu.dot_dimension_numbers<[1], [0], [0], [1], [0, 0, 1, 1], [], []>} : vector<8x32xbf16>, vector<32x48xbf16>, vector<8x48xf32> -> vector<8x48xf32>
    %c0_62 = arith.constant 0 : index
    %c0_63 = arith.constant 0 : index
    %149 = vector.load %arg20[%c0_62, %c0_63] : memref<1x48xf32, #tpu.memory_space<vmem>>, vector<1x48xf32>
    %150 = vector.broadcast %149 : vector<1x48xf32> to vector<8x48xf32>
    %151 = arith.addf %148, %150 : vector<8x48xf32>
    %c0_64 = arith.constant 0 : index
    %c0_65 = arith.constant 0 : index
    %c0_66 = arith.constant 0 : index
    %152 = vector.load %arg3[%c0_64, %c0_65, %c0_66] : memref<1x8x32xf32, #tpu.memory_space<vmem>>, vector<1x8x32xf32>
    %153 = vector.shape_cast %152 : vector<1x8x32xf32> to vector<8x32xf32>
    %154 = vector.extract_strided_slice %151 {offsets = [0, 0], sizes = [8, 32], strides = [1, 1]} : vector<8x48xf32> to vector<8x32xf32>
    %c0_67 = arith.constant 0 : index
    %c0_68 = arith.constant 0 : index
    %c0_69 = arith.constant 0 : index
    %155 = vector.load %arg4[%c0_67, %c0_68, %c0_69] : memref<1x8x32xf32, #tpu.memory_space<vmem>>, vector<1x8x32xf32>
    %156 = vector.shape_cast %155 : vector<1x8x32xf32> to vector<8x32xf32>
    %157 = arith.mulf %154, %156 : vector<8x32xf32>
    %158 = arith.addf %153, %157 : vector<8x32xf32>
    %c0_70 = arith.constant 0 : index
    %c0_71 = arith.constant 0 : index
    %c0_72 = arith.constant 0 : index
    %159 = vector.load %arg32[%c0_70, %c0_71, %c0_72] : memref<1x8x32xf32, #tpu.memory_space<vmem>>, vector<1x8x32xf32>
    %160 = vector.shape_cast %159 : vector<1x8x32xf32> to vector<8x32xf32>
    %161 = vector.shape_cast %158 : vector<8x32xf32> to vector<1x8x32xf32>
    tpu.vector_store %arg32[%c0_70, %c0_71, %c0_72], %161 {strides = array<i32>} : memref<1x8x32xf32, #tpu.memory_space<vmem>>, vector<1x8x32xf32>,
    %162 = vector.extract_strided_slice %151 {offsets = [0, 32], sizes = [8, 16], strides = [1, 1]} : vector<8x48xf32> to vector<8x16xf32>
    %163 = vector.extract_strided_slice %158 {offsets = [0, 0], sizes = [8, 16], strides = [1, 1]} : vector<8x32xf32> to vector<8x16xf32>
    %164 = vector.extract_strided_slice %158 {offsets = [0, 16], sizes = [8, 16], strides = [1, 1]} : vector<8x32xf32> to vector<8x16xf32>
    %165 = math.floor %163 : vector<8x16xf32>
    %166 = math.floor %164 : vector<8x16xf32>
    %167 = arith.subf %163, %165 : vector<8x16xf32>
    %168 = arith.subf %164, %166 : vector<8x16xf32>
    %169 = vector.extract_strided_slice %162 {offsets = [0, 0], sizes = [8, 4], strides = [1, 1]} : vector<8x16xf32> to vector<8x4xf32>
    %cst_73 = arith.constant dense<0xFF800000> : vector<8xf32>
    %170 = vector.multi_reduction <maximumf>, %169, %cst_73 [1] : vector<8x4xf32> to vector<8xf32>
    %171 = vector.shape_cast %170 : vector<8xf32> to vector<8x1xf32>
    %172 = vector.broadcast %171 : vector<8x1xf32> to vector<8x4xf32>
    %173 = arith.subf %169, %172 : vector<8x4xf32>
    %174 = math.exp %173 : vector<8x4xf32>
    %cst_74 = arith.constant dense<0.000000e+00> : vector<8xf32>
    %175 = vector.multi_reduction <add>, %174, %cst_74 [1] : vector<8x4xf32> to vector<8xf32>
    %176 = vector.shape_cast %175 : vector<8xf32> to vector<8x1xf32>
    %177 = tpu.reciprocal %176 {approx = true} : vector<8x1xf32> -> vector<8x1xf32>
    %178 = vector.broadcast %177 : vector<8x1xf32> to vector<8x4xf32>
    %179 = arith.mulf %174, %178 : vector<8x4xf32>
    %180 = vector.extract_strided_slice %162 {offsets = [0, 4], sizes = [8, 4], strides = [1, 1]} : vector<8x16xf32> to vector<8x4xf32>
    %cst_75 = arith.constant dense<0xFF800000> : vector<8xf32>
    %181 = vector.multi_reduction <maximumf>, %180, %cst_75 [1] : vector<8x4xf32> to vector<8xf32>
    %182 = vector.shape_cast %181 : vector<8xf32> to vector<8x1xf32>
    %183 = vector.broadcast %182 : vector<8x1xf32> to vector<8x4xf32>
    %184 = arith.subf %180, %183 : vector<8x4xf32>
    %185 = math.exp %184 : vector<8x4xf32>
    %cst_76 = arith.constant dense<0.000000e+00> : vector<8xf32>
    %186 = vector.multi_reduction <add>, %185, %cst_76 [1] : vector<8x4xf32> to vector<8xf32>
    %187 = vector.shape_cast %186 : vector<8xf32> to vector<8x1xf32>
    %188 = tpu.reciprocal %187 {approx = true} : vector<8x1xf32> -> vector<8x1xf32>
    %189 = vector.broadcast %188 : vector<8x1xf32> to vector<8x4xf32>
    %190 = arith.mulf %185, %189 : vector<8x4xf32>
    %191 = vector.extract_strided_slice %162 {offsets = [0, 8], sizes = [8, 4], strides = [1, 1]} : vector<8x16xf32> to vector<8x4xf32>
    %cst_77 = arith.constant dense<0xFF800000> : vector<8xf32>
    %192 = vector.multi_reduction <maximumf>, %191, %cst_77 [1] : vector<8x4xf32> to vector<8xf32>
    %193 = vector.shape_cast %192 : vector<8xf32> to vector<8x1xf32>
    %194 = vector.broadcast %193 : vector<8x1xf32> to vector<8x4xf32>
    %195 = arith.subf %191, %194 : vector<8x4xf32>
    %196 = math.exp %195 : vector<8x4xf32>
    %cst_78 = arith.constant dense<0.000000e+00> : vector<8xf32>
    %197 = vector.multi_reduction <add>, %196, %cst_78 [1] : vector<8x4xf32> to vector<8xf32>
    %198 = vector.shape_cast %197 : vector<8xf32> to vector<8x1xf32>
    %199 = tpu.reciprocal %198 {approx = true} : vector<8x1xf32> -> vector<8x1xf32>
    %200 = vector.broadcast %199 : vector<8x1xf32> to vector<8x4xf32>
    %201 = arith.mulf %196, %200 : vector<8x4xf32>
    %202 = vector.extract_strided_slice %162 {offsets = [0, 12], sizes = [8, 4], strides = [1, 1]} : vector<8x16xf32> to vector<8x4xf32>
    %cst_79 = arith.constant dense<0xFF800000> : vector<8xf32>
    %203 = vector.multi_reduction <maximumf>, %202, %cst_79 [1] : vector<8x4xf32> to vector<8xf32>
    %204 = vector.shape_cast %203 : vector<8xf32> to vector<8x1xf32>
    %205 = vector.broadcast %204 : vector<8x1xf32> to vector<8x4xf32>
    %206 = arith.subf %202, %205 : vector<8x4xf32>
    %207 = math.exp %206 : vector<8x4xf32>
    %cst_80 = arith.constant dense<0.000000e+00> : vector<8xf32>
    %208 = vector.multi_reduction <add>, %207, %cst_80 [1] : vector<8x4xf32> to vector<8xf32>
    %209 = vector.shape_cast %208 : vector<8xf32> to vector<8x1xf32>
    %210 = tpu.reciprocal %209 {approx = true} : vector<8x1xf32> -> vector<8x1xf32>
    %211 = vector.broadcast %210 : vector<8x1xf32> to vector<8x4xf32>
    %212 = arith.mulf %207, %211 : vector<8x4xf32>
    %213 = tpu.concatenate %179, %190, %201, %212 in 1 : vector<8x4xf32>, vector<8x4xf32>, vector<8x4xf32>, vector<8x4xf32> -> vector<8x16xf32>
    %cst_81 = arith.constant 1.000000e+00 : f32
    %214 = vector.broadcast %cst_81 : f32 to vector<8x16xf32>
    %215 = arith.subf %214, %168 : vector<8x16xf32>
    %216 = arith.mulf %215, %213 : vector<8x16xf32>
    %217 = arith.mulf %168, %213 : vector<8x16xf32>
    %c0_82 = arith.constant 0 : index
    %c0_83 = arith.constant 0 : index
    %218 = vector.load %arg7[%c0_82, %c0_83] : memref<1x80xf32, #tpu.memory_space<vmem>>, vector<1x80xf32>
    %c0_84 = arith.constant 0 : index
    %c0_85 = arith.constant 0 : index
    %219 = vector.load %arg8[%c0_84, %c0_85] : memref<1x80xf32, #tpu.memory_space<vmem>>, vector<1x80xf32>
    %cst_86 = arith.constant 0.000000e+00 : f32
    %220 = vector.broadcast %cst_86 : f32 to vector<8x8xf32>
    %cst_87 = arith.constant 0.000000e+00 : f32
    %221 = vector.broadcast %cst_87 : f32 to vector<8x8xf32>
    %cst_88 = arith.constant 0.000000e+00 : f32
    %222 = vector.broadcast %cst_88 : f32 to vector<8x8xf32>
    %cst_89 = arith.constant 0.000000e+00 : f32
    %223 = vector.broadcast %cst_89 : f32 to vector<8x8xf32>
    %224 = vector.extract_strided_slice %218 {offsets = [0, 0], sizes = [1, 64], strides = [1, 1]} : vector<1x80xf32> to vector<1x64xf32>
    %225 = vector.extract_strided_slice %219 {offsets = [0, 0], sizes = [1, 64], strides = [1, 1]} : vector<1x80xf32> to vector<1x64xf32>
    %cst_90 = arith.constant 0.000000e+00 : f32
    %226 = vector.broadcast %cst_90 : f32 to vector<8x64xf32>
    %227 = vector.extract_strided_slice %165 {offsets = [0, 0], sizes = [8, 1], strides = [1, 1]} : vector<8x16xf32> to vector<8x1xf32>
    %228 = vector.extract_strided_slice %166 {offsets = [0, 0], sizes = [8, 1], strides = [1, 1]} : vector<8x16xf32> to vector<8x1xf32>
    %229 = vector.extract_strided_slice %167 {offsets = [0, 0], sizes = [8, 1], strides = [1, 1]} : vector<8x16xf32> to vector<8x1xf32>
    %230 = vector.broadcast %224 : vector<1x64xf32> to vector<8x64xf32>
    %231 = vector.broadcast %227 : vector<8x1xf32> to vector<8x64xf32>
    %232 = arith.cmpf oge, %230, %231 : vector<8x64xf32>
    %cst_91 = arith.constant 1.000000e+00 : f32
    %233 = vector.broadcast %cst_91 : f32 to vector<8x1xf32>
    %234 = arith.addf %227, %233 : vector<8x1xf32>
    %235 = vector.broadcast %224 : vector<1x64xf32> to vector<8x64xf32>
    %236 = vector.broadcast %234 : vector<8x1xf32> to vector<8x64xf32>
    %237 = arith.cmpf ole, %235, %236 : vector<8x64xf32>
    %238 = arith.andi %232, %237 : vector<8x64xi1>
    %239 = vector.broadcast %224 : vector<1x64xf32> to vector<8x64xf32>
    %240 = vector.broadcast %227 : vector<8x1xf32> to vector<8x64xf32>
    %241 = arith.cmpf oeq, %239, %240 : vector<8x64xf32>
    %cst_92 = arith.constant 1.000000e+00 : f32
    %242 = vector.broadcast %cst_92 : f32 to vector<8x1xf32>
    %243 = arith.subf %242, %229 : vector<8x1xf32>
    %244 = vector.shape_cast %243 : vector<8x1xf32> to vector<8x1xf32>
    %245 = vector.broadcast %244 : vector<8x1xf32> to vector<8x64xf32>
    %246 = vector.shape_cast %229 : vector<8x1xf32> to vector<8x1xf32>
    %247 = vector.broadcast %246 : vector<8x1xf32> to vector<8x64xf32>
    %248 = arith.select %241, %245, %247 : vector<8x64xi1>, vector<8x64xf32>
    %249 = vector.broadcast %225 : vector<1x64xf32> to vector<8x64xf32>
    %250 = vector.broadcast %228 : vector<8x1xf32> to vector<8x64xf32>
    %251 = arith.cmpf oeq, %249, %250 : vector<8x64xf32>
    %252 = vector.extract_strided_slice %216 {offsets = [0, 0], sizes = [8, 1], strides = [1, 1]} : vector<8x16xf32> to vector<8x1xf32>
    %cst_93 = arith.constant 1.000000e+00 : f32
    %253 = vector.broadcast %cst_93 : f32 to vector<8x1xf32>
    %254 = arith.addf %228, %253 : vector<8x1xf32>
    %255 = vector.broadcast %225 : vector<1x64xf32> to vector<8x64xf32>
    %256 = vector.broadcast %254 : vector<8x1xf32> to vector<8x64xf32>
    %257 = arith.cmpf oeq, %255, %256 : vector<8x64xf32>
    %258 = vector.extract_strided_slice %217 {offsets = [0, 0], sizes = [8, 1], strides = [1, 1]} : vector<8x16xf32> to vector<8x1xf32>
    %cst_94 = arith.constant 0.000000e+00 : f32
    %259 = vector.shape_cast %258 : vector<8x1xf32> to vector<8x1xf32>
    %260 = vector.broadcast %259 : vector<8x1xf32> to vector<8x64xf32>
    %261 = vector.broadcast %cst_94 : f32 to vector<8x64xf32>
    %262 = arith.select %257, %260, %261 : vector<8x64xi1>, vector<8x64xf32>
    %263 = vector.shape_cast %252 : vector<8x1xf32> to vector<8x1xf32>
    %264 = vector.broadcast %263 : vector<8x1xf32> to vector<8x64xf32>
    %265 = arith.select %251, %264, %262 : vector<8x64xi1>, vector<8x64xf32>
    %266 = arith.mulf %248, %265 : vector<8x64xf32>
    %cst_95 = arith.constant 0.000000e+00 : f32
    %267 = vector.broadcast %cst_95 : f32 to vector<8x64xf32>
    %268 = arith.select %238, %266, %267 : vector<8x64xi1>, vector<8x64xf32>
    %269 = arith.addf %226, %268 : vector<8x64xf32>
    %270 = vector.extract_strided_slice %165 {offsets = [0, 1], sizes = [8, 1], strides = [1, 1]} : vector<8x16xf32> to vector<8x1xf32>
    %271 = vector.extract_strided_slice %166 {offsets = [0, 1], sizes = [8, 1], strides = [1, 1]} : vector<8x16xf32> to vector<8x1xf32>
    %272 = vector.extract_strided_slice %167 {offsets = [0, 1], sizes = [8, 1], strides = [1, 1]} : vector<8x16xf32> to vector<8x1xf32>
    %273 = vector.broadcast %224 : vector<1x64xf32> to vector<8x64xf32>
    %274 = vector.broadcast %270 : vector<8x1xf32> to vector<8x64xf32>
    %275 = arith.cmpf oge, %273, %274 : vector<8x64xf32>
    %cst_96 = arith.constant 1.000000e+00 : f32
    %276 = vector.broadcast %cst_96 : f32 to vector<8x1xf32>
    %277 = arith.addf %270, %276 : vector<8x1xf32>
    %278 = vector.broadcast %224 : vector<1x64xf32> to vector<8x64xf32>
    %279 = vector.broadcast %277 : vector<8x1xf32> to vector<8x64xf32>
    %280 = arith.cmpf ole, %278, %279 : vector<8x64xf32>
    %281 = arith.andi %275, %280 : vector<8x64xi1>
    %282 = vector.broadcast %224 : vector<1x64xf32> to vector<8x64xf32>
    %283 = vector.broadcast %270 : vector<8x1xf32> to vector<8x64xf32>
    %284 = arith.cmpf oeq, %282, %283 : vector<8x64xf32>
    %cst_97 = arith.constant 1.000000e+00 : f32
    %285 = vector.broadcast %cst_97 : f32 to vector<8x1xf32>
    %286 = arith.subf %285, %272 : vector<8x1xf32>
    %287 = vector.shape_cast %286 : vector<8x1xf32> to vector<8x1xf32>
    %288 = vector.broadcast %287 : vector<8x1xf32> to vector<8x64xf32>
    %289 = vector.shape_cast %272 : vector<8x1xf32> to vector<8x1xf32>
    %290 = vector.broadcast %289 : vector<8x1xf32> to vector<8x64xf32>
    %291 = arith.select %284, %288, %290 : vector<8x64xi1>, vector<8x64xf32>
    %292 = vector.broadcast %225 : vector<1x64xf32> to vector<8x64xf32>
    %293 = vector.broadcast %271 : vector<8x1xf32> to vector<8x64xf32>
    %294 = arith.cmpf oeq, %292, %293 : vector<8x64xf32>
    %295 = vector.extract_strided_slice %216 {offsets = [0, 1], sizes = [8, 1], strides = [1, 1]} : vector<8x16xf32> to vector<8x1xf32>
    %cst_98 = arith.constant 1.000000e+00 : f32
    %296 = vector.broadcast %cst_98 : f32 to vector<8x1xf32>
    %297 = arith.addf %271, %296 : vector<8x1xf32>
    %298 = vector.broadcast %225 : vector<1x64xf32> to vector<8x64xf32>
    %299 = vector.broadcast %297 : vector<8x1xf32> to vector<8x64xf32>
    %300 = arith.cmpf oeq, %298, %299 : vector<8x64xf32>
    %301 = vector.extract_strided_slice %217 {offsets = [0, 1], sizes = [8, 1], strides = [1, 1]} : vector<8x16xf32> to vector<8x1xf32>
    %cst_99 = arith.constant 0.000000e+00 : f32
    %302 = vector.shape_cast %301 : vector<8x1xf32> to vector<8x1xf32>
    %303 = vector.broadcast %302 : vector<8x1xf32> to vector<8x64xf32>
    %304 = vector.broadcast %cst_99 : f32 to vector<8x64xf32>
    %305 = arith.select %300, %303, %304 : vector<8x64xi1>, vector<8x64xf32>
    %306 = vector.shape_cast %295 : vector<8x1xf32> to vector<8x1xf32>
    %307 = vector.broadcast %306 : vector<8x1xf32> to vector<8x64xf32>
    %308 = arith.select %294, %307, %305 : vector<8x64xi1>, vector<8x64xf32>
    %309 = arith.mulf %291, %308 : vector<8x64xf32>
    %cst_100 = arith.constant 0.000000e+00 : f32
    %310 = vector.broadcast %cst_100 : f32 to vector<8x64xf32>
    %311 = arith.select %281, %309, %310 : vector<8x64xi1>, vector<8x64xf32>
    %312 = arith.addf %269, %311 : vector<8x64xf32>
    %313 = vector.extract_strided_slice %145 {offsets = [0, 0], sizes = [64, 8], strides = [1, 1]} : vector<80x32xbf16> to vector<64x8xbf16>
    %314 = arith.truncf %312 : vector<8x64xf32> to vector<8x64xbf16>
    %cst_101 = arith.constant dense<0.000000e+00> : vector<8x8xf32>
    %315 = tpu.matmul %314, %313, %cst_101 {dimension_numbers = #tpu.dot_dimension_numbers<[1], [0], [0], [1], [0, 0, 1, 1], [], []>} : vector<8x64xbf16>, vector<64x8xbf16>, vector<8x8xf32> -> vector<8x8xf32>
    %316 = arith.addf %220, %315 : vector<8x8xf32>
    %cst_102 = arith.constant 0.000000e+00 : f32
    %317 = vector.broadcast %cst_102 : f32 to vector<8x64xf32>
    %318 = vector.extract_strided_slice %165 {offsets = [0, 4], sizes = [8, 1], strides = [1, 1]} : vector<8x16xf32> to vector<8x1xf32>
    %319 = vector.extract_strided_slice %166 {offsets = [0, 4], sizes = [8, 1], strides = [1, 1]} : vector<8x16xf32> to vector<8x1xf32>
    %320 = vector.extract_strided_slice %167 {offsets = [0, 4], sizes = [8, 1], strides = [1, 1]} : vector<8x16xf32> to vector<8x1xf32>
    %321 = vector.broadcast %224 : vector<1x64xf32> to vector<8x64xf32>
    %322 = vector.broadcast %318 : vector<8x1xf32> to vector<8x64xf32>
    %323 = arith.cmpf oge, %321, %322 : vector<8x64xf32>
    %cst_103 = arith.constant 1.000000e+00 : f32
    %324 = vector.broadcast %cst_103 : f32 to vector<8x1xf32>
    %325 = arith.addf %318, %324 : vector<8x1xf32>
    %326 = vector.broadcast %224 : vector<1x64xf32> to vector<8x64xf32>
    %327 = vector.broadcast %325 : vector<8x1xf32> to vector<8x64xf32>
    %328 = arith.cmpf ole, %326, %327 : vector<8x64xf32>
    %329 = arith.andi %323, %328 : vector<8x64xi1>
    %330 = vector.broadcast %224 : vector<1x64xf32> to vector<8x64xf32>
    %331 = vector.broadcast %318 : vector<8x1xf32> to vector<8x64xf32>
    %332 = arith.cmpf oeq, %330, %331 : vector<8x64xf32>
    %cst_104 = arith.constant 1.000000e+00 : f32
    %333 = vector.broadcast %cst_104 : f32 to vector<8x1xf32>
    %334 = arith.subf %333, %320 : vector<8x1xf32>
    %335 = vector.shape_cast %334 : vector<8x1xf32> to vector<8x1xf32>
    %336 = vector.broadcast %335 : vector<8x1xf32> to vector<8x64xf32>
    %337 = vector.shape_cast %320 : vector<8x1xf32> to vector<8x1xf32>
    %338 = vector.broadcast %337 : vector<8x1xf32> to vector<8x64xf32>
    %339 = arith.select %332, %336, %338 : vector<8x64xi1>, vector<8x64xf32>
    %340 = vector.broadcast %225 : vector<1x64xf32> to vector<8x64xf32>
    %341 = vector.broadcast %319 : vector<8x1xf32> to vector<8x64xf32>
    %342 = arith.cmpf oeq, %340, %341 : vector<8x64xf32>
    %343 = vector.extract_strided_slice %216 {offsets = [0, 4], sizes = [8, 1], strides = [1, 1]} : vector<8x16xf32> to vector<8x1xf32>
    %cst_105 = arith.constant 1.000000e+00 : f32
    %344 = vector.broadcast %cst_105 : f32 to vector<8x1xf32>
    %345 = arith.addf %319, %344 : vector<8x1xf32>
    %346 = vector.broadcast %225 : vector<1x64xf32> to vector<8x64xf32>
    %347 = vector.broadcast %345 : vector<8x1xf32> to vector<8x64xf32>
    %348 = arith.cmpf oeq, %346, %347 : vector<8x64xf32>
    %349 = vector.extract_strided_slice %217 {offsets = [0, 4], sizes = [8, 1], strides = [1, 1]} : vector<8x16xf32> to vector<8x1xf32>
    %cst_106 = arith.constant 0.000000e+00 : f32
    %350 = vector.shape_cast %349 : vector<8x1xf32> to vector<8x1xf32>
    %351 = vector.broadcast %350 : vector<8x1xf32> to vector<8x64xf32>
    %352 = vector.broadcast %cst_106 : f32 to vector<8x64xf32>
    %353 = arith.select %348, %351, %352 : vector<8x64xi1>, vector<8x64xf32>
    %354 = vector.shape_cast %343 : vector<8x1xf32> to vector<8x1xf32>
    %355 = vector.broadcast %354 : vector<8x1xf32> to vector<8x64xf32>
    %356 = arith.select %342, %355, %353 : vector<8x64xi1>, vector<8x64xf32>
    %357 = arith.mulf %339, %356 : vector<8x64xf32>
    %cst_107 = arith.constant 0.000000e+00 : f32
    %358 = vector.broadcast %cst_107 : f32 to vector<8x64xf32>
    %359 = arith.select %329, %357, %358 : vector<8x64xi1>, vector<8x64xf32>
    %360 = arith.addf %317, %359 : vector<8x64xf32>
    %361 = vector.extract_strided_slice %165 {offsets = [0, 5], sizes = [8, 1], strides = [1, 1]} : vector<8x16xf32> to vector<8x1xf32>
    %362 = vector.extract_strided_slice %166 {offsets = [0, 5], sizes = [8, 1], strides = [1, 1]} : vector<8x16xf32> to vector<8x1xf32>
    %363 = vector.extract_strided_slice %167 {offsets = [0, 5], sizes = [8, 1], strides = [1, 1]} : vector<8x16xf32> to vector<8x1xf32>
    %364 = vector.broadcast %224 : vector<1x64xf32> to vector<8x64xf32>
    %365 = vector.broadcast %361 : vector<8x1xf32> to vector<8x64xf32>
    %366 = arith.cmpf oge, %364, %365 : vector<8x64xf32>
    %cst_108 = arith.constant 1.000000e+00 : f32
    %367 = vector.broadcast %cst_108 : f32 to vector<8x1xf32>
    %368 = arith.addf %361, %367 : vector<8x1xf32>
    %369 = vector.broadcast %224 : vector<1x64xf32> to vector<8x64xf32>
    %370 = vector.broadcast %368 : vector<8x1xf32> to vector<8x64xf32>
    %371 = arith.cmpf ole, %369, %370 : vector<8x64xf32>
    %372 = arith.andi %366, %371 : vector<8x64xi1>
    %373 = vector.broadcast %224 : vector<1x64xf32> to vector<8x64xf32>
    %374 = vector.broadcast %361 : vector<8x1xf32> to vector<8x64xf32>
    %375 = arith.cmpf oeq, %373, %374 : vector<8x64xf32>
    %cst_109 = arith.constant 1.000000e+00 : f32
    %376 = vector.broadcast %cst_109 : f32 to vector<8x1xf32>
    %377 = arith.subf %376, %363 : vector<8x1xf32>
    %378 = vector.shape_cast %377 : vector<8x1xf32> to vector<8x1xf32>
    %379 = vector.broadcast %378 : vector<8x1xf32> to vector<8x64xf32>
    %380 = vector.shape_cast %363 : vector<8x1xf32> to vector<8x1xf32>
    %381 = vector.broadcast %380 : vector<8x1xf32> to vector<8x64xf32>
    %382 = arith.select %375, %379, %381 : vector<8x64xi1>, vector<8x64xf32>
    %383 = vector.broadcast %225 : vector<1x64xf32> to vector<8x64xf32>
    %384 = vector.broadcast %362 : vector<8x1xf32> to vector<8x64xf32>
    %385 = arith.cmpf oeq, %383, %384 : vector<8x64xf32>
    %386 = vector.extract_strided_slice %216 {offsets = [0, 5], sizes = [8, 1], strides = [1, 1]} : vector<8x16xf32> to vector<8x1xf32>
    %cst_110 = arith.constant 1.000000e+00 : f32
    %387 = vector.broadcast %cst_110 : f32 to vector<8x1xf32>
    %388 = arith.addf %362, %387 : vector<8x1xf32>
    %389 = vector.broadcast %225 : vector<1x64xf32> to vector<8x64xf32>
    %390 = vector.broadcast %388 : vector<8x1xf32> to vector<8x64xf32>
    %391 = arith.cmpf oeq, %389, %390 : vector<8x64xf32>
    %392 = vector.extract_strided_slice %217 {offsets = [0, 5], sizes = [8, 1], strides = [1, 1]} : vector<8x16xf32> to vector<8x1xf32>
    %cst_111 = arith.constant 0.000000e+00 : f32
    %393 = vector.shape_cast %392 : vector<8x1xf32> to vector<8x1xf32>
    %394 = vector.broadcast %393 : vector<8x1xf32> to vector<8x64xf32>
    %395 = vector.broadcast %cst_111 : f32 to vector<8x64xf32>
    %396 = arith.select %391, %394, %395 : vector<8x64xi1>, vector<8x64xf32>
    %397 = vector.shape_cast %386 : vector<8x1xf32> to vector<8x1xf32>
    %398 = vector.broadcast %397 : vector<8x1xf32> to vector<8x64xf32>
    %399 = arith.select %385, %398, %396 : vector<8x64xi1>, vector<8x64xf32>
    %400 = arith.mulf %382, %399 : vector<8x64xf32>
    %cst_112 = arith.constant 0.000000e+00 : f32
    %401 = vector.broadcast %cst_112 : f32 to vector<8x64xf32>
    %402 = arith.select %372, %400, %401 : vector<8x64xi1>, vector<8x64xf32>
    %403 = arith.addf %360, %402 : vector<8x64xf32>
    %404 = vector.extract_strided_slice %145 {offsets = [0, 8], sizes = [64, 8], strides = [1, 1]} : vector<80x32xbf16> to vector<64x8xbf16>
    %405 = arith.truncf %403 : vector<8x64xf32> to vector<8x64xbf16>
    %cst_113 = arith.constant dense<0.000000e+00> : vector<8x8xf32>
    %406 = tpu.matmul %405, %404, %cst_113 {dimension_numbers = #tpu.dot_dimension_numbers<[1], [0], [0], [1], [0, 0, 1, 1], [], []>} : vector<8x64xbf16>, vector<64x8xbf16>, vector<8x8xf32> -> vector<8x8xf32>
    %407 = arith.addf %221, %406 : vector<8x8xf32>
    %cst_114 = arith.constant 0.000000e+00 : f32
    %408 = vector.broadcast %cst_114 : f32 to vector<8x64xf32>
    %409 = vector.extract_strided_slice %165 {offsets = [0, 8], sizes = [8, 1], strides = [1, 1]} : vector<8x16xf32> to vector<8x1xf32>
    %410 = vector.extract_strided_slice %166 {offsets = [0, 8], sizes = [8, 1], strides = [1, 1]} : vector<8x16xf32> to vector<8x1xf32>
    %411 = vector.extract_strided_slice %167 {offsets = [0, 8], sizes = [8, 1], strides = [1, 1]} : vector<8x16xf32> to vector<8x1xf32>
    %412 = vector.broadcast %224 : vector<1x64xf32> to vector<8x64xf32>
    %413 = vector.broadcast %409 : vector<8x1xf32> to vector<8x64xf32>
    %414 = arith.cmpf oge, %412, %413 : vector<8x64xf32>
    %cst_115 = arith.constant 1.000000e+00 : f32
    %415 = vector.broadcast %cst_115 : f32 to vector<8x1xf32>
    %416 = arith.addf %409, %415 : vector<8x1xf32>
    %417 = vector.broadcast %224 : vector<1x64xf32> to vector<8x64xf32>
    %418 = vector.broadcast %416 : vector<8x1xf32> to vector<8x64xf32>
    %419 = arith.cmpf ole, %417, %418 : vector<8x64xf32>
    %420 = arith.andi %414, %419 : vector<8x64xi1>
    %421 = vector.broadcast %224 : vector<1x64xf32> to vector<8x64xf32>
    %422 = vector.broadcast %409 : vector<8x1xf32> to vector<8x64xf32>
    %423 = arith.cmpf oeq, %421, %422 : vector<8x64xf32>
    %cst_116 = arith.constant 1.000000e+00 : f32
    %424 = vector.broadcast %cst_116 : f32 to vector<8x1xf32>
    %425 = arith.subf %424, %411 : vector<8x1xf32>
    %426 = vector.shape_cast %425 : vector<8x1xf32> to vector<8x1xf32>
    %427 = vector.broadcast %426 : vector<8x1xf32> to vector<8x64xf32>
    %428 = vector.shape_cast %411 : vector<8x1xf32> to vector<8x1xf32>
    %429 = vector.broadcast %428 : vector<8x1xf32> to vector<8x64xf32>
    %430 = arith.select %423, %427, %429 : vector<8x64xi1>, vector<8x64xf32>
    %431 = vector.broadcast %225 : vector<1x64xf32> to vector<8x64xf32>
    %432 = vector.broadcast %410 : vector<8x1xf32> to vector<8x64xf32>
    %433 = arith.cmpf oeq, %431, %432 : vector<8x64xf32>
    %434 = vector.extract_strided_slice %216 {offsets = [0, 8], sizes = [8, 1], strides = [1, 1]} : vector<8x16xf32> to vector<8x1xf32>
    %cst_117 = arith.constant 1.000000e+00 : f32
    %435 = vector.broadcast %cst_117 : f32 to vector<8x1xf32>
    %436 = arith.addf %410, %435 : vector<8x1xf32>
    %437 = vector.broadcast %225 : vector<1x64xf32> to vector<8x64xf32>
    %438 = vector.broadcast %436 : vector<8x1xf32> to vector<8x64xf32>
    %439 = arith.cmpf oeq, %437, %438 : vector<8x64xf32>
    %440 = vector.extract_strided_slice %217 {offsets = [0, 8], sizes = [8, 1], strides = [1, 1]} : vector<8x16xf32> to vector<8x1xf32>
    %cst_118 = arith.constant 0.000000e+00 : f32
    %441 = vector.shape_cast %440 : vector<8x1xf32> to vector<8x1xf32>
    %442 = vector.broadcast %441 : vector<8x1xf32> to vector<8x64xf32>
    %443 = vector.broadcast %cst_118 : f32 to vector<8x64xf32>
    %444 = arith.select %439, %442, %443 : vector<8x64xi1>, vector<8x64xf32>
    %445 = vector.shape_cast %434 : vector<8x1xf32> to vector<8x1xf32>
    %446 = vector.broadcast %445 : vector<8x1xf32> to vector<8x64xf32>
    %447 = arith.select %433, %446, %444 : vector<8x64xi1>, vector<8x64xf32>
    %448 = arith.mulf %430, %447 : vector<8x64xf32>
    %cst_119 = arith.constant 0.000000e+00 : f32
    %449 = vector.broadcast %cst_119 : f32 to vector<8x64xf32>
    %450 = arith.select %420, %448, %449 : vector<8x64xi1>, vector<8x64xf32>
    %451 = arith.addf %408, %450 : vector<8x64xf32>
    %452 = vector.extract_strided_slice %165 {offsets = [0, 9], sizes = [8, 1], strides = [1, 1]} : vector<8x16xf32> to vector<8x1xf32>
    %453 = vector.extract_strided_slice %166 {offsets = [0, 9], sizes = [8, 1], strides = [1, 1]} : vector<8x16xf32> to vector<8x1xf32>
    %454 = vector.extract_strided_slice %167 {offsets = [0, 9], sizes = [8, 1], strides = [1, 1]} : vector<8x16xf32> to vector<8x1xf32>
    %455 = vector.broadcast %224 : vector<1x64xf32> to vector<8x64xf32>
    %456 = vector.broadcast %452 : vector<8x1xf32> to vector<8x64xf32>
    %457 = arith.cmpf oge, %455, %456 : vector<8x64xf32>
    %cst_120 = arith.constant 1.000000e+00 : f32
    %458 = vector.broadcast %cst_120 : f32 to vector<8x1xf32>
    %459 = arith.addf %452, %458 : vector<8x1xf32>
    %460 = vector.broadcast %224 : vector<1x64xf32> to vector<8x64xf32>
    %461 = vector.broadcast %459 : vector<8x1xf32> to vector<8x64xf32>
    %462 = arith.cmpf ole, %460, %461 : vector<8x64xf32>
    %463 = arith.andi %457, %462 : vector<8x64xi1>
    %464 = vector.broadcast %224 : vector<1x64xf32> to vector<8x64xf32>
    %465 = vector.broadcast %452 : vector<8x1xf32> to vector<8x64xf32>
    %466 = arith.cmpf oeq, %464, %465 : vector<8x64xf32>
    %cst_121 = arith.constant 1.000000e+00 : f32
    %467 = vector.broadcast %cst_121 : f32 to vector<8x1xf32>
    %468 = arith.subf %467, %454 : vector<8x1xf32>
    %469 = vector.shape_cast %468 : vector<8x1xf32> to vector<8x1xf32>
    %470 = vector.broadcast %469 : vector<8x1xf32> to vector<8x64xf32>
    %471 = vector.shape_cast %454 : vector<8x1xf32> to vector<8x1xf32>
    %472 = vector.broadcast %471 : vector<8x1xf32> to vector<8x64xf32>
    %473 = arith.select %466, %470, %472 : vector<8x64xi1>, vector<8x64xf32>
    %474 = vector.broadcast %225 : vector<1x64xf32> to vector<8x64xf32>
    %475 = vector.broadcast %453 : vector<8x1xf32> to vector<8x64xf32>
    %476 = arith.cmpf oeq, %474, %475 : vector<8x64xf32>
    %477 = vector.extract_strided_slice %216 {offsets = [0, 9], sizes = [8, 1], strides = [1, 1]} : vector<8x16xf32> to vector<8x1xf32>
    %cst_122 = arith.constant 1.000000e+00 : f32
    %478 = vector.broadcast %cst_122 : f32 to vector<8x1xf32>
    %479 = arith.addf %453, %478 : vector<8x1xf32>
    %480 = vector.broadcast %225 : vector<1x64xf32> to vector<8x64xf32>
    %481 = vector.broadcast %479 : vector<8x1xf32> to vector<8x64xf32>
    %482 = arith.cmpf oeq, %480, %481 : vector<8x64xf32>
    %483 = vector.extract_strided_slice %217 {offsets = [0, 9], sizes = [8, 1], strides = [1, 1]} : vector<8x16xf32> to vector<8x1xf32>
    %cst_123 = arith.constant 0.000000e+00 : f32
    %484 = vector.shape_cast %483 : vector<8x1xf32> to vector<8x1xf32>
    %485 = vector.broadcast %484 : vector<8x1xf32> to vector<8x64xf32>
    %486 = vector.broadcast %cst_123 : f32 to vector<8x64xf32>
    %487 = arith.select %482, %485, %486 : vector<8x64xi1>, vector<8x64xf32>
    %488 = vector.shape_cast %477 : vector<8x1xf32> to vector<8x1xf32>
    %489 = vector.broadcast %488 : vector<8x1xf32> to vector<8x64xf32>
    %490 = arith.select %476, %489, %487 : vector<8x64xi1>, vector<8x64xf32>
    %491 = arith.mulf %473, %490 : vector<8x64xf32>
    %cst_124 = arith.constant 0.000000e+00 : f32
    %492 = vector.broadcast %cst_124 : f32 to vector<8x64xf32>
    %493 = arith.select %463, %491, %492 : vector<8x64xi1>, vector<8x64xf32>
    %494 = arith.addf %451, %493 : vector<8x64xf32>
    %495 = vector.extract_strided_slice %145 {offsets = [0, 16], sizes = [64, 8], strides = [1, 1]} : vector<80x32xbf16> to vector<64x8xbf16>
    %496 = arith.truncf %494 : vector<8x64xf32> to vector<8x64xbf16>
    %cst_125 = arith.constant dense<0.000000e+00> : vector<8x8xf32>
    %497 = tpu.matmul %496, %495, %cst_125 {dimension_numbers = #tpu.dot_dimension_numbers<[1], [0], [0], [1], [0, 0, 1, 1], [], []>} : vector<8x64xbf16>, vector<64x8xbf16>, vector<8x8xf32> -> vector<8x8xf32>
    %498 = arith.addf %222, %497 : vector<8x8xf32>
    %cst_126 = arith.constant 0.000000e+00 : f32
    %499 = vector.broadcast %cst_126 : f32 to vector<8x64xf32>
    %500 = vector.extract_strided_slice %165 {offsets = [0, 12], sizes = [8, 1], strides = [1, 1]} : vector<8x16xf32> to vector<8x1xf32>
    %501 = vector.extract_strided_slice %166 {offsets = [0, 12], sizes = [8, 1], strides = [1, 1]} : vector<8x16xf32> to vector<8x1xf32>
    %502 = vector.extract_strided_slice %167 {offsets = [0, 12], sizes = [8, 1], strides = [1, 1]} : vector<8x16xf32> to vector<8x1xf32>
    %503 = vector.broadcast %224 : vector<1x64xf32> to vector<8x64xf32>
    %504 = vector.broadcast %500 : vector<8x1xf32> to vector<8x64xf32>
    %505 = arith.cmpf oge, %503, %504 : vector<8x64xf32>
    %cst_127 = arith.constant 1.000000e+00 : f32
    %506 = vector.broadcast %cst_127 : f32 to vector<8x1xf32>
    %507 = arith.addf %500, %506 : vector<8x1xf32>
    %508 = vector.broadcast %224 : vector<1x64xf32> to vector<8x64xf32>
    %509 = vector.broadcast %507 : vector<8x1xf32> to vector<8x64xf32>
    %510 = arith.cmpf ole, %508, %509 : vector<8x64xf32>
    %511 = arith.andi %505, %510 : vector<8x64xi1>
    %512 = vector.broadcast %224 : vector<1x64xf32> to vector<8x64xf32>
    %513 = vector.broadcast %500 : vector<8x1xf32> to vector<8x64xf32>
    %514 = arith.cmpf oeq, %512, %513 : vector<8x64xf32>
    %cst_128 = arith.constant 1.000000e+00 : f32
    %515 = vector.broadcast %cst_128 : f32 to vector<8x1xf32>
    %516 = arith.subf %515, %502 : vector<8x1xf32>
    %517 = vector.shape_cast %516 : vector<8x1xf32> to vector<8x1xf32>
    %518 = vector.broadcast %517 : vector<8x1xf32> to vector<8x64xf32>
    %519 = vector.shape_cast %502 : vector<8x1xf32> to vector<8x1xf32>
    %520 = vector.broadcast %519 : vector<8x1xf32> to vector<8x64xf32>
    %521 = arith.select %514, %518, %520 : vector<8x64xi1>, vector<8x64xf32>
    %522 = vector.broadcast %225 : vector<1x64xf32> to vector<8x64xf32>
    %523 = vector.broadcast %501 : vector<8x1xf32> to vector<8x64xf32>
    %524 = arith.cmpf oeq, %522, %523 : vector<8x64xf32>
    %525 = vector.extract_strided_slice %216 {offsets = [0, 12], sizes = [8, 1], strides = [1, 1]} : vector<8x16xf32> to vector<8x1xf32>
    %cst_129 = arith.constant 1.000000e+00 : f32
    %526 = vector.broadcast %cst_129 : f32 to vector<8x1xf32>
    %527 = arith.addf %501, %526 : vector<8x1xf32>
    %528 = vector.broadcast %225 : vector<1x64xf32> to vector<8x64xf32>
    %529 = vector.broadcast %527 : vector<8x1xf32> to vector<8x64xf32>
    %530 = arith.cmpf oeq, %528, %529 : vector<8x64xf32>
    %531 = vector.extract_strided_slice %217 {offsets = [0, 12], sizes = [8, 1], strides = [1, 1]} : vector<8x16xf32> to vector<8x1xf32>
    %cst_130 = arith.constant 0.000000e+00 : f32
    %532 = vector.shape_cast %531 : vector<8x1xf32> to vector<8x1xf32>
    %533 = vector.broadcast %532 : vector<8x1xf32> to vector<8x64xf32>
    %534 = vector.broadcast %cst_130 : f32 to vector<8x64xf32>
    %535 = arith.select %530, %533, %534 : vector<8x64xi1>, vector<8x64xf32>
    %536 = vector.shape_cast %525 : vector<8x1xf32> to vector<8x1xf32>
    %537 = vector.broadcast %536 : vector<8x1xf32> to vector<8x64xf32>
    %538 = arith.select %524, %537, %535 : vector<8x64xi1>, vector<8x64xf32>
    %539 = arith.mulf %521, %538 : vector<8x64xf32>
    %cst_131 = arith.constant 0.000000e+00 : f32
    %540 = vector.broadcast %cst_131 : f32 to vector<8x64xf32>
    %541 = arith.select %511, %539, %540 : vector<8x64xi1>, vector<8x64xf32>
    %542 = arith.addf %499, %541 : vector<8x64xf32>
    %543 = vector.extract_strided_slice %165 {offsets = [0, 13], sizes = [8, 1], strides = [1, 1]} : vector<8x16xf32> to vector<8x1xf32>
    %544 = vector.extract_strided_slice %166 {offsets = [0, 13], sizes = [8, 1], strides = [1, 1]} : vector<8x16xf32> to vector<8x1xf32>
    %545 = vector.extract_strided_slice %167 {offsets = [0, 13], sizes = [8, 1], strides = [1, 1]} : vector<8x16xf32> to vector<8x1xf32>
    %546 = vector.broadcast %224 : vector<1x64xf32> to vector<8x64xf32>
    %547 = vector.broadcast %543 : vector<8x1xf32> to vector<8x64xf32>
    %548 = arith.cmpf oge, %546, %547 : vector<8x64xf32>
    %cst_132 = arith.constant 1.000000e+00 : f32
    %549 = vector.broadcast %cst_132 : f32 to vector<8x1xf32>
    %550 = arith.addf %543, %549 : vector<8x1xf32>
    %551 = vector.broadcast %224 : vector<1x64xf32> to vector<8x64xf32>
    %552 = vector.broadcast %550 : vector<8x1xf32> to vector<8x64xf32>
    %553 = arith.cmpf ole, %551, %552 : vector<8x64xf32>
    %554 = arith.andi %548, %553 : vector<8x64xi1>
    %555 = vector.broadcast %224 : vector<1x64xf32> to vector<8x64xf32>
    %556 = vector.broadcast %543 : vector<8x1xf32> to vector<8x64xf32>
    %557 = arith.cmpf oeq, %555, %556 : vector<8x64xf32>
    %cst_133 = arith.constant 1.000000e+00 : f32
    %558 = vector.broadcast %cst_133 : f32 to vector<8x1xf32>
    %559 = arith.subf %558, %545 : vector<8x1xf32>
    %560 = vector.shape_cast %559 : vector<8x1xf32> to vector<8x1xf32>
    %561 = vector.broadcast %560 : vector<8x1xf32> to vector<8x64xf32>
    %562 = vector.shape_cast %545 : vector<8x1xf32> to vector<8x1xf32>
    %563 = vector.broadcast %562 : vector<8x1xf32> to vector<8x64xf32>
    %564 = arith.select %557, %561, %563 : vector<8x64xi1>, vector<8x64xf32>
    %565 = vector.broadcast %225 : vector<1x64xf32> to vector<8x64xf32>
    %566 = vector.broadcast %544 : vector<8x1xf32> to vector<8x64xf32>
    %567 = arith.cmpf oeq, %565, %566 : vector<8x64xf32>
    %568 = vector.extract_strided_slice %216 {offsets = [0, 13], sizes = [8, 1], strides = [1, 1]} : vector<8x16xf32> to vector<8x1xf32>
    %cst_134 = arith.constant 1.000000e+00 : f32
    %569 = vector.broadcast %cst_134 : f32 to vector<8x1xf32>
    %570 = arith.addf %544, %569 : vector<8x1xf32>
    %571 = vector.broadcast %225 : vector<1x64xf32> to vector<8x64xf32>
    %572 = vector.broadcast %570 : vector<8x1xf32> to vector<8x64xf32>
    %573 = arith.cmpf oeq, %571, %572 : vector<8x64xf32>
    %574 = vector.extract_strided_slice %217 {offsets = [0, 13], sizes = [8, 1], strides = [1, 1]} : vector<8x16xf32> to vector<8x1xf32>
    %cst_135 = arith.constant 0.000000e+00 : f32
    %575 = vector.shape_cast %574 : vector<8x1xf32> to vector<8x1xf32>
    %576 = vector.broadcast %575 : vector<8x1xf32> to vector<8x64xf32>
    %577 = vector.broadcast %cst_135 : f32 to vector<8x64xf32>
    %578 = arith.select %573, %576, %577 : vector<8x64xi1>, vector<8x64xf32>
    %579 = vector.shape_cast %568 : vector<8x1xf32> to vector<8x1xf32>
    %580 = vector.broadcast %579 : vector<8x1xf32> to vector<8x64xf32>
    %581 = arith.select %567, %580, %578 : vector<8x64xi1>, vector<8x64xf32>
    %582 = arith.mulf %564, %581 : vector<8x64xf32>
    %cst_136 = arith.constant 0.000000e+00 : f32
    %583 = vector.broadcast %cst_136 : f32 to vector<8x64xf32>
    %584 = arith.select %554, %582, %583 : vector<8x64xi1>, vector<8x64xf32>
    %585 = arith.addf %542, %584 : vector<8x64xf32>
    %586 = vector.extract_strided_slice %145 {offsets = [0, 24], sizes = [64, 8], strides = [1, 1]} : vector<80x32xbf16> to vector<64x8xbf16>
    %587 = arith.truncf %585 : vector<8x64xf32> to vector<8x64xbf16>
    %cst_137 = arith.constant dense<0.000000e+00> : vector<8x8xf32>
    %588 = tpu.matmul %587, %586, %cst_137 {dimension_numbers = #tpu.dot_dimension_numbers<[1], [0], [0], [1], [0, 0, 1, 1], [], []>} : vector<8x64xbf16>, vector<64x8xbf16>, vector<8x8xf32> -> vector<8x8xf32>
    %589 = arith.addf %223, %588 : vector<8x8xf32>
    %590 = vector.extract_strided_slice %218 {offsets = [0, 64], sizes = [1, 16], strides = [1, 1]} : vector<1x80xf32> to vector<1x16xf32>
    %591 = vector.extract_strided_slice %219 {offsets = [0, 64], sizes = [1, 16], strides = [1, 1]} : vector<1x80xf32> to vector<1x16xf32>
    %cst_138 = arith.constant 0.000000e+00 : f32
    %592 = vector.broadcast %cst_138 : f32 to vector<8x16xf32>
    %593 = vector.extract_strided_slice %165 {offsets = [0, 2], sizes = [8, 1], strides = [1, 1]} : vector<8x16xf32> to vector<8x1xf32>
    %594 = vector.extract_strided_slice %166 {offsets = [0, 2], sizes = [8, 1], strides = [1, 1]} : vector<8x16xf32> to vector<8x1xf32>
    %595 = vector.extract_strided_slice %167 {offsets = [0, 2], sizes = [8, 1], strides = [1, 1]} : vector<8x16xf32> to vector<8x1xf32>
    %596 = vector.broadcast %590 : vector<1x16xf32> to vector<8x16xf32>
    %597 = vector.broadcast %593 : vector<8x1xf32> to vector<8x16xf32>
    %598 = arith.cmpf oge, %596, %597 : vector<8x16xf32>
    %cst_139 = arith.constant 1.000000e+00 : f32
    %599 = vector.broadcast %cst_139 : f32 to vector<8x1xf32>
    %600 = arith.addf %593, %599 : vector<8x1xf32>
    %601 = vector.broadcast %590 : vector<1x16xf32> to vector<8x16xf32>
    %602 = vector.broadcast %600 : vector<8x1xf32> to vector<8x16xf32>
    %603 = arith.cmpf ole, %601, %602 : vector<8x16xf32>
    %604 = arith.andi %598, %603 : vector<8x16xi1>
    %605 = vector.broadcast %590 : vector<1x16xf32> to vector<8x16xf32>
    %606 = vector.broadcast %593 : vector<8x1xf32> to vector<8x16xf32>
    %607 = arith.cmpf oeq, %605, %606 : vector<8x16xf32>
    %cst_140 = arith.constant 1.000000e+00 : f32
    %608 = vector.broadcast %cst_140 : f32 to vector<8x1xf32>
    %609 = arith.subf %608, %595 : vector<8x1xf32>
    %610 = vector.shape_cast %609 : vector<8x1xf32> to vector<8x1xf32>
    %611 = vector.broadcast %610 : vector<8x1xf32> to vector<8x16xf32>
    %612 = vector.shape_cast %595 : vector<8x1xf32> to vector<8x1xf32>
    %613 = vector.broadcast %612 : vector<8x1xf32> to vector<8x16xf32>
    %614 = arith.select %607, %611, %613 : vector<8x16xi1>, vector<8x16xf32>
    %615 = vector.broadcast %591 : vector<1x16xf32> to vector<8x16xf32>
    %616 = vector.broadcast %594 : vector<8x1xf32> to vector<8x16xf32>
    %617 = arith.cmpf oeq, %615, %616 : vector<8x16xf32>
    %618 = vector.extract_strided_slice %216 {offsets = [0, 2], sizes = [8, 1], strides = [1, 1]} : vector<8x16xf32> to vector<8x1xf32>
    %cst_141 = arith.constant 1.000000e+00 : f32
    %619 = vector.broadcast %cst_141 : f32 to vector<8x1xf32>
    %620 = arith.addf %594, %619 : vector<8x1xf32>
    %621 = vector.broadcast %591 : vector<1x16xf32> to vector<8x16xf32>
    %622 = vector.broadcast %620 : vector<8x1xf32> to vector<8x16xf32>
    %623 = arith.cmpf oeq, %621, %622 : vector<8x16xf32>
    %624 = vector.extract_strided_slice %217 {offsets = [0, 2], sizes = [8, 1], strides = [1, 1]} : vector<8x16xf32> to vector<8x1xf32>
    %cst_142 = arith.constant 0.000000e+00 : f32
    %625 = vector.shape_cast %624 : vector<8x1xf32> to vector<8x1xf32>
    %626 = vector.broadcast %625 : vector<8x1xf32> to vector<8x16xf32>
    %627 = vector.broadcast %cst_142 : f32 to vector<8x16xf32>
    %628 = arith.select %623, %626, %627 : vector<8x16xi1>, vector<8x16xf32>
    %629 = vector.shape_cast %618 : vector<8x1xf32> to vector<8x1xf32>
    %630 = vector.broadcast %629 : vector<8x1xf32> to vector<8x16xf32>
    %631 = arith.select %617, %630, %628 : vector<8x16xi1>, vector<8x16xf32>
    %632 = arith.mulf %614, %631 : vector<8x16xf32>
    %cst_143 = arith.constant 0.000000e+00 : f32
    %633 = vector.broadcast %cst_143 : f32 to vector<8x16xf32>
    %634 = arith.select %604, %632, %633 : vector<8x16xi1>, vector<8x16xf32>
    %635 = arith.addf %592, %634 : vector<8x16xf32>
    %636 = vector.extract_strided_slice %165 {offsets = [0, 3], sizes = [8, 1], strides = [1, 1]} : vector<8x16xf32> to vector<8x1xf32>
    %637 = vector.extract_strided_slice %166 {offsets = [0, 3], sizes = [8, 1], strides = [1, 1]} : vector<8x16xf32> to vector<8x1xf32>
    %638 = vector.extract_strided_slice %167 {offsets = [0, 3], sizes = [8, 1], strides = [1, 1]} : vector<8x16xf32> to vector<8x1xf32>
    %639 = vector.broadcast %590 : vector<1x16xf32> to vector<8x16xf32>
    %640 = vector.broadcast %636 : vector<8x1xf32> to vector<8x16xf32>
    %641 = arith.cmpf oge, %639, %640 : vector<8x16xf32>
    %cst_144 = arith.constant 1.000000e+00 : f32
    %642 = vector.broadcast %cst_144 : f32 to vector<8x1xf32>
    %643 = arith.addf %636, %642 : vector<8x1xf32>
    %644 = vector.broadcast %590 : vector<1x16xf32> to vector<8x16xf32>
    %645 = vector.broadcast %643 : vector<8x1xf32> to vector<8x16xf32>
    %646 = arith.cmpf ole, %644, %645 : vector<8x16xf32>
    %647 = arith.andi %641, %646 : vector<8x16xi1>
    %648 = vector.broadcast %590 : vector<1x16xf32> to vector<8x16xf32>
    %649 = vector.broadcast %636 : vector<8x1xf32> to vector<8x16xf32>
    %650 = arith.cmpf oeq, %648, %649 : vector<8x16xf32>
    %cst_145 = arith.constant 1.000000e+00 : f32
    %651 = vector.broadcast %cst_145 : f32 to vector<8x1xf32>
    %652 = arith.subf %651, %638 : vector<8x1xf32>
    %653 = vector.shape_cast %652 : vector<8x1xf32> to vector<8x1xf32>
    %654 = vector.broadcast %653 : vector<8x1xf32> to vector<8x16xf32>
    %655 = vector.shape_cast %638 : vector<8x1xf32> to vector<8x1xf32>
    %656 = vector.broadcast %655 : vector<8x1xf32> to vector<8x16xf32>
    %657 = arith.select %650, %654, %656 : vector<8x16xi1>, vector<8x16xf32>
    %658 = vector.broadcast %591 : vector<1x16xf32> to vector<8x16xf32>
    %659 = vector.broadcast %637 : vector<8x1xf32> to vector<8x16xf32>
    %660 = arith.cmpf oeq, %658, %659 : vector<8x16xf32>
    %661 = vector.extract_strided_slice %216 {offsets = [0, 3], sizes = [8, 1], strides = [1, 1]} : vector<8x16xf32> to vector<8x1xf32>
    %cst_146 = arith.constant 1.000000e+00 : f32
    %662 = vector.broadcast %cst_146 : f32 to vector<8x1xf32>
    %663 = arith.addf %637, %662 : vector<8x1xf32>
    %664 = vector.broadcast %591 : vector<1x16xf32> to vector<8x16xf32>
    %665 = vector.broadcast %663 : vector<8x1xf32> to vector<8x16xf32>
    %666 = arith.cmpf oeq, %664, %665 : vector<8x16xf32>
    %667 = vector.extract_strided_slice %217 {offsets = [0, 3], sizes = [8, 1], strides = [1, 1]} : vector<8x16xf32> to vector<8x1xf32>
    %cst_147 = arith.constant 0.000000e+00 : f32
    %668 = vector.shape_cast %667 : vector<8x1xf32> to vector<8x1xf32>
    %669 = vector.broadcast %668 : vector<8x1xf32> to vector<8x16xf32>
    %670 = vector.broadcast %cst_147 : f32 to vector<8x16xf32>
    %671 = arith.select %666, %669, %670 : vector<8x16xi1>, vector<8x16xf32>
    %672 = vector.shape_cast %661 : vector<8x1xf32> to vector<8x1xf32>
    %673 = vector.broadcast %672 : vector<8x1xf32> to vector<8x16xf32>
    %674 = arith.select %660, %673, %671 : vector<8x16xi1>, vector<8x16xf32>
    %675 = arith.mulf %657, %674 : vector<8x16xf32>
    %cst_148 = arith.constant 0.000000e+00 : f32
    %676 = vector.broadcast %cst_148 : f32 to vector<8x16xf32>
    %677 = arith.select %647, %675, %676 : vector<8x16xi1>, vector<8x16xf32>
    %678 = arith.addf %635, %677 : vector<8x16xf32>
    %679 = vector.extract_strided_slice %145 {offsets = [64, 0], sizes = [16, 8], strides = [1, 1]} : vector<80x32xbf16> to vector<16x8xbf16>
    %680 = arith.truncf %678 : vector<8x16xf32> to vector<8x16xbf16>
    %cst_149 = arith.constant dense<0.000000e+00> : vector<8x8xf32>
    %681 = tpu.matmul %680, %679, %cst_149 {dimension_numbers = #tpu.dot_dimension_numbers<[1], [0], [0], [1], [0, 0, 1, 1], [], []>} : vector<8x16xbf16>, vector<16x8xbf16>, vector<8x8xf32> -> vector<8x8xf32>
    %682 = arith.addf %316, %681 : vector<8x8xf32>
    %cst_150 = arith.constant 0.000000e+00 : f32
    %683 = vector.broadcast %cst_150 : f32 to vector<8x16xf32>
    %684 = vector.extract_strided_slice %165 {offsets = [0, 6], sizes = [8, 1], strides = [1, 1]} : vector<8x16xf32> to vector<8x1xf32>
    %685 = vector.extract_strided_slice %166 {offsets = [0, 6], sizes = [8, 1], strides = [1, 1]} : vector<8x16xf32> to vector<8x1xf32>
    %686 = vector.extract_strided_slice %167 {offsets = [0, 6], sizes = [8, 1], strides = [1, 1]} : vector<8x16xf32> to vector<8x1xf32>
    %687 = vector.broadcast %590 : vector<1x16xf32> to vector<8x16xf32>
    %688 = vector.broadcast %684 : vector<8x1xf32> to vector<8x16xf32>
    %689 = arith.cmpf oge, %687, %688 : vector<8x16xf32>
    %cst_151 = arith.constant 1.000000e+00 : f32
    %690 = vector.broadcast %cst_151 : f32 to vector<8x1xf32>
    %691 = arith.addf %684, %690 : vector<8x1xf32>
    %692 = vector.broadcast %590 : vector<1x16xf32> to vector<8x16xf32>
    %693 = vector.broadcast %691 : vector<8x1xf32> to vector<8x16xf32>
    %694 = arith.cmpf ole, %692, %693 : vector<8x16xf32>
    %695 = arith.andi %689, %694 : vector<8x16xi1>
    %696 = vector.broadcast %590 : vector<1x16xf32> to vector<8x16xf32>
    %697 = vector.broadcast %684 : vector<8x1xf32> to vector<8x16xf32>
    %698 = arith.cmpf oeq, %696, %697 : vector<8x16xf32>
    %cst_152 = arith.constant 1.000000e+00 : f32
    %699 = vector.broadcast %cst_152 : f32 to vector<8x1xf32>
    %700 = arith.subf %699, %686 : vector<8x1xf32>
    %701 = vector.shape_cast %700 : vector<8x1xf32> to vector<8x1xf32>
    %702 = vector.broadcast %701 : vector<8x1xf32> to vector<8x16xf32>
    %703 = vector.shape_cast %686 : vector<8x1xf32> to vector<8x1xf32>
    %704 = vector.broadcast %703 : vector<8x1xf32> to vector<8x16xf32>
    %705 = arith.select %698, %702, %704 : vector<8x16xi1>, vector<8x16xf32>
    %706 = vector.broadcast %591 : vector<1x16xf32> to vector<8x16xf32>
    %707 = vector.broadcast %685 : vector<8x1xf32> to vector<8x16xf32>
    %708 = arith.cmpf oeq, %706, %707 : vector<8x16xf32>
    %709 = vector.extract_strided_slice %216 {offsets = [0, 6], sizes = [8, 1], strides = [1, 1]} : vector<8x16xf32> to vector<8x1xf32>
    %cst_153 = arith.constant 1.000000e+00 : f32
    %710 = vector.broadcast %cst_153 : f32 to vector<8x1xf32>
    %711 = arith.addf %685, %710 : vector<8x1xf32>
    %712 = vector.broadcast %591 : vector<1x16xf32> to vector<8x16xf32>
    %713 = vector.broadcast %711 : vector<8x1xf32> to vector<8x16xf32>
    %714 = arith.cmpf oeq, %712, %713 : vector<8x16xf32>
    %715 = vector.extract_strided_slice %217 {offsets = [0, 6], sizes = [8, 1], strides = [1, 1]} : vector<8x16xf32> to vector<8x1xf32>
    %cst_154 = arith.constant 0.000000e+00 : f32
    %716 = vector.shape_cast %715 : vector<8x1xf32> to vector<8x1xf32>
    %717 = vector.broadcast %716 : vector<8x1xf32> to vector<8x16xf32>
    %718 = vector.broadcast %cst_154 : f32 to vector<8x16xf32>
    %719 = arith.select %714, %717, %718 : vector<8x16xi1>, vector<8x16xf32>
    %720 = vector.shape_cast %709 : vector<8x1xf32> to vector<8x1xf32>
    %721 = vector.broadcast %720 : vector<8x1xf32> to vector<8x16xf32>
    %722 = arith.select %708, %721, %719 : vector<8x16xi1>, vector<8x16xf32>
    %723 = arith.mulf %705, %722 : vector<8x16xf32>
    %cst_155 = arith.constant 0.000000e+00 : f32
    %724 = vector.broadcast %cst_155 : f32 to vector<8x16xf32>
    %725 = arith.select %695, %723, %724 : vector<8x16xi1>, vector<8x16xf32>
    %726 = arith.addf %683, %725 : vector<8x16xf32>
    %727 = vector.extract_strided_slice %165 {offsets = [0, 7], sizes = [8, 1], strides = [1, 1]} : vector<8x16xf32> to vector<8x1xf32>
    %728 = vector.extract_strided_slice %166 {offsets = [0, 7], sizes = [8, 1], strides = [1, 1]} : vector<8x16xf32> to vector<8x1xf32>
    %729 = vector.extract_strided_slice %167 {offsets = [0, 7], sizes = [8, 1], strides = [1, 1]} : vector<8x16xf32> to vector<8x1xf32>
    %730 = vector.broadcast %590 : vector<1x16xf32> to vector<8x16xf32>
    %731 = vector.broadcast %727 : vector<8x1xf32> to vector<8x16xf32>
    %732 = arith.cmpf oge, %730, %731 : vector<8x16xf32>
    %cst_156 = arith.constant 1.000000e+00 : f32
    %733 = vector.broadcast %cst_156 : f32 to vector<8x1xf32>
    %734 = arith.addf %727, %733 : vector<8x1xf32>
    %735 = vector.broadcast %590 : vector<1x16xf32> to vector<8x16xf32>
    %736 = vector.broadcast %734 : vector<8x1xf32> to vector<8x16xf32>
    %737 = arith.cmpf ole, %735, %736 : vector<8x16xf32>
    %738 = arith.andi %732, %737 : vector<8x16xi1>
    %739 = vector.broadcast %590 : vector<1x16xf32> to vector<8x16xf32>
    %740 = vector.broadcast %727 : vector<8x1xf32> to vector<8x16xf32>
    %741 = arith.cmpf oeq, %739, %740 : vector<8x16xf32>
    %cst_157 = arith.constant 1.000000e+00 : f32
    %742 = vector.broadcast %cst_157 : f32 to vector<8x1xf32>
    %743 = arith.subf %742, %729 : vector<8x1xf32>
    %744 = vector.shape_cast %743 : vector<8x1xf32> to vector<8x1xf32>
    %745 = vector.broadcast %744 : vector<8x1xf32> to vector<8x16xf32>
    %746 = vector.shape_cast %729 : vector<8x1xf32> to vector<8x1xf32>
    %747 = vector.broadcast %746 : vector<8x1xf32> to vector<8x16xf32>
    %748 = arith.select %741, %745, %747 : vector<8x16xi1>, vector<8x16xf32>
    %749 = vector.broadcast %591 : vector<1x16xf32> to vector<8x16xf32>
    %750 = vector.broadcast %728 : vector<8x1xf32> to vector<8x16xf32>
    %751 = arith.cmpf oeq, %749, %750 : vector<8x16xf32>
    %752 = vector.extract_strided_slice %216 {offsets = [0, 7], sizes = [8, 1], strides = [1, 1]} : vector<8x16xf32> to vector<8x1xf32>
    %cst_158 = arith.constant 1.000000e+00 : f32
    %753 = vector.broadcast %cst_158 : f32 to vector<8x1xf32>
    %754 = arith.addf %728, %753 : vector<8x1xf32>
    %755 = vector.broadcast %591 : vector<1x16xf32> to vector<8x16xf32>
    %756 = vector.broadcast %754 : vector<8x1xf32> to vector<8x16xf32>
    %757 = arith.cmpf oeq, %755, %756 : vector<8x16xf32>
    %758 = vector.extract_strided_slice %217 {offsets = [0, 7], sizes = [8, 1], strides = [1, 1]} : vector<8x16xf32> to vector<8x1xf32>
    %cst_159 = arith.constant 0.000000e+00 : f32
    %759 = vector.shape_cast %758 : vector<8x1xf32> to vector<8x1xf32>
    %760 = vector.broadcast %759 : vector<8x1xf32> to vector<8x16xf32>
    %761 = vector.broadcast %cst_159 : f32 to vector<8x16xf32>
    %762 = arith.select %757, %760, %761 : vector<8x16xi1>, vector<8x16xf32>
    %763 = vector.shape_cast %752 : vector<8x1xf32> to vector<8x1xf32>
    %764 = vector.broadcast %763 : vector<8x1xf32> to vector<8x16xf32>
    %765 = arith.select %751, %764, %762 : vector<8x16xi1>, vector<8x16xf32>
    %766 = arith.mulf %748, %765 : vector<8x16xf32>
    %cst_160 = arith.constant 0.000000e+00 : f32
    %767 = vector.broadcast %cst_160 : f32 to vector<8x16xf32>
    %768 = arith.select %738, %766, %767 : vector<8x16xi1>, vector<8x16xf32>
    %769 = arith.addf %726, %768 : vector<8x16xf32>
    %770 = vector.extract_strided_slice %145 {offsets = [64, 8], sizes = [16, 8], strides = [1, 1]} : vector<80x32xbf16> to vector<16x8xbf16>
    %771 = arith.truncf %769 : vector<8x16xf32> to vector<8x16xbf16>
    %cst_161 = arith.constant dense<0.000000e+00> : vector<8x8xf32>
    %772 = tpu.matmul %771, %770, %cst_161 {dimension_numbers = #tpu.dot_dimension_numbers<[1], [0], [0], [1], [0, 0, 1, 1], [], []>} : vector<8x16xbf16>, vector<16x8xbf16>, vector<8x8xf32> -> vector<8x8xf32>
    %773 = arith.addf %407, %772 : vector<8x8xf32>
    %cst_162 = arith.constant 0.000000e+00 : f32
    %774 = vector.broadcast %cst_162 : f32 to vector<8x16xf32>
    %775 = vector.extract_strided_slice %165 {offsets = [0, 10], sizes = [8, 1], strides = [1, 1]} : vector<8x16xf32> to vector<8x1xf32>
    %776 = vector.extract_strided_slice %166 {offsets = [0, 10], sizes = [8, 1], strides = [1, 1]} : vector<8x16xf32> to vector<8x1xf32>
    %777 = vector.extract_strided_slice %167 {offsets = [0, 10], sizes = [8, 1], strides = [1, 1]} : vector<8x16xf32> to vector<8x1xf32>
    %778 = vector.broadcast %590 : vector<1x16xf32> to vector<8x16xf32>
    %779 = vector.broadcast %775 : vector<8x1xf32> to vector<8x16xf32>
    %780 = arith.cmpf oge, %778, %779 : vector<8x16xf32>
    %cst_163 = arith.constant 1.000000e+00 : f32
    %781 = vector.broadcast %cst_163 : f32 to vector<8x1xf32>
    %782 = arith.addf %775, %781 : vector<8x1xf32>
    %783 = vector.broadcast %590 : vector<1x16xf32> to vector<8x16xf32>
    %784 = vector.broadcast %782 : vector<8x1xf32> to vector<8x16xf32>
    %785 = arith.cmpf ole, %783, %784 : vector<8x16xf32>
    %786 = arith.andi %780, %785 : vector<8x16xi1>
    %787 = vector.broadcast %590 : vector<1x16xf32> to vector<8x16xf32>
    %788 = vector.broadcast %775 : vector<8x1xf32> to vector<8x16xf32>
    %789 = arith.cmpf oeq, %787, %788 : vector<8x16xf32>
    %cst_164 = arith.constant 1.000000e+00 : f32
    %790 = vector.broadcast %cst_164 : f32 to vector<8x1xf32>
    %791 = arith.subf %790, %777 : vector<8x1xf32>
    %792 = vector.shape_cast %791 : vector<8x1xf32> to vector<8x1xf32>
    %793 = vector.broadcast %792 : vector<8x1xf32> to vector<8x16xf32>
    %794 = vector.shape_cast %777 : vector<8x1xf32> to vector<8x1xf32>
    %795 = vector.broadcast %794 : vector<8x1xf32> to vector<8x16xf32>
    %796 = arith.select %789, %793, %795 : vector<8x16xi1>, vector<8x16xf32>
    %797 = vector.broadcast %591 : vector<1x16xf32> to vector<8x16xf32>
    %798 = vector.broadcast %776 : vector<8x1xf32> to vector<8x16xf32>
    %799 = arith.cmpf oeq, %797, %798 : vector<8x16xf32>
    %800 = vector.extract_strided_slice %216 {offsets = [0, 10], sizes = [8, 1], strides = [1, 1]} : vector<8x16xf32> to vector<8x1xf32>
    %cst_165 = arith.constant 1.000000e+00 : f32
    %801 = vector.broadcast %cst_165 : f32 to vector<8x1xf32>
    %802 = arith.addf %776, %801 : vector<8x1xf32>
    %803 = vector.broadcast %591 : vector<1x16xf32> to vector<8x16xf32>
    %804 = vector.broadcast %802 : vector<8x1xf32> to vector<8x16xf32>
    %805 = arith.cmpf oeq, %803, %804 : vector<8x16xf32>
    %806 = vector.extract_strided_slice %217 {offsets = [0, 10], sizes = [8, 1], strides = [1, 1]} : vector<8x16xf32> to vector<8x1xf32>
    %cst_166 = arith.constant 0.000000e+00 : f32
    %807 = vector.shape_cast %806 : vector<8x1xf32> to vector<8x1xf32>
    %808 = vector.broadcast %807 : vector<8x1xf32> to vector<8x16xf32>
    %809 = vector.broadcast %cst_166 : f32 to vector<8x16xf32>
    %810 = arith.select %805, %808, %809 : vector<8x16xi1>, vector<8x16xf32>
    %811 = vector.shape_cast %800 : vector<8x1xf32> to vector<8x1xf32>
    %812 = vector.broadcast %811 : vector<8x1xf32> to vector<8x16xf32>
    %813 = arith.select %799, %812, %810 : vector<8x16xi1>, vector<8x16xf32>
    %814 = arith.mulf %796, %813 : vector<8x16xf32>
    %cst_167 = arith.constant 0.000000e+00 : f32
    %815 = vector.broadcast %cst_167 : f32 to vector<8x16xf32>
    %816 = arith.select %786, %814, %815 : vector<8x16xi1>, vector<8x16xf32>
    %817 = arith.addf %774, %816 : vector<8x16xf32>
    %818 = vector.extract_strided_slice %165 {offsets = [0, 11], sizes = [8, 1], strides = [1, 1]} : vector<8x16xf32> to vector<8x1xf32>
    %819 = vector.extract_strided_slice %166 {offsets = [0, 11], sizes = [8, 1], strides = [1, 1]} : vector<8x16xf32> to vector<8x1xf32>
    %820 = vector.extract_strided_slice %167 {offsets = [0, 11], sizes = [8, 1], strides = [1, 1]} : vector<8x16xf32> to vector<8x1xf32>
    %821 = vector.broadcast %590 : vector<1x16xf32> to vector<8x16xf32>
    %822 = vector.broadcast %818 : vector<8x1xf32> to vector<8x16xf32>
    %823 = arith.cmpf oge, %821, %822 : vector<8x16xf32>
    %cst_168 = arith.constant 1.000000e+00 : f32
    %824 = vector.broadcast %cst_168 : f32 to vector<8x1xf32>
    %825 = arith.addf %818, %824 : vector<8x1xf32>
    %826 = vector.broadcast %590 : vector<1x16xf32> to vector<8x16xf32>
    %827 = vector.broadcast %825 : vector<8x1xf32> to vector<8x16xf32>
    %828 = arith.cmpf ole, %826, %827 : vector<8x16xf32>
    %829 = arith.andi %823, %828 : vector<8x16xi1>
    %830 = vector.broadcast %590 : vector<1x16xf32> to vector<8x16xf32>
    %831 = vector.broadcast %818 : vector<8x1xf32> to vector<8x16xf32>
    %832 = arith.cmpf oeq, %830, %831 : vector<8x16xf32>
    %cst_169 = arith.constant 1.000000e+00 : f32
    %833 = vector.broadcast %cst_169 : f32 to vector<8x1xf32>
    %834 = arith.subf %833, %820 : vector<8x1xf32>
    %835 = vector.shape_cast %834 : vector<8x1xf32> to vector<8x1xf32>
    %836 = vector.broadcast %835 : vector<8x1xf32> to vector<8x16xf32>
    %837 = vector.shape_cast %820 : vector<8x1xf32> to vector<8x1xf32>
    %838 = vector.broadcast %837 : vector<8x1xf32> to vector<8x16xf32>
    %839 = arith.select %832, %836, %838 : vector<8x16xi1>, vector<8x16xf32>
    %840 = vector.broadcast %591 : vector<1x16xf32> to vector<8x16xf32>
    %841 = vector.broadcast %819 : vector<8x1xf32> to vector<8x16xf32>
    %842 = arith.cmpf oeq, %840, %841 : vector<8x16xf32>
    %843 = vector.extract_strided_slice %216 {offsets = [0, 11], sizes = [8, 1], strides = [1, 1]} : vector<8x16xf32> to vector<8x1xf32>
    %cst_170 = arith.constant 1.000000e+00 : f32
    %844 = vector.broadcast %cst_170 : f32 to vector<8x1xf32>
    %845 = arith.addf %819, %844 : vector<8x1xf32>
    %846 = vector.broadcast %591 : vector<1x16xf32> to vector<8x16xf32>
    %847 = vector.broadcast %845 : vector<8x1xf32> to vector<8x16xf32>
    %848 = arith.cmpf oeq, %846, %847 : vector<8x16xf32>
    %849 = vector.extract_strided_slice %217 {offsets = [0, 11], sizes = [8, 1], strides = [1, 1]} : vector<8x16xf32> to vector<8x1xf32>
    %cst_171 = arith.constant 0.000000e+00 : f32
    %850 = vector.shape_cast %849 : vector<8x1xf32> to vector<8x1xf32>
    %851 = vector.broadcast %850 : vector<8x1xf32> to vector<8x16xf32>
    %852 = vector.broadcast %cst_171 : f32 to vector<8x16xf32>
    %853 = arith.select %848, %851, %852 : vector<8x16xi1>, vector<8x16xf32>
    %854 = vector.shape_cast %843 : vector<8x1xf32> to vector<8x1xf32>
    %855 = vector.broadcast %854 : vector<8x1xf32> to vector<8x16xf32>
    %856 = arith.select %842, %855, %853 : vector<8x16xi1>, vector<8x16xf32>
    %857 = arith.mulf %839, %856 : vector<8x16xf32>
    %cst_172 = arith.constant 0.000000e+00 : f32
    %858 = vector.broadcast %cst_172 : f32 to vector<8x16xf32>
    %859 = arith.select %829, %857, %858 : vector<8x16xi1>, vector<8x16xf32>
    %860 = arith.addf %817, %859 : vector<8x16xf32>
    %861 = vector.extract_strided_slice %145 {offsets = [64, 16], sizes = [16, 8], strides = [1, 1]} : vector<80x32xbf16> to vector<16x8xbf16>
    %862 = arith.truncf %860 : vector<8x16xf32> to vector<8x16xbf16>
    %cst_173 = arith.constant dense<0.000000e+00> : vector<8x8xf32>
    %863 = tpu.matmul %862, %861, %cst_173 {dimension_numbers = #tpu.dot_dimension_numbers<[1], [0], [0], [1], [0, 0, 1, 1], [], []>} : vector<8x16xbf16>, vector<16x8xbf16>, vector<8x8xf32> -> vector<8x8xf32>
    %864 = arith.addf %498, %863 : vector<8x8xf32>
    %cst_174 = arith.constant 0.000000e+00 : f32
    %865 = vector.broadcast %cst_174 : f32 to vector<8x16xf32>
    %866 = vector.extract_strided_slice %165 {offsets = [0, 14], sizes = [8, 1], strides = [1, 1]} : vector<8x16xf32> to vector<8x1xf32>
    %867 = vector.extract_strided_slice %166 {offsets = [0, 14], sizes = [8, 1], strides = [1, 1]} : vector<8x16xf32> to vector<8x1xf32>
    %868 = vector.extract_strided_slice %167 {offsets = [0, 14], sizes = [8, 1], strides = [1, 1]} : vector<8x16xf32> to vector<8x1xf32>
    %869 = vector.broadcast %590 : vector<1x16xf32> to vector<8x16xf32>
    %870 = vector.broadcast %866 : vector<8x1xf32> to vector<8x16xf32>
    %871 = arith.cmpf oge, %869, %870 : vector<8x16xf32>
    %cst_175 = arith.constant 1.000000e+00 : f32
    %872 = vector.broadcast %cst_175 : f32 to vector<8x1xf32>
    %873 = arith.addf %866, %872 : vector<8x1xf32>
    %874 = vector.broadcast %590 : vector<1x16xf32> to vector<8x16xf32>
    %875 = vector.broadcast %873 : vector<8x1xf32> to vector<8x16xf32>
    %876 = arith.cmpf ole, %874, %875 : vector<8x16xf32>
    %877 = arith.andi %871, %876 : vector<8x16xi1>
    %878 = vector.broadcast %590 : vector<1x16xf32> to vector<8x16xf32>
    %879 = vector.broadcast %866 : vector<8x1xf32> to vector<8x16xf32>
    %880 = arith.cmpf oeq, %878, %879 : vector<8x16xf32>
    %cst_176 = arith.constant 1.000000e+00 : f32
    %881 = vector.broadcast %cst_176 : f32 to vector<8x1xf32>
    %882 = arith.subf %881, %868 : vector<8x1xf32>
    %883 = vector.shape_cast %882 : vector<8x1xf32> to vector<8x1xf32>
    %884 = vector.broadcast %883 : vector<8x1xf32> to vector<8x16xf32>
    %885 = vector.shape_cast %868 : vector<8x1xf32> to vector<8x1xf32>
    %886 = vector.broadcast %885 : vector<8x1xf32> to vector<8x16xf32>
    %887 = arith.select %880, %884, %886 : vector<8x16xi1>, vector<8x16xf32>
    %888 = vector.broadcast %591 : vector<1x16xf32> to vector<8x16xf32>
    %889 = vector.broadcast %867 : vector<8x1xf32> to vector<8x16xf32>
    %890 = arith.cmpf oeq, %888, %889 : vector<8x16xf32>
    %891 = vector.extract_strided_slice %216 {offsets = [0, 14], sizes = [8, 1], strides = [1, 1]} : vector<8x16xf32> to vector<8x1xf32>
    %cst_177 = arith.constant 1.000000e+00 : f32
    %892 = vector.broadcast %cst_177 : f32 to vector<8x1xf32>
    %893 = arith.addf %867, %892 : vector<8x1xf32>
    %894 = vector.broadcast %591 : vector<1x16xf32> to vector<8x16xf32>
    %895 = vector.broadcast %893 : vector<8x1xf32> to vector<8x16xf32>
    %896 = arith.cmpf oeq, %894, %895 : vector<8x16xf32>
    %897 = vector.extract_strided_slice %217 {offsets = [0, 14], sizes = [8, 1], strides = [1, 1]} : vector<8x16xf32> to vector<8x1xf32>
    %cst_178 = arith.constant 0.000000e+00 : f32
    %898 = vector.shape_cast %897 : vector<8x1xf32> to vector<8x1xf32>
    %899 = vector.broadcast %898 : vector<8x1xf32> to vector<8x16xf32>
    %900 = vector.broadcast %cst_178 : f32 to vector<8x16xf32>
    %901 = arith.select %896, %899, %900 : vector<8x16xi1>, vector<8x16xf32>
    %902 = vector.shape_cast %891 : vector<8x1xf32> to vector<8x1xf32>
    %903 = vector.broadcast %902 : vector<8x1xf32> to vector<8x16xf32>
    %904 = arith.select %890, %903, %901 : vector<8x16xi1>, vector<8x16xf32>
    %905 = arith.mulf %887, %904 : vector<8x16xf32>
    %cst_179 = arith.constant 0.000000e+00 : f32
    %906 = vector.broadcast %cst_179 : f32 to vector<8x16xf32>
    %907 = arith.select %877, %905, %906 : vector<8x16xi1>, vector<8x16xf32>
    %908 = arith.addf %865, %907 : vector<8x16xf32>
    %909 = vector.extract_strided_slice %165 {offsets = [0, 15], sizes = [8, 1], strides = [1, 1]} : vector<8x16xf32> to vector<8x1xf32>
    %910 = vector.extract_strided_slice %166 {offsets = [0, 15], sizes = [8, 1], strides = [1, 1]} : vector<8x16xf32> to vector<8x1xf32>
    %911 = vector.extract_strided_slice %167 {offsets = [0, 15], sizes = [8, 1], strides = [1, 1]} : vector<8x16xf32> to vector<8x1xf32>
    %912 = vector.broadcast %590 : vector<1x16xf32> to vector<8x16xf32>
    %913 = vector.broadcast %909 : vector<8x1xf32> to vector<8x16xf32>
    %914 = arith.cmpf oge, %912, %913 : vector<8x16xf32>
    %cst_180 = arith.constant 1.000000e+00 : f32
    %915 = vector.broadcast %cst_180 : f32 to vector<8x1xf32>
    %916 = arith.addf %909, %915 : vector<8x1xf32>
    %917 = vector.broadcast %590 : vector<1x16xf32> to vector<8x16xf32>
    %918 = vector.broadcast %916 : vector<8x1xf32> to vector<8x16xf32>
    %919 = arith.cmpf ole, %917, %918 : vector<8x16xf32>
    %920 = arith.andi %914, %919 : vector<8x16xi1>
    %921 = vector.broadcast %590 : vector<1x16xf32> to vector<8x16xf32>
    %922 = vector.broadcast %909 : vector<8x1xf32> to vector<8x16xf32>
    %923 = arith.cmpf oeq, %921, %922 : vector<8x16xf32>
    %cst_181 = arith.constant 1.000000e+00 : f32
    %924 = vector.broadcast %cst_181 : f32 to vector<8x1xf32>
    %925 = arith.subf %924, %911 : vector<8x1xf32>
    %926 = vector.shape_cast %925 : vector<8x1xf32> to vector<8x1xf32>
    %927 = vector.broadcast %926 : vector<8x1xf32> to vector<8x16xf32>
    %928 = vector.shape_cast %911 : vector<8x1xf32> to vector<8x1xf32>
    %929 = vector.broadcast %928 : vector<8x1xf32> to vector<8x16xf32>
    %930 = arith.select %923, %927, %929 : vector<8x16xi1>, vector<8x16xf32>
    %931 = vector.broadcast %591 : vector<1x16xf32> to vector<8x16xf32>
    %932 = vector.broadcast %910 : vector<8x1xf32> to vector<8x16xf32>
    %933 = arith.cmpf oeq, %931, %932 : vector<8x16xf32>
    %934 = vector.extract_strided_slice %216 {offsets = [0, 15], sizes = [8, 1], strides = [1, 1]} : vector<8x16xf32> to vector<8x1xf32>
    %cst_182 = arith.constant 1.000000e+00 : f32
    %935 = vector.broadcast %cst_182 : f32 to vector<8x1xf32>
    %936 = arith.addf %910, %935 : vector<8x1xf32>
    %937 = vector.broadcast %591 : vector<1x16xf32> to vector<8x16xf32>
    %938 = vector.broadcast %936 : vector<8x1xf32> to vector<8x16xf32>
    %939 = arith.cmpf oeq, %937, %938 : vector<8x16xf32>
    %940 = vector.extract_strided_slice %217 {offsets = [0, 15], sizes = [8, 1], strides = [1, 1]} : vector<8x16xf32> to vector<8x1xf32>
    %cst_183 = arith.constant 0.000000e+00 : f32
    %941 = vector.shape_cast %940 : vector<8x1xf32> to vector<8x1xf32>
    %942 = vector.broadcast %941 : vector<8x1xf32> to vector<8x16xf32>
    %943 = vector.broadcast %cst_183 : f32 to vector<8x16xf32>
    %944 = arith.select %939, %942, %943 : vector<8x16xi1>, vector<8x16xf32>
    %945 = vector.shape_cast %934 : vector<8x1xf32> to vector<8x1xf32>
    %946 = vector.broadcast %945 : vector<8x1xf32> to vector<8x16xf32>
    %947 = arith.select %933, %946, %944 : vector<8x16xi1>, vector<8x16xf32>
    %948 = arith.mulf %930, %947 : vector<8x16xf32>
    %cst_184 = arith.constant 0.000000e+00 : f32
    %949 = vector.broadcast %cst_184 : f32 to vector<8x16xf32>
    %950 = arith.select %920, %948, %949 : vector<8x16xi1>, vector<8x16xf32>
    %951 = arith.addf %908, %950 : vector<8x16xf32>
    %952 = vector.extract_strided_slice %145 {offsets = [64, 24], sizes = [16, 8], strides = [1, 1]} : vector<80x32xbf16> to vector<16x8xbf16>
    %953 = arith.truncf %951 : vector<8x16xf32> to vector<8x16xbf16>
    %cst_185 = arith.constant dense<0.000000e+00> : vector<8x8xf32>
    %954 = tpu.matmul %953, %952, %cst_185 {dimension_numbers = #tpu.dot_dimension_numbers<[1], [0], [0], [1], [0, 0, 1, 1], [], []>} : vector<8x16xbf16>, vector<16x8xbf16>, vector<8x8xf32> -> vector<8x8xf32>
    %955 = arith.addf %589, %954 : vector<8x8xf32>
    %956 = tpu.concatenate %682, %773, %864, %955 in 1 : vector<8x8xf32>, vector<8x8xf32>, vector<8x8xf32>, vector<8x8xf32> -> vector<8x32xf32>
    %957 = arith.truncf %956 : vector<8x32xf32> to vector<8x32xbf16>
    %c0_186 = arith.constant 0 : index
    %c0_187 = arith.constant 0 : index
    %958 = vector.load %arg21[%c0_186, %c0_187] : memref<32x32xbf16, #tpu.memory_space<vmem>>, vector<32x32xbf16>
    %cst_188 = arith.constant dense<0.000000e+00> : vector<8x32xf32>
    %959 = tpu.matmul %957, %958, %cst_188 {dimension_numbers = #tpu.dot_dimension_numbers<[1], [0], [0], [1], [0, 0, 1, 1], [], []>} : vector<8x32xbf16>, vector<32x32xbf16>, vector<8x32xf32> -> vector<8x32xf32>
    %c0_189 = arith.constant 0 : index
    %c0_190 = arith.constant 0 : index
    %960 = vector.load %arg22[%c0_189, %c0_190] : memref<1x32xf32, #tpu.memory_space<vmem>>, vector<1x32xf32>
    %961 = vector.broadcast %960 : vector<1x32xf32> to vector<8x32xf32>
    %962 = arith.addf %959, %961 : vector<8x32xf32>
    %963 = arith.addf %132, %962 : vector<8x32xf32>
    %cst_191 = arith.constant dense<0.000000e+00> : vector<8xf32>
    %964 = vector.multi_reduction <add>, %963, %cst_191 [1] : vector<8x32xf32> to vector<8xf32>
    %965 = vector.shape_cast %964 : vector<8xf32> to vector<8x1xf32>
    %cst_192 = arith.constant 3.200000e+01 : f32
    %966 = vector.broadcast %cst_192 : f32 to vector<8x1xf32>
    %967 = arith.divf %965, %966 : vector<8x1xf32>
    %968 = vector.broadcast %967 : vector<8x1xf32> to vector<8x32xf32>
    %969 = arith.subf %963, %968 : vector<8x32xf32>
    %970 = arith.mulf %969, %969 : vector<8x32xf32>
    %cst_193 = arith.constant dense<0.000000e+00> : vector<8xf32>
    %971 = vector.multi_reduction <add>, %970, %cst_193 [1] : vector<8x32xf32> to vector<8xf32>
    %972 = vector.shape_cast %971 : vector<8xf32> to vector<8x1xf32>
    %cst_194 = arith.constant 3.200000e+01 : f32
    %973 = vector.broadcast %cst_194 : f32 to vector<8x1xf32>
    %974 = arith.divf %972, %973 : vector<8x1xf32>
    %975 = vector.broadcast %967 : vector<8x1xf32> to vector<8x32xf32>
    %976 = arith.subf %963, %975 : vector<8x32xf32>
    %cst_195 = arith.constant 9.99999974E-6 : f32
    %977 = vector.broadcast %cst_195 : f32 to vector<8x1xf32>
    %978 = arith.addf %974, %977 : vector<8x1xf32>
    %979 = math.rsqrt %978 : vector<8x1xf32>
    %980 = vector.broadcast %979 : vector<8x1xf32> to vector<8x32xf32>
    %981 = arith.mulf %976, %980 : vector<8x32xf32>
    %c0_196 = arith.constant 0 : index
    %c0_197 = arith.constant 0 : index
    %982 = vector.load %arg23[%c0_196, %c0_197] : memref<1x32xf32, #tpu.memory_space<vmem>>, vector<1x32xf32>
    %983 = vector.broadcast %982 : vector<1x32xf32> to vector<8x32xf32>
    %984 = arith.mulf %981, %983 : vector<8x32xf32>
    %c0_198 = arith.constant 0 : index
    %c0_199 = arith.constant 0 : index
    %985 = vector.load %arg24[%c0_198, %c0_199] : memref<1x32xf32, #tpu.memory_space<vmem>>, vector<1x32xf32>
    %986 = vector.broadcast %985 : vector<1x32xf32> to vector<8x32xf32>
    %987 = arith.addf %984, %986 : vector<8x32xf32>
    %988 = arith.truncf %987 : vector<8x32xf32> to vector<8x32xbf16>
    %c0_200 = arith.constant 0 : index
    %c0_201 = arith.constant 0 : index
    %989 = vector.load %arg25[%c0_200, %c0_201] : memref<32x64xbf16, #tpu.memory_space<vmem>>, vector<32x64xbf16>
    %cst_202 = arith.constant dense<0.000000e+00> : vector<8x64xf32>
    %990 = tpu.matmul %988, %989, %cst_202 {dimension_numbers = #tpu.dot_dimension_numbers<[1], [0], [0], [1], [0, 0, 1, 1], [], []>} : vector<8x32xbf16>, vector<32x64xbf16>, vector<8x64xf32> -> vector<8x64xf32>
    %c0_203 = arith.constant 0 : index
    %c0_204 = arith.constant 0 : index
    %991 = vector.load %arg26[%c0_203, %c0_204] : memref<1x64xf32, #tpu.memory_space<vmem>>, vector<1x64xf32>
    %992 = vector.broadcast %991 : vector<1x64xf32> to vector<8x64xf32>
    %993 = arith.addf %990, %992 : vector<8x64xf32>
    %cst_205 = arith.constant 0.000000e+00 : f32
    %994 = vector.broadcast %cst_205 : f32 to vector<8x64xf32>
    %995 = arith.maximumf %993, %994 : vector<8x64xf32>
    %996 = arith.truncf %995 : vector<8x64xf32> to vector<8x64xbf16>
    %c0_206 = arith.constant 0 : index
    %c0_207 = arith.constant 0 : index
    %997 = vector.load %arg27[%c0_206, %c0_207] : memref<64x32xbf16, #tpu.memory_space<vmem>>, vector<64x32xbf16>
    %cst_208 = arith.constant dense<0.000000e+00> : vector<8x32xf32>
    %998 = tpu.matmul %996, %997, %cst_208 {dimension_numbers = #tpu.dot_dimension_numbers<[1], [0], [0], [1], [0, 0, 1, 1], [], []>} : vector<8x64xbf16>, vector<64x32xbf16>, vector<8x32xf32> -> vector<8x32xf32>
    %c0_209 = arith.constant 0 : index
    %c0_210 = arith.constant 0 : index
    %999 = vector.load %arg28[%c0_209, %c0_210] : memref<1x32xf32, #tpu.memory_space<vmem>>, vector<1x32xf32>
    %1000 = vector.broadcast %999 : vector<1x32xf32> to vector<8x32xf32>
    %1001 = arith.addf %998, %1000 : vector<8x32xf32>
    %1002 = arith.addf %987, %1001 : vector<8x32xf32>
    %cst_211 = arith.constant dense<0.000000e+00> : vector<8xf32>
    %1003 = vector.multi_reduction <add>, %1002, %cst_211 [1] : vector<8x32xf32> to vector<8xf32>
    %1004 = vector.shape_cast %1003 : vector<8xf32> to vector<8x1xf32>
    %cst_212 = arith.constant 3.200000e+01 : f32
    %1005 = vector.broadcast %cst_212 : f32 to vector<8x1xf32>
    %1006 = arith.divf %1004, %1005 : vector<8x1xf32>
    %1007 = vector.broadcast %1006 : vector<8x1xf32> to vector<8x32xf32>
    %1008 = arith.subf %1002, %1007 : vector<8x32xf32>
    %1009 = arith.mulf %1008, %1008 : vector<8x32xf32>
    %cst_213 = arith.constant dense<0.000000e+00> : vector<8xf32>
    %1010 = vector.multi_reduction <add>, %1009, %cst_213 [1] : vector<8x32xf32> to vector<8xf32>
    %1011 = vector.shape_cast %1010 : vector<8xf32> to vector<8x1xf32>
    %cst_214 = arith.constant 3.200000e+01 : f32
    %1012 = vector.broadcast %cst_214 : f32 to vector<8x1xf32>
    %1013 = arith.divf %1011, %1012 : vector<8x1xf32>
    %1014 = vector.broadcast %1006 : vector<8x1xf32> to vector<8x32xf32>
    %1015 = arith.subf %1002, %1014 : vector<8x32xf32>
    %cst_215 = arith.constant 9.99999974E-6 : f32
    %1016 = vector.broadcast %cst_215 : f32 to vector<8x1xf32>
    %1017 = arith.addf %1013, %1016 : vector<8x1xf32>
    %1018 = math.rsqrt %1017 : vector<8x1xf32>
    %1019 = vector.broadcast %1018 : vector<8x1xf32> to vector<8x32xf32>
    %1020 = arith.mulf %1015, %1019 : vector<8x32xf32>
    %c0_216 = arith.constant 0 : index
    %c0_217 = arith.constant 0 : index
    %1021 = vector.load %arg29[%c0_216, %c0_217] : memref<1x32xf32, #tpu.memory_space<vmem>>, vector<1x32xf32>
    %1022 = vector.broadcast %1021 : vector<1x32xf32> to vector<8x32xf32>
    %1023 = arith.mulf %1020, %1022 : vector<8x32xf32>
    %c0_218 = arith.constant 0 : index
    %c0_219 = arith.constant 0 : index
    %1024 = vector.load %arg30[%c0_218, %c0_219] : memref<1x32xf32, #tpu.memory_space<vmem>>, vector<1x32xf32>
    %1025 = vector.broadcast %1024 : vector<1x32xf32> to vector<8x32xf32>
    %1026 = arith.addf %1023, %1025 : vector<8x32xf32>
    %c0_220 = arith.constant 0 : index
    %c0_221 = arith.constant 0 : index
    %c0_222 = arith.constant 0 : index
    %1027 = vector.load %arg31[%c0_220, %c0_221, %c0_222] : memref<1x8x32xf32, #tpu.memory_space<vmem>>, vector<1x8x32xf32>
    %1028 = vector.shape_cast %1027 : vector<1x8x32xf32> to vector<8x32xf32>
    %1029 = vector.shape_cast %1026 : vector<8x32xf32> to vector<1x8x32xf32>
    tpu.vector_store %arg31[%c0_220, %c0_221, %c0_222], %1029 {strides = array<i32>} : memref<1x8x32xf32, #tpu.memory_space<vmem>>, vector<1x8x32xf32>,
    return
  }
  func.func @transform_0(%arg0: i32) -> (i32, i32, i32) {
    %c0_i32 = arith.constant 0 : i32
    %c0_i32_0 = arith.constant 0 : i32
    %c0_i32_1 = arith.constant 0 : i32
    return %arg0, %c0_i32, %c0_i32_0 : i32, i32, i32
  }
  func.func @transform_1(%arg0: i32) -> (i32, i32, i32) {
    %c0_i32 = arith.constant 0 : i32
    %c0_i32_0 = arith.constant 0 : i32
    %c0_i32_1 = arith.constant 0 : i32
    return %arg0, %c0_i32, %c0_i32_0 : i32, i32, i32
  }
  func.func @transform_2(%arg0: i32) -> (i32, i32, i32) {
    %c0_i32 = arith.constant 0 : i32
    %c0_i32_0 = arith.constant 0 : i32
    %c0_i32_1 = arith.constant 0 : i32
    return %arg0, %c0_i32, %c0_i32_0 : i32, i32, i32
  }
  func.func @transform_3(%arg0: i32) -> (i32, i32, i32) {
    %c0_i32 = arith.constant 0 : i32
    %c0_i32_0 = arith.constant 0 : i32
    %c0_i32_1 = arith.constant 0 : i32
    return %arg0, %c0_i32, %c0_i32_0 : i32, i32, i32
  }
  func.func @transform_4(%arg0: i32) -> (i32, i32, i32) {
    %c0_i32 = arith.constant 0 : i32
    %c0_i32_0 = arith.constant 0 : i32
    %c0_i32_1 = arith.constant 0 : i32
    return %arg0, %c0_i32, %c0_i32_0 : i32, i32, i32
  }
  func.func @transform_5(%arg0: i32) -> (i32, i32, i32) {
    %c0_i32 = arith.constant 0 : i32
    %c0_i32_0 = arith.constant 0 : i32
    %c0_i32_1 = arith.constant 0 : i32
    return %arg0, %c0_i32, %c0_i32_0 : i32, i32, i32
  }
  func.func @transform_6(%arg0: i32) -> (i32, i32) {
    %c0_i32 = arith.constant 0 : i32
    %c0_i32_0 = arith.constant 0 : i32
    %c0_i32_1 = arith.constant 0 : i32
    return %c0_i32, %c0_i32_0 : i32, i32
  }
  func.func @transform_7(%arg0: i32) -> (i32, i32) {
    %c0_i32 = arith.constant 0 : i32
    %c0_i32_0 = arith.constant 0 : i32
    %c0_i32_1 = arith.constant 0 : i32
    return %c0_i32, %c0_i32_0 : i32, i32
  }
  func.func @transform_8(%arg0: i32) -> (i32, i32) {
    %c0_i32 = arith.constant 0 : i32
    %c0_i32_0 = arith.constant 0 : i32
    %c0_i32_1 = arith.constant 0 : i32
    return %c0_i32, %c0_i32_0 : i32, i32
  }
  func.func @transform_9(%arg0: i32) -> (i32, i32) {
    %c0_i32 = arith.constant 0 : i32
    %c0_i32_0 = arith.constant 0 : i32
    %c0_i32_1 = arith.constant 0 : i32
    return %c0_i32, %c0_i32_0 : i32, i32
  }
  func.func @transform_10(%arg0: i32) -> (i32, i32) {
    %c0_i32 = arith.constant 0 : i32
    %c0_i32_0 = arith.constant 0 : i32
    %c0_i32_1 = arith.constant 0 : i32
    return %c0_i32, %c0_i32_0 : i32, i32
  }
  func.func @transform_11(%arg0: i32) -> (i32, i32) {
    %c0_i32 = arith.constant 0 : i32
    %c0_i32_0 = arith.constant 0 : i32
    %c0_i32_1 = arith.constant 0 : i32
    return %c0_i32, %c0_i32_0 : i32, i32
  }
  func.func @transform_12(%arg0: i32) -> (i32, i32) {
    %c0_i32 = arith.constant 0 : i32
    %c0_i32_0 = arith.constant 0 : i32
    %c0_i32_1 = arith.constant 0 : i32
    return %c0_i32, %c0_i32_0 : i32, i32
  }
  func.func @transform_13(%arg0: i32) -> (i32, i32) {
    %c0_i32 = arith.constant 0 : i32
    %c0_i32_0 = arith.constant 0 : i32
    %c0_i32_1 = arith.constant 0 : i32
    return %c0_i32, %c0_i32_0 : i32, i32
  }
  func.func @transform_14(%arg0: i32) -> (i32, i32) {
    %c0_i32 = arith.constant 0 : i32
    %c0_i32_0 = arith.constant 0 : i32
    %c0_i32_1 = arith.constant 0 : i32
    return %c0_i32, %c0_i32_0 : i32, i32
  }
  func.func @transform_15(%arg0: i32) -> (i32, i32) {
    %c0_i32 = arith.constant 0 : i32
    %c0_i32_0 = arith.constant 0 : i32
    %c0_i32_1 = arith.constant 0 : i32
    return %c0_i32, %c0_i32_0 : i32, i32
  }
  func.func @transform_16(%arg0: i32) -> (i32, i32) {
    %c0_i32 = arith.constant 0 : i32
    %c0_i32_0 = arith.constant 0 : i32
    %c0_i32_1 = arith.constant 0 : i32
    return %c0_i32, %c0_i32_0 : i32, i32
  }
  func.func @transform_17(%arg0: i32) -> (i32, i32) {
    %c0_i32 = arith.constant 0 : i32
    %c0_i32_0 = arith.constant 0 : i32
    %c0_i32_1 = arith.constant 0 : i32
    return %c0_i32, %c0_i32_0 : i32, i32
  }
  func.func @transform_18(%arg0: i32) -> (i32, i32) {
    %c0_i32 = arith.constant 0 : i32
    %c0_i32_0 = arith.constant 0 : i32
    %c0_i32_1 = arith.constant 0 : i32
    return %c0_i32, %c0_i32_0 : i32, i32
  }
  func.func @transform_19(%arg0: i32) -> (i32, i32) {
    %c0_i32 = arith.constant 0 : i32
    %c0_i32_0 = arith.constant 0 : i32
    %c0_i32_1 = arith.constant 0 : i32
    return %c0_i32, %c0_i32_0 : i32, i32
  }
  func.func @transform_20(%arg0: i32) -> (i32, i32) {
    %c0_i32 = arith.constant 0 : i32
    %c0_i32_0 = arith.constant 0 : i32
    %c0_i32_1 = arith.constant 0 : i32
    return %c0_i32, %c0_i32_0 : i32, i32
  }
  func.func @transform_21(%arg0: i32) -> (i32, i32) {
    %c0_i32 = arith.constant 0 : i32
    %c0_i32_0 = arith.constant 0 : i32
    %c0_i32_1 = arith.constant 0 : i32
    return %c0_i32, %c0_i32_0 : i32, i32
  }
  func.func @transform_22(%arg0: i32) -> (i32, i32) {
    %c0_i32 = arith.constant 0 : i32
    %c0_i32_0 = arith.constant 0 : i32
    %c0_i32_1 = arith.constant 0 : i32
    return %c0_i32, %c0_i32_0 : i32, i32
  }
  func.func @transform_23(%arg0: i32) -> (i32, i32) {
    %c0_i32 = arith.constant 0 : i32
    %c0_i32_0 = arith.constant 0 : i32
    %c0_i32_1 = arith.constant 0 : i32
    return %c0_i32, %c0_i32_0 : i32, i32
  }
  func.func @transform_24(%arg0: i32) -> (i32, i32) {
    %c0_i32 = arith.constant 0 : i32
    %c0_i32_0 = arith.constant 0 : i32
    %c0_i32_1 = arith.constant 0 : i32
    return %c0_i32, %c0_i32_0 : i32, i32
  }
  func.func @transform_25(%arg0: i32) -> (i32, i32) {
    %c0_i32 = arith.constant 0 : i32
    %c0_i32_0 = arith.constant 0 : i32
    %c0_i32_1 = arith.constant 0 : i32
    return %c0_i32, %c0_i32_0 : i32, i32
  }
  func.func @transform_26(%arg0: i32) -> (i32, i32) {
    %c0_i32 = arith.constant 0 : i32
    %c0_i32_0 = arith.constant 0 : i32
    %c0_i32_1 = arith.constant 0 : i32
    return %c0_i32, %c0_i32_0 : i32, i32
  }
  func.func @transform_27(%arg0: i32) -> (i32, i32) {
    %c0_i32 = arith.constant 0 : i32
    %c0_i32_0 = arith.constant 0 : i32
    %c0_i32_1 = arith.constant 0 : i32
    return %c0_i32, %c0_i32_0 : i32, i32
  }
  func.func @transform_28(%arg0: i32) -> (i32, i32) {
    %c0_i32 = arith.constant 0 : i32
    %c0_i32_0 = arith.constant 0 : i32
    %c0_i32_1 = arith.constant 0 : i32
    return %c0_i32, %c0_i32_0 : i32, i32
  }
  func.func @transform_29(%arg0: i32) -> (i32, i32) {
    %c0_i32 = arith.constant 0 : i32
    %c0_i32_0 = arith.constant 0 : i32
    %c0_i32_1 = arith.constant 0 : i32
    return %c0_i32, %c0_i32_0 : i32, i32
  }
  func.func @transform_30(%arg0: i32) -> (i32, i32, i32) {
    %c0_i32 = arith.constant 0 : i32
    %c0_i32_0 = arith.constant 0 : i32
    %c0_i32_1 = arith.constant 0 : i32
    return %arg0, %c0_i32, %c0_i32_0 : i32, i32, i32
  }
  func.func @transform_31(%arg0: i32) -> (i32, i32, i32) {
    %c0_i32 = arith.constant 0 : i32
    %c0_i32_0 = arith.constant 0 : i32
    %c0_i32_1 = arith.constant 0 : i32
    return %arg0, %c0_i32, %c0_i32_0 : i32, i32, i32
  }
}

</mosaic_0001>

<bundles_post_ra>
// kernel: deformable_transformer_decoder_forward.2
= control target key start
LH: loop header
LB: loop body
LE: loop exit
PB: predicated region body
PF: predicated region fallthrough
CT: control target
= control target key end

     0   :  { %s4382_s6 = smov 1   ;;  %s4383_s10 = smov 2   ;;  %s5669_s0 = inlined_call_operand.smem [shape: u32[32], index: -1, kind: input, shape index: {}] }
   0x1   :  { %s4468_s5 = sld [smem:[%s5669_s0]]   ;;  %s4384_s14 = smov 3  }
   0x2   :  { %s4473_s9 = sld [smem:[%s5669_s0 + %s4382_s6]]   ;;  %s4385_s18 = smov 4  }
   0x3   :  { %s4478_s13 = sld [smem:[%s5669_s0 + %s4383_s10]]   ;;  %s4386_s22 = smov 5  }
   0x4   :  { %s4483_s17 = sld [smem:[%s5669_s0 + %s4384_s14]]   ;;  %s4387_s26 = smov 6  }
   0x5   :  { %s4488_s21 = sld [smem:[%s5669_s0 + %s4385_s18]]   ;;  %s4388_s30 = smov 7  }
   0x6   :  { %s4493_s25 = sld [smem:[%s5669_s0 + %s4386_s22]]   ;;  %s4389_s4 = smov 8  }
   0x7   :  { %s4498_s29 = sld [smem:[%s5669_s0 + %s4387_s26]]   ;;  %s4390_s10 = smov 9  }
   0x8   :  { %s4503_s3 = sld [smem:[%s5669_s0 + %s4388_s30]]   ;;  %s4391_s15 = smov 10  }
   0x9   :  { %5727 = sst [smem:[#allocation2_spill]] %s4478_s13  ;;  %s4392_s20 = smov 11  }
   0xa   :  { %s4508_s8 = sld [smem:[%s5669_s0 + %s4389_s4]]   ;;  %s4393_s26 = smov 12  }
   0xb   :  { %s4513_s14 = sld [smem:[%s5669_s0 + %s4390_s10]]   ;;  %s4394_s1 = smov 13  }
   0xc   :  { %5728 = sst [smem:[#allocation3_spill]] %s4493_s25  ;;  %s4395_s7 = smov 14  }
   0xd   :  { %5729 = sst [smem:[#allocation4_spill]] %s4498_s29  ;;  %s4397_s22 = smov 16  }
   0xe   :  { %5730 = sst [smem:[#allocation5_spill]] %s4503_s3  ;;  %s4398_s28 = smov 17  }
   0xf   :  { %s4518_s19 = sld [smem:[%s5669_s0 + %s4391_s15]]   ;;  %s4396_s15 = smov 15  }
  0x10   :  { %s4523_s24 = sld [smem:[%s5669_s0 + %s4392_s20]]  }
  0x11   :  { %s4528_s30 = sld [smem:[%s5669_s0 + %s4393_s26]]  }
  0x12   :  { %s4533_s6 = sld [smem:[%s5669_s0 + %s4394_s1]]  }
  0x13   :  { %s4538_s12 = sld [smem:[%s5669_s0 + %s4395_s7]]   ;;  %s4399_s7 = smov 18  }
  0x14   :  { %s4543_s20 = sld [smem:[%s5669_s0 + %s4396_s15]]   ;;  %s4400_s15 = smov 19  }
  0x15   :  { %s4548_s27 = sld [smem:[%s5669_s0 + %s4397_s22]]   ;;  %s4401_s22 = smov 20  }
  0x16   :  { %s4553_s4 = sld [smem:[%s5669_s0 + %s4398_s28]]   ;;  %s4402_s28 = smov 21  }
  0x17   :  { %s4558_s29 = sld [smem:[%s5669_s0 + %s4399_s7]]   ;;  %s4403_s7 = smov 22  }
  0x18   :  { %s4563_s3 = sld [smem:[%s5669_s0 + %s4400_s15]]   ;;  %s4404_s15 = smov 23  }
  0x19   :  { %s4568_s25 = sld [smem:[%s5669_s0 + %s4401_s22]]   ;;  %s4405_s22 = smov 24  }
  0x1a   :  { %s4578_s13 = sld [smem:[%s5669_s0 + %s4403_s7]]   ;;  %s4407_s7 = smov 26  }
  0x1c   :  { %5731 = sst [smem:[#allocation6_spill]] %s4553_s4 }
  0x1d   :  { %s4573_s4 = sld [smem:[%s5669_s0 + %s4402_s28]]   ;;  %s4406_s28 = smov 25  }
  0x1e   :  { %5732 = sst [smem:[#allocation7_spill]] %s4563_s3 }
  0x1f   :  { %5733 = sst [smem:[#allocation8_spill]] %s4568_s25 }
  0x20   :  { %5735 = sst [smem:[#allocation10_spill]] %s4578_s13 }
  0x21   :  { %s4583_s3 = sld [smem:[%s5669_s0 + %s4404_s15]]   ;;  %s4408_s15 = smov 27  }
  0x22   :  { %s4588_s25 = sld [smem:[%s5669_s0 + %s4405_s22]]   ;;  %s4409_s22 = smov 28  }
  0x23   :  { %5734 = sst [smem:[#allocation9_spill]] %s4573_s4 }
  0x24   :  { %s4593_s4 = sld [smem:[%s5669_s0 + %s4406_s28]]   ;;  %s4410_s28 = smov 29  }
  0x25   :  { %s4598_s13 = sld [smem:[%s5669_s0 + %s4407_s7]]   ;;  %s4411_s7 = smov 30  }
  0x27   :  { %5736 = sst [smem:[#allocation11_spill]] %s4583_s3 }
  0x28   :  { %5737 = sst [smem:[#allocation12_spill]] %s4588_s25 }
  0x29   :  { %s4603_s3 = sld [smem:[%s5669_s0 + %s4408_s15]]   ;;  %s4412_s15 = smov 31  }
  0x2a   :  { %5738 = sst [smem:[#allocation13_spill]] %s4593_s4 }
  0x2b   :  { %5739 = sst [smem:[#allocation14_spill]] %s4598_s13 }
  0x2c   :  { %s4608_s25 = sld [smem:[%s5669_s0 + %s4409_s22]]   ;;  %s4625_s22 = smov 0  }
  0x2d   :  { %s4613_s4 = sld [smem:[%s5669_s0 + %s4410_s28]]  }
  0x2e   :  { %s4618_s13 = sld [smem:[%s5669_s0 + %s4411_s7]]  }
  0x2f   :  { %5740 = sst [smem:[#allocation15_spill]] %s4603_s3 }
  0x30   :  { %s4623_s3 = sld [smem:[%s5669_s0 + %s4412_s15]]  }
  0x31 LB: > { %s3753_s23 = sadd.s32 4294967295, %s4380_s22   ;;  %p3757_p0 = scmp.ge.s32.totalorder %s4380_s22, 1  ;;  %s4380_s22 = sphi %s4625_s22, %s74_s22  }
  0x32   : > { %p918_p1 = scmp.lt.s32.totalorder %s4380_s22, 3 }
  0x34   : > { %p919_p2 = pnand %p3757_p0, %p918_p1 }
  0x36   : > { %922 = sbr.rel (%p919_p2) target bundleno = 4682 (0x124a), region = 140 }
  0x3b   : > { %v4313_v0 = vld [vmem:[%s4508_s8 + $0x8] sm:$0xff]   ;;  %v5698_v1 = vmov 0.0   ;;  %v4314_v2 = vld [vmem:[%s4508_s8] sm:$0xff]   ;;  %vm4414_vm0 = vmmov 0   ;;  %p1022_p3 = scmp.lt.s32.totalorder %s3753_s23, 1  ;;  %vm1084_vm1 = vcmask 261120  }
  0x3c   : > { %3909 = vmatprep.subr.bf16.mxu1 %v5698_v1  ;;  %3925 = vmatprep.subr.bf16.mxu0 %v5698_v1  ;;  %v3766_v7 = vld [vmem:[%s4513_s14] ss:$0 sm:$0xff]  ;;  %s4415_s7 = smov 120   ;;  %s4416_s10 = smov 96   ;;  %v4315_v14 = vld [vmem:[%s4518_s19 + $0x8] sm:$0xff]   ;;  %vm1200_vm2 = vcmask 64512  }
  0x3d   : > { %3910 = vmatpush3.bf16.msra.mxu1 %v4313_v0  ;;  %3913 = vmatprep.mubr.msk.bf16.mxu1 %vm4414_vm0, %v5698_v1  ;;  %s5871_s23 = smov (!%p1022_p3, %s3753_s23), 1  ;;  %s4417_s11 = smov 80   ;;  %v4316_v15 = vld [vmem:[%s4518_s19] sm:$0xff]   ;;  %vm1263_vm3 = vcmask 1043456   ;;  %vm1654_vm4 = vcmask 130048   ;;  %vm1656_vm5 = vcmask 195584  }
  0x3e   : > { %3911 = vmatprep.subr.bf16.mxu1 %v5698_v1  ;;  %3927 = vmatprep.mubr.msk.bf16.mxu0 %vm4414_vm0, %v5698_v1  ;;  %s4645_s0 = sshll.u32 %s5871_s23, 3  ;;  %s4113_s26 = smul.u32 40, %s5871_s23  ;;  %v3770_v55 = vld [vmem:[%s4523_s24] ss:$0 sm:$0xff]  ;;  %vm2069_vm6 = vcmask 326944   ;;  %vm2052_vm7 = vcmask 294144  }
  0x3f   : > { %s1025_s28 = scalar_lea.vmem %s4468_s5, %s4645_s0  ;;  %s1029_s1 = scalar_lea.vmem %s4473_s9, %s4645_s0  ;;  %vm2101_vm8 = vcmask 392544   ;;  %vm2085_vm9 = vcmask 359744   ;;  %vm2063_vm10 = vcmask 31744   ;;  %vm2135_vm11 = vcmask 97280  }
  0x40   : > { %v4653_v3 = vld [vmem:[%s1025_s28] sm:$0xff]  ;;  %s4658_s2 = scalar_lea.vmem %s4488_s21, %s4113_s26  ;;  %s4418_s15 = smov 88  }
  0x41   : > { %3912 = vmatpush3.bf16.msra.mxu1 %v4314_v2  ;;  %v4655_v4 = vld [vmem:[%s1029_s1] sm:$0xff]  ;;  %s4419_s16 = smov 72   ;;  %s5677_s18 = smov 112   ;;  %v1128_v16 = vpack.c.bf16 %v4653_v3, %v4653_v3 }
  0x42   : > { %3917 = vmatprep.subr.bf16.mxu1 %v5698_v1  ;;  %v1059_v5 = vadd.f32 %v4655_v4, %v4653_v3  ;;  %s5675_s26 = smov 104   ;;  %s5674_s28 = smov 8  }
  0x43   : > { %s4423_s1 = smov 16  }
  0x44   : > { %v1060_v6 = vpack.c.bf16 %v1059_v5, %v1059_v5 }
  0x46   : > { %3914 = vmatmul.mubr.msk.bf16.vlgmr.msra.gmra.mxu1 %vm1084_vm1, %v1060_v6 }
  0x47   : > { %3921 = vmatprep.mubr.msk.bf16.mxu1 %vm4414_vm0, %v5698_v1  ;;  %3918 = vmatpush3.bf16.msra.mxu1 %v4315_v14 }
  0x48   : > { %3919 = vmatprep.subr.bf16.mxu1 %v5698_v1 }
  0x4b   : > { %3920 = vmatpush3.bf16.msra.mxu1 %v4316_v15 }
  0x4c   : > { %3931 = vmatprep.subr.bf16.mxu1 %v5698_v1 }
  0x4e   : > { %3922 = vmatmul.mubr.msk.bf16.vlgmr.msra.gmra.mxu1 %vm1084_vm1, %v1128_v16 }
  0x4f   : > { %3933 = vmatprep.mubr.msk.bf16.mxu1 %vm4414_vm0, %v5698_v1 }
 0x106   : > { %v1122_v8 = vpop.f32.mrf.mxu1 }
 0x107   : > { %v1123_v9 = vadd.f32 %v3766_v7, %v1122_v8 }
 0x108   : > { %v3915_v10 = vpop.f32.mrf.mxu1 }
 0x109   : > { %v1195_v11 = vpack.c.bf16 %v1123_v9, %v1123_v9 }
 0x10a   : > { %v1125_v12 = vpop.f32.mrf.mxu1 }
 0x10b   : > { %1307 = vrot.lane.b32.xlu1 %v1195_v11, %s4415_s7  ;;  %1198 = vrot.lane.b32.xlu0 %v1195_v11, %s4416_s10 }
 0x10c   : > { %v3916_v13 = vpop.f32.mrf.mxu1 }
 0x10e   : > { %v1189_v52 = vpop.f32.mrf.mxu1 }
 0x10f   : > { %1421 = vrot.lane.b32.xlu1 %v1195_v11, %s4417_s11  ;;  %1309 = vrot.lane.b32.xlu0 %v1195_v11, %s4418_s15  ;;  %v1190_v57 = vadd.f32 %v3770_v55, %v1189_v52  ;;  %s5673_s11 = smov 24  }
 0x110   : > { %v3923_v53 = vpop.f32.mrf.mxu1 }
 0x111   : > { %v1196_v58 = vpack.c.bf16 %v1190_v57, %v1190_v57 }
 0x112   : > { %v1192_v54 = vpop.f32.mrf.mxu1 }
 0x113   : > { %1532 = vrot.lane.b32.xlu1 %v1195_v11, %s4419_s16  ;;  %1419 = vrot.lane.b32.xlu0 %v1195_v11, %s5677_s18  ;;  %v1265_v59 = vsel %vm1263_vm3, %v1196_v58, 0  ;;  %v4318_v54 = vld [vmem:[%s4528_s30] sm:$0xff]   ;;  %s5742_s16 = sld [smem:[#allocation7_spill]] }
 0x114   : > { %v3924_v56 = vpop.f32.mrf.mxu1  ;;  %3932 = vmatpush3.bf16.msra.mxu1 %v1265_v59 }
 0x115   : > { %3943 = vmatprep.subr.bf16.mxu1 %v5698_v1 }
 0x117   : > { %1530 = vrot.lane.b32.xlu0 %v1195_v11, %s5675_s26 }
 0x17d   : > { %v1199_v17 = vpop.permute.xlu0 %1198  ;;  %v1308_v20 = vpop.permute.xlu1 %1307 }
 0x17e   : > { %v1205_v18 = vsel %vm1200_vm2, %v1199_v17, 0 }
 0x17f   : > { %3926 = vmatpush3.bf16.xpose.msra.mxu0 %v1205_v18 }
 0x180   : > { %3937 = vmatprep.subr.bf16.mxu0 %v5698_v1 }
 0x181   : > { %v1310_v19 = vpop.permute.xlu0 %1309  ;;  %v1422_v22 = vpop.permute.xlu1 %1421 }
 0x182   : > { %v1315_v21 = vsel %vm1200_vm2, %v1310_v19, 0  ;;  %v1427_v23 = vsel %vm1200_vm2, %v1422_v22, 0 }
 0x185   : > { %v1533_v24 = vpop.permute.xlu1 %1532  ;;  %v1420_v25 = vpop.permute.xlu0 %1419 }
 0x186   : > { %3928 = vmatmul.mubr.msk.bf16.vlgmr.msra.gmra.mxu0 %vm1200_vm2, %v1195_v11  ;;  %v1538_v26 = vsel %vm1200_vm2, %v1533_v24, 0 }
 0x187   : > { %3938 = vmatpush3.bf16.xpose.msra.mxu0 %v1315_v21  ;;  %3939 = vmatprep.mubr.msk.bf16.mxu0 %vm4414_vm0, %v5698_v1 }
 0x188   : > { %3949 = vmatprep.subr.bf16.mxu0 %v5698_v1 }
 0x189   : > { %v1531_v27 = vpop.permute.xlu0 %1530 }
 0x18e   : > { %3940 = vmatmul.mubr.msk.bf16.vlgmr.msra.gmra.mxu0 %vm1200_vm2, %v1308_v20 }
 0x18f   : > { %3950 = vmatpush3.bf16.xpose.msra.mxu0 %v1427_v23  ;;  %3951 = vmatprep.mubr.msk.bf16.mxu0 %vm4414_vm0, %v5698_v1 }
 0x190   : > { %3961 = vmatprep.subr.bf16.mxu0 %v5698_v1 }
 0x196   : > { %3952 = vmatmul.mubr.msk.bf16.vlgmr.msra.gmra.mxu0 %vm1200_vm2, %v1420_v25 }
 0x197   : > { %3962 = vmatpush3.bf16.xpose.msra.mxu0 %v1538_v26  ;;  %3963 = vmatprep.mubr.msk.bf16.mxu0 %vm4414_vm0, %v5698_v1 }
 0x198   : > { %3973 = vmatprep.subr.bf16.mxu0 %v5698_v1 }
 0x19e   : > { %3964 = vmatmul.mubr.msk.bf16.vlgmr.msra.gmra.mxu0 %vm1200_vm2, %v1531_v27 }
 0x19f   : > { %3977 = vmatprep.mubr.msk.bf16.mxu0 %vm4414_vm0, %v5698_v1 }
 0x246   : > { %v1241_v28 = vpop.f32.mrf.mxu0 }
 0x247   : > { %v1247_v29 = vmul.f32 0.35355338, %v1241_v28 }
 0x248   : > { %v3929_v30 = vpop.f32.mrf.mxu0 }
 0x249   : > { %v1248_v31 = vsel %vm1200_vm2, %v1247_v29, -inf }
 0x24a   : > { %1249 = vmax.xlane.f32.xlu1 %v1248_v31  ;;  %v1244_v32 = vpop.f32.mrf.mxu0 }
 0x24c   : > { %v3930_v33 = vpop.f32.mrf.mxu0 }
 0x24e   : > { %v1351_v34 = vpop.f32.mrf.mxu0 }
 0x24f   : > { %v1357_v35 = vmul.f32 0.35355338, %v1351_v34 }
 0x250   : > { %v3941_v36 = vpop.f32.mrf.mxu0 }
 0x251   : > { %v1358_v37 = vsel %vm1200_vm2, %v1357_v35, -inf }
 0x252   : > { %1359 = vmax.xlane.f32.xlu0 %v1358_v37  ;;  %v1354_v38 = vpop.f32.mrf.mxu0 }
 0x254   : > { %v3942_v39 = vpop.f32.mrf.mxu0 }
 0x256   : > { %v1463_v40 = vpop.f32.mrf.mxu0 }
 0x257   : > { %v1469_v41 = vmul.f32 0.35355338, %v1463_v40 }
 0x258   : > { %v3953_v42 = vpop.f32.mrf.mxu0 }
 0x259   : > { %v1470_v43 = vsel %vm1200_vm2, %v1469_v41, -inf }
 0x25a   : > { %1471 = vmax.xlane.f32.xlu0 %v1470_v43  ;;  %v1466_v44 = vpop.f32.mrf.mxu0 }
 0x25b   : > { %v4317_v44 = vld [vmem:[%s4528_s30 + $0x8] sm:$0xff]  }
 0x25c   : > { %v3954_v45 = vpop.f32.mrf.mxu0  ;;  %3974 = vmatpush3.bf16.msra.mxu0 %v4317_v44 }
 0x25d   : > { %3975 = vmatprep.subr.bf16.mxu0 %v5698_v1 }
 0x25e   : > { %v1574_v46 = vpop.f32.mrf.mxu0 }
 0x25f   : > { %v1580_v47 = vmul.f32 0.35355338, %v1574_v46 }
 0x260   : > { %v3965_v48 = vpop.f32.mrf.mxu0  ;;  %3976 = vmatpush3.bf16.msra.mxu0 %v4318_v54  ;;  %v4327_v54 = vld [vmem:[%s4658_s2 + $0x20] sm:$0xff]  }
 0x261   : > { %v1581_v49 = vsel %vm1200_vm2, %v1580_v47, -inf  ;;  %4005 = vmatprep.subr.bf16.mxu0 %v5698_v1 }
 0x262   : > { %1582 = vmax.xlane.f32.xlu1 %v1581_v49  ;;  %v1577_v50 = vpop.f32.mrf.mxu0 }
 0x264   : > { %v3966_v51 = vpop.f32.mrf.mxu0 }
 0x2d3   : > { %v1250_v60 = vpop.xlane.xlu1 %1249 }
 0x2d4   : > { %v1251_v61 = vsub.f32 %v1247_v29, %v1250_v60 }
 0x2d6   : > { %v1252_v62 = vmul.f32 1.442695, %v1251_v61 }
 0x2d8   : > { %4336 = vpow2.f32 %v1252_v62 }
 0x2db   : > { %v1360_v63 = vpop.xlane.xlu0 %1359 }
 0x2dc   : > { %v1361_v0 = vsub.f32 %v1357_v35, %v1360_v63 }
 0x2de   : > { %v1362_v2 = vmul.f32 1.442695, %v1361_v0 }
 0x2e0   : > { %4338 = vpow2.f32 %v1362_v2 }
 0x2e3   : > { %v1472_v5 = vpop.xlane.xlu0 %1471 }
 0x2e4   : > { %v1473_v6 = vsub.f32 %v1469_v41, %v1472_v5  ;;  %v3782_v5 = vld [vmem:[%s4533_s6] ss:$0 sm:$0xff] }
 0x2e5   : > { %v4337_v7 = vpop.eup %4336 }
 0x2e6   : > { %v1474_v8 = vmul.f32 1.442695, %v1473_v6  ;;  %v1254_v9 = vsel %vm1200_vm2, %v4337_v7, 0.0 }
 0x2e7   : > { %1255 = vadd.xlane.f32.xlu0 %v1254_v9 }
 0x2e8   : > { %4340 = vpow2.f32 %v1474_v8 }
 0x2eb   : > { %v1583_v14 = vpop.xlane.xlu1 %1582 }
 0x2ec   : > { %v1584_v15 = vsub.f32 %v1580_v47, %v1583_v14 }
 0x2ed   : > { %v4339_v10 = vpop.eup %4338 }
 0x2ee   : > { %v1364_v11 = vsel %vm1200_vm2, %v4339_v10, 0.0  ;;  %v1585_v16 = vmul.f32 1.442695, %v1584_v15 }
 0x2ef   : > { %1365 = vadd.xlane.f32.xlu1 %v1364_v11 }
 0x2f0   : > { %4342 = vpow2.f32 %v1585_v16 }
 0x2f5   : > { %v4341_v12 = vpop.eup %4340 }
 0x2f6   : > { %v1476_v13 = vsel %vm1200_vm2, %v4341_v12, 0.0 }
 0x2f7   : > { %1477 = vadd.xlane.f32.xlu0 %v1476_v13 }
 0x2fd   : > { %v4343_v17 = vpop.eup %4342 }
 0x2fe   : > { %v1587_v18 = vsel %vm1200_vm2, %v4343_v17, 0.0 }
 0x300   : > { %1482 = vrot.lane.b32.xlu1 %v1196_v58, %s5677_s18  ;;  %s1055_s18 = scalar_lea.vmem %s4623_s3, %s4645_s0 }
 0x30d   : > { %1371 = vrot.lane.b32.xlu0 %v1196_v58, %s4415_s7 }
 0x324   : > { %1588 = vadd.xlane.f32.xlu1 %v1587_v18  ;;  %v4319_v18 = vld [vmem:[%s4558_s29 + $0x8] sm:$0xff]  }
 0x335   : > { %1593 = vrot.lane.b32.xlu1 %v1196_v58, %s5675_s26 }
 0x370   : > { %v1256_v19 = vpop.xlane.xlu0 %1255 }
 0x371   : > { %4344 = vrcp.f32 %v1256_v19  ;;  %v4320_v19 = vld [vmem:[%s4558_s29] sm:$0xff]  }
 0x378   : > { %v1366_v20 = vpop.xlane.xlu1 %1365 }
 0x379   : > { %4346 = vrcp.f32 %v1366_v20 }
 0x37c   : > { %v1483_v29 = vpop.permute.xlu1 %1482 }
 0x37d   : > { %v1488_v31 = vsel %vm1263_vm3, %v1483_v29, 0 }
 0x37e   : > { %v4345_v21 = vpop.eup %4344 }
 0x37f   : > { %v1258_v22 = vmul.f32 %v4345_v21, %v4337_v7 }
 0x380   : > { %v1478_v23 = vpop.xlane.xlu0 %1477 }
 0x381   : > { %4348 = vrcp.f32 %v1478_v23  ;;  %v1259_v24 = vpack.c.bf16 %v1258_v22, %v1258_v22  ;;  %v3786_v23 = vld [vmem:[%s4538_s12] ss:$0 sm:$0xff] }
 0x383   : > { %3934 = vmatmul.mubr.msk.bf16.vlgmr.msra.gmra.mxu1 %vm1200_vm2, %v1259_v24 }
 0x384   : > { %v1372_v25 = vpop.permute.xlu0 %1371  ;;  %3945 = vmatprep.mubr.msk.bf16.mxu1 %vm4414_vm0, %v5698_v1 }
 0x385   : > { %v1377_v26 = vsel %vm1263_vm3, %v1372_v25, 0  ;;  %v3787_v25 = vld [vmem:[%s4543_s20] ss:$0 sm:$0xff] }
 0x386   : > { %v4347_v27 = vpop.eup %4346  ;;  %3944 = vmatpush3.bf16.msra.mxu1 %v1377_v26 }
 0x387   : > { %3955 = vmatprep.subr.bf16.mxu1 %v5698_v1  ;;  %v1368_v28 = vmul.f32 %v4347_v27, %v4339_v10 }
 0x389   : > { %v1369_v30 = vpack.c.bf16 %v1368_v28, %v1368_v28 }
 0x38b   : > { %3946 = vmatmul.mubr.msk.bf16.vlgmr.msra.gmra.mxu1 %vm1200_vm2, %v1369_v30  ;;  %v4425_v30 = vmov 2  }
 0x38c   : > { %3956 = vmatpush3.bf16.msra.mxu1 %v1488_v31  ;;  %3957 = vmatprep.mubr.msk.bf16.mxu1 %vm4414_vm0, %v5698_v1  ;;  %v5691_v31 = vmov 18  }
 0x38d   : > { %3967 = vmatprep.subr.bf16.mxu1 %v5698_v1  ;;  %4201 = vset.pattern.permute.xlu1 %v4425_v30 }
 0x38e   : > { %v4349_v32 = vpop.eup %4348  ;;  %4202 = vset.pattern.permute.xlu0 %v5691_v31 }
 0x38f   : > { %v1480_v33 = vmul.f32 %v4349_v32, %v4341_v12  ;;  %v4321_v32 = vld [vmem:[%s4548_s27 + $0x8] sm:$0xff]  }
 0x391   : > { %v1481_v34 = vpack.c.bf16 %v1480_v33, %v1480_v33  ;;  %v4323_v33 = vld [vmem:[%s4658_s2] sm:$0xff]  }
 0x393   : > { %3958 = vmatmul.mubr.msk.bf16.vlgmr.msra.gmra.mxu1 %vm1200_vm2, %v1481_v34  ;;  %v4324_v34 = vld [vmem:[%s4658_s2 + $0x8] sm:$0xff]  }
 0x394   : > { %3969 = vmatprep.mubr.msk.bf16.mxu1 %vm4414_vm0, %v5698_v1 }
 0x3ad   : > { %v1589_v35 = vpop.xlane.xlu1 %1588 }
 0x3ae   : > { %4350 = vrcp.f32 %v1589_v35  ;;  %v3801_v35 = vld [vmem:[%s5742_s16] ss:$0 sm:$0xff]  ;;  %s5800_s16 = sld [smem:[#allocation4_spill]] }
 0x3b1   : > { %v1594_v36 = vpop.permute.xlu1 %1593 }
 0x3b2   : > { %v1599_v37 = vsel %vm1263_vm3, %v1594_v36, 0 }
 0x3b3   : > { %3968 = vmatpush3.bf16.msra.mxu1 %v1599_v37 }
 0x3b4   : > { %3981 = vmatprep.subr.bf16.mxu1 %v5698_v1 }
 0x3bb   : > { %v4351_v38 = vpop.eup %4350 }
 0x3bc   : > { %v1591_v39 = vmul.f32 %v4351_v38, %v4343_v17 }
 0x3be   : > { %v1592_v40 = vpack.c.bf16 %v1591_v39, %v1591_v39 }
 0x3c0   : > { %3970 = vmatmul.mubr.msk.bf16.vlgmr.msra.gmra.mxu1 %vm1200_vm2, %v1592_v40 }
 0x3c1   : > { %3985 = vmatprep.mubr.msk.bf16.mxu1 %vm4414_vm0, %v5698_v1  ;;  %3982 = vmatpush3.bf16.msra.mxu1 %v4321_v32 }
 0x3c2   : > { %3983 = vmatprep.subr.bf16.mxu1 %v5698_v1 }
 0x443   : > { %v1301_v41 = vpop.f32.mrf.mxu1 }
 0x445   : > { %v3935_v42 = vpop.f32.mrf.mxu1 }
 0x447   : > { %v1304_v43 = vpop.f32.mrf.mxu1 }
 0x449   : > { %v3936_v45 = vpop.f32.mrf.mxu1 }
 0x44b   : > { %v1413_v46 = vpop.f32.mrf.mxu1 }
 0x44c   : > { %1642 = vrot.lane.b32.xlu0 %v1413_v46, %s5674_s28  ;;  %s1037_s28 = scalar_lea.vmem %s4483_s17, %s4645_s0 }
 0x44d   : > { %v3947_v47 = vpop.f32.mrf.mxu1  ;;  %v2046_v36 = vld [vmem:[%s1037_s28] sm:$0xff]  ;;  %s4114_s28 = smul.u32 80, %s5871_s23  ;;  %s5762_s23 = smov 112  }
 0x44f   : > { %v1416_v48 = vpop.f32.mrf.mxu1 }
 0x451   : > { %v3948_v49 = vpop.f32.mrf.mxu1 }
 0x452   : > { %v4325_v49 = vld [vmem:[%s4658_s2 + $0x10] sm:$0xff]  }
 0x453   : > { %v1524_v50 = vpop.f32.mrf.mxu1 }
 0x454   : > { %1646 = vrot.lane.b32.xlu1 %v1524_v50, %s4423_s1 }
 0x455   : > { %v3959_v51 = vpop.f32.mrf.mxu1 }
 0x456   : > { %v4326_v51 = vld [vmem:[%s4658_s2 + $0x18] sm:$0xff]   ;;  %s4429_s2 = smov 92  }
 0x457   : > { %v1527_v52 = vpop.f32.mrf.mxu1 }
 0x458   : > { %v5692_v52 = vmov 19  }
 0x459   : > { %v3960_v53 = vpop.f32.mrf.mxu1 }
 0x480   : > { %v1635_v55 = vpop.f32.mrf.mxu1 }
 0x481   : > { %1650 = vrot.lane.b32.xlu0 %v1635_v55, %s5673_s11  ;;  %s5743_s11 = sld [smem:[#allocation2_spill]]  ;;  %v4428_v55 = vmov 3  }
 0x482   : > { %v3971_v56 = vpop.f32.mrf.mxu1 }
 0x484   : > { %v1638_v57 = vpop.f32.mrf.mxu1 }
 0x486   : > { %v3972_v58 = vpop.f32.mrf.mxu1 }
 0x487   : > { %s1033_s26 = scalar_lea.vmem %s5743_s11, %s4645_s0 }
 0x488   : > { %v2045_v39 = vld [vmem:[%s1033_s26] sm:$0xff]  ;;  %s5744_s26 = sld [smem:[#allocation6_spill]] }
 0x4be   : > { %v1643_v59 = vpop.permute.xlu0 %1642 }
 0x4bf   : > { %v1653_v61 = vsel %vm1200_vm2, %v1301_v41, %v1643_v59 }
 0x4c6   : > { %v1647_v60 = vpop.permute.xlu1 %1646 }
 0x4c7   : > { %v1655_v62 = vsel %vm1654_vm4, %v1653_v61, %v1647_v60 }
 0x4f3   : > { %v1651_v63 = vpop.permute.xlu0 %1650 }
 0x4f4   : > { %v1657_v0 = vsel %vm1656_vm5, %v1655_v62, %v1651_v63 }
 0x4f5   : > { %v1658_v2 = vpack.c.bf16 %v1657_v0, %v1657_v0 }
 0x4f7   : > { %3978 = vmatmul.mubr.msk.bf16.vlgmr.msra.gmra.mxu0 %vm1084_vm1, %v1658_v2 }
 0x4f8   : > { %4009 = vmatprep.mubr.msk.bf16.mxu0 %vm4414_vm0, %v5698_v1  ;;  %4006 = vmatpush3.bf16.msra.mxu0 %v4319_v18 }
 0x4f9   : > { %4007 = vmatprep.subr.bf16.mxu0 %v5698_v1 }
 0x4fc   : > { %4008 = vmatpush3.bf16.msra.mxu0 %v4320_v19 }
 0x4fd   : > { %4013 = vmatprep.subr.bf16.mxu0 %v5698_v1 }
 0x5b7   : > { %v1719_v6 = vpop.f32.mrf.mxu0 }
 0x5b8   : > { %v1720_v7 = vadd.f32 %v3782_v5, %v1719_v6 }
 0x5b9   : > { %v3979_v8 = vpop.f32.mrf.mxu0 }
 0x5ba   : > { %v1725_v9 = vadd.f32 %v1720_v7, %v4653_v3 }
 0x5bb   : > { %v1722_v10 = vpop.f32.mrf.mxu0 }
 0x5bc   : > { %v1726_v11 = vsel %vm1084_vm1, %v1725_v9, 0.0 }
 0x5bd   : > { %1727 = vadd.xlane.f32.xlu1 %v1726_v11  ;;  %v3980_v12 = vpop.f32.mrf.mxu0 }
 0x646   : > { %v1728_v13 = vpop.xlane.xlu1 %1727 }
 0x647   : > { %v1730_v14 = vmul.f32 0.03125, %v1728_v13  ;;  %v5700_v13 = vmov 22  }
 0x649   : > { %v1731_v15 = vsub.f32 %v1725_v9, %v1730_v14  ;;  %v5696_v14 = vmov 23  }
 0x64b   : > { %v1732_v16 = vmul.f32 %v1731_v15, %v1731_v15 }
 0x64d   : > { %v1733_v17 = vsel %vm1084_vm1, %v1732_v16, 0.0  ;;  %v4434_v16 = vmov 7  }
 0x64e   : > { %1734 = vadd.xlane.f32.xlu0 %v1733_v17  ;;  %v4860_v17 = vld [vmem:[%s5744_s26] ss:$0 sm:$0xff]  ;;  %s5860_s26 = smov 8  }
 0x6d7   : > { %v1735_v3 = vpop.xlane.xlu0 %1734 }
 0x6d8   : > { %v1736_v20 = vmul.f32 0.03125, %v1735_v3 }
 0x6da   : > { %v1737_v21 = vadd.f32 1e-05, %v1736_v20 }
 0x6dc   : > { %4352 = vrsqrt.f32 %v1737_v21 }
 0x6e9   : > { %v4353_v22 = vpop.eup %4352 }
 0x6ea   : > { %v1739_v24 = vmul.f32 %v4353_v22, %v1731_v15  ;;  %v4433_v15 = vmov 6  }
 0x6ec   : > { %v1747_v26 = vmul.f32 %v3786_v23, %v1739_v24 }
 0x6ee   : > { %v4755_v27 = vadd.f32 %v3787_v25, %v1747_v26 }
 0x6f0   : > { %5741 = vst [vmem:[#allocation16_spill] sm:$0xff] %v4755_v27  ;;  %v1756_v28 = vadd.f32 %v4755_v27, %v4655_v4  ;;  %v4322_v4 = vld [vmem:[%s4548_s27] sm:$0xff]  }
 0x6f1   : > { %3984 = vmatpush3.bf16.msra.mxu1 %v4322_v4 }
 0x6f2   : > { %v1978_v29 = vpack.c.bf16 %v1756_v28, %v1756_v28  ;;  %4037 = vmatprep.subr.bf16.mxu1 %v5698_v1 }
 0x6f4   : > { %4010 = vmatmul.mubr.msk.bf16.vlgmr.msra.gmra.mxu0 %vm1084_vm1, %v1978_v29  ;;  %3986 = vmatmul.mubr.msk.bf16.vlgmr.msra.gmra.mxu1 %vm1084_vm1, %v4323_v33 }
 0x6f5   : > { %4015 = vmatprep.mubr.msk.bf16.mxu0 %vm4414_vm0, %v5698_v1  ;;  %3989 = vmatprep.mubr.msk.bf16.mxu1 %vm4414_vm0, %v5698_v1 }
 0x6fc   : > { %3990 = vmatmul.mubr.msk.bf16.gmra.mxu1 %vm1084_vm1, %v4324_v34 }
 0x6fd   : > { %3993 = vmatprep.mubr.msk.bf16.mxu1 %vm4414_vm0, %v5698_v1 }
 0x704   : > { %3994 = vmatmul.mubr.msk.bf16.gmra.mxu1 %vm1084_vm1, %v4325_v49 }
 0x705   : > { %3997 = vmatprep.mubr.msk.bf16.mxu1 %vm4414_vm0, %v5698_v1 }
 0x70c   : > { %3998 = vmatmul.mubr.msk.bf16.gmra.mxu1 %vm1084_vm1, %v4326_v51 }
 0x70d   : > { %4001 = vmatprep.mubr.msk.bf16.mxu1 %vm4414_vm0, %v5698_v1 }
 0x714   : > { %4002 = vmatmul.mubr.msk.bf16.gmra.mxu1 %vm1084_vm1, %v4327_v54 }
 0x715   : > { %4045 = vmatprep.mubr.msk.bf16.mxu1 %vm4414_vm0, %v5698_v1 }
 0x7b4   : > { %v2039_v37 = vpop.f32.mrf.mxu0  ;;  %v1864_v18 = vpop.f32.mrf.mxu1 }
 0x7b5   : > { %v4781_v38 = vadd.f32 %v3801_v35, %v2039_v37  ;;  %v4863_v19 = vadd.f32 %v4860_v17, %v1864_v18  ;;  %v4435_v35 = vmov 0  }
 0x7b6   : > { %v4011_v40 = vpop.f32.mrf.mxu0  ;;  %v3987_v3 = vpop.f32.mrf.mxu1 }
 0x7b7   : > { %v2047_v41 = vmul.f32 %v2046_v36, %v4781_v38  ;;  %v2070_v42 = vsel %vm2069_vm6, %v4781_v38, -inf  ;;  %v2053_v43 = vsel %vm2052_vm7, %v4781_v38, -inf  ;;  %v2102_v47 = vsel %vm2101_vm8, %v4781_v38, -inf }
 0x7b8   : > { %2071 = vmax.xlane.f32.xlu1 %v2070_v42  ;;  %2054 = vmax.xlane.f32.xlu0 %v2053_v43  ;;  %v2042_v44 = vpop.f32.mrf.mxu0  ;;  %v2086_v48 = vsel %vm2085_vm9, %v4781_v38, -inf  ;;  %v1867_v20 = vpop.f32.mrf.mxu1 }
 0x7b9   : > { %v2048_v45 = vadd.f32 %v2047_v41, %v2045_v39  ;;  %v4867_v21 = vadd.f32 %v4860_v17, %v1867_v20  ;;  %v5685_v20 = vmov 26  }
 0x7ba   : > { %v4012_v46 = vpop.f32.mrf.mxu0  ;;  %v3988_v22 = vpop.f32.mrf.mxu1 }
 0x7bb   : > { %2049 = vst.msk [vmem:[%s1055_s18] sm:$0xff] %vm1084_vm1, %v2048_v45  ;;  %v4795_v50 = vfloor.f32 %v2048_v45  ;;  %s4430_s18 = smov 84  }
 0x7bc   : > { %2103 = vmax.xlane.f32.xlu1 %v2102_v47  ;;  %2087 = vmax.xlane.f32.xlu0 %v2086_v48  ;;  %v1872_v23 = vpop.f32.mrf.mxu1 }
 0x7bd   : > { %v4806_v53 = vadd.f32 1.0, %v4795_v50  ;;  %v4815_v56 = vsub.f32 %v2048_v45, %v4795_v50  ;;  %v4871_v24 = vadd.f32 %v4860_v17, %v1872_v23  ;;  %v4437_v23 = vmov 11  }
 0x7be   : > { %v3991_v25 = vpop.f32.mrf.mxu1 }
 0x7bf   : > { %v4822_v57 = vsub.f32 1.0, %v4815_v56  ;;  %v5683_v25 = vmov 27  }
 0x7c0   : > { %v1875_v26 = vpop.f32.mrf.mxu1 }
 0x7c1   : > { %v4876_v28 = vadd.f32 %v4860_v17, %v1875_v26 }
 0x7c2   : > { %v3992_v29 = vpop.f32.mrf.mxu1 }
 0x7cd   : > { %2522 = vperm.xlu1 %4201, %v4795_v50  }
 0x7d1   : > { %4204 = vset.pattern.permute.xlu1 %v5692_v52 }
 0x7d2   : > { %2543 = vperm.xlu0 %4202, %v4795_v50   ;;  %2587 = vperm.xlu1 %4204, %v4795_v50  }
 0x7d6   : > { %4203 = vset.pattern.permute.xlu0 %v4428_v55  ;;  %2592 = vperm.xlu1 %4204, %v4806_v53  }
 0x7d7   : > { %2566 = vperm.xlu0 %4203, %v4795_v50  }
 0x7da   : > { %4206 = vset.pattern.permute.xlu1 %v4425_v30 }
 0x7db   : > { %4205 = vset.pattern.permute.xlu0 %v5691_v31  ;;  %2538 = vperm.xlu1 %4206, %v4815_v56  }
 0x7dc   : > { %2548 = vperm.xlu0 %4205, %v4806_v53  }
 0x7df   : > { %4207 = vset.pattern.permute.xlu1 %v4428_v55 }
 0x7e0   : > { %4208 = vset.pattern.permute.xlu0 %v4425_v30  ;;  %2582 = vperm.xlu1 %4207, %v4815_v56  }
 0x7e1   : > { %2534 = vperm.xlu0 %4208, %v4822_v57  }
 0x7e5   : > { %4209 = vset.pattern.permute.xlu0 %v4428_v55 }
 0x7e6   : > { %2578 = vperm.xlu0 %4209, %v4822_v57  }
 0x7ea   : > { %4210 = vset.pattern.permute.xlu0 %v4425_v30  ;;  %v1880_v30 = vpop.f32.mrf.mxu1 }
 0x7eb   : > { %v4883_v32 = vadd.f32 %v4860_v17, %v1880_v30  ;;  %v4439_v30 = vmov 10  }
 0x7ec   : > { %v3995_v4 = vpop.f32.mrf.mxu1 }
 0x7ee   : > { %v1883_v34 = vpop.f32.mrf.mxu1 }
 0x7ef   : > { %v4888_v36 = vadd.f32 %v4860_v17, %v1883_v34 }
 0x7f0   : > { %v3996_v37 = vpop.f32.mrf.mxu1 }
 0x7f1   : > { %v4440_v37 = vmov 15  }
 0x7f2   : > { %v1888_v39 = vpop.f32.mrf.mxu1 }
 0x7f3   : > { %v4892_v40 = vadd.f32 %v4860_v17, %v1888_v39 }
 0x7f4   : > { %v3999_v41 = vpop.f32.mrf.mxu1 }
 0x7f5   : > { %v4441_v41 = vmov 14  }
 0x7f6   : > { %v1891_v42 = vpop.f32.mrf.mxu1 }
 0x7f7   : > { %v4895_v43 = vadd.f32 %v4860_v17, %v1891_v42 }
 0x7f8   : > { %v4000_v44 = vpop.f32.mrf.mxu1 }
 0x7fa   : > { %v4897_v45 = vpop.f32.mrf.mxu1 }
 0x7fb   : > { %v1897_v42 = vadd.f32 %v4860_v17, %v4897_v45  ;;  %v5679_v45 = vmov 31  }
 0x7fc   : > { %v4003_v46 = vpop.f32.mrf.mxu1 }
 0x7fe   : > { %v4899_v47 = vpop.f32.mrf.mxu1 }
 0x800   : > { %v4004_v48 = vpop.f32.mrf.mxu1 }
 0x801   : > { %v1900_v48 = vadd.f32 %v4860_v17, %v4899_v47 }
 0x841   : > { %v2072_v58 = vpop.xlane.xlu1 %2071  ;;  %v2055_v59 = vpop.xlane.xlu0 %2054 }
 0x842   : > { %v2073_v60 = vsub.f32 %v4781_v38, %v2072_v58  ;;  %v2056_v61 = vsub.f32 %v4781_v38, %v2055_v59 }
 0x844   : > { %v2074_v62 = vmul.f32 1.442695, %v2073_v60  ;;  %v2057_v63 = vmul.f32 1.442695, %v2056_v61 }
 0x845   : > { %v2104_v0 = vpop.xlane.xlu1 %2103  ;;  %v2088_v2 = vpop.xlane.xlu0 %2087 }
 0x846   : > { %4354 = vpow2.f32 %v2074_v62  ;;  %v2105_v5 = vsub.f32 %v4781_v38, %v2104_v0  ;;  %v2089_v6 = vsub.f32 %v4781_v38, %v2088_v2 }
 0x847   : > { %4356 = vpow2.f32 %v2057_v63 }
 0x848   : > { %v2106_v7 = vmul.f32 1.442695, %v2105_v5  ;;  %v2090_v8 = vmul.f32 1.442695, %v2089_v6 }
 0x849   : > { %v4901_v49 = vpop.permute.xlu1 %2522 }
 0x84a   : > { %4358 = vpow2.f32 %v2106_v7 }
 0x84b   : > { %4360 = vpow2.f32 %v2090_v8 }
 0x84d   : > { %v4903_v51 = vpop.permute.xlu0 %2543  ;;  %v4905_v54 = vpop.permute.xlu1 %2587 }
 0x851   : > { %v4909_v58 = vpop.permute.xlu1 %2592 }
 0x852   : > { %v4907_v55 = vpop.permute.xlu0 %2566 }
 0x853   : > { %v4833_v9 = vpop.eup %4354 }
 0x854   : > { %v4835_v10 = vpop.eup %4356  ;;  %2077 = vrot.lane.b32.xlu1 %v4833_v9, %s4429_s2  ;;  %s4459_s2 = smov 64  }
 0x855   : > { %2060 = vrot.lane.b32.xlu0 %v4835_v10, %s4416_s10 }
 0x856   : > { %v4913_v60 = vpop.permute.xlu1 %2538 }
 0x857   : > { %v4840_v11 = vpop.eup %4358  ;;  %v4911_v59 = vpop.permute.xlu0 %2548 }
 0x858   : > { %v4842_v12 = vpop.eup %4360 }
 0x859   : > { %2093 = vrot.lane.b32.xlu1 %v4842_v12, %s4418_s15  ;;  %2109 = vrot.lane.b32.xlu0 %v4840_v11, %s4430_s18  ;;  %s5745_s15 = sld [smem:[#allocation3_spill]] }
 0x85a   : > { %s5859_s18 = sld [smem:[#allocation8_spill]] }
 0x85b   : > { %v4917_v62 = vpop.permute.xlu1 %2582 }
 0x85c   : > { %v4915_v61 = vpop.permute.xlu0 %2534 }
 0x85d   : > { %2571 = vperm.xlu1 %4207, %v4806_v53   ;;  %2527 = vperm.xlu0 %4210, %v4806_v53  }
 0x85f   : > { %s4879_s11 = scalar_lea.vmem %s5745_s15, %s4114_s28  ;;  %s5861_s15 = sld [smem:[#allocation9_spill]] }
 0x860   : > { %v1911_v33 = vld [vmem:[%s4879_s11 + $0x40] sm:$0xff]  ;;  %v1912_v38 = vld [vmem:[%s4879_s11 + $0x48] sm:$0xff]  ;;  %v1905_v44 = vld [vmem:[%s4879_s11 + $0x10] sm:$0xff]  ;;  %s5862_s28 = smov 24  }
 0x861   : > { %4211 = vset.pattern.permute.xlu1 %v5700_v13  ;;  %4212 = vset.pattern.permute.xlu0 %v5696_v14  ;;  %v4919_v63 = vpop.permute.xlu0 %2578  ;;  %v1908_v26 = vld [vmem:[%s4879_s11 + $0x28] sm:$0xff] }
 0x862   : > { %2727 = vperm.xlu1 %4211, %v4806_v53   ;;  %2771 = vperm.xlu0 %4212, %v4806_v53  }
 0x866   : > { %4213 = vset.pattern.permute.xlu1 %v4433_v15  ;;  %4220 = vset.pattern.permute.xlu0 %v4433_v15 }
 0x867   : > { %2701 = vperm.xlu1 %4213, %v4795_v50  }
 0x86b   : > { %4214 = vset.pattern.permute.xlu1 %v5700_v13 }
 0x86c   : > { %2722 = vperm.xlu1 %4214, %v4795_v50  }
 0x870   : > { %4215 = vset.pattern.permute.xlu1 %v4434_v16 }
 0x871   : > { %2745 = vperm.xlu1 %4215, %v4795_v50  }
 0x875   : > { %4216 = vset.pattern.permute.xlu1 %v5696_v14 }
 0x876   : > { %2766 = vperm.xlu1 %4216, %v4795_v50  }
 0x87a   : > { %4217 = vset.pattern.permute.xlu1 %v4433_v15 }
 0x87b   : > { %2713 = vperm.xlu1 %4217, %v4822_v57  }
 0x87f   : > { %2717 = vperm.xlu1 %4217, %v4815_v56  }
 0x883   : > { %4218 = vset.pattern.permute.xlu1 %v4434_v16 }
 0x884   : > { %2757 = vperm.xlu1 %4218, %v4822_v57  }
 0x888   : > { %2761 = vperm.xlu1 %4218, %v4815_v56  }
 0x88c   : > { %4219 = vset.pattern.permute.xlu1 %v4435_v35 }
 0x88d   : > { %1955 = vperm.xlu1 %4219, %v1911_v33  }
 0x891   : > { %1960 = vperm.xlu1 %4219, %v1912_v38  }
 0x895   : > { %4221 = vset.pattern.permute.xlu1 %v4434_v16  ;;  %v1909_v16 = vld [vmem:[%s4879_s11 + $0x30] sm:$0xff] }
 0x8c6   : > { %v2078_v0 = vpop.permute.xlu1 %2077 }
 0x8c7   : > { %v2061_v2 = vpop.permute.xlu0 %2060  ;;  %v2080_v5 = vsel %vm2063_vm10, %v2078_v0, 0.0 }
 0x8c8   : > { %2081 = vadd.xlane.f32.xlu0 %v2080_v5  ;;  %v2064_v6 = vsel %vm2063_vm10, %v2061_v2, 0.0 }
 0x8c9   : > { %2065 = vadd.xlane.f32.xlu1 %v2064_v6  ;;  %v5681_v6 = vmov 30  }
 0x8cb   : > { %v2094_v7 = vpop.permute.xlu1 %2093  ;;  %v2110_v17 = vpop.permute.xlu0 %2109 }
 0x8cc   : > { %v2096_v8 = vsel %vm2063_vm10, %v2094_v7, 0.0  ;;  %v2112_v47 = vsel %vm2063_vm10, %v2110_v17, 0.0 }
 0x8cd   : > { %2097 = vadd.xlane.f32.xlu0 %v2096_v8 }
 0x8d8   : > { %v4924_v15 = vpop.permute.xlu1 %2571  ;;  %v4984_v8 = vpop.permute.xlu0 %2527 }
 0x8da   : > { %2750 = vperm.xlu1 %4221, %v4806_v53  }
 0x8dd   : > { %v4928_v18 = vpop.permute.xlu1 %2727 }
 0x8de   : > { %4222 = vset.pattern.permute.xlu1 %v4435_v35 }
 0x8df   : > { %1945 = vperm.xlu1 %4222, %v1909_v16   ;;  %v1904_v16 = vld [vmem:[%s4879_s11 + $0x8] sm:$0xff] }
 0x8e2   : > { %v4931_v3 = vpop.permute.xlu1 %2701 }
 0x8e3   : > { %2706 = vperm.xlu0 %4220, %v4806_v53   ;;  %4223 = vset.pattern.permute.xlu1 %v5685_v20 }
 0x8e4   : > { %2925 = vperm.xlu1 %4223, %v4806_v53  }
 0x8e7   : > { %v4936_v22 = vpop.permute.xlu1 %2722  ;;  %4227 = vset.pattern.permute.xlu0 %v4437_v23 }
 0x8e8   : > { %2943 = vperm.xlu0 %4227, %v4795_v50   ;;  %4224 = vset.pattern.permute.xlu1 %v5683_v25 }
 0x8e9   : > { %2969 = vperm.xlu1 %4224, %v4806_v53  }
 0x8ec   : > { %v4942_v29 = vpop.permute.xlu1 %2745  ;;  %2955 = vperm.xlu0 %4227, %v4822_v57  }
 0x8ed   : > { %4225 = vset.pattern.permute.xlu1 %v4435_v35 }
 0x8ee   : > { %1940 = vperm.xlu1 %4225, %v1908_v26  }
 0x8f0   : > { %4230 = vset.pattern.permute.xlu0 %v4439_v30 }
 0x8f1   : > { %v4946_v4 = vpop.permute.xlu1 %2766  ;;  %2899 = vperm.xlu0 %4230, %v4795_v50  }
 0x8f2   : > { %4226 = vset.pattern.permute.xlu1 %v5685_v20  ;;  %v5687_v20 = vmov 17  }
 0x8f3   : > { %2920 = vperm.xlu1 %4226, %v4795_v50  }
 0x8f5   : > { %2911 = vperm.xlu0 %4230, %v4822_v57  }
 0x8f6   : > { %v4952_v33 = vpop.permute.xlu1 %2713 }
 0x8f7   : > { %4228 = vset.pattern.permute.xlu1 %v5683_v25 }
 0x8f8   : > { %2964 = vperm.xlu1 %4228, %v4795_v50  }
 0x8f9   : > { %2904 = vperm.xlu0 %4230, %v4806_v53  }
 0x8fa   : > { %v4957_v34 = vpop.permute.xlu1 %2717 }
 0x8fc   : > { %4229 = vset.pattern.permute.xlu1 %v4439_v30 }
 0x8fd   : > { %4237 = vset.pattern.permute.xlu0 %v4440_v37  ;;  %2915 = vperm.xlu1 %4229, %v4815_v56  }
 0x8fe   : > { %3136 = vperm.xlu0 %4237, %v4795_v50  }
 0x8ff   : > { %v4961_v38 = vpop.permute.xlu1 %2757 }
 0x901   : > { %4231 = vset.pattern.permute.xlu1 %v4437_v23  ;;  %v4988_v23 = vpop.permute.xlu0 %2771 }
 0x902   : > { %3148 = vperm.xlu0 %4237, %v4822_v57   ;;  %2959 = vperm.xlu1 %4231, %v4815_v56  }
 0x903   : > { %v4965_v39 = vpop.permute.xlu1 %2761 }
 0x906   : > { %4240 = vset.pattern.permute.xlu0 %v4441_v41  ;;  %2948 = vperm.xlu1 %4231, %v4806_v53  }
 0x907   : > { %3092 = vperm.xlu0 %4240, %v4795_v50  }
 0x908   : > { %v1956_v46 = vpop.permute.xlu1 %1955 }
 0x909   : > { %v1971_v0 = vmul.f32 %v1956_v46, %v1897_v42 }
 0x90a   : > { %4232 = vset.pattern.permute.xlu1 %v4435_v35 }
 0x90b   : > { %1925 = vperm.xlu1 %4232, %v1905_v44  }
 0x90c   : > { %v1961_v2 = vpop.permute.xlu1 %1960 }
 0x90d   : > { %v1972_v5 = vmul.f32 %v1961_v2, %v1900_v48 }
 0x90f   : > { %4233 = vset.pattern.permute.xlu1 %v5681_v6  ;;  %v4976_v7 = vpack.c.bf16 %v1972_v5, %v1971_v0 }
 0x910   : > { %3118 = vperm.xlu1 %4233, %v4806_v53  }
 0x911   : > { %4014 = vmatpush3.bf16.msra.mxu0 %v4976_v7 }
 0x912   : > { %4019 = vmatprep.subr.bf16.mxu0 %v5698_v1 }
 0x914   : > { %4234 = vset.pattern.permute.xlu1 %v5679_v45 }
 0x934   : > { %2113 = vadd.xlane.f32.xlu1 %v2112_v47 }
 0x945   : > { %3162 = vperm.xlu1 %4234, %v4806_v53  }
 0x949   : > { %4235 = vset.pattern.permute.xlu1 %v4435_v35 }
 0x94a   : > { %1920 = vperm.xlu1 %4235, %v1904_v16   ;;  %v5694_v16 = vmov 20  }
 0x94e   : > { %4236 = vset.pattern.permute.xlu1 %v5681_v6 }
 0x94f   : > { %3113 = vperm.xlu1 %4236, %v4795_v50  }
 0x951   : > { %v2082_v26 = vpop.xlane.xlu0 %2081 }
 0x952   : > { %v2066_v30 = vpop.xlane.xlu1 %2065  ;;  %4362 = vrcp.f32 %v2082_v26 }
 0x953   : > { %4364 = vrcp.f32 %v2066_v30  ;;  %4238 = vset.pattern.permute.xlu1 %v5679_v45  ;;  %v5703_v30 = vmov 4  }
 0x954   : > { %3157 = vperm.xlu1 %4238, %v4795_v50  }
 0x956   : > { %v2098_v42 = vpop.xlane.xlu0 %2097 }
 0x957   : > { %4366 = vrcp.f32 %v2098_v42 }
 0x958   : > { %4239 = vset.pattern.permute.xlu1 %v4441_v41 }
 0x959   : > { %3108 = vperm.xlu1 %4239, %v4815_v56  }
 0x95d   : > { %4241 = vset.pattern.permute.xlu1 %v4440_v37  ;;  %v5689_v37 = vmov 16  }
 0x95f   : > { %v4363_v44 = vpop.eup %4362 }
 0x960   : > { %v4365_v46 = vpop.eup %4364  ;;  %v2084_v48 = vmul.f32 %v4363_v44, %v4833_v9  ;;  %v5005_v9 = vpop.permute.xlu1 %2750  ;;  %v5702_v44 = vmov 5  }
 0x961   : > { %v2068_v0 = vmul.f32 %v4365_v46, %v4835_v10 }
 0x962   : > { %2122 = vrot.lane.b32.xlu1 %v2084_v48, %s4416_s10 }
 0x963   : > { %2118 = vrot.lane.b32.xlu0 %v2068_v0, %s4416_s10 }
 0x964   : > { %v4367_v2 = vpop.eup %4366  ;;  %v5009_v10 = vpop.permute.xlu1 %1945 }
 0x965   : > { %v2100_v5 = vmul.f32 %v4367_v2, %v4842_v12  ;;  %v4445_v12 = vmov 1  }
 0x967   : > { %2126 = vrot.lane.b32.xlu1 %v2100_v5, %s4416_s10 }
 0x968   : > { %v5013_v41 = vpop.permute.xlu1 %2925 }
 0x96b   : > { %3152 = vperm.xlu1 %4241, %v4815_v56  }
 0x96c   : > { %v5017_v17 = vpop.permute.xlu1 %2969 }
 0x96f   : > { %3141 = vperm.xlu1 %4241, %v4806_v53  }
 0x970   : > { %v5021_v47 = vpop.permute.xlu1 %1940 }
 0x973   : > { %4242 = vset.pattern.permute.xlu1 %v5689_v37 }
 0x974   : > { %2190 = vperm.xlu1 %4242, %v4806_v53   ;;  %v5026_v26 = vpop.permute.xlu1 %2920 }
 0x978   : > { %4243 = vset.pattern.permute.xlu1 %v4435_v35  ;;  %v5031_v42 = vpop.permute.xlu1 %2964 }
 0x979   : > { %2154 = vperm.xlu1 %4243, %v4795_v50  }
 0x97c   : > { %v5035_v46 = vpop.permute.xlu1 %2915 }
 0x97d   : > { %4246 = vset.pattern.permute.xlu1 %v4445_v12 }
 0x97e   : > { %2210 = vperm.xlu1 %4246, %v4795_v50  }
 0x980   : > { %v5039_v48 = vpop.permute.xlu1 %2959 }
 0x981   : > { %5746 = vst [vmem:[#allocation17_spill] sm:$0xff] %v5039_v48 }
 0x982   : > { %4248 = vset.pattern.permute.xlu1 %v4435_v35 }
 0x983   : > { %2169 = vperm.xlu1 %4248, %v4822_v57  }
 0x984   : > { %v5043_v0 = vpop.permute.xlu1 %2948 }
 0x987   : > { %4249 = vset.pattern.permute.xlu1 %v4445_v12 }
 0x988   : > { %2222 = vperm.xlu1 %4249, %v4822_v57   ;;  %v1926_v2 = vpop.permute.xlu1 %1925 }
 0x98c   : > { %4251 = vset.pattern.permute.xlu1 %v4435_v35  ;;  %v5048_v5 = vpop.permute.xlu1 %3118 }
 0x98d   : > { %2161 = vperm.xlu1 %4251, %v4806_v53   ;;  %5747 = vst [vmem:[#allocation18_spill] sm:$0xff] %v5048_v5 }
 0x991   : > { %2793 = vrot.lane.b32.xlu1 %v4976_v7, %s4415_s7 }
 0x992   : > { %4252 = vset.pattern.permute.xlu1 %v5694_v16 }
 0x995   : > { %2281 = vperm.xlu1 %4252, %v4806_v53  }
 0x999   : > { %4253 = vset.pattern.permute.xlu1 %v5703_v30 }
 0x99a   : > { %2255 = vperm.xlu1 %4253, %v4795_v50  }
 0x99e   : > { %4256 = vset.pattern.permute.xlu1 %v5702_v44 }
 0x99f   : > { %2299 = vperm.xlu1 %4256, %v4795_v50  }
 0x9a3   : > { %4257 = vset.pattern.permute.xlu1 %v5703_v30 }
 0x9a4   : > { %2267 = vperm.xlu1 %4257, %v4822_v57  }
 0x9a8   : > { %4259 = vset.pattern.permute.xlu1 %v5702_v44 }
 0x9a9   : > { %2311 = vperm.xlu1 %4259, %v4822_v57  }
 0x9ad   : > { %4261 = vset.pattern.permute.xlu1 %v5703_v30 }
 0x9ae   : > { %2260 = vperm.xlu1 %4261, %v4806_v53  }
 0x9b2   : > { %4262 = vset.pattern.permute.xlu1 %v5691_v31 }
 0x9bd   : > { %v2114_v45 = vpop.xlane.xlu1 %2113 }
 0x9be   : > { %4368 = vrcp.f32 %v2114_v45  ;;  %v1910_v45 = vld [vmem:[%s4879_s11 + $0x38] sm:$0xff] }
 0x9c1   : > { %v5088_v1 = vpop.permute.xlu1 %3162 }
 0x9c2   : > { %5753 = vst [vmem:[#allocation24_spill] sm:$0xff] %v5088_v1 }
 0x9c5   : > { %v1921_v44 = vpop.permute.xlu1 %1920 }
 0x9ca   : > { %v5096_v5 = vpop.permute.xlu1 %3113 }
 0x9cb   : > { %v4369_v6 = vpop.eup %4368 }
 0x9cc   : > { %v2116_v25 = vmul.f32 %v4369_v6, %v4840_v11  ;;  %v1907_v11 = vld [vmem:[%s4879_s11 + $0x20] sm:$0xff] }
 0x9cd   : > { %v1903_v6 = vld [vmem:[%s4879_s11] sm:$0xff] }
 0x9ce   : > { %2130 = vrot.lane.b32.xlu0 %v2116_v25, %s4416_s10  ;;  %v1906_v25 = vld [vmem:[%s4879_s11 + $0x18] sm:$0xff]  ;;  %s5799_s10 = sld [smem:[#allocation5_spill]] }
 0x9cf   : > { %s5865_s11 = sld [smem:[#allocation14_spill]] }
 0x9d2   : > { %3104 = vperm.xlu0 %4240, %v4822_v57  }
 0x9d6   : > { %3097 = vperm.xlu0 %4240, %v4806_v53  }
 0x9da   : > { %4244 = vset.pattern.permute.xlu0 %v5689_v37 }
 0x9db   : > { %2185 = vperm.xlu0 %4244, %v4795_v50  }
 0x9df   : > { %4245 = vset.pattern.permute.xlu0 %v5687_v20  ;;  %v5068_v20 = vpop.permute.xlu0 %2706 }
 0x9e0   : > { %2236 = vperm.xlu0 %4245, %v4806_v53  }
 0x9e3   : > { %v5070_v37 = vpop.permute.xlu0 %2943 }
 0x9e4   : > { %2231 = vperm.xlu0 %4245, %v4795_v50  }
 0x9e8   : > { %4247 = vset.pattern.permute.xlu0 %v4435_v35  ;;  %v5072_v35 = vpop.permute.xlu0 %2955 }
 0x9e9   : > { %1950 = vperm.xlu0 %4247, %v1910_v45   ;;  %5748 = vst [vmem:[#allocation19_spill] sm:$0xff] %v5072_v35  ;;  %v1969_v35 = vmul.f32 %v5009_v10, %v4892_v40  ;;  %v1965_v40 = vmul.f32 %v1926_v2, %v4871_v24 }
 0x9ec   : > { %v5074_v45 = vpop.permute.xlu0 %2899 }
 0x9ed   : > { %1935 = vperm.xlu0 %4247, %v1907_v11  }
 0x9f0   : > { %v5076_v11 = vpop.permute.xlu0 %2911 }
 0x9f1   : > { %1930 = vperm.xlu0 %4247, %v1906_v25  }
 0x9f4   : > { %v5078_v25 = vpop.permute.xlu0 %2904 }
 0x9f5   : > { %1915 = vperm.xlu0 %4247, %v1903_v6  }
 0x9f8   : > { %v5080_v6 = vpop.permute.xlu0 %3136 }
 0x9f9   : > { %2174 = vperm.xlu0 %4247, %v4815_v56   ;;  %5749 = vst [vmem:[#allocation20_spill] sm:$0xff] %v5080_v6 }
 0x9fd   : > { %4250 = vset.pattern.permute.xlu0 %v4445_v12  ;;  %v5082_v12 = vpop.permute.xlu0 %3148 }
 0x9fe   : > { %2226 = vperm.xlu0 %4250, %v4815_v56   ;;  %5750 = vst [vmem:[#allocation21_spill] sm:$0xff] %v5082_v12  ;;  %v5100_v12 = vpop.permute.xlu1 %3157 }
 0x9ff   : > { %5758 = vst [vmem:[#allocation29_spill] sm:$0xff] %v5100_v12 }
 0xa01   : > { %v5084_v31 = vpop.permute.xlu0 %3092 }
 0xa02   : > { %2215 = vperm.xlu0 %4250, %v4806_v53   ;;  %5751 = vst [vmem:[#allocation22_spill] sm:$0xff] %v5084_v31 }
 0xa05   : > { %v2119_v52 = vpop.permute.xlu0 %2118 }
 0xa06   : > { %4254 = vset.pattern.permute.xlu0 %v5694_v16 }
 0xa40   : > { %v2131_v16 = vpop.permute.xlu0 %2130 }
 0xa4d   : > { %v5086_v14 = vpop.permute.xlu0 %3104 }
 0xa4e   : > { %5752 = vst [vmem:[#allocation23_spill] sm:$0xff] %v5086_v14 }
 0xa51   : > { %v5090_v13 = vpop.permute.xlu0 %3097 }
 0xa52   : > { %5754 = vst [vmem:[#allocation25_spill] sm:$0xff] %v5090_v13  ;;  %v5107_v13 = vpop.permute.xlu1 %3108 }
 0xa56   : > { %v5092_v30 = vpop.permute.xlu0 %2185 }
 0xa57   : > { %5755 = vst [vmem:[#allocation26_spill] sm:$0xff] %v5092_v30 }
 0xa5b   : > { %v5094_v27 = vpop.permute.xlu0 %2236 }
 0xa5c   : > { %5756 = vst [vmem:[#allocation27_spill] sm:$0xff] %v5094_v27  ;;  %v1968_v27 = vmul.f32 %v5021_v47, %v4888_v36 }
 0xa5f   : > { %v5098_v6 = vpop.permute.xlu0 %2231 }
 0xa60   : > { %5757 = vst [vmem:[#allocation28_spill] sm:$0xff] %v5098_v6 }
 0xa64   : > { %v1951_v31 = vpop.permute.xlu0 %1950 }
 0xa65   : > { %v1970_v14 = vmul.f32 %v1951_v31, %v4895_v43 }
 0xa67   : > { %v5105_v1 = vpack.c.bf16 %v1970_v14, %v1969_v35  ;;  %v2123_v14 = vpop.permute.xlu1 %2122 }
 0xa68   : > { %v1936_v48 = vpop.permute.xlu0 %1935  ;;  %v2133_v47 = vsel %vm2063_vm10, %v2119_v52, %v2123_v14  ;;  %v5763_v52 = vmov 22  }
 0xa69   : > { %5759 = vst [vmem:[#allocation30_spill] sm:$0xff] %v5105_v1  ;;  %v1967_v30 = vmul.f32 %v1936_v48, %v4883_v32  ;;  %2849 = vrot.lane.b32.xlu0 %v5105_v1, %s4415_s7  ;;  %v1964_v32 = vmul.f32 %v1921_v44, %v4867_v21  ;;  %v5761_v44 = vmov 5  }
 0xa6b   : > { %v5114_v6 = vpack.c.bf16 %v1968_v27, %v1967_v30  ;;  %v5707_v27 = vmov 21   ;;  %v5760_v30 = vmov 4  }
 0xa6c   : > { %v1931_v12 = vpop.permute.xlu0 %1930 }
 0xa6d   : > { %v1966_v31 = vmul.f32 %v1931_v12, %v4876_v28  ;;  %2276 = vperm.xlu0 %4254, %v4795_v50   ;;  %2847 = vrot.lane.b32.xlu1 %v5114_v6, %s4415_s7  ;;  %v2127_v28 = vpop.permute.xlu1 %2126 }
 0xa6f   : > { %v5121_v43 = vpack.c.bf16 %v1966_v31, %v1965_v40 }
 0xa70   : > { %v1916_v36 = vpop.permute.xlu0 %1915 }
 0xa71   : > { %v1963_v10 = vmul.f32 %v1916_v36, %v4863_v19  ;;  %4255 = vset.pattern.permute.xlu0 %v5707_v27  ;;  %2845 = vrot.lane.b32.xlu1 %v5121_v43, %s4415_s7  ;;  %v2134_v19 = vsel %vm1200_vm2, %v2133_v47, %v2127_v28  ;;  %v5142_v48 = vpop.permute.xlu1 %3152 }
 0xa72   : > { %2325 = vperm.xlu0 %4255, %v4806_v53   ;;  %v2136_v21 = vsel %vm2135_vm11, %v2134_v19, %v2131_v16 }
 0xa73   : > { %v5129_v24 = vpack.c.bf16 %v1964_v32, %v1963_v10 }
 0xa74   : > { %v5169_v47 = vpop.permute.xlu0 %2174 }
 0xa75   : > { %2843 = vrot.lane.b32.xlu1 %v5129_v24, %s4415_s7  ;;  %v5147_v16 = vpop.permute.xlu1 %3141  ;;  %5773 = vst [vmem:[#allocation40_spill] sm:$0xff] %v5169_v47  ;;  %s5783_s7 = smov 104  }
 0xa76   : > { %2320 = vperm.xlu0 %4255, %v4795_v50  }
 0xa79   : > { %2139 = vrot.lane.b32.xlu1 %v2136_v21, %s4423_s1  ;;  %v5149_v2 = vpop.permute.xlu1 %2190  ;;  %v5173_v21 = vpop.permute.xlu0 %2226 }
 0xa7a   : > { %4258 = vset.pattern.permute.xlu0 %v5760_v30  ;;  %5775 = vst [vmem:[#allocation42_spill] sm:$0xff] %v5173_v21 }
 0xa7b   : > { %2271 = vperm.xlu0 %4258, %v4815_v56  }
 0xa7d   : > { %v5151_v35 = vpop.permute.xlu1 %2154 }
 0xa7e   : > { %5764 = vst [vmem:[#allocation31_spill] sm:$0xff] %v5151_v35 }
 0xa7f   : > { %4260 = vset.pattern.permute.xlu0 %v5761_v44  ;;  %v5177_v44 = vpop.permute.xlu0 %2215 }
 0xa80   : > { %2315 = vperm.xlu0 %4260, %v4815_v56   ;;  %5777 = vst [vmem:[#allocation44_spill] sm:$0xff] %v5177_v44  ;;  %v5801_v44 = vmov 24  }
 0xa81   : > { %v5153_v12 = vpop.permute.xlu1 %2210 }
 0xa82   : > { %5765 = vst [vmem:[#allocation32_spill] sm:$0xff] %v5153_v12 }
 0xa84   : > { %2304 = vperm.xlu0 %4260, %v4806_v53  }
 0xa85   : > { %v5155_v40 = vpop.permute.xlu1 %2169 }
 0xa86   : > { %5766 = vst [vmem:[#allocation33_spill] sm:$0xff] %v5155_v40  ;;  %v5804_v40 = vmov 25  }
 0xa88   : > { %2990 = vrot.lane.b32.xlu0 %v4976_v7, %s5762_s23 }
 0xa89   : > { %4266 = vset.pattern.permute.xlu0 %v5763_v52  ;;  %v5157_v31 = vpop.permute.xlu1 %2222 }
 0xa8a   : > { %5767 = vst [vmem:[#allocation34_spill] sm:$0xff] %v5157_v31 }
 0xa8d   : > { %v5159_v14 = vpop.permute.xlu1 %2161 }
 0xa8e   : > { %5768 = vst [vmem:[#allocation35_spill] sm:$0xff] %v5159_v14  ;;  %v5301_v14 = vld [vmem:[%s5799_s10] ss:$0 sm:$0xff]  ;;  %s5868_s10 = sld [smem:[#allocation13_spill]] }
 0xa8f   : > { %vm2595_vm12 = vcmp.eq.f32.partialorder %v5301_v14, %v4909_v58  ;;  %vm2590_vm13 = vcmp.eq.f32.partialorder %v5301_v14, %v4905_v54  ;;  %vm2551_vm14 = vcmp.eq.f32.partialorder %v5301_v14, %v4911_v59  ;;  %vm2546_vm15 = vcmp.eq.f32.partialorder %v5301_v14, %v4903_v51 }
 0xa91   : > { %v5161_v36 = vpop.permute.xlu1 %2793 }
 0xa92   : > { %5769 = vst [vmem:[#allocation36_spill] sm:$0xff] %v5161_v36  ;;  %v5779_v36 = vmov 0.0  }
 0xa95   : > { %v5163_v32 = vpop.permute.xlu1 %2281 }
 0xa96   : > { %5770 = vst [vmem:[#allocation37_spill] sm:$0xff] %v5163_v32 }
 0xa99   : > { %v5165_v10 = vpop.permute.xlu1 %2255 }
 0xa9a   : > { %5771 = vst [vmem:[#allocation38_spill] sm:$0xff] %v5165_v10 }
 0xa9d   : > { %v5167_v28 = vpop.permute.xlu1 %2299 }
 0xa9e   : > { %5772 = vst [vmem:[#allocation39_spill] sm:$0xff] %v5167_v28 }
 0xaa1   : > { %v5171_v19 = vpop.permute.xlu1 %2267 }
 0xaa2   : > { %5774 = vst [vmem:[#allocation41_spill] sm:$0xff] %v5171_v19 }
 0xaa5   : > { %v5175_v30 = vpop.permute.xlu1 %2311 }
 0xaa6   : > { %5776 = vst [vmem:[#allocation43_spill] sm:$0xff] %v5175_v30 }
 0xaa9   : > { %v5179_v27 = vpop.permute.xlu1 %2260 }
 0xaaa   : > { %5778 = vst [vmem:[#allocation45_spill] sm:$0xff] %v5179_v27 }
 0xadb   : > { %v2850_v31 = vpop.permute.xlu0 %2849 }
 0xadc   : > { %4038 = vmatpush3.bf16.msra.mxu1 %v2850_v31  ;;  %v5780_v31 = vmov 23  }
 0xadd   : > { %4039 = vmatprep.subr.bf16.mxu1 %v5779_v36 }
 0xadf   : > { %v2848_v32 = vpop.permute.xlu1 %2847 }
 0xae0   : > { %4040 = vmatpush3.bf16.msra.mxu1 %v2848_v32  ;;  %v5781_v32 = vmov 19  }
 0xae1   : > { %4041 = vmatprep.subr.bf16.mxu1 %v5779_v36 }
 0xae3   : > { %v2846_v28 = vpop.permute.xlu1 %2845 }
 0xae4   : > { %4042 = vmatpush3.bf16.msra.mxu1 %v2846_v28 }
 0xae5   : > { %4043 = vmatprep.subr.bf16.mxu1 %v5779_v36 }
 0xae7   : > { %v2844_v19 = vpop.permute.xlu1 %2843 }
 0xae8   : > { %4044 = vmatpush3.bf16.msra.mxu1 %v2844_v19  ;;  %v5782_v19 = vmov 18  }
 0xae9   : > { %4055 = vmatprep.subr.bf16.mxu1 %v5779_v36 }
 0xaeb   : > { %v2140_v30 = vpop.permute.xlu1 %2139 }
 0xaec   : > { %v5186_v10 = vmul.f32 %v2140_v30, %v4815_v56  ;;  %v5195_v28 = vmul.f32 %v2140_v30, %v4822_v57  ;;  %v5721_v30 = vmov 24  }
 0xaee   : > { %2732 = vperm.xlu0 %4266, %v5186_v10   ;;  %2553 = vperm.xlu1 %4262, %v5186_v10  }
 0xaf2   : > { %4267 = vset.pattern.permute.xlu0 %v5780_v31  ;;  %4263 = vset.pattern.permute.xlu1 %v5781_v32 }
 0xaf3   : > { %2776 = vperm.xlu0 %4267, %v5186_v10   ;;  %2597 = vperm.xlu1 %4263, %v5186_v10  }
 0xaf7   : > { %4268 = vset.pattern.permute.xlu0 %v5763_v52  ;;  %4264 = vset.pattern.permute.xlu1 %v5782_v19  ;;  %v4452_v52 = vmov 8   ;;  %v5719_v19 = vmov 28  }
 0xaf8   : > { %2737 = vperm.xlu0 %4268, %v5195_v28   ;;  %2558 = vperm.xlu1 %4264, %v5195_v28  }
 0xafc   : > { %4269 = vset.pattern.permute.xlu0 %v5780_v31  ;;  %4265 = vset.pattern.permute.xlu1 %v5781_v32  ;;  %v5714_v31 = vmov 25   ;;  %v5711_v32 = vmov 29  }
 0xafd   : > { %2781 = vperm.xlu0 %4269, %v5195_v28   ;;  %2602 = vperm.xlu1 %4265, %v5195_v28  }
 0xb01   : > { %3183 = vrot.lane.b32.xlu0 %v4976_v7, %s5783_s7  ;;  %4270 = vset.pattern.permute.xlu1 %v5721_v30  ;;  %v5713_v7 = vmov 9  }
 0xb02   : > { %2370 = vperm.xlu1 %4270, %v4806_v53   ;;  %4272 = vset.pattern.permute.xlu0 %v5721_v30 }
 0xb05   : > { %2365 = vperm.xlu0 %4272, %v4795_v50  }
 0xb06   : > { %3042 = vrot.lane.b32.xlu1 %v5105_v1, %s5762_s23 }
 0xb07   : > { %4271 = vset.pattern.permute.xlu1 %v4452_v52 }
 0xb09   : > { %4273 = vset.pattern.permute.xlu0 %v5714_v31  ;;  %v5785_v31 = vmov 27  }
 0xb0a   : > { %2414 = vperm.xlu0 %4273, %v4806_v53   ;;  %2344 = vperm.xlu1 %4271, %v4795_v50  }
 0xb0e   : > { %2409 = vperm.xlu0 %4273, %v4795_v50   ;;  %4274 = vset.pattern.permute.xlu1 %v5713_v7 }
 0xb0f   : > { %2388 = vperm.xlu1 %4274, %v4795_v50  }
 0xb12   : > { %4276 = vset.pattern.permute.xlu0 %v5711_v32  ;;  %v5716_v32 = vmov 12  }
 0xb13   : > { %2503 = vperm.xlu0 %4276, %v4806_v53   ;;  %4275 = vset.pattern.permute.xlu1 %v5719_v19 }
 0xb14   : > { %2459 = vperm.xlu1 %4275, %v4806_v53  }
 0xb17   : > { %4278 = vset.pattern.permute.xlu0 %v5713_v7 }
 0xb18   : > { %2400 = vperm.xlu0 %4278, %v4822_v57   ;;  %3235 = vrot.lane.b32.xlu1 %v5105_v1, %s5783_s7  ;;  %v5793_v1 = vmov 17  }
 0xb19   : > { %4277 = vset.pattern.permute.xlu1 %v4452_v52 }
 0xb1c   : > { %4279 = vset.pattern.permute.xlu0 %v4452_v52  ;;  %2360 = vperm.xlu1 %4277, %v4815_v56   ;;  %v5784_v52 = vmov 26  }
 0xb1d   : > { %2356 = vperm.xlu0 %4279, %v4822_v57  }
 0xb20   : > { %4280 = vset.pattern.permute.xlu1 %v5713_v7  ;;  %v5718_v7 = vmov 13  }
 0xb21   : > { %2349 = vperm.xlu0 %4279, %v4806_v53   ;;  %2404 = vperm.xlu1 %4280, %v4815_v56  }
 0xb25   : > { %4304 = vset.pattern.permute.xlu0 %v5716_v32  ;;  %4281 = vset.pattern.permute.xlu1 %v5719_v19  ;;  %v5786_v32 = vmov 30   ;;  %v5788_v19 = vmov 31  }
 0xb26   : > { %2433 = vperm.xlu0 %4304, %v4795_v50   ;;  %2454 = vperm.xlu1 %4281, %v4795_v50  }
 0xb2a   : > { %2449 = vperm.xlu0 %4304, %v4815_v56   ;;  %4282 = vset.pattern.permute.xlu1 %v5784_v52 }
 0xb2b   : > { %2930 = vperm.xlu1 %4282, %v5186_v10  }
 0xb2e   : > { %4307 = vset.pattern.permute.xlu0 %v5718_v7  ;;  %v5250_v7 = vpop.permute.xlu0 %2276 }
 0xb2f   : > { %2477 = vperm.xlu0 %4307, %v4795_v50   ;;  %4283 = vset.pattern.permute.xlu1 %v5785_v31  ;;  %5787 = vst [vmem:[#allocation46_spill] sm:$0xff] %v5250_v7 }
 0xb30   : > { %2974 = vperm.xlu1 %4283, %v5186_v10  }
 0xb32   : > { %v5254_v30 = vpop.permute.xlu0 %2325 }
 0xb33   : > { %2493 = vperm.xlu0 %4307, %v4815_v56   ;;  %5789 = vst [vmem:[#allocation47_spill] sm:$0xff] %v5254_v30  ;;  %v5797_v30 = vmov 20  }
 0xb34   : > { %4284 = vset.pattern.permute.xlu1 %v5784_v52 }
 0xb35   : > { %2935 = vperm.xlu1 %4284, %v5195_v28  }
 0xb36   : > { %v5258_v56 = vpop.permute.xlu0 %2320 }
 0xb37   : > { %5790 = vst [vmem:[#allocation48_spill] sm:$0xff] %v5258_v56 }
 0xb39   : > { %4285 = vset.pattern.permute.xlu1 %v5785_v31  ;;  %v5791_v31 = vmov 16  }
 0xb3a   : > { %2979 = vperm.xlu1 %4285, %v5195_v28   ;;  %v5263_v52 = vpop.permute.xlu0 %2271 }
 0xb3b   : > { %5792 = vst [vmem:[#allocation49_spill] sm:$0xff] %v5263_v52 }
 0xb3e   : > { %4286 = vset.pattern.permute.xlu1 %v5786_v32  ;;  %v5268_v36 = vpop.permute.xlu0 %2315 }
 0xb3f   : > { %3123 = vperm.xlu1 %4286, %v5186_v10   ;;  %5794 = vst [vmem:[#allocation50_spill] sm:$0xff] %v5268_v36  ;;  %v5798_v36 = vmov 21  }
 0xb43   : > { %4287 = vset.pattern.permute.xlu1 %v5788_v19 }
 0xb44   : > { %3167 = vperm.xlu1 %4287, %v5186_v10  }
 0xb48   : > { %4288 = vset.pattern.permute.xlu1 %v5786_v32  ;;  %v5272_v32 = vpop.permute.xlu0 %2304 }
 0xb49   : > { %3128 = vperm.xlu1 %4288, %v5195_v28   ;;  %5795 = vst [vmem:[#allocation51_spill] sm:$0xff] %v5272_v32 }
 0xb4c   : > { %v5276_v56 = vpop.permute.xlu0 %2990 }
 0xb4d   : > { %4289 = vset.pattern.permute.xlu1 %v5788_v19  ;;  %5796 = vst [vmem:[#allocation52_spill] sm:$0xff] %v5276_v56 }
 0xb4e   : > { %3172 = vperm.xlu1 %4289, %v5195_v28  }
 0xb52   : > { %4290 = vset.pattern.permute.xlu1 %v5791_v31 }
 0xb53   : > { %2196 = vperm.xlu1 %4290, %v5186_v10  }
 0xb57   : > { %4291 = vset.pattern.permute.xlu1 %v5793_v1 }
 0xb58   : > { %2241 = vperm.xlu1 %4291, %v5186_v10  }
 0xb5c   : > { %4292 = vset.pattern.permute.xlu1 %v5791_v31 }
 0xb5d   : > { %2202 = vperm.xlu1 %4292, %v5195_v28  }
 0xb61   : > { %4293 = vset.pattern.permute.xlu1 %v5793_v1 }
 0xb62   : > { %2246 = vperm.xlu1 %4293, %v5195_v28  }
 0xb66   : > { %4294 = vset.pattern.permute.xlu1 %v5797_v30 }
 0xb67   : > { %2286 = vperm.xlu1 %4294, %v5186_v10  }
 0xb69   : > { %v5280_v27 = vpop.permute.xlu0 %2732  ;;  %v2554_v52 = vpop.permute.xlu1 %2553 }
 0xb6b   : > { %4295 = vset.pattern.permute.xlu1 %v5798_v36 }
 0xb6c   : > { %2330 = vperm.xlu1 %4295, %v5186_v10  }
 0xb6e   : > { %v5284_v31 = vpop.permute.xlu0 %2776  ;;  %v2598_v32 = vpop.permute.xlu1 %2597 }
 0xb6f   : > { %v2600_v35 = vsel %vm2595_vm12, %v2598_v32, 0.0 }
 0xb70   : > { %4296 = vset.pattern.permute.xlu1 %v5797_v30 }
 0xb71   : > { %2291 = vperm.xlu1 %4296, %v5195_v28  }
 0xb73   : > { %v5288_v1 = vpop.permute.xlu0 %2737  ;;  %v2559_v56 = vpop.permute.xlu1 %2558 }
 0xb75   : > { %4297 = vset.pattern.permute.xlu1 %v5798_v36 }
 0xb76   : > { %2335 = vperm.xlu1 %4297, %v5195_v28  }
 0xb78   : > { %v5292_v7 = vpop.permute.xlu0 %2781  ;;  %v2603_v21 = vpop.permute.xlu1 %2602 }
 0xb7a   : > { %4298 = vset.pattern.permute.xlu1 %v5801_v44 }
 0xb7b   : > { %2375 = vperm.xlu1 %4298, %v5186_v10  }
 0xb7c   : > { %v5296_v12 = vpop.permute.xlu0 %3183 }
 0xb7d   : > { %5802 = vst [vmem:[#allocation53_spill] sm:$0xff] %v5296_v12  ;;  %v5298_v30 = vpop.permute.xlu1 %2370  ;;  %v5314_v12 = vld [vmem:[%s5800_s16] ss:$0 sm:$0xff]  ;;  %s5869_s16 = sld [smem:[#allocation15_spill]] }
 0xb7e   : > { %5803 = vst [vmem:[#allocation54_spill] sm:$0xff] %v5298_v30  ;;  %v2605_v30 = vsel %vm2590_vm13, %v2603_v21, %v2600_v35  ;;  %vm2576_vm3 = vcmp.eq.f32.partialorder %v5314_v12, %v4907_v55  ;;  %vm2532_vm6 = vcmp.eq.f32.partialorder %v5314_v12, %v4901_v49  ;;  %vm2574_vm7 = vcmp.le.f32.partialorder %v5314_v12, %v4924_v15 }
 0xb7f   : > { %4299 = vset.pattern.permute.xlu1 %v5804_v40  ;;  %v2585_v58 = vsel %vm2576_vm3, %v4919_v63, %v4917_v62  ;;  %v2541_v59 = vsel %vm2532_vm6, %v4915_v61, %v4913_v60  ;;  %vm2569_vm8 = vcmp.ge.f32.partialorder %v5314_v12, %v4907_v55  ;;  %vm2530_vm9 = vcmp.le.f32.partialorder %v5314_v12, %v4984_v8 }
 0xb80   : > { %v5304_v47 = vpop.permute.xlu0 %2365  ;;  %2419 = vperm.xlu1 %4299, %v5186_v10   ;;  %v2606_v51 = vmul.f32 %v2605_v30, %v2585_v58  ;;  %vm2575_vm10 = vmand %vm2569_vm8, %vm2574_vm7  ;;  %vm2525_vm11 = vcmp.ge.f32.partialorder %v5314_v12, %v4901_v49  ;;  %v5807_v8 = vmov 28   ;;  %vm2769_vm3 = vcmp.eq.f32.partialorder %v5301_v14, %v4946_v4 }
 0xb81   : > { %5805 = vst [vmem:[#allocation55_spill] sm:$0xff] %v5304_v47  ;;  %v5309_v36 = vpop.permute.xlu1 %3042  ;;  %v2556_v47 = vsel %vm2551_vm14, %v2554_v52, 0.0  ;;  %vm2531_vm12 = vmand %vm2525_vm11, %vm2530_vm9  ;;  %vm2774_vm14 = vcmp.eq.f32.partialorder %v5301_v14, %v4988_v23  ;;  %vm2730_vm6 = vcmp.eq.f32.partialorder %v5301_v14, %v4928_v18  ;;  %vm2725_vm7 = vcmp.eq.f32.partialorder %v5301_v14, %v4936_v22 }
 0xb82   : > { %5806 = vst [vmem:[#allocation56_spill] sm:$0xff] %v5309_v36  ;;  %v2561_v54 = vsel %vm2546_vm15, %v2559_v56, %v2556_v47  ;;  %v2607_v15 = vsel %vm2575_vm10, %v2606_v51, 0.0  ;;  %vm2755_vm8 = vcmp.eq.f32.partialorder %v5314_v12, %v4942_v29  ;;  %v2735_v23 = vsel %vm2730_vm6, %v5280_v27, 0.0 }
 0xb83   : > { %v2562_v62 = vmul.f32 %v2561_v54, %v2541_v59  ;;  %v2764_v4 = vsel %vm2755_vm8, %v4961_v38, %v4965_v39  ;;  %vm2711_vm9 = vcmp.eq.f32.partialorder %v5314_v12, %v4931_v3  ;;  %vm2753_vm10 = vcmp.le.f32.partialorder %v5314_v12, %v5005_v9 }
 0xb84   : > { %4300 = vset.pattern.permute.xlu1 %v5801_v44  ;;  %v5808_v44 = vmov 29   ;;  %v2720_v27 = vsel %vm2711_vm9, %v4952_v33, %v4957_v34  ;;  %vm2748_vm11 = vcmp.ge.f32.partialorder %v5314_v12, %v4942_v29  ;;  %v5810_v39 = vmov 12  }
 0xb85   : > { %v5325_v32 = vpop.permute.xlu0 %2414  ;;  %2380 = vperm.xlu1 %4300, %v5195_v28   ;;  %v5328_v36 = vpop.permute.xlu1 %2344  ;;  %v2563_v60 = vsel %vm2531_vm12, %v2562_v62, 0.0  ;;  %vm2709_vm12 = vcmp.le.f32.partialorder %v5314_v12, %v5068_v20  ;;  %v5811_v34 = vmov 13   ;;  %vm2923_vm6 = vcmp.eq.f32.partialorder %v5301_v14, %v5026_v26 }
 0xb86   : > { %v2608_v55 = vadd.f32 %v2607_v15, %v2563_v60  ;;  %vm2354_vm13 = vcmp.eq.f32.partialorder %v5314_v12, %v5328_v36  ;;  %vm2953_vm8 = vcmp.eq.f32.partialorder %v5314_v12, %v5070_v37  ;;  %vm2907_vm9 = vcmp.le.f32.partialorder %v5314_v12, %v5078_v25  ;;  %v5812_v60 = vld [vmem:[#allocation17_spill] sm:$0xff]  ;;  %v5813_v25 = vld [vmem:[#allocation19_spill] sm:$0xff] }
 0xb89   : > { %v5340_v63 = vpop.permute.xlu0 %2409  ;;  %4301 = vset.pattern.permute.xlu1 %v5804_v40  ;;  %v2609_v40 = vpack.c.bf16 %v2608_v55, %v2608_v55  ;;  %v2962_v55 = vsel %vm2953_vm8, %v5813_v25, %v5812_v60  ;;  %vm3116_vm8 = vcmp.eq.f32.partialorder %v5301_v14, %v5096_v5  ;;  %v5820_v5 = vld [vmem:[#allocation24_spill] sm:$0xff] }
 0xb8a   : > { %2424 = vperm.xlu1 %4301, %v5195_v28   ;;  %v5346_v35 = vpop.permute.xlu1 %2388  ;;  %v5832_v60 = vld [vmem:[#allocation44_spill] sm:$0xff] }
 0xb8b   : > { %vm2398_vm15 = vcmp.eq.f32.partialorder %v5314_v12, %v5346_v35 }
 0xb8e   : > { %v5348_v61 = vpop.permute.xlu0 %2503  ;;  %4302 = vset.pattern.permute.xlu1 %v5807_v8 }
 0xb8f   : > { %2464 = vperm.xlu1 %4302, %v5186_v10   ;;  %v5352_v47 = vpop.permute.xlu1 %2459 }
 0xb93   : > { %v2401_v21 = vpop.permute.xlu0 %2400  ;;  %2611 = vrot.lane.b32.xlu1 %v2609_v40, %s4459_s2  ;;  %v5355_v49 = vpop.permute.xlu1 %3235 }
 0xb94   : > { %4303 = vset.pattern.permute.xlu1 %v5808_v44 }
 0xb97   : > { %2498 = vperm.xlu1 %4303, %v4795_v50   ;;  %v2361_v56 = vpop.permute.xlu1 %2360  ;;  %v2779_v50 = vsel %vm2774_vm14, %v5284_v31, 0.0  ;;  %v2740_v31 = vsel %vm2725_vm7, %v5288_v1, %v2735_v23  ;;  %vm2704_vm14 = vcmp.ge.f32.partialorder %v5314_v12, %v4931_v3  ;;  %vm2909_vm7 = vcmp.eq.f32.partialorder %v5314_v12, %v5074_v45  ;;  %v5821_v23 = vld [vmem:[#allocation20_spill] sm:$0xff] }
 0xb98   : > { %v2357_v52 = vpop.permute.xlu0 %2356  ;;  %v2784_v51 = vsel %vm2769_vm3, %v5292_v7, %v2779_v50  ;;  %v2741_v38 = vmul.f32 %v2740_v31, %v2720_v27  ;;  %vm2928_vm3 = vcmp.eq.f32.partialorder %v5301_v14, %v5013_v41  ;;  %v2918_v41 = vsel %vm2909_vm7, %v5076_v11, %v5035_v46 }
 0xb99   : > { %v5361_v30 = vsel %vm2354_vm13, %v2357_v52, %v2361_v56  ;;  %v2785_v18 = vmul.f32 %v2784_v51, %v2764_v4  ;;  %vm2754_vm13 = vmand %vm2748_vm11, %vm2753_vm10  ;;  %vm2972_vm10 = vcmp.eq.f32.partialorder %v5301_v14, %v5017_v17  ;;  %vm2967_vm11 = vcmp.eq.f32.partialorder %v5301_v14, %v5031_v42  ;;  %v5817_v52 = vld [vmem:[#allocation23_spill] sm:$0xff] }
 0xb9b   : > { %2508 = vperm.xlu1 %4303, %v5186_v10   ;;  %v5809_v10 = vmov 9   ;;  %v2786_v9 = vsel %vm2754_vm13, %v2785_v18, 0.0  ;;  %vm2902_vm13 = vcmp.ge.f32.partialorder %v5314_v12, %v5074_v45  ;;  %v5823_v18 = vld [vmem:[#allocation21_spill] sm:$0xff] }
 0xb9c   : > { %v2405_v58 = vpop.permute.xlu1 %2404 }
 0xb9d   : > { %v5371_v54 = vsel %vm2398_vm15, %v2401_v21, %v2405_v58  ;;  %vm2710_vm15 = vmand %vm2704_vm14, %vm2709_vm12  ;;  %vm2951_vm12 = vcmp.le.f32.partialorder %v5314_v12, %v5043_v0  ;;  %vm2946_vm14 = vcmp.ge.f32.partialorder %v5314_v12, %v5070_v37  ;;  %v5814_v37 = vld [vmem:[#allocation18_spill] sm:$0xff] }
 0xb9e   : > { %v2742_v1 = vsel %vm2710_vm15, %v2741_v38, 0.0  ;;  %vm2908_vm15 = vmand %vm2902_vm13, %vm2907_vm9  ;;  %v5815_v21 = vld [vmem:[#allocation22_spill] sm:$0xff]  ;;  %vm3146_vm13 = vcmp.eq.f32.partialorder %v5314_v12, %v5821_v23 }
 0xb9f   : > { %4305 = vset.pattern.permute.xlu1 %v5809_v10  ;;  %v2787_v33 = vadd.f32 %v2786_v9, %v2742_v1  ;;  %vm3102_vm7 = vcmp.eq.f32.partialorder %v5314_v12, %v5815_v21  ;;  %v5822_v10 = vld [vmem:[#allocation29_spill] sm:$0xff] }
 0xba0   : > { %2393 = vperm.xlu1 %4305, %v4806_v53   ;;  %v3111_v58 = vsel %vm3102_vm7, %v5817_v52, %v5107_v13  ;;  %vm2193_vm7 = vcmp.eq.f32.partialorder %v5301_v14, %v5149_v2  ;;  %v5829_v2 = vld [vmem:[#allocation27_spill] sm:$0xff] }
 0xba1   : > { %v5390_v22 = vpop.permute.xlu1 %2454  ;;  %v2788_v20 = vpack.c.bf16 %v2787_v33, %v2787_v33  ;;  %v5825_v33 = vld [vmem:[#allocation26_spill] sm:$0xff] }
 0xba4   : > { %4306 = vset.pattern.permute.xlu1 %v5810_v39 }
 0xba5   : > { %2445 = vperm.xlu1 %4306, %v4822_v57  }
 0xba6   : > { %v2931_v7 = vpop.permute.xlu1 %2930 }
 0xba7   : > { %v2933_v59 = vsel %vm2928_vm3, %v2931_v7, 0.0  ;;  %vm2952_vm3 = vmand %vm2946_vm14, %vm2951_vm12  ;;  %vm3165_vm12 = vcmp.eq.f32.partialorder %v5301_v14, %v5820_v5  ;;  %vm3160_vm14 = vcmp.eq.f32.partialorder %v5301_v14, %v5822_v10  ;;  %v5841_v10 = vld [vmem:[#allocation47_spill] sm:$0xff] }
 0xba9   : > { %4308 = vset.pattern.permute.xlu1 %v5807_v8 }
 0xbaa   : > { %2469 = vperm.xlu1 %4308, %v5195_v28  }
 0xbab   : > { %v2975_v29 = vpop.permute.xlu1 %2974 }
 0xbae   : > { %2790 = vrot.lane.b32.xlu1 %v2788_v20, %s4459_s2 }
 0xbaf   : > { %4309 = vset.pattern.permute.xlu1 %v5811_v34  ;;  %v5826_v34 = vld [vmem:[#allocation40_spill] sm:$0xff] }
 0xbb0   : > { %v2936_v3 = vpop.permute.xlu1 %2935 }
 0xbb1   : > { %v2938_v62 = vsel %vm2923_vm6, %v2936_v3, %v2933_v59  ;;  %vm3121_vm6 = vcmp.eq.f32.partialorder %v5301_v14, %v5814_v37  ;;  %v5827_v3 = vld [vmem:[#allocation33_spill] sm:$0xff] }
 0xbb2   : > { %2489 = vperm.xlu1 %4309, %v4822_v57   ;;  %v2977_v57 = vsel %vm2972_vm10, %v2975_v29, 0.0  ;;  %v2939_v26 = vmul.f32 %v2938_v62, %v2918_v41  ;;  %vm3095_vm10 = vcmp.ge.f32.partialorder %v5314_v12, %v5815_v21 }
 0xbb4   : > { %v2940_v42 = vsel %vm2908_vm15, %v2939_v26, 0.0  ;;  %vm3144_vm15 = vcmp.le.f32.partialorder %v5314_v12, %v5147_v16  ;;  %v5830_v26 = vld [vmem:[#allocation32_spill] sm:$0xff] }
 0xbb5   : > { %v2980_v15 = vpop.permute.xlu1 %2979 }
 0xbb6   : > { %v2982_v8 = vsel %vm2967_vm11, %v2980_v15, %v2977_v57  ;;  %4310 = vset.pattern.permute.xlu1 %v5808_v44  ;;  %v5828_v57 = vld [vmem:[#allocation35_spill] sm:$0xff]  ;;  %v5831_v15 = vld [vmem:[#allocation28_spill] sm:$0xff] }
 0xbb7   : > { %v2983_v17 = vmul.f32 %v2982_v8, %v2962_v55  ;;  %2513 = vperm.xlu1 %4310, %v5195_v28   ;;  %v5816_v28 = vld [vmem:[#allocation25_spill] sm:$0xff]  ;;  %v5833_v8 = vld [vmem:[#allocation42_spill] sm:$0xff] }
 0xbb8   : > { %vm3100_vm9 = vcmp.le.f32.partialorder %v5314_v12, %v5816_v28  ;;  %v5835_v28 = vld [vmem:[#allocation37_spill] sm:$0xff] }
 0xbb9   : > { %v2984_v46 = vsel %vm2952_vm3, %v2983_v17, 0.0  ;;  %vm5451_vm11 = vmand %vm3095_vm10, %vm3100_vm9  ;;  %vm3139_vm3 = vcmp.ge.f32.partialorder %v5314_v12, %v5821_v23  ;;  %vm2188_vm9 = vcmp.eq.f32.partialorder %v5301_v14, %v5825_v33  ;;  %vm2164_vm10 = vcmp.le.f32.partialorder %v5314_v12, %v5828_v57  ;;  %v5834_v17 = vld [vmem:[#allocation34_spill] sm:$0xff]  ;;  %v5840_v23 = vld [vmem:[#allocation45_spill] sm:$0xff] }
 0xbba   : > { %v2985_v0 = vadd.f32 %v2984_v46, %v2940_v42  ;;  %v3124_v11 = vpop.permute.xlu1 %3123  ;;  %v5847_v33 = vld [vmem:[#allocation54_spill] sm:$0xff] }
 0xbbb   : > { %4311 = vset.pattern.permute.xlu1 %v5810_v39  ;;  %v3126_v44 = vsel %vm3121_vm6, %v3124_v11, 0.0  ;;  %vm3145_vm6 = vmand %vm3139_vm3, %vm3144_vm15 }
 0xbbc   : > { %v2986_v45 = vpack.c.bf16 %v2985_v0, %v2985_v0  ;;  %2438 = vperm.xlu1 %4311, %v4806_v53  }
 0xbbe   : > { %2988 = vrot.lane.b32.xlu0 %v2986_v45, %s4459_s2 }
 0xbbf   : > { %v3168_v40 = vpop.permute.xlu1 %3167 }
 0xbc0   : > { %v3170_v4 = vsel %vm3165_vm12, %v3168_v40, 0.0  ;;  %vm2220_vm12 = vcmp.eq.f32.partialorder %v5314_v12, %v5830_v26 }
 0xbc1   : > { %v2229_v42 = vsel %vm2220_vm12, %v5834_v17, %v5833_v8  ;;  %vm2328_vm12 = vcmp.eq.f32.partialorder %v5301_v14, %v5841_v10 }
 0xbc2   : > { %2482 = vperm.xlu0 %4307, %v4806_v53  }
 0xbc4   : > { %v3129_v56 = vpop.permute.xlu1 %3128 }
 0xbc5   : > { %v3131_v50 = vsel %vm3116_vm8, %v3129_v56, %v3126_v44  ;;  %v5836_v44 = vld [vmem:[#allocation38_spill] sm:$0xff] }
 0xbc6   : > { %v3132_v53 = vmul.f32 %v3131_v50, %v3111_v58  ;;  %3233 = vrot.lane.b32.xlu0 %v5114_v6, %s5783_s7  ;;  %v5837_v56 = vld [vmem:[#allocation46_spill] sm:$0xff]  ;;  %v5838_v50 = vld [vmem:[#allocation49_spill] sm:$0xff] }
 0xbc7   : > { %4312 = vset.pattern.permute.xlu0 %v5788_v19  ;;  %v3155_v19 = vsel %vm3146_vm13, %v5823_v18, %v5142_v48  ;;  %v5824_v48 = vld [vmem:[#allocation31_spill] sm:$0xff]  ;;  %vm2234_vm13 = vcmp.eq.f32.partialorder %v5301_v14, %v5831_v15 }
 0xbc8   : > { %v3133_v13 = vsel %vm5451_vm11, %v3132_v53, 0.0  ;;  %vm2166_vm8 = vcmp.eq.f32.partialorder %v5314_v12, %v5824_v48  ;;  %vm2239_vm11 = vcmp.eq.f32.partialorder %v5301_v14, %v5829_v2  ;;  %vm2157_vm15 = vcmp.ge.f32.partialorder %v5314_v12, %v5824_v48  ;;  %v5839_v53 = vld [vmem:[#allocation41_spill] sm:$0xff]  ;;  %v5844_v18 = vld [vmem:[#allocation51_spill] sm:$0xff]  ;;  %v2350_v2 = vpop.permute.xlu0 %2349 }
 0xbc9   : > { %v3173_v31 = vpop.permute.xlu1 %3172  ;;  %v2177_v59 = vsel %vm2166_vm8, %v5827_v3, %v5826_v34  ;;  %vm2165_vm3 = vmand %vm2157_vm15, %vm2164_vm10  ;;  %vm2284_vm8 = vcmp.eq.f32.partialorder %v5301_v14, %v5835_v28  ;;  %vm2279_vm10 = vcmp.eq.f32.partialorder %v5301_v14, %v5837_v56  ;;  %vm2307_vm15 = vcmp.le.f32.partialorder %v5314_v12, %v5844_v18  ;;  %v5855_v56 = vld [vmem:[#allocation52_spill] sm:$0xff] }
 0xbca   : > { %v3175_v27 = vsel %vm3160_vm14, %v3173_v31, %v3170_v4  ;;  %3231 = vrot.lane.b32.xlu0 %v5121_v43, %s5783_s7  ;;  %vm2218_vm14 = vcmp.le.f32.partialorder %v5314_v12, %v5832_v60  ;;  %v5842_v4 = vld [vmem:[#allocation39_spill] sm:$0xff]  ;;  %v5843_v31 = vld [vmem:[#allocation48_spill] sm:$0xff] }
 0xbcb   : > { %v3176_v38 = vmul.f32 %v3175_v27, %v3155_v19 }
 0xbcd   : > { %v3177_v39 = vsel %vm3145_vm6, %v3176_v38, 0.0  ;;  %vm2213_vm6 = vcmp.ge.f32.partialorder %v5314_v12, %v5830_v26  ;;  %v5845_v38 = vld [vmem:[#allocation50_spill] sm:$0xff]  ;;  %v5850_v26 = vld [vmem:[#allocation55_spill] sm:$0xff] }
 0xbce   : > { %v3178_v9 = vadd.f32 %v3177_v39, %v3133_v13  ;;  %3229 = vrot.lane.b32.xlu0 %v5129_v24, %s5783_s7  ;;  %v2197_v16 = vpop.permute.xlu1 %2196  ;;  %v5846_v39 = vld [vmem:[#allocation43_spill] sm:$0xff]  ;;  %s5867_s7 = sld [smem:[#allocation11_spill]] }
 0xbcf   : > { %v2199_v29 = vsel %vm2193_vm7, %v2197_v16, 0.0  ;;  %vm2219_vm7 = vmand %vm2213_vm6, %vm2218_vm14  ;;  %vm2323_vm14 = vcmp.eq.f32.partialorder %v5301_v14, %v5843_v31 }
 0xbd0   : > { %v3179_v7 = vpack.c.bf16 %v3178_v9, %v3178_v9 }
 0xbd2   : > { %3181 = vrot.lane.b32.xlu1 %v3179_v7, %s4459_s2  ;;  %s1051_s2 = scalar_lea.vmem %s4618_s13, %s4645_s0 }
 0xbd3   : > { %v2242_v1 = vpop.permute.xlu1 %2241 }
 0xbd4   : > { %v2244_v25 = vsel %vm2239_vm11, %v2242_v1, 0.0  ;;  %vm2263_vm11 = vcmp.le.f32.partialorder %v5314_v12, %v5840_v23 }
 0xbd6   : > { %3040 = vrot.lane.b32.xlu1 %v5114_v6, %s5762_s23 }
 0xbd8   : > { %v2203_v20 = vpop.permute.xlu1 %2202 }
 0xbd9   : > { %v2205_v62 = vsel %vm2188_vm9, %v2203_v20, %v2199_v29  ;;  %vm2265_vm9 = vcmp.eq.f32.partialorder %v5314_v12, %v5836_v44 }
 0xbda   : > { %v2206_v41 = vmul.f32 %v2205_v62, %v2177_v59  ;;  %3038 = vrot.lane.b32.xlu1 %v5121_v43, %s5762_s23  ;;  %v2274_v51 = vsel %vm2265_vm9, %v5839_v53, %v5838_v50  ;;  %vm2373_vm9 = vcmp.eq.f32.partialorder %v5301_v14, %v5847_v33  ;;  %v5848_v59 = vld [vmem:[#allocation56_spill] sm:$0xff]  ;;  %v5856_v50 = vld [vmem:[#allocation53_spill] sm:$0xff] }
 0xbdc   : > { %v2207_v11 = vsel %vm2165_vm3, %v2206_v41, 0.0  ;;  %vm2258_vm3 = vcmp.ge.f32.partialorder %v5314_v12, %v5836_v44  ;;  %v5849_v41 = vmov 0.0  }
 0xbdd   : > { %v2247_v55 = vpop.permute.xlu1 %2246  ;;  %vm2264_vm6 = vmand %vm2258_vm3, %vm2263_vm11  ;;  %vm2417_vm11 = vcmp.eq.f32.partialorder %v5301_v14, %v5325_v32  ;;  %vm2412_vm3 = vcmp.eq.f32.partialorder %v5301_v14, %v5340_v63 }
 0xbde   : > { %v2249_v46 = vsel %vm2234_vm13, %v2247_v55, %v2244_v25  ;;  %3036 = vrot.lane.b32.xlu1 %v5129_v24, %s5762_s23  ;;  %vm2309_vm13 = vcmp.eq.f32.partialorder %v5314_v12, %v5842_v4  ;;  %s5866_s23 = sld [smem:[#allocation10_spill]] }
 0xbdf   : > { %v2250_v0 = vmul.f32 %v2249_v46, %v2229_v42  ;;  %v2318_v9 = vsel %vm2309_vm13, %v5846_v39, %v5845_v38  ;;  %vm2352_vm13 = vcmp.le.f32.partialorder %v5314_v12, %v2350_v2 }
 0xbe1   : > { %v2251_v45 = vsel %vm2219_vm7, %v2250_v0, 0.0  ;;  %vm2302_vm7 = vcmp.ge.f32.partialorder %v5314_v12, %v5842_v4  ;;  %v5853_v0 = vld [vmem:[#allocation30_spill] sm:$0xff] }
 0xbe2   : > { %v5505_v40 = vadd.f32 %v2251_v45, %v2207_v11  ;;  %v2287_v37 = vpop.permute.xlu1 %2286 }
 0xbe3   : > { %v2289_v52 = vsel %vm2284_vm8, %v2287_v37, 0.0  ;;  %vm2308_vm8 = vmand %vm2302_vm7, %vm2307_vm15  ;;  %vm2391_vm7 = vcmp.ge.f32.partialorder %v5314_v12, %v5346_v35 }
 0xbe4   : > { %v2253_v45 = vpack.c.bf16 %v5505_v40, %v5505_v40 }
 0xbe7   : > { %v2331_v21 = vpop.permute.xlu1 %2330 }
 0xbe8   : > { %v2333_v19 = vsel %vm2328_vm12, %v2331_v21, 0.0  ;;  %vm2368_vm12 = vcmp.eq.f32.partialorder %v5301_v14, %v5850_v26  ;;  %v5854_v21 = vld [vmem:[#allocation36_spill] sm:$0xff] }
 0xbec   : > { %v2292_v58 = vpop.permute.xlu1 %2291 }
 0xbed   : > { %v2294_v5 = vsel %vm2279_vm10, %v2292_v58, %v2289_v52  ;;  %vm2656_vm10 = vcmask 523264  }
 0xbee   : > { %v2295_v13 = vmul.f32 %v2294_v5, %v2274_v51 }
 0xbf0   : > { %v2296_v1 = vsel %vm2264_vm6, %v2295_v13, 0.0  ;;  %vm2462_vm6 = vcmp.eq.f32.partialorder %v5301_v14, %v5352_v47  ;;  %v2434_v47 = vpop.permute.xlu0 %2433 }
 0xbf1   : > { %v2336_v27 = vpop.permute.xlu1 %2335 }
 0xbf2   : > { %v2338_v16 = vsel %vm2323_vm14, %v2336_v27, %v2333_v19  ;;  %vm2347_vm14 = vcmp.ge.f32.partialorder %v5314_v12, %v5328_v36 }
 0xbf3   : > { %v2339_v7 = vmul.f32 %v2338_v16, %v2318_v9  ;;  %vm5546_vm15 = vmand %vm2347_vm14, %vm2352_vm13 }
 0xbf5   : > { %v2340_v48 = vsel %vm2308_vm8, %v2339_v7, 0.0 }
 0xbf6   : > { %v2341_v29 = vadd.f32 %v2340_v48, %v2296_v1  ;;  %v2376_v20 = vpop.permute.xlu1 %2375 }
 0xbf7   : > { %v2378_v34 = vsel %vm2373_vm9, %v2376_v20, 0.0 }
 0xbf8   : > { %v2342_v3 = vpack.c.bf16 %v2341_v29, %v2341_v29 }
 0xbfa   : > { %4046 = vmatmul.mubr.msk.bf16.vlgmr.msra.gmra.mxu1 %vm2656_vm10, %v2342_v3 }
 0xbfb   : > { %4056 = vmatpush3.bf16.msra.mxu1 %v5848_v59  ;;  %v2420_v62 = vpop.permute.xlu1 %2419  ;;  %4063 = vmatprep.mubr.msk.bf16.mxu1 %vm4414_vm0, %v5849_v41 }
 0xbfc   : > { %v2422_v57 = vsel %vm2417_vm11, %v2420_v62, 0.0  ;;  %4057 = vmatprep.subr.bf16.mxu1 %v5849_v41  ;;  %vm2457_vm11 = vcmp.eq.f32.partialorder %v5301_v14, %v5390_v22 }
 0xc00   : > { %v2381_v15 = vpop.permute.xlu1 %2380 }
 0xc01   : > { %v2383_v60 = vsel %vm2368_vm12, %v2381_v15, %v2378_v34  ;;  %vm2506_vm12 = vcmp.eq.f32.partialorder %v5301_v14, %v5348_v61  ;;  %v4328_v15 = vld [vmem:[%s5859_s18 + $0x8] sm:$0xff]  }
 0xc02   : > { %v2384_v32 = vmul.f32 %v2383_v60, %v5361_v30 }
 0xc04   : > { %v2385_v55 = vsel %vm5546_vm15, %v2384_v32, 0.0 }
 0xc05   : > { %v2425_v8 = vpop.permute.xlu1 %2424 }
 0xc06   : > { %v2427_v17 = vsel %vm2412_vm3, %v2425_v8, %v2422_v57 }
 0xc07   : > { %v2428_v42 = vmul.f32 %v2427_v17, %v5371_v54 }
 0xc0a   : > { %v2465_v36 = vpop.permute.xlu1 %2464 }
 0xc0b   : > { %v2467_v46 = vsel %vm2462_vm6, %v2465_v36, 0.0 }
 0xc0e   : > { %v2612_v30 = vpop.permute.xlu1 %2611 }
 0xc0f   : > { %4016 = vmatmul.mubr.msk.bf16.vlgmr.msra.gmra.mxu0 %vm1654_vm4, %v2612_v30 }
 0xc10   : > { %4020 = vmatpush3.bf16.msra.mxu0 %v5853_v0  ;;  %4027 = vmatprep.mubr.msk.bf16.mxu0 %vm4414_vm0, %v5849_v41 }
 0xc11   : > { %4021 = vmatprep.subr.bf16.mxu0 %v5849_v41 }
 0xc12   : > { %v2499_v63 = vpop.permute.xlu1 %2498 }
 0xc13   : > { %vm2501_vm13 = vcmp.eq.f32.partialorder %v5301_v14, %v2499_v63 }
 0xc14   : > { %4022 = vmatpush3.bf16.msra.mxu0 %v5114_v6 }
 0xc15   : > { %4023 = vmatprep.subr.bf16.mxu0 %v5849_v41 }
 0xc16   : > { %v2509_v54 = vpop.permute.xlu1 %2508 }
 0xc17   : > { %v2511_v10 = vsel %vm2506_vm12, %v2509_v54, 0.0 }
 0xc18   : > { %4024 = vmatpush3.bf16.msra.mxu0 %v5121_v43  ;;  %v2450_v43 = vpop.permute.xlu0 %2449 }
 0xc19   : > { %4025 = vmatprep.subr.bf16.mxu0 %v5849_v41 }
 0xc1b   : > { %v2394_v11 = vpop.permute.xlu1 %2393 }
 0xc1c   : > { %vm2396_vm8 = vcmp.le.f32.partialorder %v5314_v12, %v2394_v11  ;;  %4026 = vmatpush3.bf16.msra.mxu0 %v5129_v24  ;;  %v2478_v35 = vpop.permute.xlu0 %2477 }
 0xc1d   : > { %vm2397_vm9 = vmand %vm2391_vm7, %vm2396_vm8  ;;  %4031 = vmatprep.subr.bf16.mxu0 %v5849_v41  ;;  %vm2480_vm15 = vcmp.ge.f32.partialorder %v5314_v12, %v2478_v35  ;;  %vm2487_vm3 = vcmp.eq.f32.partialorder %v5314_v12, %v2478_v35  ;;  %vm2436_vm8 = vcmp.ge.f32.partialorder %v5314_v12, %v2434_v47 }
 0xc1e   : > { %v2429_v6 = vsel %vm2397_vm9, %v2428_v42, 0.0  ;;  %vm2443_vm9 = vcmp.eq.f32.partialorder %v5314_v12, %v2434_v47 }
 0xc1f   : > { %v5573_v37 = vadd.f32 %v2429_v6, %v2385_v55  ;;  %4028 = vmatmul.mubr.msk.bf16.vlgmr.msra.gmra.mxu0 %vm2656_vm10, %v2253_v45  ;;  %v4329_v45 = vld [vmem:[%s5859_s18] sm:$0xff]  }
 0xc20   : > { %4032 = vmatpush3.bf16.msra.mxu0 %v5854_v21  ;;  %v2446_v28 = vpop.permute.xlu1 %2445  ;;  %4033 = vmatprep.mubr.msk.bf16.mxu0 %vm4414_vm0, %v5849_v41  ;;  %v2494_v52 = vpop.permute.xlu0 %2493 }
 0xc21   : > { %4049 = vmatprep.subr.bf16.mxu0 %v5849_v41  ;;  %v2452_v18 = vsel %vm2443_vm9, %v2446_v28, %v2450_v43  ;;  %v2431_v1 = vpack.c.bf16 %v5573_v37, %v5573_v37 }
 0xc25   : > { %v2470_v24 = vpop.permute.xlu1 %2469 }
 0xc26   : > { %v2472_v40 = vsel %vm2457_vm11, %v2470_v24, %v2467_v46 }
 0xc27   : > { %v2473_v27 = vmul.f32 %v2472_v40, %v2452_v18 }
 0xc29   : > { %v2791_v44 = vpop.permute.xlu1 %2790 }
 0xc2a   : > { %4034 = vmatmul.mubr.msk.bf16.vlgmr.msra.gmra.mxu0 %vm1654_vm4, %v2791_v44 }
 0xc2b   : > { %4050 = vmatpush3.bf16.msra.mxu0 %v5855_v56  ;;  %4051 = vmatprep.mubr.msk.bf16.mxu0 %vm4414_vm0, %v5849_v41 }
 0xc2c   : > { %4067 = vmatprep.subr.bf16.mxu0 %v5849_v41 }
 0xc2d   : > { %v2490_v22 = vpop.permute.xlu1 %2489 }
 0xc2e   : > { %v2496_v31 = vsel %vm2487_vm3, %v2490_v22, %v2494_v52 }
 0xc30   : > { %v2989_v58 = vpop.permute.xlu0 %2988 }
 0xc32   : > { %4052 = vmatmul.mubr.msk.bf16.vlgmr.msra.gmra.mxu0 %vm1654_vm4, %v2989_v58  ;;  %v2514_v53 = vpop.permute.xlu1 %2513 }
 0xc33   : > { %4068 = vmatpush3.bf16.msra.mxu0 %v5856_v50  ;;  %4069 = vmatprep.mubr.msk.bf16.mxu0 %vm4414_vm0, %v5849_v41  ;;  %v2516_v4 = vsel %vm2501_vm13, %v2514_v53, %v2511_v10 }
 0xc34   : > { %4073 = vmatprep.subr.bf16.mxu0 %v5849_v41 }
 0xc37   : > { %v2439_v5 = vpop.permute.xlu1 %2438 }
 0xc38   : > { %vm2441_vm6 = vcmp.le.f32.partialorder %v5314_v12, %v2439_v5 }
 0xc39   : > { %vm2442_vm11 = vmand %vm2436_vm8, %vm2441_vm6 }
 0xc3a   : > { %v2474_v9 = vsel %vm2442_vm11, %v2473_v27, 0.0 }
 0xc3d   : > { %v2483_v51 = vpop.permute.xlu0 %2482 }
 0xc3e   : > { %vm2485_vm14 = vcmp.le.f32.partialorder %v5314_v12, %v2483_v51 }
 0xc3f   : > { %vm5604_vm7 = vmand %vm2480_vm15, %vm2485_vm14 }
 0xc41   : > { %v3234_v23 = vpop.permute.xlu0 %3233 }
 0xc44   : > { %v3182_v13 = vpop.permute.xlu1 %3181 }
 0xc45   : > { %4070 = vmatmul.mubr.msk.bf16.vlgmr.msra.gmra.mxu0 %vm1654_vm4, %v3182_v13  ;;  %v3232_v19 = vpop.permute.xlu0 %3231 }
 0xc46   : > { %4074 = vmatpush3.bf16.msra.mxu0 %v5355_v49  ;;  %4081 = vmatprep.mubr.msk.bf16.mxu0 %vm4414_vm0, %v5849_v41  ;;  %v2517_v49 = vmul.f32 %v2516_v4, %v2496_v31  ;;  %v5864_v31 = vld [vmem:[#allocation16_spill] sm:$0xff] }
 0xc47   : > { %4075 = vmatprep.subr.bf16.mxu0 %v5849_v41 }
 0xc48   : > { %v3041_v61 = vpop.permute.xlu1 %3040  ;;  %v2518_v38 = vsel %vm5604_vm7, %v2517_v49, 0.0 }
 0xc49   : > { %4058 = vmatpush3.bf16.msra.mxu1 %v3041_v61  ;;  %v2519_v12 = vadd.f32 %v2518_v38, %v2474_v9  ;;  %v3230_v7 = vpop.permute.xlu0 %3229 }
 0xc4a   : > { %4076 = vmatpush3.bf16.msra.mxu0 %v3234_v23  ;;  %4059 = vmatprep.subr.bf16.mxu1 %v5849_v41  ;;  %v3815_v23 = vld [vmem:[%s5861_s15] ss:$0 sm:$0xff] }
 0xc4b   : > { %4077 = vmatprep.subr.bf16.mxu0 %v5849_v41  ;;  %v2520_v48 = vpack.c.bf16 %v2519_v12, %v2519_v12 }
 0xc4c   : > { %v3039_v39 = vpop.permute.xlu1 %3038 }
 0xc4d   : > { %4060 = vmatpush3.bf16.msra.mxu1 %v3039_v39 }
 0xc4e   : > { %4078 = vmatpush3.bf16.msra.mxu0 %v3232_v19  ;;  %4061 = vmatprep.subr.bf16.mxu1 %v5849_v41 }
 0xc4f   : > { %4079 = vmatprep.subr.bf16.mxu0 %v5849_v41 }
 0xc50   : > { %v3037_v16 = vpop.permute.xlu1 %3036 }
 0xc51   : > { %4062 = vmatpush3.bf16.msra.mxu1 %v3037_v16 }
 0xc52   : > { %4080 = vmatpush3.bf16.msra.mxu0 %v3230_v7  ;;  %4085 = vmatprep.subr.bf16.mxu1 %v5849_v41 }
 0xc53   : > { %4101 = vmatprep.subr.bf16.mxu0 %v5849_v41 }
 0xc54   : > { %4064 = vmatmul.mubr.msk.bf16.vlgmr.msra.gmra.mxu1 %vm2656_vm10, %v2431_v1  ;;  %v4332_v1 = vld [vmem:[%s5865_s11 + $0x18] sm:$0xff]  }
 0xc55   : > { %4082 = vmatmul.mubr.msk.bf16.vlgmr.msra.gmra.mxu0 %vm2656_vm10, %v2520_v48  ;;  %4089 = vmatprep.mubr.msk.bf16.mxu1 %vm4414_vm0, %v5849_v41  ;;  %v4333_v48 = vld [vmem:[%s5865_s11 + $0x10] sm:$0xff]  }
 0xc56   : > { %4109 = vmatprep.mubr.msk.bf16.mxu0 %vm4414_vm0, %v5849_v41  ;;  %4086 = vmatpush3.bf16.msra.mxu1 %v4328_v15  ;;  %v4334_v15 = vld [vmem:[%s5865_s11 + $0x8] sm:$0xff]  }
 0xc57   : > { %4087 = vmatprep.subr.bf16.mxu1 %v5849_v41  ;;  %4102 = vmatpush3.bf16.msra.mxu0 %v4332_v1 }
 0xc58   : > { %4103 = vmatprep.subr.bf16.mxu0 %v5849_v41 }
 0xc5a   : > { %4088 = vmatpush3.bf16.msra.mxu1 %v4329_v45 }
 0xc5b   : > { %4093 = vmatprep.subr.bf16.mxu1 %v5849_v41  ;;  %4104 = vmatpush3.bf16.msra.mxu0 %v4333_v48 }
 0xc5c   : > { %4105 = vmatprep.subr.bf16.mxu0 %v5849_v41 }
 0xc5f   : > { %4106 = vmatpush3.bf16.msra.mxu0 %v4334_v15 }
 0xc60   : > { %4107 = vmatprep.subr.bf16.mxu0 %v5849_v41 }
 0xcba   : > { %v2892_v33 = vpop.f32.mrf.mxu1 }
 0xcbc   : > { %v4047_v29 = vpop.f32.mrf.mxu1 }
 0xcbe   : > { %v2895_v20 = vpop.f32.mrf.mxu1 }
 0xcc0   : > { %v4048_v34 = vpop.f32.mrf.mxu1 }
 0xccf   : > { %v2650_v3 = vpop.f32.mrf.mxu0 }
 0xcd1   : > { %v4017_v59 = vpop.f32.mrf.mxu0 }
 0xcd3   : > { %v2653_v62 = vpop.f32.mrf.mxu0 }
 0xcd4   : > { %v3820_v62 = vld [vmem:[%s5867_s7] ss:$0 sm:$0xff] }
 0xcd5   : > { %v4018_v57 = vpop.f32.mrf.mxu0 }
 0xcdf   : > { %v2694_v2 = vpop.f32.mrf.mxu0 }
 0xce0   : > { %v2695_v26 = vadd.f32 %v2694_v2, %v2650_v3  ;;  %v3819_v3 = vld [vmem:[%s5866_s23] ss:$0 sm:$0xff] }
 0xce1   : > { %v4029_v60 = vpop.f32.mrf.mxu0 }
 0xce2   : > { %v4335_v60 = vld [vmem:[%s5865_s11] sm:$0xff]  }
 0xce3   : > { %v2697_v32 = vpop.f32.mrf.mxu0  ;;  %4108 = vmatpush3.bf16.msra.mxu0 %v4335_v60 }
 0xce4   : > { %v3821_v32 = vld [vmem:[%s5868_s10] ss:$0 sm:$0xff] }
 0xce5   : > { %v4030_v25 = vpop.f32.mrf.mxu0 }
 0xcea   : > { %v2833_v55 = vpop.f32.mrf.mxu0 }
 0xceb   : > { %v2893_v8 = vadd.f32 %v2892_v33, %v2833_v55 }
 0xcec   : > { %v4035_v17 = vpop.f32.mrf.mxu0 }
 0xced   : > { %3285 = vrot.lane.b32.xlu1 %v2893_v8, %s5860_s26 }
 0xcee   : > { %v2836_v42 = vpop.f32.mrf.mxu0 }
 0xcf0   : > { %v4036_v36 = vpop.f32.mrf.mxu0 }
 0xcf2   : > { %v3030_v46 = vpop.f32.mrf.mxu0 }
 0xcf4   : > { %v4053_v30 = vpop.f32.mrf.mxu0 }
 0xcf5   : > { %v3825_v30 = vld [vmem:[%s5869_s16] ss:$0 sm:$0xff] }
 0xcf6   : > { %v3033_v0 = vpop.f32.mrf.mxu0 }
 0xcf8   : > { %v4054_v63 = vpop.f32.mrf.mxu0 }
 0xd05   : > { %v3223_v54 = vpop.f32.mrf.mxu0 }
 0xd07   : > { %v4071_v47 = vpop.f32.mrf.mxu0 }
 0xd09   : > { %v3226_v11 = vpop.f32.mrf.mxu0 }
 0xd0b   : > { %v4072_v6 = vpop.f32.mrf.mxu0 }
 0xd14   : > { %v3085_v37 = vpop.f32.mrf.mxu1 }
 0xd15   : > { %v3086_v43 = vadd.f32 %v3085_v37, %v3030_v46  ;;  %v3278_v21 = vpop.f32.mrf.mxu0 }
 0xd16   : > { %v3279_v28 = vadd.f32 %v3278_v21, %v3223_v54  ;;  %v4065_v24 = vpop.f32.mrf.mxu1 }
 0xd17   : > { %v4083_v35 = vpop.f32.mrf.mxu0  ;;  %3289 = vrot.lane.b32.xlu0 %v3086_v43, %s4423_s1  ;;  %s5863_s1 = sld [smem:[#allocation12_spill]] }
 0xd18   : > { %3293 = vrot.lane.b32.xlu1 %v3279_v28, %s5862_s28  ;;  %v3088_v40 = vpop.f32.mrf.mxu1 }
 0xd19   : > { %v3281_v44 = vpop.f32.mrf.mxu0 }
 0xd1a   : > { %v4066_v56 = vpop.f32.mrf.mxu1 }
 0xd1b   : > { %v4084_v52 = vpop.f32.mrf.mxu0  ;;  %v3831_v56 = vld [vmem:[%s4608_s25] ss:$0 sm:$0xff] }
 0xd1d   : > { %v4330_v16 = vld [vmem:[%s5863_s1 + $0x8] sm:$0xff]   ;;  %v4331_v7 = vld [vmem:[%s5863_s1] sm:$0xff]  }
 0xd5f   : > { %v3286_v58 = vpop.permute.xlu1 %3285 }
 0xd60   : > { %v3296_v50 = vsel %vm1200_vm2, %v2695_v26, %v3286_v58  ;;  %v3832_v58 = vld [vmem:[%s4613_s4] ss:$0 sm:$0xff] }
 0xd89   : > { %v3290_v22 = vpop.permute.xlu0 %3289 }
 0xd8a   : > { %v3294_v53 = vpop.permute.xlu1 %3293  ;;  %v3297_v51 = vsel %vm1654_vm4, %v3296_v50, %v3290_v22 }
 0xd8b   : > { %v3298_v5 = vsel %vm1656_vm5, %v3297_v51, %v3294_v53 }
 0xd8c   : > { %v3299_v13 = vpack.c.bf16 %v3298_v5, %v3298_v5 }
 0xd8e   : > { %4090 = vmatmul.mubr.msk.bf16.vlgmr.msra.gmra.mxu1 %vm1084_vm1, %v3299_v13 }
 0xd8f   : > { %4097 = vmatprep.mubr.msk.bf16.mxu1 %vm4414_vm0, %v5849_v41  ;;  %4094 = vmatpush3.bf16.msra.mxu1 %v4330_v16 }
 0xd90   : > { %4095 = vmatprep.subr.bf16.mxu1 %v5849_v41 }
 0xd93   : > { %4096 = vmatpush3.bf16.msra.mxu1 %v4331_v7 }
 0xe4e   : > { %v3360_v10 = vpop.f32.mrf.mxu1 }
 0xe4f   : > { %v3361_v4 = vadd.f32 %v3815_v23, %v3360_v10 }
 0xe50   : > { %v4091_v61 = vpop.f32.mrf.mxu1 }
 0xe51   : > { %v3366_v14 = vadd.f32 %v3361_v4, %v5864_v31 }
 0xe52   : > { %v3363_v49 = vpop.f32.mrf.mxu1 }
 0xe53   : > { %v3367_v18 = vsel %vm1084_vm1, %v3366_v14, 0.0 }
 0xe54   : > { %3368 = vadd.xlane.f32.xlu0 %v3367_v18  ;;  %v4092_v19 = vpop.f32.mrf.mxu1 }
 0xedd   : > { %v3369_v27 = vpop.xlane.xlu0 %3368 }
 0xede   : > { %v3370_v38 = vmul.f32 0.03125, %v3369_v27 }
 0xee0   : > { %v3371_v39 = vsub.f32 %v3366_v14, %v3370_v38 }
 0xee2   : > { %v3372_v9 = vmul.f32 %v3371_v39, %v3371_v39 }
 0xee4   : > { %v3373_v12 = vsel %vm1084_vm1, %v3372_v9, 0.0 }
 0xee5   : > { %3374 = vadd.xlane.f32.xlu1 %v3373_v12 }
 0xf6e   : > { %v3375_v33 = vpop.xlane.xlu1 %3374 }
 0xf6f   : > { %v3376_v29 = vmul.f32 0.03125, %v3375_v33 }
 0xf71   : > { %v3377_v20 = vadd.f32 1e-05, %v3376_v29 }
 0xf73   : > { %4370 = vrsqrt.f32 %v3377_v20 }
 0xf80   : > { %v4371_v34 = vpop.eup %4370 }
 0xf81   : > { %v3379_v59 = vmul.f32 %v4371_v34, %v3371_v39 }
 0xf83   : > { %v3387_v57 = vmul.f32 %v3819_v3, %v3379_v59 }
 0xf85   : > { %v3395_v2 = vadd.f32 %v3820_v62, %v3387_v57 }
 0xf87   : > { %v3396_v26 = vpack.c.bf16 %v3395_v2, %v3395_v2 }
 0xf89   : > { %4098 = vmatmul.mubr.msk.bf16.vlgmr.msra.gmra.mxu1 %vm1084_vm1, %v3396_v26 }
0x1049   : > { %v3457_v25 = vpop.f32.mrf.mxu1 }
0x104a   : > { %v3458_v55 = vadd.f32 %v3821_v32, %v3457_v25 }
0x104b   : > { %v4099_v8 = vpop.f32.mrf.mxu1 }
0x104c   : > { %v3463_v17 = vmax.f32 %v3458_v55, 0.0 }
0x104d   : > { %v3460_v42 = vpop.f32.mrf.mxu1 }
0x104e   : > { %v3464_v36 = vpack.c.bf16 %v3463_v17, %v3463_v17 }
0x104f   : > { %v4100_v46 = vpop.f32.mrf.mxu1 }
0x1050   : > { %4110 = vmatmul.mubr.msk.bf16.vlgmr.msra.gmra.mxu0 %vm2656_vm10, %v3464_v36 }
0x1110   : > { %v3541_v0 = vpop.f32.mrf.mxu0 }
0x1111   : > { %v3542_v63 = vadd.f32 %v3825_v30, %v3541_v0 }
0x1112   : > { %v4111_v54 = vpop.f32.mrf.mxu0 }
0x1113   : > { %v3547_v47 = vadd.f32 %v3542_v63, %v3395_v2 }
0x1114   : > { %v3544_v11 = vpop.f32.mrf.mxu0 }
0x1115   : > { %v3548_v41 = vsel %vm1084_vm1, %v3547_v47, 0.0 }
0x1116   : > { %3549 = vadd.xlane.f32.xlu0 %v3548_v41  ;;  %v4112_v45 = vpop.f32.mrf.mxu0 }
0x119f   : > { %v3550_v6 = vpop.xlane.xlu0 %3549 }
0x11a0   : > { %v3551_v37 = vmul.f32 0.03125, %v3550_v6 }
0x11a2   : > { %v3552_v43 = vsub.f32 %v3547_v47, %v3551_v37 }
0x11a4   : > { %v3553_v21 = vmul.f32 %v3552_v43, %v3552_v43 }
0x11a6   : > { %v3554_v28 = vsel %vm1084_vm1, %v3553_v21, 0.0 }
0x11a7   : > { %3555 = vadd.xlane.f32.xlu0 %v3554_v28 }
0x1230   : > { %v3556_v24 = vpop.xlane.xlu0 %3555 }
0x1231   : > { %v3557_v35 = vmul.f32 0.03125, %v3556_v24 }
0x1233   : > { %v3558_v40 = vadd.f32 1e-05, %v3557_v35 }
0x1235   : > { %4372 = vrsqrt.f32 %v3558_v40 }
0x1242   : > { %v4373_v44 = vpop.eup %4372 }
0x1243   : > { %v3560_v52 = vmul.f32 %v4373_v44, %v3552_v43 }
0x1245   : > { %v3568_v50 = vmul.f32 %v3831_v56, %v3560_v52 }
0x1247   : > { %v3576_v22 = vadd.f32 %v3832_v58, %v3568_v50 }
0x1249   : > { %3577 = vst.msk [vmem:[%s1051_s2] sm:$0xff] %vm1084_vm1, %v3576_v22 }
0x124a PF: > { %s74_s22 = sadd.s32 1, %s4380_s22  }
0x124b   : > { %p71_p4 = scmp.ge.s32.totalorder %s74_s22, 4  }
0x124d   :  { %73 = sbr.rel (!%p71_p4) target bundleno = 49 (0x31), region = 228 }

// kernel: deformable_transformer_decoder_forward.3
= control target key start
LH: loop header
LB: loop body
LE: loop exit
PB: predicated region body
PF: predicated region fallthrough
CT: control target
= control target key end

     0   :  { %s4928_s6 = smov 1   ;;  %s4929_s10 = smov 2   ;;  %s6361_s0 = inlined_call_operand.smem [shape: u32[32], index: -1, kind: input, shape index: {}] }
   0x1   :  { %s5022_s5 = sld [smem:[%s6361_s0]]   ;;  %s4930_s14 = smov 3  }
   0x2   :  { %s5027_s9 = sld [smem:[%s6361_s0 + %s4928_s6]]   ;;  %s4931_s18 = smov 4  }
   0x3   :  { %s5032_s13 = sld [smem:[%s6361_s0 + %s4929_s10]]   ;;  %s4932_s22 = smov 5  }
   0x4   :  { %s5037_s17 = sld [smem:[%s6361_s0 + %s4930_s14]]   ;;  %s4933_s26 = smov 6  }
   0x5   :  { %s5042_s21 = sld [smem:[%s6361_s0 + %s4931_s18]]   ;;  %s4934_s30 = smov 7  }
   0x6   :  { %s5047_s25 = sld [smem:[%s6361_s0 + %s4932_s22]]   ;;  %s4935_s4 = smov 8  }
   0x7   :  { %6437 = sst [smem:[#allocation20_spill]] %s5022_s5  ;;  %s4936_s10 = smov 9  }
   0x8   :  { %s5052_s29 = sld [smem:[%s6361_s0 + %s4933_s26]]   ;;  %s4937_s15 = smov 10  }
   0x9   :  { %6438 = sst [smem:[#allocation21_spill]] %s5032_s13  ;;  %s4938_s20 = smov 11  }
   0xa   :  { %6439 = sst [smem:[#allocation22_spill]] %s5037_s17  ;;  %s4939_s26 = smov 12  }
   0xb   :  { %s5057_s3 = sld [smem:[%s6361_s0 + %s4934_s30]]   ;;  %s4940_s1 = smov 13  }
   0xc   :  { %6440 = sst [smem:[#allocation23_spill]] %s5047_s25  ;;  %s4941_s7 = smov 14  }
   0xd   :  { %s5062_s8 = sld [smem:[%s6361_s0 + %s4935_s4]]   ;;  %s4943_s22 = smov 16  }
   0xe   :  { %6441 = sst [smem:[#allocation24_spill]] %s5052_s29  ;;  %s4944_s28 = smov 17  }
   0xf   :  { %s5067_s14 = sld [smem:[%s6361_s0 + %s4936_s10]]  }
  0x10   :  { %s5072_s19 = sld [smem:[%s6361_s0 + %s4937_s15]]   ;;  %s4942_s15 = smov 15  }
  0x11   :  { %6442 = sst [smem:[#allocation25_spill]] %s5057_s3 }
  0x12   :  { %s5077_s24 = sld [smem:[%s6361_s0 + %s4938_s20]]  }
  0x13   :  { %s5082_s30 = sld [smem:[%s6361_s0 + %s4939_s26]]  }
  0x14   :  { %s5087_s6 = sld [smem:[%s6361_s0 + %s4940_s1]]  }
  0x15   :  { %s5092_s12 = sld [smem:[%s6361_s0 + %s4941_s7]]   ;;  %s4945_s7 = smov 18  }
  0x16   :  { %s5097_s20 = sld [smem:[%s6361_s0 + %s4942_s15]]   ;;  %s4946_s15 = smov 19  }
  0x17   :  { %s5102_s27 = sld [smem:[%s6361_s0 + %s4943_s22]]   ;;  %s4947_s22 = smov 20  }
  0x18   :  { %s5107_s4 = sld [smem:[%s6361_s0 + %s4944_s28]]   ;;  %s4948_s28 = smov 21  }
  0x19   :  { %s5112_s29 = sld [smem:[%s6361_s0 + %s4945_s7]]   ;;  %s4949_s7 = smov 22  }
  0x1a   :  { %s5117_s3 = sld [smem:[%s6361_s0 + %s4946_s15]]   ;;  %s4950_s15 = smov 23  }
  0x1b   :  { %6443 = sst [smem:[#allocation26_spill]] %s5092_s12 }
  0x1c   :  { %6444 = sst [smem:[#allocation27_spill]] %s5097_s20 }
  0x1d   :  { %6445 = sst [smem:[#allocation28_spill]] %s5102_s27 }
  0x1e   :  { %6446 = sst [smem:[#allocation29_spill]] %s5107_s4 }
  0x1f   :  { %6447 = sst [smem:[#allocation30_spill]] %s5112_s29 }
  0x20   :  { %6448 = sst [smem:[#allocation31_spill]] %s5117_s3 }
  0x21   :  { %s5122_s25 = sld [smem:[%s6361_s0 + %s4947_s22]]   ;;  %s4951_s22 = smov 24  }
  0x22   :  { %s5127_s4 = sld [smem:[%s6361_s0 + %s4948_s28]]   ;;  %s4952_s28 = smov 25  }
  0x23   :  { %s5132_s13 = sld [smem:[%s6361_s0 + %s4949_s7]]   ;;  %s4953_s7 = smov 26  }
  0x24   :  { %s5137_s3 = sld [smem:[%s6361_s0 + %s4950_s15]]   ;;  %s4954_s15 = smov 27  }
  0x25   :  { %s5147_s17 = sld [smem:[%s6361_s0 + %s4952_s28]]   ;;  %s4956_s28 = smov 29  }
  0x26   :  { %s5152_s27 = sld [smem:[%s6361_s0 + %s4953_s7]]   ;;  %s4957_s7 = smov 30  }
  0x27   :  { %6449 = sst [smem:[#allocation32_spill]] %s5122_s25 }
  0x28   :  { %6450 = sst [smem:[#allocation33_spill]] %s5127_s4 }
  0x29   :  { %6451 = sst [smem:[#allocation34_spill]] %s5132_s13 }
  0x2a   :  { %6452 = sst [smem:[#allocation35_spill]] %s5137_s3 }
  0x2b   :  { %s5142_s25 = sld [smem:[%s6361_s0 + %s4951_s22]]   ;;  %s4955_s22 = smov 28  }
  0x2c   :  { %6454 = sst [smem:[#allocation37_spill]] %s5152_s27 }
  0x2d   :  { %s5157_s20 = sld [smem:[%s6361_s0 + %s4954_s15]]   ;;  %s4958_s15 = smov 31  }
  0x2e   :  { %s5167_s12 = sld [smem:[%s6361_s0 + %s4956_s28]]  }
  0x2f   :  { %s5172_s27 = sld [smem:[%s6361_s0 + %s4957_s7]]  }
  0x30   :  { %s5177_s29 = sld [smem:[%s6361_s0 + %s4958_s15]]  }
  0x31   :  { %6453 = sst [smem:[#allocation36_spill]] %s5142_s25 }
  0x32   :  { %s5162_s25 = sld [smem:[%s6361_s0 + %s4955_s22]]  }
  0x33   :  { %69 = vsyncpa [#allocation3], 0 }
  0x34   :  { %70 = vsyncpa [#allocation6], 0 }
  0x35   :  { %71 = vsyncpa [#allocation9], 0 }
  0x36   :  { %72 = vsyncpa [#allocation12], 0 }
  0x37   :  { %73 = vsyncpa [#allocation4], 0 }
  0x38   :  { %75 = vsyncpa [#allocation4 + $0x1], 0  ;;  %s5179_s22 = smov 0   ;;  %s5181_s23 = smov 0  }
  0x39   :  { %s5183_s26 = smov 0   ;;  %s5185_s28 = smov 0  }
  0x3a LB: > { %6455 = sst [smem:[#allocation38_spill]] %s4914_s22  ;;  %s5200_s0 = sadd.s32 4294967295, %s4926_s28   ;;  %s4926_s28 = sphi %s5185_s28, %s6617_s28   ;;  %s4922_s26 = sphi %s5183_s26, %s6619_s26   ;;  %s4918_s23 = sphi %s5181_s23, %s6621_s23   ;;  %s4914_s22 = sphi %s5179_s22, %s6620_s22  }
  0x3b   : > { %6456 = sst [smem:[#allocation39_spill]] %s4922_s26  ;;  %s3930_s1 = sadd.s32 4294967294, %s4926_s28  }
  0x3c   : > { %6457 = sst [smem:[#allocation40_spill]] %s4926_s28  ;;  %s5204_s2 = sadd.s32 1, %s4926_s28  }
  0x3d   : > { %6458 = sst [smem:[#allocation41_spill]] %s5204_s2  ;;  %s748_s7 = sadd.s32 1, %s4922_s26 }
  0x3e   : > { %s745_s10 = ssub.s32 %s4926_s28, %s5204_s2  ;;  %p758_p0 = scmp.ne.s32.totalorder %s4922_s26, %s4918_s23 }
  0x3f   : > { %p746_p1 = scmp.eq.s32.totalorder %s745_s10, 0  ;;  %p759_p2 = scmp.eq.s32.totalorder %s5200_s0, 1 }
  0x40   : > { %p764_p3 = scmp.ne.s32.totalorder %s4918_s23, %s4914_s22  ;;  %p765_p4 = scmp.eq.s32.totalorder %s3930_s1, 1 }
  0x41   : > { %s5215_s11 = scalar_select %p746_p1, %s4922_s26, %s748_s7  }
  0x42   : > { %p5217_p5 = por %p759_p2, %p758_p0  ;;  %p5221_p6 = por %p765_p4, %p764_p3 }
  0x43   : > { %6459 = sst [smem:[#allocation42_spill]] %s5215_s11  ;;  %p3931_p7 = scmp.ge.s32.totalorder %s4926_s28, 1 }
  0x44   : > { %s6460_s15 = scalar_select %p5217_p5, 1, 0 }
  0x45   : > { %s6461_s16 = scalar_select %p5221_p6, 1, 0 }
  0x46   : > { %p798_p8 = scmp.lt.s32.totalorder %s4926_s28, 3  ;;  %p6372_p9 = scmp.eq.s32.totalorder %s5200_s0, 0 }
  0x47   : > { %6462 = sst [smem:[#allocation43_spill]] %s6461_s16  ;;  %s4959_s10 = smov [#allocation5]  }
  0x48   : > { %p5228_p10 = pnand %p3931_p7, %p798_p8  ;;  %s867_s1 = sshll.u32 %s4959_s10, 4  ;;  %s868_s1 = int_to_ptr.vmem [resolvable:$true] %s867_s1 }
  0x49   : > { %s4960_s7 = smov [#allocation8]   ;;  %s4961_s2 = smov [#allocation11]  }
  0x4a   : > { %s6463_s18 = scalar_select %p5228_p10, 1, 0 }
  0x4b   : > { %p4337_p11 = pneg %p5228_p10  ;;  %s892_s11 = sshll.u32 %s4960_s7, 4  ;;  %s893_s11 = int_to_ptr.vmem [resolvable:$true] %s892_s11 }
  0x4c   : > { %s917_s16 = sshll.u32 %s4961_s2, 4  ;;  %s4679_s10 = scalar_lea.vmem %s868_s1, 16  ;;  %s5240_s16 = int_to_ptr.vmem [resolvable:$true] %s917_s16 }
  0x4d   : > { %p5236_p12 = pnand %p6372_p9, %p4337_p11  ;;  %p4680_p0 = scmp.ne.s32.totalorder %s868_s1, %s4679_s10 }
  0x4e   : > { %s4686_s7 = scalar_lea.vmem %s868_s1, 32  ;;  %p4687_p3 = scmp.lt.s32.totalorder %s868_s1, %s868_s1 }
  0x4f   : > { %p5244_p13 = pneg %p5236_p12  ;;  %p4688_p4 = scmp.lt.s32.totalorder %s4686_s7, %s4679_s10 }
  0x51   : > { %p4682_p1 = pnand %p4680_p0, %p5244_p13  ;;  %p4689_p7 = por %p4688_p4, %p4687_p3 }
  0x53   : > { %p4683_p2 = pneg %p4682_p1 }
  0x55   : > { %p4690_p8 = pnand %p4689_p7, %p4683_p2 }
  0x57   : > { %4693 = shalt.err (!%p4690_p8)
}
  0x58   : > { %s6466_s13 = sld [smem:[#allocation34_spill]]  ;;  %s4705_s2 = scalar_lea.vmem %s893_s11, 16 }
  0x59   : > { %p4706_p11 = scmp.ne.s32.totalorder %s893_s11, %s4705_s2  ;;  %s4712_s28 = scalar_lea.vmem %s893_s11, 32 }
  0x5a   : > { %p4713_p5 = scmp.lt.s32.totalorder %s893_s11, %s893_s11  ;;  %p4714_p0 = scmp.lt.s32.totalorder %s4712_s28, %s4705_s2 }
  0x5b   : > { %p4708_p9 = pnand %p4706_p11, %p5244_p13 }
  0x5c   : > { %p4715_p1 = por %p4714_p0, %p4713_p5 }
  0x5d   : > { %p4709_p6 = pneg %p4708_p9 }
  0x5e   : > { %4343 = dma.hbm_to_vmem [thread:$0]  (!%p5236_p12), %s6466_s13, 16, %s868_s1, [#allocation6]  }
  0x5f   : > { %p4716_p10 = pnand %p4715_p1, %p4709_p6 }
  0x61   : > { %4719 = shalt.err (!%p4716_p10)
}
  0x62   : > { %4349 = dma.hbm_to_vmem [thread:$0]  (!%p5236_p12), %s5147_s17, 16, %s893_s11, [#allocation9]  }
  0x63   : > { %s4731_s1 = scalar_lea.vmem %s5240_s16, 16  ;;  %s4738_s10 = scalar_lea.vmem %s5240_s16, 32 }
  0x64   : > { %p4732_p2 = scmp.ne.s32.totalorder %s5240_s16, %s4731_s1  ;;  %p4739_p4 = scmp.lt.s32.totalorder %s5240_s16, %s5240_s16 }
  0x65   : > { %p4740_p5 = scmp.lt.s32.totalorder %s4738_s10, %s4731_s1 }
  0x66   : > { %p4734_p3 = pnand %p4732_p2, %p5244_p13 }
  0x67   : > { %p4741_p6 = por %p4740_p5, %p4739_p4 }
  0x68   : > { %p4735_p9 = pneg %p4734_p3 }
  0x6a   : > { %p4742_p10 = pnand %p4741_p6, %p4735_p9 }
  0x6c   : > { %4745 = shalt.err (!%p4742_p10)
}
  0x6d   : > { %4355 = dma.hbm_to_vmem [thread:$0]  (!%p5236_p12), %s5162_s25, 16, %s5240_s16, [#allocation12]  }
  0x6e   : > { %s4962_s28 = smov [#allocation2]   ;;  %s4963_s7 = smov [#allocation7]  }
  0x6f   : > { %s856_s11 = sshll.u32 %s4962_s28, 4  ;;  %s878_s2 = sshll.u32 %s4963_s7, 4  ;;  %s857_s11 = int_to_ptr.vmem [resolvable:$true] %s856_s11  ;;  %s879_s2 = int_to_ptr.vmem [resolvable:$true] %s878_s2 }
  0x70   : > { %s4757_s13 = scalar_lea.vmem %s857_s11, 16  ;;  %s4764_s1 = scalar_lea.vmem %s857_s11, 32 }
  0x71   : > { %p4758_p7 = scmp.ne.s32.totalorder %s857_s11, %s4757_s13  ;;  %p4765_p0 = scmp.lt.s32.totalorder %s857_s11, %s857_s11 }
  0x72   : > { %p4766_p1 = scmp.lt.s32.totalorder %s4764_s1, %s4757_s13 }
  0x73   : > { %p4760_p8 = pnand %p4758_p7, %p5244_p13 }
  0x74   : > { %p4767_p2 = por %p4766_p1, %p4765_p0 }
  0x75   : > { %p4761_p11 = pneg %p4760_p8 }
  0x77   : > { %p4768_p3 = pnand %p4767_p2, %p4761_p11 }
  0x79   : > { %4771 = shalt.err (!%p4768_p3)
}
  0x7a   : > { %s6467_s4 = sld [smem:[#allocation33_spill]]  ;;  %s4783_s16 = scalar_lea.vmem %s879_s2, 16 }
  0x7b   : > { %p4784_p9 = scmp.ne.s32.totalorder %s879_s2, %s4783_s16  ;;  %s4790_s10 = scalar_lea.vmem %s879_s2, 32 }
  0x7c   : > { %p4791_p6 = scmp.lt.s32.totalorder %s879_s2, %s879_s2  ;;  %p4792_p10 = scmp.lt.s32.totalorder %s4790_s10, %s4783_s16 }
  0x7d   : > { %p4786_p4 = pnand %p4784_p9, %p5244_p13 }
  0x7e   : > { %p4793_p7 = por %p4792_p10, %p4791_p6 }
  0x7f   : > { %p4787_p5 = pneg %p4786_p4 }
  0x80   : > { %4340 = dma.hbm_to_vmem [thread:$0]  (!%p5236_p12), %s6467_s4, 16, %s857_s11, [#allocation3]  }
  0x81   : > { %p4794_p8 = pnand %p4793_p7, %p4787_p5 }
  0x83   : > { %4797 = shalt.err (!%p4794_p8)
}
  0x84   : > { %s6468_s3 = sld [smem:[#allocation35_spill]]  ;;  %s4964_s13 = smov [#allocation10]  }
  0x85   : > { %s906_s28 = sshll.u32 %s4964_s13, 4  ;;  %s4965_s11 = smov [#allocation13]   ;;  %s907_s28 = int_to_ptr.vmem [resolvable:$true] %s906_s28 }
  0x86   : > { %s928_s7 = sshll.u32 %s4965_s11, 4  ;;  %s4809_s1 = scalar_lea.vmem %s907_s28, 16  ;;  %s929_s7 = int_to_ptr.vmem [resolvable:$true] %s928_s7 }
  0x87   : > { %p4810_p11 = scmp.ne.s32.totalorder %s907_s28, %s4809_s1  ;;  %s4816_s4 = scalar_lea.vmem %s907_s28, 32 }
  0x88   : > { %p4817_p2 = scmp.lt.s32.totalorder %s907_s28, %s907_s28  ;;  %p4818_p3 = scmp.lt.s32.totalorder %s4816_s4, %s4809_s1 }
  0x89   : > { %p4812_p0 = pnand %p4810_p11, %p5244_p13 }
  0x8a   : > { %4346 = dma.hbm_to_vmem [thread:$0]  (!%p5236_p12), %s6468_s3, 16, %s879_s2, [#allocation6]  }
  0x8b   : > { %p4813_p1 = pneg %p4812_p0  ;;  %p4819_p9 = por %p4818_p3, %p4817_p2 }
  0x8d   : > { %p4820_p4 = pnand %p4819_p9, %p4813_p1 }
  0x8f   : > { %4823 = shalt.err (!%p4820_p4)
}
  0x90   : > { %4352 = dma.hbm_to_vmem [thread:$0]  (!%p5236_p12), %s5157_s20, 16, %s907_s28, [#allocation9]  }
  0x91   : > { %s4835_s2 = scalar_lea.vmem %s929_s7, 16  ;;  %s4842_s16 = scalar_lea.vmem %s929_s7, 32 }
  0x92   : > { %p4836_p5 = scmp.ne.s32.totalorder %s929_s7, %s4835_s2  ;;  %p4843_p7 = scmp.lt.s32.totalorder %s929_s7, %s929_s7 }
  0x93   : > { %p4844_p8 = scmp.lt.s32.totalorder %s4842_s16, %s4835_s2 }
  0x94   : > { %p4838_p6 = pnand %p4836_p5, %p5244_p13 }
  0x95   : > { %p4845_p11 = por %p4844_p8, %p4843_p7 }
  0x96   : > { %p4839_p10 = pneg %p4838_p6 }
  0x98   : > { %p4846_p0 = pnand %p4845_p11, %p4839_p10 }
  0x9a   : > { %4849 = shalt.err (!%p4846_p0)
}
  0x9b   : > { %4358 = dma.hbm_to_vmem [thread:$0]  (!%p5236_p12), %s5167_s12, 16, %s929_s7, [#allocation12]  }
  0x9c   : > { %p6469_p1 = scmp.ne.s32.totalorder %s6463_s18, 0 }
  0x9e   : > { %985 = sbr.rel (%p6469_p1) target bundleno = 4811 (0x12cb), region = 140 }
  0xa3   : > { %p6470_p2 = scmp.eq.s32.totalorder %s5200_s0, 0 }
  0xa5   : > { %4893 = dma.done.wait (%p6470_p2), [#allocation3], 16   ;;  %p6471_p3 = pmov %p6470_p2 }
  0xa6   : > { %p6472_p13 = pmov %p6470_p2 }
  0xa7   : > { %4895 = vsyncadd (%p6471_p3), [#allocation3], 4294967280 }
  0xa8   : > { %4897 = dma.done.wait (%p6472_p13), [#allocation6], 32   ;;  %p6473_p9 = pmov %p6470_p2 }
  0xa9   : > { %p6474_p4 = pmov %p6470_p2 }
  0xaa   : > { %4899 = vsyncadd (%p6473_p9), [#allocation6], 4294967264 }
  0xab   : > { %4901 = dma.done.wait (%p6474_p4), [#allocation9], 32   ;;  %p6475_p12 = pmov %p6470_p2 }
  0xac   : > { %p6476_p5 = pmov %p6470_p2 }
  0xad   : > { %4903 = vsyncadd (%p6475_p12), [#allocation9], 4294967264 }
  0xae   : > { %4905 = dma.done.wait (%p6476_p5), [#allocation12], 32   ;;  %p6477_p6 = pmov %p6470_p2 }
  0xaf   : > { %s6478_s5 = sld [smem:[#allocation20_spill]]  ;;  %p1114_p10 = scmp.lt.s32.totalorder %s5200_s0, 1  ;;  %v6406_v0 = vmov 0.0   ;;  %vm4967_vm0 = vmmov 0   ;;  %v4607_v1 = vld [vmem:[%s5062_s8 + $0x8] sm:$0xff]   ;;  %v4608_v2 = vld [vmem:[%s5062_s8] sm:$0xff]  }
  0xb0   : > { %4907 = vsyncadd (%p6477_p6), [#allocation12], 4294967264  ;;  %4101 = vmatprep.subr.bf16.mxu1 %v6406_v0  ;;  %4105 = vmatprep.mubr.msk.bf16.mxu1 %vm4967_vm0, %v6406_v0  ;;  %vm1172_vm1 = vcmask 261120   ;;  %v3956_v7 = vld [vmem:[%s5067_s14] ss:$0 sm:$0xff]  ;;  %s6384_s28 = smov 120  }
  0xb1   : > { %s5312_s4 = scalar_select %p1114_p10, %s5200_s0, 1  ;;  %4117 = vmatprep.subr.bf16.mxu0 %v6406_v0  ;;  %4119 = vmatprep.mubr.msk.bf16.mxu0 %vm4967_vm0, %v6406_v0  ;;  %v4609_v14 = vld [vmem:[%s5072_s19 + $0x8] sm:$0xff]   ;;  %v4610_v15 = vld [vmem:[%s5072_s19] sm:$0xff]   ;;  %vm1288_vm2 = vcmask 64512   ;;  %vm1351_vm3 = vcmask 1043456   ;;  %vm1742_vm4 = vcmask 130048  }
  0xb2   : > { %4102 = vmatpush3.bf16.msra.mxu1 %v4607_v1  ;;  %s4969_s11 = smov 96   ;;  %s4970_s7 = smov 80   ;;  %v3960_v55 = vld [vmem:[%s5077_s24] ss:$0 sm:$0xff]  ;;  %vm1744_vm5 = vcmask 195584   ;;  %vm2157_vm6 = vcmask 326944  }
  0xb3   : > { %s5318_s22 = sshll.u32 %s5312_s4, 3  ;;  %4103 = vmatprep.subr.bf16.mxu1 %v6406_v0  ;;  %s4305_s10 = smul.u32 40, %s5312_s4  ;;  %vm2140_vm7 = vcmask 294144   ;;  %vm2189_vm8 = vcmask 392544   ;;  %vm2173_vm9 = vcmask 359744   ;;  %vm2151_vm10 = vcmask 31744  }
  0xb4   : > { %s1121_s18 = scalar_lea.vmem %s5027_s9, %s5318_s22  ;;  %s6386_s1 = smov 88   ;;  %vm2223_vm11 = vcmask 97280  }
  0xb5   : > { %s1117_s26 = scalar_lea.vmem %s6478_s5, %s5318_s22  ;;  %v5328_v4 = vld [vmem:[%s1121_s18] sm:$0xff]  ;;  %s5336_s13 = scalar_lea.vmem %s5042_s21, %s4305_s10 }
  0xb6   : > { %v5326_v3 = vld [vmem:[%s1117_s26] sm:$0xff]  ;;  %4104 = vmatpush3.bf16.msra.mxu1 %v4608_v2  ;;  %s4972_s2 = smov 72   ;;  %s6380_s16 = smov 112  }
  0xb7   : > { %v1147_v5 = vadd.f32 %v5328_v4, %v5326_v3  ;;  %4109 = vmatprep.subr.bf16.mxu1 %v6406_v0  ;;  %s6378_s26 = smov 104   ;;  %v1216_v16 = vpack.c.bf16 %v5326_v3, %v5326_v3  ;;  %s6377_s18 = smov 8  }
  0xb8   : > { %s6382_s10 = smov 16   ;;  %p6612_p8 = scmp.ne.s32.totalorder %s6460_s15, 0 }
  0xb9   : > { %v1148_v6 = vpack.c.bf16 %v1147_v5, %v1147_v5  ;;  %s5013_s3 = smov [#allocation14]  }
  0xbb   : > { %4106 = vmatmul.mubr.msk.bf16.vlgmr.msra.gmra.mxu1 %vm1172_vm1, %v1148_v6 }
  0xbc   : > { %4113 = vmatprep.mubr.msk.bf16.mxu1 %vm4967_vm0, %v6406_v0  ;;  %4110 = vmatpush3.bf16.msra.mxu1 %v4609_v14 }
  0xbd   : > { %4111 = vmatprep.subr.bf16.mxu1 %v6406_v0 }
  0xc0   : > { %4112 = vmatpush3.bf16.msra.mxu1 %v4610_v15 }
  0xc1   : > { %4123 = vmatprep.subr.bf16.mxu1 %v6406_v0 }
  0xc3   : > { %4114 = vmatmul.mubr.msk.bf16.vlgmr.msra.gmra.mxu1 %vm1172_vm1, %v1216_v16 }
  0xc4   : > { %4125 = vmatprep.mubr.msk.bf16.mxu1 %vm4967_vm0, %v6406_v0 }
 0x17b   : > { %v1210_v8 = vpop.f32.mrf.mxu1 }
 0x17c   : > { %v1211_v9 = vadd.f32 %v3956_v7, %v1210_v8 }
 0x17d   : > { %v4107_v10 = vpop.f32.mrf.mxu1 }
 0x17e   : > { %v1283_v11 = vpack.c.bf16 %v1211_v9, %v1211_v9 }
 0x17f   : > { %v1213_v12 = vpop.f32.mrf.mxu1 }
 0x180   : > { %1395 = vrot.lane.b32.xlu1 %v1283_v11, %s6384_s28  ;;  %1286 = vrot.lane.b32.xlu0 %v1283_v11, %s4969_s11 }
 0x181   : > { %v4108_v13 = vpop.f32.mrf.mxu1 }
 0x183   : > { %v1277_v52 = vpop.f32.mrf.mxu1 }
 0x184   : > { %1509 = vrot.lane.b32.xlu1 %v1283_v11, %s4970_s7  ;;  %1397 = vrot.lane.b32.xlu0 %v1283_v11, %s6386_s1  ;;  %v1278_v57 = vadd.f32 %v3960_v55, %v1277_v52  ;;  %s6376_s7 = smov 24   ;;  %s1143_s1 = scalar_lea.vmem %s5177_s29, %s5318_s22 }
 0x185   : > { %v4115_v53 = vpop.f32.mrf.mxu1 }
 0x186   : > { %v1284_v58 = vpack.c.bf16 %v1278_v57, %v1278_v57 }
 0x187   : > { %v1280_v54 = vpop.f32.mrf.mxu1 }
 0x188   : > { %1620 = vrot.lane.b32.xlu1 %v1283_v11, %s4972_s2  ;;  %1507 = vrot.lane.b32.xlu0 %v1283_v11, %s6380_s16  ;;  %v1353_v59 = vsel %vm1351_vm3, %v1284_v58, 0  ;;  %v4612_v54 = vld [vmem:[%s5082_s30] sm:$0xff]   ;;  %s6479_s2 = sld [smem:[#allocation30_spill]] }
 0x189   : > { %v4116_v56 = vpop.f32.mrf.mxu1  ;;  %4124 = vmatpush3.bf16.msra.mxu1 %v1353_v59 }
 0x18a   : > { %4135 = vmatprep.subr.bf16.mxu1 %v6406_v0 }
 0x18c   : > { %1618 = vrot.lane.b32.xlu0 %v1283_v11, %s6378_s26 }
 0x1f2   : > { %v1287_v17 = vpop.permute.xlu0 %1286  ;;  %v1396_v20 = vpop.permute.xlu1 %1395 }
 0x1f3   : > { %v1293_v18 = vsel %vm1288_vm2, %v1287_v17, 0 }
 0x1f4   : > { %4118 = vmatpush3.bf16.xpose.msra.mxu0 %v1293_v18 }
 0x1f5   : > { %4129 = vmatprep.subr.bf16.mxu0 %v6406_v0 }
 0x1f6   : > { %v1398_v19 = vpop.permute.xlu0 %1397  ;;  %v1510_v22 = vpop.permute.xlu1 %1509 }
 0x1f7   : > { %v1403_v21 = vsel %vm1288_vm2, %v1398_v19, 0  ;;  %v1515_v23 = vsel %vm1288_vm2, %v1510_v22, 0 }
 0x1fa   : > { %v1621_v24 = vpop.permute.xlu1 %1620  ;;  %v1508_v25 = vpop.permute.xlu0 %1507 }
 0x1fb   : > { %4120 = vmatmul.mubr.msk.bf16.vlgmr.msra.gmra.mxu0 %vm1288_vm2, %v1283_v11  ;;  %v1626_v26 = vsel %vm1288_vm2, %v1621_v24, 0 }
 0x1fc   : > { %4130 = vmatpush3.bf16.xpose.msra.mxu0 %v1403_v21  ;;  %4131 = vmatprep.mubr.msk.bf16.mxu0 %vm4967_vm0, %v6406_v0 }
 0x1fd   : > { %4141 = vmatprep.subr.bf16.mxu0 %v6406_v0 }
 0x1fe   : > { %v1619_v27 = vpop.permute.xlu0 %1618 }
 0x203   : > { %4132 = vmatmul.mubr.msk.bf16.vlgmr.msra.gmra.mxu0 %vm1288_vm2, %v1396_v20 }
 0x204   : > { %4142 = vmatpush3.bf16.xpose.msra.mxu0 %v1515_v23  ;;  %4143 = vmatprep.mubr.msk.bf16.mxu0 %vm4967_vm0, %v6406_v0 }
 0x205   : > { %4153 = vmatprep.subr.bf16.mxu0 %v6406_v0 }
 0x20b   : > { %4144 = vmatmul.mubr.msk.bf16.vlgmr.msra.gmra.mxu0 %vm1288_vm2, %v1508_v25 }
 0x20c   : > { %4154 = vmatpush3.bf16.xpose.msra.mxu0 %v1626_v26  ;;  %4155 = vmatprep.mubr.msk.bf16.mxu0 %vm4967_vm0, %v6406_v0 }
 0x20d   : > { %4165 = vmatprep.subr.bf16.mxu0 %v6406_v0 }
 0x213   : > { %4156 = vmatmul.mubr.msk.bf16.vlgmr.msra.gmra.mxu0 %vm1288_vm2, %v1619_v27 }
 0x214   : > { %4169 = vmatprep.mubr.msk.bf16.mxu0 %vm4967_vm0, %v6406_v0 }
 0x2bb   : > { %v1329_v28 = vpop.f32.mrf.mxu0 }
 0x2bc   : > { %v1335_v29 = vmul.f32 0.35355338, %v1329_v28 }
 0x2bd   : > { %v4121_v30 = vpop.f32.mrf.mxu0 }
 0x2be   : > { %v1336_v31 = vsel %vm1288_vm2, %v1335_v29, -inf }
 0x2bf   : > { %1337 = vmax.xlane.f32.xlu1 %v1336_v31  ;;  %v1332_v32 = vpop.f32.mrf.mxu0 }
 0x2c1   : > { %v4122_v33 = vpop.f32.mrf.mxu0 }
 0x2c3   : > { %v1439_v34 = vpop.f32.mrf.mxu0 }
 0x2c4   : > { %v1445_v35 = vmul.f32 0.35355338, %v1439_v34 }
 0x2c5   : > { %v4133_v36 = vpop.f32.mrf.mxu0 }
 0x2c6   : > { %v1446_v37 = vsel %vm1288_vm2, %v1445_v35, -inf }
 0x2c7   : > { %1447 = vmax.xlane.f32.xlu0 %v1446_v37  ;;  %v1442_v38 = vpop.f32.mrf.mxu0 }
 0x2c9   : > { %v4134_v39 = vpop.f32.mrf.mxu0 }
 0x2cb   : > { %v1551_v40 = vpop.f32.mrf.mxu0 }
 0x2cc   : > { %v1557_v41 = vmul.f32 0.35355338, %v1551_v40 }
 0x2cd   : > { %v4145_v42 = vpop.f32.mrf.mxu0 }
 0x2ce   : > { %v1558_v43 = vsel %vm1288_vm2, %v1557_v41, -inf }
 0x2cf   : > { %1559 = vmax.xlane.f32.xlu0 %v1558_v43  ;;  %v1554_v44 = vpop.f32.mrf.mxu0 }
 0x2d0   : > { %v4611_v44 = vld [vmem:[%s5082_s30 + $0x8] sm:$0xff]  }
 0x2d1   : > { %v4146_v45 = vpop.f32.mrf.mxu0  ;;  %4166 = vmatpush3.bf16.msra.mxu0 %v4611_v44 }
 0x2d2   : > { %4167 = vmatprep.subr.bf16.mxu0 %v6406_v0 }
 0x2d3   : > { %v1662_v46 = vpop.f32.mrf.mxu0 }
 0x2d4   : > { %v1668_v47 = vmul.f32 0.35355338, %v1662_v46 }
 0x2d5   : > { %v4157_v48 = vpop.f32.mrf.mxu0  ;;  %4168 = vmatpush3.bf16.msra.mxu0 %v4612_v54  ;;  %v4621_v54 = vld [vmem:[%s5336_s13 + $0x20] sm:$0xff]  }
 0x2d6   : > { %v1669_v49 = vsel %vm1288_vm2, %v1668_v47, -inf  ;;  %4197 = vmatprep.subr.bf16.mxu0 %v6406_v0 }
 0x2d7   : > { %1670 = vmax.xlane.f32.xlu1 %v1669_v49  ;;  %v1665_v50 = vpop.f32.mrf.mxu0 }
 0x2d9   : > { %v4158_v51 = vpop.f32.mrf.mxu0 }
 0x348   : > { %v1338_v60 = vpop.xlane.xlu1 %1337 }
 0x349   : > { %v1339_v61 = vsub.f32 %v1335_v29, %v1338_v60 }
 0x34b   : > { %v1340_v62 = vmul.f32 1.442695, %v1339_v61 }
 0x34d   : > { %4630 = vpow2.f32 %v1340_v62 }
 0x350   : > { %v1448_v63 = vpop.xlane.xlu0 %1447 }
 0x351   : > { %v1449_v1 = vsub.f32 %v1445_v35, %v1448_v63 }
 0x353   : > { %v1450_v2 = vmul.f32 1.442695, %v1449_v1 }
 0x355   : > { %4632 = vpow2.f32 %v1450_v2 }
 0x358   : > { %v1560_v5 = vpop.xlane.xlu0 %1559 }
 0x359   : > { %v1561_v6 = vsub.f32 %v1557_v41, %v1560_v5  ;;  %v3972_v5 = vld [vmem:[%s5087_s6] ss:$0 sm:$0xff] }
 0x35a   : > { %v4631_v7 = vpop.eup %4630 }
 0x35b   : > { %v1562_v8 = vmul.f32 1.442695, %v1561_v6  ;;  %v1342_v9 = vsel %vm1288_vm2, %v4631_v7, 0.0 }
 0x35c   : > { %1343 = vadd.xlane.f32.xlu0 %v1342_v9 }
 0x35d   : > { %4634 = vpow2.f32 %v1562_v8 }
 0x360   : > { %v1671_v14 = vpop.xlane.xlu1 %1670 }
 0x361   : > { %v1672_v15 = vsub.f32 %v1668_v47, %v1671_v14 }
 0x362   : > { %v4633_v10 = vpop.eup %4632 }
 0x363   : > { %v1452_v11 = vsel %vm1288_vm2, %v4633_v10, 0.0  ;;  %v1673_v16 = vmul.f32 1.442695, %v1672_v15 }
 0x364   : > { %1453 = vadd.xlane.f32.xlu1 %v1452_v11 }
 0x365   : > { %4636 = vpow2.f32 %v1673_v16 }
 0x36a   : > { %v4635_v12 = vpop.eup %4634 }
 0x36b   : > { %v1564_v13 = vsel %vm1288_vm2, %v4635_v12, 0.0 }
 0x36c   : > { %1565 = vadd.xlane.f32.xlu0 %v1564_v13 }
 0x372   : > { %v4637_v17 = vpop.eup %4636 }
 0x373   : > { %v1675_v18 = vsel %vm1288_vm2, %v4637_v17, 0.0 }
 0x375   : > { %1570 = vrot.lane.b32.xlu1 %v1284_v58, %s6380_s16 }
 0x382   : > { %1459 = vrot.lane.b32.xlu0 %v1284_v58, %s6384_s28 }
 0x399   : > { %1676 = vadd.xlane.f32.xlu1 %v1675_v18  ;;  %v4613_v18 = vld [vmem:[%s6479_s2 + $0x8] sm:$0xff]  }
 0x3aa   : > { %1681 = vrot.lane.b32.xlu1 %v1284_v58, %s6378_s26  ;;  %s6482_s26 = sld [smem:[#allocation28_spill]] }
 0x3b0   : > { %s6483_s16 = smov %s6482_s26 }
 0x3e5   : > { %v1344_v19 = vpop.xlane.xlu0 %1343 }
 0x3e6   : > { %4638 = vrcp.f32 %v1344_v19  ;;  %v4614_v19 = vld [vmem:[%s6479_s2] sm:$0xff]  }
 0x3ed   : > { %v1454_v20 = vpop.xlane.xlu1 %1453 }
 0x3ee   : > { %4640 = vrcp.f32 %v1454_v20 }
 0x3f1   : > { %v1571_v29 = vpop.permute.xlu1 %1570 }
 0x3f2   : > { %v1576_v31 = vsel %vm1351_vm3, %v1571_v29, 0 }
 0x3f3   : > { %v4639_v21 = vpop.eup %4638 }
 0x3f4   : > { %v1346_v22 = vmul.f32 %v4639_v21, %v4631_v7 }
 0x3f5   : > { %v1566_v23 = vpop.xlane.xlu0 %1565 }
 0x3f6   : > { %4642 = vrcp.f32 %v1566_v23  ;;  %v1347_v24 = vpack.c.bf16 %v1346_v22, %v1346_v22 }
 0x3f8   : > { %4126 = vmatmul.mubr.msk.bf16.vlgmr.msra.gmra.mxu1 %vm1288_vm2, %v1347_v24 }
 0x3f9   : > { %v1460_v25 = vpop.permute.xlu0 %1459  ;;  %4137 = vmatprep.mubr.msk.bf16.mxu1 %vm4967_vm0, %v6406_v0 }
 0x3fa   : > { %v1465_v26 = vsel %vm1351_vm3, %v1460_v25, 0 }
 0x3fb   : > { %v4641_v27 = vpop.eup %4640  ;;  %4136 = vmatpush3.bf16.msra.mxu1 %v1465_v26 }
 0x3fc   : > { %4147 = vmatprep.subr.bf16.mxu1 %v6406_v0  ;;  %v1456_v28 = vmul.f32 %v4641_v27, %v4633_v10 }
 0x3fe   : > { %v1457_v30 = vpack.c.bf16 %v1456_v28, %v1456_v28 }
 0x400   : > { %4138 = vmatmul.mubr.msk.bf16.vlgmr.msra.gmra.mxu1 %vm1288_vm2, %v1457_v30  ;;  %v4978_v30 = vmov 2  }
 0x401   : > { %4148 = vmatpush3.bf16.msra.mxu1 %v1576_v31  ;;  %4149 = vmatprep.mubr.msk.bf16.mxu1 %vm4967_vm0, %v6406_v0  ;;  %v6399_v31 = vmov 18  }
 0x402   : > { %4159 = vmatprep.subr.bf16.mxu1 %v6406_v0  ;;  %4495 = vset.pattern.permute.xlu1 %v4978_v30 }
 0x403   : > { %v4643_v32 = vpop.eup %4642  ;;  %4496 = vset.pattern.permute.xlu0 %v6399_v31 }
 0x404   : > { %v1568_v33 = vmul.f32 %v4643_v32, %v4635_v12  ;;  %v4615_v32 = vld [vmem:[%s6482_s26 + $0x8] sm:$0xff]  }
 0x406   : > { %v1569_v34 = vpack.c.bf16 %v1568_v33, %v1568_v33  ;;  %v4617_v33 = vld [vmem:[%s5336_s13] sm:$0xff]  }
 0x408   : > { %4150 = vmatmul.mubr.msk.bf16.vlgmr.msra.gmra.mxu1 %vm1288_vm2, %v1569_v34  ;;  %v4618_v34 = vld [vmem:[%s5336_s13 + $0x8] sm:$0xff]  }
 0x409   : > { %4161 = vmatprep.mubr.msk.bf16.mxu1 %vm4967_vm0, %v6406_v0 }
 0x422   : > { %v1677_v35 = vpop.xlane.xlu1 %1676 }
 0x423   : > { %4644 = vrcp.f32 %v1677_v35 }
 0x426   : > { %v1682_v36 = vpop.permute.xlu1 %1681 }
 0x427   : > { %v1687_v37 = vsel %vm1351_vm3, %v1682_v36, 0 }
 0x428   : > { %4160 = vmatpush3.bf16.msra.mxu1 %v1687_v37 }
 0x429   : > { %4173 = vmatprep.subr.bf16.mxu1 %v6406_v0 }
 0x430   : > { %v4645_v38 = vpop.eup %4644 }
 0x431   : > { %v1679_v39 = vmul.f32 %v4645_v38, %v4637_v17 }
 0x433   : > { %v1680_v40 = vpack.c.bf16 %v1679_v39, %v1679_v39 }
 0x435   : > { %4162 = vmatmul.mubr.msk.bf16.vlgmr.msra.gmra.mxu1 %vm1288_vm2, %v1680_v40 }
 0x436   : > { %4177 = vmatprep.mubr.msk.bf16.mxu1 %vm4967_vm0, %v6406_v0  ;;  %4174 = vmatpush3.bf16.msra.mxu1 %v4615_v32 }
 0x437   : > { %4175 = vmatprep.subr.bf16.mxu1 %v6406_v0 }
 0x4b8   : > { %v1389_v41 = vpop.f32.mrf.mxu1 }
 0x4ba   : > { %v4127_v42 = vpop.f32.mrf.mxu1 }
 0x4bc   : > { %v1392_v43 = vpop.f32.mrf.mxu1 }
 0x4be   : > { %v4128_v45 = vpop.f32.mrf.mxu1 }
 0x4c0   : > { %v1501_v46 = vpop.f32.mrf.mxu1 }
 0x4c1   : > { %1730 = vrot.lane.b32.xlu0 %v1501_v46, %s6377_s18  ;;  %s6481_s18 = sld [smem:[#allocation27_spill]] }
 0x4c2   : > { %v4139_v47 = vpop.f32.mrf.mxu1 }
 0x4c4   : > { %v1504_v48 = vpop.f32.mrf.mxu1 }
 0x4c6   : > { %v4140_v49 = vpop.f32.mrf.mxu1 }
 0x4c7   : > { %v3977_v25 = vld [vmem:[%s6481_s18] ss:$0 sm:$0xff]  ;;  %s6487_s18 = sld [smem:[#allocation21_spill]]  ;;  %v4619_v49 = vld [vmem:[%s5336_s13 + $0x10] sm:$0xff]  }
 0x4c8   : > { %v1612_v50 = vpop.f32.mrf.mxu1 }
 0x4c9   : > { %1734 = vrot.lane.b32.xlu1 %v1612_v50, %s6382_s10  ;;  %s6486_s10 = sld [smem:[#allocation31_spill]] }
 0x4ca   : > { %v4151_v51 = vpop.f32.mrf.mxu1 }
 0x4cb   : > { %v4620_v51 = vld [vmem:[%s5336_s13 + $0x18] sm:$0xff]   ;;  %s6488_s13 = smov 88  }
 0x4cc   : > { %v1615_v52 = vpop.f32.mrf.mxu1 }
 0x4cd   : > { %s1125_s28 = scalar_lea.vmem %s6487_s18, %s5318_s22  ;;  %v6400_v52 = vmov 19  }
 0x4ce   : > { %v4152_v53 = vpop.f32.mrf.mxu1  ;;  %v2133_v39 = vld [vmem:[%s1125_s28] sm:$0xff]  ;;  %s4983_s28 = smov 84  }
 0x4cf   : > { %v3991_v35 = vld [vmem:[%s6486_s10] ss:$0 sm:$0xff]  ;;  %s6490_s10 = sld [smem:[#allocation23_spill]] }
 0x4f5   : > { %v1723_v55 = vpop.f32.mrf.mxu1 }
 0x4f6   : > { %1738 = vrot.lane.b32.xlu0 %v1723_v55, %s6376_s7  ;;  %s6480_s7 = sld [smem:[#allocation26_spill]]  ;;  %v4981_v55 = vmov 3  }
 0x4f7   : > { %v4163_v56 = vpop.f32.mrf.mxu1 }
 0x4f9   : > { %v1726_v57 = vpop.f32.mrf.mxu1 }
 0x4fb   : > { %v4164_v58 = vpop.f32.mrf.mxu1 }
 0x4fc   : > { %v3976_v23 = vld [vmem:[%s6480_s7] ss:$0 sm:$0xff]  ;;  %s6485_s7 = sld [smem:[#allocation22_spill]] }
 0x502   : > { %s1129_s26 = scalar_lea.vmem %s6485_s7, %s5318_s22  ;;  %s4982_s22 = smov 92  }
 0x503   : > { %v2134_v36 = vld [vmem:[%s1129_s26] sm:$0xff]  ;;  %s4306_s7 = smul.u32 80, %s5312_s4  ;;  %s6491_s4 = smov 120  }
 0x504   : > { %s6509_s26 = smov 112  }
 0x505   : > { %s5555_s18 = scalar_lea.vmem %s6490_s10, %s4306_s7  ;;  %s6606_s10 = sld [smem:[#allocation32_spill]] }
 0x506   : > { %s6607_s7 = smov 8  }
 0x533   : > { %v1731_v59 = vpop.permute.xlu0 %1730 }
 0x534   : > { %v1741_v61 = vsel %vm1288_vm2, %v1389_v41, %v1731_v59 }
 0x53b   : > { %v1735_v60 = vpop.permute.xlu1 %1734 }
 0x53c   : > { %v1743_v62 = vsel %vm1742_vm4, %v1741_v61, %v1735_v60 }
 0x568   : > { %v1739_v63 = vpop.permute.xlu0 %1738 }
 0x569   : > { %v1745_v1 = vsel %vm1744_vm5, %v1743_v62, %v1739_v63 }
 0x56a   : > { %v1746_v2 = vpack.c.bf16 %v1745_v1, %v1745_v1 }
 0x56c   : > { %4170 = vmatmul.mubr.msk.bf16.vlgmr.msra.gmra.mxu0 %vm1172_vm1, %v1746_v2 }
 0x56d   : > { %4201 = vmatprep.mubr.msk.bf16.mxu0 %vm4967_vm0, %v6406_v0  ;;  %4198 = vmatpush3.bf16.msra.mxu0 %v4613_v18 }
 0x56e   : > { %4199 = vmatprep.subr.bf16.mxu0 %v6406_v0 }
 0x571   : > { %4200 = vmatpush3.bf16.msra.mxu0 %v4614_v19 }
 0x572   : > { %4205 = vmatprep.subr.bf16.mxu0 %v6406_v0 }
 0x62c   : > { %v1807_v6 = vpop.f32.mrf.mxu0 }
 0x62d   : > { %v1808_v7 = vadd.f32 %v3972_v5, %v1807_v6 }
 0x62e   : > { %v4171_v8 = vpop.f32.mrf.mxu0 }
 0x62f   : > { %v1813_v9 = vadd.f32 %v1808_v7, %v5326_v3 }
 0x630   : > { %v1810_v10 = vpop.f32.mrf.mxu0 }
 0x631   : > { %v1814_v11 = vsel %vm1172_vm1, %v1813_v9, 0.0 }
 0x632   : > { %1815 = vadd.xlane.f32.xlu1 %v1814_v11  ;;  %v4172_v12 = vpop.f32.mrf.mxu0 }
 0x6bb   : > { %v1816_v13 = vpop.xlane.xlu1 %1815 }
 0x6bc   : > { %v1818_v14 = vmul.f32 0.03125, %v1816_v13  ;;  %v6408_v13 = vmov 22  }
 0x6be   : > { %v1819_v15 = vsub.f32 %v1813_v9, %v1818_v14  ;;  %v6404_v14 = vmov 23  }
 0x6c0   : > { %v1820_v16 = vmul.f32 %v1819_v15, %v1819_v15 }
 0x6c2   : > { %v1821_v17 = vsel %vm1172_vm1, %v1820_v16, 0.0  ;;  %v4987_v16 = vmov 7  }
 0x6c3   : > { %1822 = vadd.xlane.f32.xlu0 %v1821_v17 }
 0x74c   : > { %v1823_v3 = vpop.xlane.xlu0 %1822 }
 0x74d   : > { %v1824_v20 = vmul.f32 0.03125, %v1823_v3 }
 0x74f   : > { %v1825_v21 = vadd.f32 1e-05, %v1824_v20 }
 0x751   : > { %4646 = vrsqrt.f32 %v1825_v21 }
 0x75e   : > { %v4647_v22 = vpop.eup %4646 }
 0x75f   : > { %v1827_v24 = vmul.f32 %v4647_v22, %v1819_v15  ;;  %v4986_v15 = vmov 6  }
 0x761   : > { %v1835_v26 = vmul.f32 %v3976_v23, %v1827_v24 }
 0x763   : > { %v5431_v27 = vadd.f32 %v3977_v25, %v1835_v26 }
 0x765   : > { %6484 = vst [vmem:[#allocation44_spill] sm:$0xff] %v5431_v27  ;;  %v1844_v28 = vadd.f32 %v5431_v27, %v5328_v4  ;;  %v4616_v4 = vld [vmem:[%s6483_s16] sm:$0xff]  }
 0x766   : > { %4176 = vmatpush3.bf16.msra.mxu1 %v4616_v4 }
 0x767   : > { %v2066_v29 = vpack.c.bf16 %v1844_v28, %v1844_v28  ;;  %4229 = vmatprep.subr.bf16.mxu1 %v6406_v0 }
 0x769   : > { %4202 = vmatmul.mubr.msk.bf16.vlgmr.msra.gmra.mxu0 %vm1172_vm1, %v2066_v29  ;;  %4178 = vmatmul.mubr.msk.bf16.vlgmr.msra.gmra.mxu1 %vm1172_vm1, %v4617_v33  ;;  %v1999_v33 = vld [vmem:[%s5555_s18 + $0x40] sm:$0xff] }
 0x76a   : > { %4207 = vmatprep.mubr.msk.bf16.mxu0 %vm4967_vm0, %v6406_v0  ;;  %4181 = vmatprep.mubr.msk.bf16.mxu1 %vm4967_vm0, %v6406_v0 }
 0x771   : > { %4182 = vmatmul.mubr.msk.bf16.gmra.mxu1 %vm1172_vm1, %v4618_v34 }
 0x772   : > { %4185 = vmatprep.mubr.msk.bf16.mxu1 %vm4967_vm0, %v6406_v0 }
 0x779   : > { %4186 = vmatmul.mubr.msk.bf16.gmra.mxu1 %vm1172_vm1, %v4619_v49 }
 0x77a   : > { %4189 = vmatprep.mubr.msk.bf16.mxu1 %vm4967_vm0, %v6406_v0 }
 0x781   : > { %4190 = vmatmul.mubr.msk.bf16.gmra.mxu1 %vm1172_vm1, %v4620_v51 }
 0x782   : > { %4193 = vmatprep.mubr.msk.bf16.mxu1 %vm4967_vm0, %v6406_v0 }
 0x789   : > { %4194 = vmatmul.mubr.msk.bf16.gmra.mxu1 %vm1172_vm1, %v4621_v54 }
 0x78a   : > { %4237 = vmatprep.mubr.msk.bf16.mxu1 %vm4967_vm0, %v6406_v0 }
 0x829   : > { %v2127_v37 = vpop.f32.mrf.mxu0  ;;  %v1952_v18 = vpop.f32.mrf.mxu1 }
 0x82a   : > { %v5457_v38 = vadd.f32 %v3991_v35, %v2127_v37  ;;  %v4988_v35 = vmov 0  }
 0x82b   : > { %v4203_v40 = vpop.f32.mrf.mxu0  ;;  %v4179_v3 = vpop.f32.mrf.mxu1 }
 0x82c   : > { %v2135_v41 = vmul.f32 %v2134_v36, %v5457_v38  ;;  %v2158_v42 = vsel %vm2157_vm6, %v5457_v38, -inf  ;;  %v2141_v43 = vsel %vm2140_vm7, %v5457_v38, -inf  ;;  %v2190_v47 = vsel %vm2189_vm8, %v5457_v38, -inf }
 0x82d   : > { %2159 = vmax.xlane.f32.xlu1 %v2158_v42  ;;  %2142 = vmax.xlane.f32.xlu0 %v2141_v43  ;;  %v2130_v44 = vpop.f32.mrf.mxu0  ;;  %v2174_v48 = vsel %vm2173_vm9, %v5457_v38, -inf  ;;  %v1955_v20 = vpop.f32.mrf.mxu1 }
 0x82e   : > { %v2136_v45 = vadd.f32 %v2135_v41, %v2133_v39 }
 0x82f   : > { %v4204_v46 = vpop.f32.mrf.mxu0  ;;  %v4180_v22 = vpop.f32.mrf.mxu1 }
 0x830   : > { %2137 = vst.msk [vmem:[%s1143_s1] sm:$0xff] %vm1172_vm1, %v2136_v45  ;;  %v5471_v50 = vfloor.f32 %v2136_v45  ;;  %s6489_s1 = sld [smem:[#allocation29_spill]] }
 0x831   : > { %2191 = vmax.xlane.f32.xlu1 %v2190_v47  ;;  %2175 = vmax.xlane.f32.xlu0 %v2174_v48  ;;  %v1960_v23 = vpop.f32.mrf.mxu1 }
 0x832   : > { %v5482_v53 = vadd.f32 1.0, %v5471_v50  ;;  %v5491_v56 = vsub.f32 %v2136_v45, %v5471_v50 }
 0x833   : > { %v4183_v25 = vpop.f32.mrf.mxu1 }
 0x834   : > { %v5498_v57 = vsub.f32 1.0, %v5491_v56  ;;  %v6391_v25 = vmov 27  }
 0x835   : > { %v1963_v26 = vpop.f32.mrf.mxu1 }
 0x836   : > { %v5536_v17 = vld [vmem:[%s6489_s1] ss:$0 sm:$0xff]  ;;  %s5012_s1 = smov 64  }
 0x837   : > { %v5539_v19 = vadd.f32 %v5536_v17, %v1952_v18  ;;  %v5543_v21 = vadd.f32 %v5536_v17, %v1955_v20  ;;  %v5547_v24 = vadd.f32 %v5536_v17, %v1960_v23  ;;  %v5552_v28 = vadd.f32 %v5536_v17, %v1963_v26  ;;  %v4184_v29 = vpop.f32.mrf.mxu1  ;;  %v1996_v26 = vld [vmem:[%s5555_s18 + $0x28] sm:$0xff] }
 0x838   : > { %v6393_v20 = vmov 26   ;;  %v4990_v23 = vmov 11  }
 0x842   : > { %2610 = vperm.xlu1 %4495, %v5471_v50  }
 0x846   : > { %4498 = vset.pattern.permute.xlu1 %v6400_v52 }
 0x847   : > { %2631 = vperm.xlu0 %4496, %v5471_v50   ;;  %2675 = vperm.xlu1 %4498, %v5471_v50  }
 0x84b   : > { %4497 = vset.pattern.permute.xlu0 %v4981_v55  ;;  %2680 = vperm.xlu1 %4498, %v5482_v53  }
 0x84c   : > { %2654 = vperm.xlu0 %4497, %v5471_v50  }
 0x84f   : > { %4500 = vset.pattern.permute.xlu1 %v4978_v30 }
 0x850   : > { %4499 = vset.pattern.permute.xlu0 %v6399_v31  ;;  %2626 = vperm.xlu1 %4500, %v5491_v56  }
 0x851   : > { %2636 = vperm.xlu0 %4499, %v5482_v53  }
 0x854   : > { %4501 = vset.pattern.permute.xlu1 %v4981_v55 }
 0x855   : > { %4502 = vset.pattern.permute.xlu0 %v4978_v30  ;;  %2670 = vperm.xlu1 %4501, %v5491_v56  }
 0x856   : > { %2622 = vperm.xlu0 %4502, %v5498_v57  }
 0x85a   : > { %4503 = vset.pattern.permute.xlu0 %v4981_v55 }
 0x85b   : > { %2666 = vperm.xlu0 %4503, %v5498_v57  }
 0x85f   : > { %4504 = vset.pattern.permute.xlu0 %v4978_v30  ;;  %v1968_v30 = vpop.f32.mrf.mxu1 }
 0x860   : > { %v5559_v32 = vadd.f32 %v5536_v17, %v1968_v30  ;;  %v4992_v30 = vmov 10  }
 0x861   : > { %v4187_v4 = vpop.f32.mrf.mxu1 }
 0x863   : > { %v1971_v34 = vpop.f32.mrf.mxu1 }
 0x864   : > { %v5564_v36 = vadd.f32 %v5536_v17, %v1971_v34 }
 0x865   : > { %v4188_v37 = vpop.f32.mrf.mxu1 }
 0x866   : > { %v4993_v37 = vmov 15  }
 0x867   : > { %v1976_v39 = vpop.f32.mrf.mxu1 }
 0x868   : > { %v5568_v40 = vadd.f32 %v5536_v17, %v1976_v39 }
 0x869   : > { %v4191_v41 = vpop.f32.mrf.mxu1 }
 0x86a   : > { %v4994_v41 = vmov 14  }
 0x86b   : > { %v1979_v42 = vpop.f32.mrf.mxu1 }
 0x86c   : > { %v5571_v43 = vadd.f32 %v5536_v17, %v1979_v42 }
 0x86d   : > { %v4192_v44 = vpop.f32.mrf.mxu1 }
 0x86e   : > { %v1993_v44 = vld [vmem:[%s5555_s18 + $0x10] sm:$0xff] }
 0x86f   : > { %v5573_v45 = vpop.f32.mrf.mxu1 }
 0x870   : > { %v1985_v42 = vadd.f32 %v5536_v17, %v5573_v45  ;;  %v6387_v45 = vmov 31  }
 0x871   : > { %v4195_v46 = vpop.f32.mrf.mxu1 }
 0x873   : > { %v5575_v47 = vpop.f32.mrf.mxu1 }
 0x875   : > { %v4196_v48 = vpop.f32.mrf.mxu1 }
 0x876   : > { %v1988_v48 = vadd.f32 %v5536_v17, %v5575_v47 }
 0x8b6   : > { %v2160_v58 = vpop.xlane.xlu1 %2159  ;;  %v2143_v59 = vpop.xlane.xlu0 %2142 }
 0x8b7   : > { %v2161_v60 = vsub.f32 %v5457_v38, %v2160_v58  ;;  %v2144_v61 = vsub.f32 %v5457_v38, %v2143_v59 }
 0x8b9   : > { %v2162_v62 = vmul.f32 1.442695, %v2161_v60  ;;  %v2145_v63 = vmul.f32 1.442695, %v2144_v61 }
 0x8ba   : > { %v2192_v1 = vpop.xlane.xlu1 %2191  ;;  %v2176_v2 = vpop.xlane.xlu0 %2175 }
 0x8bb   : > { %4648 = vpow2.f32 %v2162_v62  ;;  %v2193_v5 = vsub.f32 %v5457_v38, %v2192_v1  ;;  %v2177_v6 = vsub.f32 %v5457_v38, %v2176_v2  ;;  %v2000_v38 = vld [vmem:[%s5555_s18 + $0x48] sm:$0xff] }
 0x8bc   : > { %4650 = vpow2.f32 %v2145_v63 }
 0x8bd   : > { %v2194_v7 = vmul.f32 1.442695, %v2193_v5  ;;  %v2178_v8 = vmul.f32 1.442695, %v2177_v6 }
 0x8be   : > { %v5577_v49 = vpop.permute.xlu1 %2610 }
 0x8bf   : > { %4652 = vpow2.f32 %v2194_v7 }
 0x8c0   : > { %4654 = vpow2.f32 %v2178_v8 }
 0x8c2   : > { %v5579_v51 = vpop.permute.xlu0 %2631  ;;  %v5581_v54 = vpop.permute.xlu1 %2675 }
 0x8c6   : > { %v5585_v58 = vpop.permute.xlu1 %2680 }
 0x8c7   : > { %v5583_v55 = vpop.permute.xlu0 %2654 }
 0x8c8   : > { %v5509_v9 = vpop.eup %4648 }
 0x8c9   : > { %v5511_v10 = vpop.eup %4650  ;;  %2165 = vrot.lane.b32.xlu1 %v5509_v9, %s4982_s22  ;;  %s6530_s22 = smov 104  }
 0x8ca   : > { %2148 = vrot.lane.b32.xlu0 %v5511_v10, %s4969_s11 }
 0x8cb   : > { %v5589_v60 = vpop.permute.xlu1 %2626 }
 0x8cc   : > { %v5516_v11 = vpop.eup %4652  ;;  %v5587_v59 = vpop.permute.xlu0 %2636 }
 0x8cd   : > { %v5518_v12 = vpop.eup %4654 }
 0x8ce   : > { %2181 = vrot.lane.b32.xlu1 %v5518_v12, %s6488_s13  ;;  %2197 = vrot.lane.b32.xlu0 %v5516_v11, %s4983_s28  ;;  %s6546_s13 = sld [smem:[#allocation25_spill]] }
 0x8cf   : > { %s6547_s28 = sld [smem:[#allocation24_spill]] }
 0x8d0   : > { %v5593_v62 = vpop.permute.xlu1 %2670 }
 0x8d1   : > { %v5591_v61 = vpop.permute.xlu0 %2622 }
 0x8d2   : > { %2659 = vperm.xlu1 %4501, %v5482_v53   ;;  %2615 = vperm.xlu0 %4504, %v5482_v53  }
 0x8d6   : > { %4505 = vset.pattern.permute.xlu1 %v6408_v13  ;;  %4506 = vset.pattern.permute.xlu0 %v6404_v14  ;;  %v5595_v63 = vpop.permute.xlu0 %2666 }
 0x8d7   : > { %2815 = vperm.xlu1 %4505, %v5482_v53   ;;  %2859 = vperm.xlu0 %4506, %v5482_v53  }
 0x8db   : > { %4507 = vset.pattern.permute.xlu1 %v4986_v15  ;;  %4514 = vset.pattern.permute.xlu0 %v4986_v15 }
 0x8dc   : > { %2789 = vperm.xlu1 %4507, %v5471_v50  }
 0x8e0   : > { %4508 = vset.pattern.permute.xlu1 %v6408_v13 }
 0x8e1   : > { %2810 = vperm.xlu1 %4508, %v5471_v50  }
 0x8e5   : > { %4509 = vset.pattern.permute.xlu1 %v4987_v16 }
 0x8e6   : > { %2833 = vperm.xlu1 %4509, %v5471_v50  }
 0x8ea   : > { %4510 = vset.pattern.permute.xlu1 %v6404_v14 }
 0x8eb   : > { %2854 = vperm.xlu1 %4510, %v5471_v50  }
 0x8ef   : > { %4511 = vset.pattern.permute.xlu1 %v4986_v15 }
 0x8f0   : > { %2801 = vperm.xlu1 %4511, %v5498_v57  }
 0x8f4   : > { %2805 = vperm.xlu1 %4511, %v5491_v56  }
 0x8f8   : > { %4512 = vset.pattern.permute.xlu1 %v4987_v16 }
 0x8f9   : > { %2845 = vperm.xlu1 %4512, %v5498_v57  }
 0x8fd   : > { %2849 = vperm.xlu1 %4512, %v5491_v56  }
 0x901   : > { %4513 = vset.pattern.permute.xlu1 %v4988_v35 }
 0x902   : > { %2043 = vperm.xlu1 %4513, %v1999_v33  }
 0x906   : > { %2048 = vperm.xlu1 %4513, %v2000_v38  }
 0x90a   : > { %4515 = vset.pattern.permute.xlu1 %v4987_v16  ;;  %v1997_v16 = vld [vmem:[%s5555_s18 + $0x30] sm:$0xff] }
 0x93b   : > { %v2166_v1 = vpop.permute.xlu1 %2165 }
 0x93c   : > { %v2149_v2 = vpop.permute.xlu0 %2148  ;;  %v2168_v5 = vsel %vm2151_vm10, %v2166_v1, 0.0 }
 0x93d   : > { %2169 = vadd.xlane.f32.xlu0 %v2168_v5  ;;  %v2152_v6 = vsel %vm2151_vm10, %v2149_v2, 0.0 }
 0x93e   : > { %2153 = vadd.xlane.f32.xlu1 %v2152_v6  ;;  %v6389_v6 = vmov 30  }
 0x940   : > { %v2182_v7 = vpop.permute.xlu1 %2181  ;;  %v2198_v17 = vpop.permute.xlu0 %2197 }
 0x941   : > { %v2184_v8 = vsel %vm2151_vm10, %v2182_v7, 0.0  ;;  %v2200_v47 = vsel %vm2151_vm10, %v2198_v17, 0.0 }
 0x942   : > { %2185 = vadd.xlane.f32.xlu0 %v2184_v8 }
 0x94d   : > { %v5600_v15 = vpop.permute.xlu1 %2659  ;;  %v5660_v8 = vpop.permute.xlu0 %2615 }
 0x94f   : > { %2838 = vperm.xlu1 %4515, %v5482_v53  }
 0x952   : > { %v5604_v18 = vpop.permute.xlu1 %2815 }
 0x953   : > { %4516 = vset.pattern.permute.xlu1 %v4988_v35 }
 0x954   : > { %2033 = vperm.xlu1 %4516, %v1997_v16   ;;  %v1992_v16 = vld [vmem:[%s5555_s18 + $0x8] sm:$0xff] }
 0x957   : > { %v5607_v3 = vpop.permute.xlu1 %2789 }
 0x958   : > { %2794 = vperm.xlu0 %4514, %v5482_v53   ;;  %4517 = vset.pattern.permute.xlu1 %v6393_v20 }
 0x959   : > { %3013 = vperm.xlu1 %4517, %v5482_v53  }
 0x95c   : > { %v5612_v22 = vpop.permute.xlu1 %2810  ;;  %4521 = vset.pattern.permute.xlu0 %v4990_v23 }
 0x95d   : > { %3031 = vperm.xlu0 %4521, %v5471_v50   ;;  %4518 = vset.pattern.permute.xlu1 %v6391_v25 }
 0x95e   : > { %3057 = vperm.xlu1 %4518, %v5482_v53  }
 0x961   : > { %v5618_v29 = vpop.permute.xlu1 %2833  ;;  %3043 = vperm.xlu0 %4521, %v5498_v57  }
 0x962   : > { %4519 = vset.pattern.permute.xlu1 %v4988_v35 }
 0x963   : > { %2028 = vperm.xlu1 %4519, %v1996_v26  }
 0x965   : > { %4524 = vset.pattern.permute.xlu0 %v4992_v30 }
 0x966   : > { %v5622_v4 = vpop.permute.xlu1 %2854  ;;  %2987 = vperm.xlu0 %4524, %v5471_v50  }
 0x967   : > { %4520 = vset.pattern.permute.xlu1 %v6393_v20  ;;  %v6395_v20 = vmov 17  }
 0x968   : > { %3008 = vperm.xlu1 %4520, %v5471_v50  }
 0x96a   : > { %2999 = vperm.xlu0 %4524, %v5498_v57  }
 0x96b   : > { %v5628_v33 = vpop.permute.xlu1 %2801 }
 0x96c   : > { %4522 = vset.pattern.permute.xlu1 %v6391_v25 }
 0x96d   : > { %3052 = vperm.xlu1 %4522, %v5471_v50  }
 0x96e   : > { %2992 = vperm.xlu0 %4524, %v5482_v53  }
 0x96f   : > { %v5633_v34 = vpop.permute.xlu1 %2805 }
 0x971   : > { %4523 = vset.pattern.permute.xlu1 %v4992_v30 }
 0x972   : > { %4531 = vset.pattern.permute.xlu0 %v4993_v37  ;;  %3003 = vperm.xlu1 %4523, %v5491_v56  }
 0x973   : > { %3224 = vperm.xlu0 %4531, %v5471_v50  }
 0x974   : > { %v5637_v38 = vpop.permute.xlu1 %2845 }
 0x976   : > { %4525 = vset.pattern.permute.xlu1 %v4990_v23  ;;  %v5664_v23 = vpop.permute.xlu0 %2859 }
 0x977   : > { %3236 = vperm.xlu0 %4531, %v5498_v57   ;;  %3047 = vperm.xlu1 %4525, %v5491_v56  }
 0x978   : > { %v5641_v39 = vpop.permute.xlu1 %2849 }
 0x97b   : > { %4534 = vset.pattern.permute.xlu0 %v4994_v41  ;;  %3036 = vperm.xlu1 %4525, %v5482_v53  }
 0x97c   : > { %3180 = vperm.xlu0 %4534, %v5471_v50  }
 0x97d   : > { %v2044_v46 = vpop.permute.xlu1 %2043 }
 0x97e   : > { %v2059_v1 = vmul.f32 %v2044_v46, %v1985_v42 }
 0x97f   : > { %4526 = vset.pattern.permute.xlu1 %v4988_v35 }
 0x980   : > { %2013 = vperm.xlu1 %4526, %v1993_v44  }
 0x981   : > { %v2049_v2 = vpop.permute.xlu1 %2048 }
 0x982   : > { %v2060_v5 = vmul.f32 %v2049_v2, %v1988_v48 }
 0x984   : > { %4527 = vset.pattern.permute.xlu1 %v6389_v6  ;;  %v5652_v7 = vpack.c.bf16 %v2060_v5, %v2059_v1 }
 0x985   : > { %3206 = vperm.xlu1 %4527, %v5482_v53  }
 0x986   : > { %4206 = vmatpush3.bf16.msra.mxu0 %v5652_v7 }
 0x987   : > { %4211 = vmatprep.subr.bf16.mxu0 %v6406_v0 }
 0x989   : > { %4528 = vset.pattern.permute.xlu1 %v6387_v45 }
 0x9a9   : > { %2201 = vadd.xlane.f32.xlu1 %v2200_v47 }
 0x9ba   : > { %3250 = vperm.xlu1 %4528, %v5482_v53  }
 0x9be   : > { %4529 = vset.pattern.permute.xlu1 %v4988_v35 }
 0x9bf   : > { %2008 = vperm.xlu1 %4529, %v1992_v16   ;;  %v6402_v16 = vmov 20  }
 0x9c3   : > { %4530 = vset.pattern.permute.xlu1 %v6389_v6 }
 0x9c4   : > { %3201 = vperm.xlu1 %4530, %v5471_v50  }
 0x9c6   : > { %v2170_v26 = vpop.xlane.xlu0 %2169 }
 0x9c7   : > { %v2154_v30 = vpop.xlane.xlu1 %2153  ;;  %4656 = vrcp.f32 %v2170_v26 }
 0x9c8   : > { %4658 = vrcp.f32 %v2154_v30  ;;  %4532 = vset.pattern.permute.xlu1 %v6387_v45  ;;  %v6411_v30 = vmov 4  }
 0x9c9   : > { %3245 = vperm.xlu1 %4532, %v5471_v50  }
 0x9cb   : > { %v2186_v42 = vpop.xlane.xlu0 %2185 }
 0x9cc   : > { %4660 = vrcp.f32 %v2186_v42 }
 0x9cd   : > { %4533 = vset.pattern.permute.xlu1 %v4994_v41 }
 0x9ce   : > { %3196 = vperm.xlu1 %4533, %v5491_v56  }
 0x9d2   : > { %4535 = vset.pattern.permute.xlu1 %v4993_v37  ;;  %v6397_v37 = vmov 16  }
 0x9d4   : > { %v4657_v44 = vpop.eup %4656 }
 0x9d5   : > { %v4659_v46 = vpop.eup %4658  ;;  %v2172_v48 = vmul.f32 %v4657_v44, %v5509_v9  ;;  %v5681_v9 = vpop.permute.xlu1 %2838  ;;  %v6410_v44 = vmov 5  }
 0x9d6   : > { %v2156_v1 = vmul.f32 %v4659_v46, %v5511_v10 }
 0x9d7   : > { %2210 = vrot.lane.b32.xlu1 %v2172_v48, %s4969_s11 }
 0x9d8   : > { %2206 = vrot.lane.b32.xlu0 %v2156_v1, %s4969_s11 }
 0x9d9   : > { %v4661_v2 = vpop.eup %4660  ;;  %v5685_v10 = vpop.permute.xlu1 %2033 }
 0x9da   : > { %v2188_v5 = vmul.f32 %v4661_v2, %v5518_v12  ;;  %v4998_v12 = vmov 1  }
 0x9dc   : > { %2214 = vrot.lane.b32.xlu1 %v2188_v5, %s4969_s11 }
 0x9dd   : > { %v5689_v41 = vpop.permute.xlu1 %3013 }
 0x9e0   : > { %3240 = vperm.xlu1 %4535, %v5491_v56  }
 0x9e1   : > { %v5693_v17 = vpop.permute.xlu1 %3057 }
 0x9e4   : > { %3229 = vperm.xlu1 %4535, %v5482_v53  }
 0x9e5   : > { %v5697_v47 = vpop.permute.xlu1 %2028 }
 0x9e8   : > { %4536 = vset.pattern.permute.xlu1 %v6397_v37 }
 0x9e9   : > { %2278 = vperm.xlu1 %4536, %v5482_v53   ;;  %v5702_v26 = vpop.permute.xlu1 %3008 }
 0x9ed   : > { %4537 = vset.pattern.permute.xlu1 %v4988_v35  ;;  %v5707_v42 = vpop.permute.xlu1 %3052 }
 0x9ee   : > { %2242 = vperm.xlu1 %4537, %v5471_v50  }
 0x9f1   : > { %v5711_v46 = vpop.permute.xlu1 %3003 }
 0x9f2   : > { %4540 = vset.pattern.permute.xlu1 %v4998_v12 }
 0x9f3   : > { %2298 = vperm.xlu1 %4540, %v5471_v50  }
 0x9f5   : > { %v5715_v48 = vpop.permute.xlu1 %3047 }
 0x9f6   : > { %6492 = vst [vmem:[#allocation45_spill] sm:$0xff] %v5715_v48 }
 0x9f7   : > { %4542 = vset.pattern.permute.xlu1 %v4988_v35 }
 0x9f8   : > { %2257 = vperm.xlu1 %4542, %v5498_v57  }
 0x9f9   : > { %v5719_v1 = vpop.permute.xlu1 %3036 }
 0x9fc   : > { %4543 = vset.pattern.permute.xlu1 %v4998_v12 }
 0x9fd   : > { %2310 = vperm.xlu1 %4543, %v5498_v57   ;;  %v2014_v2 = vpop.permute.xlu1 %2013 }
 0xa01   : > { %4545 = vset.pattern.permute.xlu1 %v4988_v35  ;;  %v5724_v5 = vpop.permute.xlu1 %3206 }
 0xa02   : > { %2249 = vperm.xlu1 %4545, %v5482_v53   ;;  %6493 = vst [vmem:[#allocation46_spill] sm:$0xff] %v5724_v5 }
 0xa06   : > { %2881 = vrot.lane.b32.xlu1 %v5652_v7, %s6491_s4 }
 0xa07   : > { %4546 = vset.pattern.permute.xlu1 %v6402_v16 }
 0xa0a   : > { %2369 = vperm.xlu1 %4546, %v5482_v53  }
 0xa0e   : > { %4547 = vset.pattern.permute.xlu1 %v6411_v30 }
 0xa0f   : > { %2343 = vperm.xlu1 %4547, %v5471_v50  }
 0xa13   : > { %4550 = vset.pattern.permute.xlu1 %v6410_v44 }
 0xa14   : > { %2387 = vperm.xlu1 %4550, %v5471_v50  }
 0xa18   : > { %4551 = vset.pattern.permute.xlu1 %v6411_v30 }
 0xa19   : > { %2355 = vperm.xlu1 %4551, %v5498_v57  }
 0xa1d   : > { %4553 = vset.pattern.permute.xlu1 %v6410_v44 }
 0xa1e   : > { %2399 = vperm.xlu1 %4553, %v5498_v57  }
 0xa22   : > { %4555 = vset.pattern.permute.xlu1 %v6411_v30 }
 0xa23   : > { %2348 = vperm.xlu1 %4555, %v5482_v53  }
 0xa27   : > { %4556 = vset.pattern.permute.xlu1 %v6399_v31 }
 0xa32   : > { %v2202_v45 = vpop.xlane.xlu1 %2201 }
 0xa33   : > { %4662 = vrcp.f32 %v2202_v45  ;;  %v1998_v45 = vld [vmem:[%s5555_s18 + $0x38] sm:$0xff] }
 0xa36   : > { %v5764_v0 = vpop.permute.xlu1 %3250 }
 0xa37   : > { %6499 = vst [vmem:[#allocation52_spill] sm:$0xff] %v5764_v0 }
 0xa3a   : > { %v2009_v44 = vpop.permute.xlu1 %2008 }
 0xa3f   : > { %v5772_v5 = vpop.permute.xlu1 %3201 }
 0xa40   : > { %v4663_v6 = vpop.eup %4662 }
 0xa41   : > { %v2204_v25 = vmul.f32 %v4663_v6, %v5516_v11  ;;  %v1995_v11 = vld [vmem:[%s5555_s18 + $0x20] sm:$0xff] }
 0xa42   : > { %v1991_v6 = vld [vmem:[%s5555_s18] sm:$0xff] }
 0xa43   : > { %2218 = vrot.lane.b32.xlu0 %v2204_v25, %s4969_s11  ;;  %v1994_v25 = vld [vmem:[%s5555_s18 + $0x18] sm:$0xff]  ;;  %s6506_s11 = smov 16   ;;  %s6608_s18 = smov 24  }
 0xa47   : > { %3192 = vperm.xlu0 %4534, %v5498_v57  }
 0xa4b   : > { %3185 = vperm.xlu0 %4534, %v5482_v53  }
 0xa4f   : > { %4538 = vset.pattern.permute.xlu0 %v6397_v37 }
 0xa50   : > { %2273 = vperm.xlu0 %4538, %v5471_v50  }
 0xa54   : > { %4539 = vset.pattern.permute.xlu0 %v6395_v20  ;;  %v5744_v20 = vpop.permute.xlu0 %2794 }
 0xa55   : > { %2324 = vperm.xlu0 %4539, %v5482_v53  }
 0xa58   : > { %v5746_v37 = vpop.permute.xlu0 %3031 }
 0xa59   : > { %2319 = vperm.xlu0 %4539, %v5471_v50  }
 0xa5d   : > { %4541 = vset.pattern.permute.xlu0 %v4988_v35  ;;  %v5748_v35 = vpop.permute.xlu0 %3043 }
 0xa5e   : > { %2038 = vperm.xlu0 %4541, %v1998_v45   ;;  %6494 = vst [vmem:[#allocation47_spill] sm:$0xff] %v5748_v35  ;;  %v2057_v35 = vmul.f32 %v5685_v10, %v5568_v40  ;;  %v2053_v40 = vmul.f32 %v2014_v2, %v5547_v24 }
 0xa61   : > { %v5750_v45 = vpop.permute.xlu0 %2987 }
 0xa62   : > { %2023 = vperm.xlu0 %4541, %v1995_v11  }
 0xa65   : > { %v5752_v11 = vpop.permute.xlu0 %2999 }
 0xa66   : > { %2018 = vperm.xlu0 %4541, %v1994_v25  }
 0xa69   : > { %v5754_v25 = vpop.permute.xlu0 %2992 }
 0xa6a   : > { %2003 = vperm.xlu0 %4541, %v1991_v6  }
 0xa6d   : > { %v5756_v6 = vpop.permute.xlu0 %3224 }
 0xa6e   : > { %2262 = vperm.xlu0 %4541, %v5491_v56   ;;  %6495 = vst [vmem:[#allocation48_spill] sm:$0xff] %v5756_v6 }
 0xa72   : > { %4544 = vset.pattern.permute.xlu0 %v4998_v12  ;;  %v5758_v12 = vpop.permute.xlu0 %3236 }
 0xa73   : > { %2314 = vperm.xlu0 %4544, %v5491_v56   ;;  %6496 = vst [vmem:[#allocation49_spill] sm:$0xff] %v5758_v12  ;;  %v5776_v12 = vpop.permute.xlu1 %3245 }
 0xa74   : > { %6504 = vst [vmem:[#allocation57_spill] sm:$0xff] %v5776_v12 }
 0xa76   : > { %v5760_v31 = vpop.permute.xlu0 %3180 }
 0xa77   : > { %2303 = vperm.xlu0 %4544, %v5482_v53   ;;  %6497 = vst [vmem:[#allocation50_spill] sm:$0xff] %v5760_v31 }
 0xa7a   : > { %v2207_v52 = vpop.permute.xlu0 %2206 }
 0xa7b   : > { %4548 = vset.pattern.permute.xlu0 %v6402_v16 }
 0xab5   : > { %v2219_v16 = vpop.permute.xlu0 %2218 }
 0xac2   : > { %v5762_v14 = vpop.permute.xlu0 %3192 }
 0xac3   : > { %6498 = vst [vmem:[#allocation51_spill] sm:$0xff] %v5762_v14 }
 0xac6   : > { %v5766_v13 = vpop.permute.xlu0 %3185 }
 0xac7   : > { %6500 = vst [vmem:[#allocation53_spill] sm:$0xff] %v5766_v13  ;;  %v5783_v13 = vpop.permute.xlu1 %3196 }
 0xacb   : > { %v5768_v30 = vpop.permute.xlu0 %2273 }
 0xacc   : > { %6501 = vst [vmem:[#allocation54_spill] sm:$0xff] %v5768_v30 }
 0xad0   : > { %v5770_v27 = vpop.permute.xlu0 %2324 }
 0xad1   : > { %6502 = vst [vmem:[#allocation55_spill] sm:$0xff] %v5770_v27  ;;  %v2056_v27 = vmul.f32 %v5697_v47, %v5564_v36 }
 0xad4   : > { %v5774_v6 = vpop.permute.xlu0 %2319 }
 0xad5   : > { %6503 = vst [vmem:[#allocation56_spill] sm:$0xff] %v5774_v6 }
 0xad9   : > { %v2039_v31 = vpop.permute.xlu0 %2038 }
 0xada   : > { %v2058_v14 = vmul.f32 %v2039_v31, %v5571_v43 }
 0xadc   : > { %v5781_v0 = vpack.c.bf16 %v2058_v14, %v2057_v35  ;;  %v2211_v14 = vpop.permute.xlu1 %2210 }
 0xadd   : > { %v2024_v48 = vpop.permute.xlu0 %2023  ;;  %v2221_v47 = vsel %vm2151_vm10, %v2207_v52, %v2211_v14  ;;  %v6510_v52 = vmov 22  }
 0xade   : > { %6505 = vst [vmem:[#allocation58_spill] sm:$0xff] %v5781_v0  ;;  %v2055_v30 = vmul.f32 %v2024_v48, %v5559_v32  ;;  %2937 = vrot.lane.b32.xlu0 %v5781_v0, %s6491_s4  ;;  %v2052_v32 = vmul.f32 %v2009_v44, %v5543_v21  ;;  %v6508_v44 = vmov 5  }
 0xae0   : > { %v5790_v6 = vpack.c.bf16 %v2056_v27, %v2055_v30  ;;  %v6415_v27 = vmov 21   ;;  %v6507_v30 = vmov 4  }
 0xae1   : > { %v2019_v12 = vpop.permute.xlu0 %2018 }
 0xae2   : > { %v2054_v31 = vmul.f32 %v2019_v12, %v5552_v28  ;;  %2364 = vperm.xlu0 %4548, %v5471_v50   ;;  %2935 = vrot.lane.b32.xlu1 %v5790_v6, %s6491_s4  ;;  %v2215_v28 = vpop.permute.xlu1 %2214 }
 0xae4   : > { %v5797_v43 = vpack.c.bf16 %v2054_v31, %v2053_v40 }
 0xae5   : > { %v2004_v36 = vpop.permute.xlu0 %2003 }
 0xae6   : > { %v2051_v10 = vmul.f32 %v2004_v36, %v5539_v19  ;;  %4549 = vset.pattern.permute.xlu0 %v6415_v27  ;;  %2933 = vrot.lane.b32.xlu1 %v5797_v43, %s6491_s4  ;;  %v2222_v19 = vsel %vm1288_vm2, %v2221_v47, %v2215_v28  ;;  %v5818_v48 = vpop.permute.xlu1 %3240 }
 0xae7   : > { %2413 = vperm.xlu0 %4549, %v5482_v53   ;;  %v2224_v21 = vsel %vm2223_vm11, %v2222_v19, %v2219_v16 }
 0xae8   : > { %v5805_v24 = vpack.c.bf16 %v2052_v32, %v2051_v10 }
 0xae9   : > { %v5845_v47 = vpop.permute.xlu0 %2262 }
 0xaea   : > { %2931 = vrot.lane.b32.xlu1 %v5805_v24, %s6491_s4  ;;  %v5823_v16 = vpop.permute.xlu1 %3229  ;;  %6520 = vst [vmem:[#allocation68_spill] sm:$0xff] %v5845_v47  ;;  %s6609_s4 = sld [smem:[#allocation36_spill]] }
 0xaeb   : > { %2408 = vperm.xlu0 %4549, %v5471_v50  }
 0xaee   : > { %2227 = vrot.lane.b32.xlu1 %v2224_v21, %s6506_s11  ;;  %v5825_v2 = vpop.permute.xlu1 %2278  ;;  %v5849_v21 = vpop.permute.xlu0 %2314 }
 0xaef   : > { %4552 = vset.pattern.permute.xlu0 %v6507_v30  ;;  %6522 = vst [vmem:[#allocation70_spill] sm:$0xff] %v5849_v21 }
 0xaf0   : > { %2359 = vperm.xlu0 %4552, %v5491_v56  }
 0xaf2   : > { %v5827_v35 = vpop.permute.xlu1 %2242 }
 0xaf3   : > { %6511 = vst [vmem:[#allocation59_spill] sm:$0xff] %v5827_v35 }
 0xaf4   : > { %4554 = vset.pattern.permute.xlu0 %v6508_v44  ;;  %v5853_v44 = vpop.permute.xlu0 %2303 }
 0xaf5   : > { %2403 = vperm.xlu0 %4554, %v5491_v56   ;;  %6524 = vst [vmem:[#allocation72_spill] sm:$0xff] %v5853_v44  ;;  %v6548_v44 = vmov 24  }
 0xaf6   : > { %v5829_v12 = vpop.permute.xlu1 %2298 }
 0xaf7   : > { %6512 = vst [vmem:[#allocation60_spill] sm:$0xff] %v5829_v12 }
 0xaf9   : > { %2392 = vperm.xlu0 %4554, %v5482_v53  }
 0xafa   : > { %v5831_v40 = vpop.permute.xlu1 %2257 }
 0xafb   : > { %6513 = vst [vmem:[#allocation61_spill] sm:$0xff] %v5831_v40  ;;  %v6551_v40 = vmov 25  }
 0xafd   : > { %3078 = vrot.lane.b32.xlu0 %v5652_v7, %s6509_s26 }
 0xafe   : > { %4560 = vset.pattern.permute.xlu0 %v6510_v52  ;;  %v5833_v31 = vpop.permute.xlu1 %2310 }
 0xaff   : > { %6514 = vst [vmem:[#allocation62_spill] sm:$0xff] %v5833_v31 }
 0xb02   : > { %v5835_v14 = vpop.permute.xlu1 %2249 }
 0xb03   : > { %6515 = vst [vmem:[#allocation63_spill] sm:$0xff] %v5835_v14  ;;  %v5977_v14 = vld [vmem:[%s6546_s13] ss:$0 sm:$0xff]  ;;  %s4024_s13 = sshll.u32 %s5200_s0, 7 }
 0xb04   : > { %vm2683_vm12 = vcmp.eq.f32.partialorder %v5977_v14, %v5585_v58  ;;  %vm2678_vm13 = vcmp.eq.f32.partialorder %v5977_v14, %v5581_v54  ;;  %vm2639_vm14 = vcmp.eq.f32.partialorder %v5977_v14, %v5587_v59  ;;  %vm2634_vm15 = vcmp.eq.f32.partialorder %v5977_v14, %v5579_v51 }
 0xb06   : > { %v5837_v36 = vpop.permute.xlu1 %2881 }
 0xb07   : > { %6516 = vst [vmem:[#allocation64_spill] sm:$0xff] %v5837_v36  ;;  %v6526_v36 = vmov 0.0  }
 0xb0a   : > { %v5839_v32 = vpop.permute.xlu1 %2369 }
 0xb0b   : > { %6517 = vst [vmem:[#allocation65_spill] sm:$0xff] %v5839_v32 }
 0xb0e   : > { %v5841_v10 = vpop.permute.xlu1 %2343 }
 0xb0f   : > { %6518 = vst [vmem:[#allocation66_spill] sm:$0xff] %v5841_v10 }
 0xb12   : > { %v5843_v28 = vpop.permute.xlu1 %2387 }
 0xb13   : > { %6519 = vst [vmem:[#allocation67_spill] sm:$0xff] %v5843_v28 }
 0xb16   : > { %v5847_v19 = vpop.permute.xlu1 %2355 }
 0xb17   : > { %6521 = vst [vmem:[#allocation69_spill] sm:$0xff] %v5847_v19 }
 0xb1a   : > { %v5851_v30 = vpop.permute.xlu1 %2399 }
 0xb1b   : > { %6523 = vst [vmem:[#allocation71_spill] sm:$0xff] %v5851_v30 }
 0xb1e   : > { %v5855_v27 = vpop.permute.xlu1 %2348 }
 0xb1f   : > { %6525 = vst [vmem:[#allocation73_spill] sm:$0xff] %v5855_v27 }
 0xb50   : > { %v2938_v31 = vpop.permute.xlu0 %2937 }
 0xb51   : > { %4230 = vmatpush3.bf16.msra.mxu1 %v2938_v31  ;;  %v6527_v31 = vmov 23  }
 0xb52   : > { %4231 = vmatprep.subr.bf16.mxu1 %v6526_v36 }
 0xb54   : > { %v2936_v32 = vpop.permute.xlu1 %2935 }
 0xb55   : > { %4232 = vmatpush3.bf16.msra.mxu1 %v2936_v32  ;;  %v6528_v32 = vmov 19  }
 0xb56   : > { %4233 = vmatprep.subr.bf16.mxu1 %v6526_v36 }
 0xb58   : > { %v2934_v28 = vpop.permute.xlu1 %2933 }
 0xb59   : > { %4234 = vmatpush3.bf16.msra.mxu1 %v2934_v28 }
 0xb5a   : > { %4235 = vmatprep.subr.bf16.mxu1 %v6526_v36 }
 0xb5c   : > { %v2932_v19 = vpop.permute.xlu1 %2931 }
 0xb5d   : > { %4236 = vmatpush3.bf16.msra.mxu1 %v2932_v19  ;;  %v6529_v19 = vmov 18  }
 0xb5e   : > { %4247 = vmatprep.subr.bf16.mxu1 %v6526_v36 }
 0xb60   : > { %v2228_v30 = vpop.permute.xlu1 %2227 }
 0xb61   : > { %v5862_v10 = vmul.f32 %v2228_v30, %v5491_v56  ;;  %v5871_v28 = vmul.f32 %v2228_v30, %v5498_v57  ;;  %v6429_v30 = vmov 24  }
 0xb63   : > { %2820 = vperm.xlu0 %4560, %v5862_v10   ;;  %2641 = vperm.xlu1 %4556, %v5862_v10  }
 0xb67   : > { %4561 = vset.pattern.permute.xlu0 %v6527_v31  ;;  %4557 = vset.pattern.permute.xlu1 %v6528_v32 }
 0xb68   : > { %2864 = vperm.xlu0 %4561, %v5862_v10   ;;  %2685 = vperm.xlu1 %4557, %v5862_v10  }
 0xb6c   : > { %4562 = vset.pattern.permute.xlu0 %v6510_v52  ;;  %4558 = vset.pattern.permute.xlu1 %v6529_v19  ;;  %v5005_v52 = vmov 8   ;;  %v6427_v19 = vmov 28  }
 0xb6d   : > { %2825 = vperm.xlu0 %4562, %v5871_v28   ;;  %2646 = vperm.xlu1 %4558, %v5871_v28  }
 0xb71   : > { %4563 = vset.pattern.permute.xlu0 %v6527_v31  ;;  %4559 = vset.pattern.permute.xlu1 %v6528_v32  ;;  %v6422_v31 = vmov 25   ;;  %v6419_v32 = vmov 29  }
 0xb72   : > { %2869 = vperm.xlu0 %4563, %v5871_v28   ;;  %2690 = vperm.xlu1 %4559, %v5871_v28  }
 0xb76   : > { %3271 = vrot.lane.b32.xlu0 %v5652_v7, %s6530_s22  ;;  %4564 = vset.pattern.permute.xlu1 %v6429_v30  ;;  %v6421_v7 = vmov 9  }
 0xb77   : > { %2458 = vperm.xlu1 %4564, %v5482_v53   ;;  %4566 = vset.pattern.permute.xlu0 %v6429_v30 }
 0xb7a   : > { %2453 = vperm.xlu0 %4566, %v5471_v50  }
 0xb7b   : > { %3130 = vrot.lane.b32.xlu1 %v5781_v0, %s6509_s26 }
 0xb7c   : > { %4565 = vset.pattern.permute.xlu1 %v5005_v52 }
 0xb7e   : > { %4567 = vset.pattern.permute.xlu0 %v6422_v31  ;;  %v6532_v31 = vmov 27  }
 0xb7f   : > { %2502 = vperm.xlu0 %4567, %v5482_v53   ;;  %2432 = vperm.xlu1 %4565, %v5471_v50  }
 0xb83   : > { %2497 = vperm.xlu0 %4567, %v5471_v50   ;;  %4568 = vset.pattern.permute.xlu1 %v6421_v7 }
 0xb84   : > { %2476 = vperm.xlu1 %4568, %v5471_v50  }
 0xb87   : > { %4570 = vset.pattern.permute.xlu0 %v6419_v32  ;;  %v6424_v32 = vmov 12  }
 0xb88   : > { %2591 = vperm.xlu0 %4570, %v5482_v53   ;;  %4569 = vset.pattern.permute.xlu1 %v6427_v19 }
 0xb89   : > { %2547 = vperm.xlu1 %4569, %v5482_v53  }
 0xb8c   : > { %4572 = vset.pattern.permute.xlu0 %v6421_v7 }
 0xb8d   : > { %2488 = vperm.xlu0 %4572, %v5498_v57   ;;  %3323 = vrot.lane.b32.xlu1 %v5781_v0, %s6530_s22  ;;  %v6540_v0 = vmov 17  }
 0xb8e   : > { %4571 = vset.pattern.permute.xlu1 %v5005_v52 }
 0xb91   : > { %4573 = vset.pattern.permute.xlu0 %v5005_v52  ;;  %2448 = vperm.xlu1 %4571, %v5491_v56   ;;  %v6531_v52 = vmov 26  }
 0xb92   : > { %2444 = vperm.xlu0 %4573, %v5498_v57  }
 0xb95   : > { %4574 = vset.pattern.permute.xlu1 %v6421_v7  ;;  %v6426_v7 = vmov 13  }
 0xb96   : > { %2437 = vperm.xlu0 %4573, %v5482_v53   ;;  %2492 = vperm.xlu1 %4574, %v5491_v56  }
 0xb9a   : > { %4598 = vset.pattern.permute.xlu0 %v6424_v32  ;;  %4575 = vset.pattern.permute.xlu1 %v6427_v19  ;;  %v6533_v32 = vmov 30   ;;  %v6535_v19 = vmov 31  }
 0xb9b   : > { %2521 = vperm.xlu0 %4598, %v5471_v50   ;;  %2542 = vperm.xlu1 %4575, %v5471_v50  }
 0xb9f   : > { %2537 = vperm.xlu0 %4598, %v5491_v56   ;;  %4576 = vset.pattern.permute.xlu1 %v6531_v52 }
 0xba0   : > { %3018 = vperm.xlu1 %4576, %v5862_v10  }
 0xba3   : > { %4601 = vset.pattern.permute.xlu0 %v6426_v7  ;;  %v5926_v7 = vpop.permute.xlu0 %2364 }
 0xba4   : > { %2565 = vperm.xlu0 %4601, %v5471_v50   ;;  %4577 = vset.pattern.permute.xlu1 %v6532_v31  ;;  %6534 = vst [vmem:[#allocation74_spill] sm:$0xff] %v5926_v7 }
 0xba5   : > { %3062 = vperm.xlu1 %4577, %v5862_v10  }
 0xba7   : > { %v5930_v30 = vpop.permute.xlu0 %2413 }
 0xba8   : > { %2581 = vperm.xlu0 %4601, %v5491_v56   ;;  %6536 = vst [vmem:[#allocation75_spill] sm:$0xff] %v5930_v30  ;;  %v6544_v30 = vmov 20  }
 0xba9   : > { %4578 = vset.pattern.permute.xlu1 %v6531_v52 }
 0xbaa   : > { %3023 = vperm.xlu1 %4578, %v5871_v28  }
 0xbab   : > { %v5934_v56 = vpop.permute.xlu0 %2408 }
 0xbac   : > { %6537 = vst [vmem:[#allocation76_spill] sm:$0xff] %v5934_v56 }
 0xbae   : > { %4579 = vset.pattern.permute.xlu1 %v6532_v31  ;;  %v6538_v31 = vmov 16  }
 0xbaf   : > { %3067 = vperm.xlu1 %4579, %v5871_v28   ;;  %v5939_v52 = vpop.permute.xlu0 %2359 }
 0xbb0   : > { %6539 = vst [vmem:[#allocation77_spill] sm:$0xff] %v5939_v52 }
 0xbb3   : > { %4580 = vset.pattern.permute.xlu1 %v6533_v32  ;;  %v5944_v36 = vpop.permute.xlu0 %2403 }
 0xbb4   : > { %3211 = vperm.xlu1 %4580, %v5862_v10   ;;  %6541 = vst [vmem:[#allocation78_spill] sm:$0xff] %v5944_v36  ;;  %v6545_v36 = vmov 21  }
 0xbb8   : > { %4581 = vset.pattern.permute.xlu1 %v6535_v19 }
 0xbb9   : > { %3255 = vperm.xlu1 %4581, %v5862_v10  }
 0xbbd   : > { %4582 = vset.pattern.permute.xlu1 %v6533_v32  ;;  %v5948_v32 = vpop.permute.xlu0 %2392 }
 0xbbe   : > { %3216 = vperm.xlu1 %4582, %v5871_v28   ;;  %6542 = vst [vmem:[#allocation79_spill] sm:$0xff] %v5948_v32 }
 0xbc1   : > { %v5952_v56 = vpop.permute.xlu0 %3078 }
 0xbc2   : > { %4583 = vset.pattern.permute.xlu1 %v6535_v19  ;;  %6543 = vst [vmem:[#allocation80_spill] sm:$0xff] %v5952_v56 }
 0xbc3   : > { %3260 = vperm.xlu1 %4583, %v5871_v28  }
 0xbc7   : > { %4584 = vset.pattern.permute.xlu1 %v6538_v31 }
 0xbc8   : > { %2284 = vperm.xlu1 %4584, %v5862_v10  }
 0xbcc   : > { %4585 = vset.pattern.permute.xlu1 %v6540_v0 }
 0xbcd   : > { %2329 = vperm.xlu1 %4585, %v5862_v10  }
 0xbd1   : > { %4586 = vset.pattern.permute.xlu1 %v6538_v31 }
 0xbd2   : > { %2290 = vperm.xlu1 %4586, %v5871_v28  }
 0xbd6   : > { %4587 = vset.pattern.permute.xlu1 %v6540_v0 }
 0xbd7   : > { %2334 = vperm.xlu1 %4587, %v5871_v28  }
 0xbdb   : > { %4588 = vset.pattern.permute.xlu1 %v6544_v30 }
 0xbdc   : > { %2374 = vperm.xlu1 %4588, %v5862_v10  }
 0xbde   : > { %v5956_v27 = vpop.permute.xlu0 %2820  ;;  %v2642_v52 = vpop.permute.xlu1 %2641 }
 0xbe0   : > { %4589 = vset.pattern.permute.xlu1 %v6545_v36 }
 0xbe1   : > { %2418 = vperm.xlu1 %4589, %v5862_v10  }
 0xbe3   : > { %v5960_v31 = vpop.permute.xlu0 %2864  ;;  %v2686_v32 = vpop.permute.xlu1 %2685 }
 0xbe4   : > { %v2688_v35 = vsel %vm2683_vm12, %v2686_v32, 0.0 }
 0xbe5   : > { %4590 = vset.pattern.permute.xlu1 %v6544_v30 }
 0xbe6   : > { %2379 = vperm.xlu1 %4590, %v5871_v28  }
 0xbe8   : > { %v5964_v0 = vpop.permute.xlu0 %2825  ;;  %v2647_v56 = vpop.permute.xlu1 %2646 }
 0xbea   : > { %4591 = vset.pattern.permute.xlu1 %v6545_v36 }
 0xbeb   : > { %2423 = vperm.xlu1 %4591, %v5871_v28  }
 0xbed   : > { %v5968_v7 = vpop.permute.xlu0 %2869  ;;  %v2691_v21 = vpop.permute.xlu1 %2690 }
 0xbef   : > { %4592 = vset.pattern.permute.xlu1 %v6548_v44 }
 0xbf0   : > { %2463 = vperm.xlu1 %4592, %v5862_v10  }
 0xbf1   : > { %v5972_v12 = vpop.permute.xlu0 %3271 }
 0xbf2   : > { %6549 = vst [vmem:[#allocation81_spill] sm:$0xff] %v5972_v12  ;;  %v5974_v30 = vpop.permute.xlu1 %2458  ;;  %v5990_v12 = vld [vmem:[%s6547_s28] ss:$0 sm:$0xff] }
 0xbf3   : > { %6550 = vst [vmem:[#allocation82_spill] sm:$0xff] %v5974_v30  ;;  %v2693_v30 = vsel %vm2678_vm13, %v2691_v21, %v2688_v35  ;;  %vm2664_vm3 = vcmp.eq.f32.partialorder %v5990_v12, %v5583_v55  ;;  %vm2620_vm6 = vcmp.eq.f32.partialorder %v5990_v12, %v5577_v49  ;;  %vm2662_vm7 = vcmp.le.f32.partialorder %v5990_v12, %v5600_v15 }
 0xbf4   : > { %4593 = vset.pattern.permute.xlu1 %v6551_v40  ;;  %v2673_v58 = vsel %vm2664_vm3, %v5595_v63, %v5593_v62  ;;  %v2629_v59 = vsel %vm2620_vm6, %v5591_v61, %v5589_v60  ;;  %vm2657_vm8 = vcmp.ge.f32.partialorder %v5990_v12, %v5583_v55  ;;  %vm2618_vm9 = vcmp.le.f32.partialorder %v5990_v12, %v5660_v8 }
 0xbf5   : > { %v5980_v47 = vpop.permute.xlu0 %2453  ;;  %2507 = vperm.xlu1 %4593, %v5862_v10   ;;  %v2694_v51 = vmul.f32 %v2693_v30, %v2673_v58  ;;  %vm2663_vm10 = vmand %vm2657_vm8, %vm2662_vm7  ;;  %vm2613_vm11 = vcmp.ge.f32.partialorder %v5990_v12, %v5577_v49  ;;  %v6554_v8 = vmov 28   ;;  %vm2857_vm3 = vcmp.eq.f32.partialorder %v5977_v14, %v5622_v4 }
 0xbf6   : > { %6552 = vst [vmem:[#allocation83_spill] sm:$0xff] %v5980_v47  ;;  %v5985_v36 = vpop.permute.xlu1 %3130  ;;  %v2644_v47 = vsel %vm2639_vm14, %v2642_v52, 0.0  ;;  %vm2619_vm12 = vmand %vm2613_vm11, %vm2618_vm9  ;;  %vm2862_vm14 = vcmp.eq.f32.partialorder %v5977_v14, %v5664_v23  ;;  %vm2818_vm6 = vcmp.eq.f32.partialorder %v5977_v14, %v5604_v18  ;;  %vm2813_vm7 = vcmp.eq.f32.partialorder %v5977_v14, %v5612_v22 }
 0xbf7   : > { %6553 = vst [vmem:[#allocation84_spill] sm:$0xff] %v5985_v36  ;;  %v2649_v54 = vsel %vm2634_vm15, %v2647_v56, %v2644_v47  ;;  %v2695_v15 = vsel %vm2663_vm10, %v2694_v51, 0.0  ;;  %vm2843_vm8 = vcmp.eq.f32.partialorder %v5990_v12, %v5618_v29  ;;  %v2823_v23 = vsel %vm2818_vm6, %v5956_v27, 0.0 }
 0xbf8   : > { %v2650_v62 = vmul.f32 %v2649_v54, %v2629_v59  ;;  %v2852_v4 = vsel %vm2843_vm8, %v5637_v38, %v5641_v39  ;;  %vm2799_vm9 = vcmp.eq.f32.partialorder %v5990_v12, %v5607_v3  ;;  %vm2841_vm10 = vcmp.le.f32.partialorder %v5990_v12, %v5681_v9 }
 0xbf9   : > { %4594 = vset.pattern.permute.xlu1 %v6548_v44  ;;  %v6555_v44 = vmov 29   ;;  %v2808_v27 = vsel %vm2799_vm9, %v5628_v33, %v5633_v34  ;;  %vm2836_vm11 = vcmp.ge.f32.partialorder %v5990_v12, %v5618_v29  ;;  %v6557_v39 = vmov 12  }
 0xbfa   : > { %v6001_v32 = vpop.permute.xlu0 %2502  ;;  %2468 = vperm.xlu1 %4594, %v5871_v28   ;;  %v6004_v36 = vpop.permute.xlu1 %2432  ;;  %v2651_v60 = vsel %vm2619_vm12, %v2650_v62, 0.0  ;;  %vm2797_vm12 = vcmp.le.f32.partialorder %v5990_v12, %v5744_v20  ;;  %v6558_v34 = vmov 13   ;;  %vm3011_vm6 = vcmp.eq.f32.partialorder %v5977_v14, %v5702_v26 }
 0xbfb   : > { %v2696_v55 = vadd.f32 %v2695_v15, %v2651_v60  ;;  %vm2442_vm13 = vcmp.eq.f32.partialorder %v5990_v12, %v6004_v36  ;;  %vm3041_vm8 = vcmp.eq.f32.partialorder %v5990_v12, %v5746_v37  ;;  %vm2995_vm9 = vcmp.le.f32.partialorder %v5990_v12, %v5754_v25  ;;  %v6559_v60 = vld [vmem:[#allocation45_spill] sm:$0xff]  ;;  %v6560_v25 = vld [vmem:[#allocation47_spill] sm:$0xff] }
 0xbfe   : > { %v6016_v63 = vpop.permute.xlu0 %2497  ;;  %4595 = vset.pattern.permute.xlu1 %v6551_v40  ;;  %v2697_v40 = vpack.c.bf16 %v2696_v55, %v2696_v55  ;;  %v3050_v55 = vsel %vm3041_vm8, %v6560_v25, %v6559_v60  ;;  %vm3204_vm8 = vcmp.eq.f32.partialorder %v5977_v14, %v5772_v5  ;;  %v6567_v5 = vld [vmem:[#allocation52_spill] sm:$0xff] }
 0xbff   : > { %2512 = vperm.xlu1 %4595, %v5871_v28   ;;  %v6022_v35 = vpop.permute.xlu1 %2476  ;;  %v6579_v60 = vld [vmem:[#allocation72_spill] sm:$0xff] }
 0xc00   : > { %vm2486_vm15 = vcmp.eq.f32.partialorder %v5990_v12, %v6022_v35 }
 0xc03   : > { %v6024_v61 = vpop.permute.xlu0 %2591  ;;  %4596 = vset.pattern.permute.xlu1 %v6554_v8 }
 0xc04   : > { %2552 = vperm.xlu1 %4596, %v5862_v10   ;;  %v6028_v47 = vpop.permute.xlu1 %2547 }
 0xc08   : > { %v2489_v21 = vpop.permute.xlu0 %2488  ;;  %2699 = vrot.lane.b32.xlu1 %v2697_v40, %s5012_s1  ;;  %v6031_v49 = vpop.permute.xlu1 %3323 }
 0xc09   : > { %4597 = vset.pattern.permute.xlu1 %v6555_v44 }
 0xc0c   : > { %2586 = vperm.xlu1 %4597, %v5471_v50   ;;  %v2449_v56 = vpop.permute.xlu1 %2448  ;;  %v2867_v50 = vsel %vm2862_vm14, %v5960_v31, 0.0  ;;  %v2828_v31 = vsel %vm2813_vm7, %v5964_v0, %v2823_v23  ;;  %vm2792_vm14 = vcmp.ge.f32.partialorder %v5990_v12, %v5607_v3  ;;  %vm2997_vm7 = vcmp.eq.f32.partialorder %v5990_v12, %v5750_v45  ;;  %v6568_v23 = vld [vmem:[#allocation48_spill] sm:$0xff] }
 0xc0d   : > { %v2445_v52 = vpop.permute.xlu0 %2444  ;;  %v2872_v51 = vsel %vm2857_vm3, %v5968_v7, %v2867_v50  ;;  %v2829_v38 = vmul.f32 %v2828_v31, %v2808_v27  ;;  %vm3016_vm3 = vcmp.eq.f32.partialorder %v5977_v14, %v5689_v41  ;;  %v3006_v41 = vsel %vm2997_vm7, %v5752_v11, %v5711_v46 }
 0xc0e   : > { %v6037_v30 = vsel %vm2442_vm13, %v2445_v52, %v2449_v56  ;;  %v2873_v18 = vmul.f32 %v2872_v51, %v2852_v4  ;;  %vm2842_vm13 = vmand %vm2836_vm11, %vm2841_vm10  ;;  %vm3060_vm10 = vcmp.eq.f32.partialorder %v5977_v14, %v5693_v17  ;;  %vm3055_vm11 = vcmp.eq.f32.partialorder %v5977_v14, %v5707_v42  ;;  %v6564_v52 = vld [vmem:[#allocation51_spill] sm:$0xff] }
 0xc10   : > { %2596 = vperm.xlu1 %4597, %v5862_v10   ;;  %v6556_v10 = vmov 9   ;;  %v2874_v9 = vsel %vm2842_vm13, %v2873_v18, 0.0  ;;  %vm2990_vm13 = vcmp.ge.f32.partialorder %v5990_v12, %v5750_v45  ;;  %v6570_v18 = vld [vmem:[#allocation49_spill] sm:$0xff] }
 0xc11   : > { %v2493_v58 = vpop.permute.xlu1 %2492 }
 0xc12   : > { %v6047_v54 = vsel %vm2486_vm15, %v2489_v21, %v2493_v58  ;;  %vm2798_vm15 = vmand %vm2792_vm14, %vm2797_vm12  ;;  %vm3039_vm12 = vcmp.le.f32.partialorder %v5990_v12, %v5719_v1  ;;  %vm3034_vm14 = vcmp.ge.f32.partialorder %v5990_v12, %v5746_v37  ;;  %v6561_v37 = vld [vmem:[#allocation46_spill] sm:$0xff] }
 0xc13   : > { %v2830_v0 = vsel %vm2798_vm15, %v2829_v38, 0.0  ;;  %vm2996_vm15 = vmand %vm2990_vm13, %vm2995_vm9  ;;  %v6562_v21 = vld [vmem:[#allocation50_spill] sm:$0xff]  ;;  %vm3234_vm13 = vcmp.eq.f32.partialorder %v5990_v12, %v6568_v23 }
 0xc14   : > { %4599 = vset.pattern.permute.xlu1 %v6556_v10  ;;  %v2875_v33 = vadd.f32 %v2874_v9, %v2830_v0  ;;  %vm3190_vm7 = vcmp.eq.f32.partialorder %v5990_v12, %v6562_v21  ;;  %v6569_v10 = vld [vmem:[#allocation57_spill] sm:$0xff] }
 0xc15   : > { %2481 = vperm.xlu1 %4599, %v5482_v53   ;;  %v3199_v58 = vsel %vm3190_vm7, %v6564_v52, %v5783_v13  ;;  %vm2281_vm7 = vcmp.eq.f32.partialorder %v5977_v14, %v5825_v2  ;;  %v6576_v2 = vld [vmem:[#allocation55_spill] sm:$0xff] }
 0xc16   : > { %v6066_v22 = vpop.permute.xlu1 %2542  ;;  %v2876_v20 = vpack.c.bf16 %v2875_v33, %v2875_v33  ;;  %v6572_v33 = vld [vmem:[#allocation54_spill] sm:$0xff] }
 0xc19   : > { %4600 = vset.pattern.permute.xlu1 %v6557_v39 }
 0xc1a   : > { %2533 = vperm.xlu1 %4600, %v5498_v57  }
 0xc1b   : > { %v3019_v7 = vpop.permute.xlu1 %3018 }
 0xc1c   : > { %v3021_v59 = vsel %vm3016_vm3, %v3019_v7, 0.0  ;;  %vm3040_vm3 = vmand %vm3034_vm14, %vm3039_vm12  ;;  %vm3253_vm12 = vcmp.eq.f32.partialorder %v5977_v14, %v6567_v5  ;;  %vm3248_vm14 = vcmp.eq.f32.partialorder %v5977_v14, %v6569_v10  ;;  %v6588_v10 = vld [vmem:[#allocation75_spill] sm:$0xff] }
 0xc1e   : > { %4602 = vset.pattern.permute.xlu1 %v6554_v8 }
 0xc1f   : > { %2557 = vperm.xlu1 %4602, %v5871_v28  }
 0xc20   : > { %v3063_v29 = vpop.permute.xlu1 %3062 }
 0xc23   : > { %2878 = vrot.lane.b32.xlu1 %v2876_v20, %s5012_s1 }
 0xc24   : > { %4603 = vset.pattern.permute.xlu1 %v6558_v34  ;;  %v6573_v34 = vld [vmem:[#allocation68_spill] sm:$0xff] }
 0xc25   : > { %v3024_v3 = vpop.permute.xlu1 %3023 }
 0xc26   : > { %v3026_v62 = vsel %vm3011_vm6, %v3024_v3, %v3021_v59  ;;  %vm3209_vm6 = vcmp.eq.f32.partialorder %v5977_v14, %v6561_v37  ;;  %v6574_v3 = vld [vmem:[#allocation61_spill] sm:$0xff] }
 0xc27   : > { %2577 = vperm.xlu1 %4603, %v5498_v57   ;;  %v3065_v57 = vsel %vm3060_vm10, %v3063_v29, 0.0  ;;  %v3027_v26 = vmul.f32 %v3026_v62, %v3006_v41  ;;  %vm3183_vm10 = vcmp.ge.f32.partialorder %v5990_v12, %v6562_v21 }
 0xc29   : > { %v3028_v42 = vsel %vm2996_vm15, %v3027_v26, 0.0  ;;  %vm3232_vm15 = vcmp.le.f32.partialorder %v5990_v12, %v5823_v16  ;;  %v6577_v26 = vld [vmem:[#allocation60_spill] sm:$0xff] }
 0xc2a   : > { %v3068_v15 = vpop.permute.xlu1 %3067 }
 0xc2b   : > { %v3070_v8 = vsel %vm3055_vm11, %v3068_v15, %v3065_v57  ;;  %4604 = vset.pattern.permute.xlu1 %v6555_v44  ;;  %v6575_v57 = vld [vmem:[#allocation63_spill] sm:$0xff]  ;;  %v6578_v15 = vld [vmem:[#allocation56_spill] sm:$0xff] }
 0xc2c   : > { %v3071_v17 = vmul.f32 %v3070_v8, %v3050_v55  ;;  %2601 = vperm.xlu1 %4604, %v5871_v28   ;;  %v6563_v28 = vld [vmem:[#allocation53_spill] sm:$0xff]  ;;  %v6580_v8 = vld [vmem:[#allocation70_spill] sm:$0xff] }
 0xc2d   : > { %vm3188_vm9 = vcmp.le.f32.partialorder %v5990_v12, %v6563_v28  ;;  %v6582_v28 = vld [vmem:[#allocation65_spill] sm:$0xff] }
 0xc2e   : > { %v3072_v46 = vsel %vm3040_vm3, %v3071_v17, 0.0  ;;  %vm6127_vm11 = vmand %vm3183_vm10, %vm3188_vm9  ;;  %vm3227_vm3 = vcmp.ge.f32.partialorder %v5990_v12, %v6568_v23  ;;  %vm2276_vm9 = vcmp.eq.f32.partialorder %v5977_v14, %v6572_v33  ;;  %vm2252_vm10 = vcmp.le.f32.partialorder %v5990_v12, %v6575_v57  ;;  %v6581_v17 = vld [vmem:[#allocation62_spill] sm:$0xff]  ;;  %v6587_v23 = vld [vmem:[#allocation73_spill] sm:$0xff] }
 0xc2f   : > { %v3073_v1 = vadd.f32 %v3072_v46, %v3028_v42  ;;  %v3212_v11 = vpop.permute.xlu1 %3211  ;;  %v6594_v33 = vld [vmem:[#allocation82_spill] sm:$0xff] }
 0xc30   : > { %4605 = vset.pattern.permute.xlu1 %v6557_v39  ;;  %v3214_v44 = vsel %vm3209_vm6, %v3212_v11, 0.0  ;;  %vm3233_vm6 = vmand %vm3227_vm3, %vm3232_vm15 }
 0xc31   : > { %v3074_v45 = vpack.c.bf16 %v3073_v1, %v3073_v1  ;;  %2526 = vperm.xlu1 %4605, %v5482_v53  }
 0xc33   : > { %3076 = vrot.lane.b32.xlu0 %v3074_v45, %s5012_s1 }
 0xc34   : > { %v3256_v40 = vpop.permute.xlu1 %3255 }
 0xc35   : > { %v3258_v4 = vsel %vm3253_vm12, %v3256_v40, 0.0  ;;  %vm2308_vm12 = vcmp.eq.f32.partialorder %v5990_v12, %v6577_v26 }
 0xc36   : > { %v2317_v42 = vsel %vm2308_vm12, %v6581_v17, %v6580_v8  ;;  %vm2416_vm12 = vcmp.eq.f32.partialorder %v5977_v14, %v6588_v10 }
 0xc37   : > { %2570 = vperm.xlu0 %4601, %v5482_v53  }
 0xc39   : > { %v3217_v56 = vpop.permute.xlu1 %3216 }
 0xc3a   : > { %v3219_v50 = vsel %vm3204_vm8, %v3217_v56, %v3214_v44  ;;  %v6583_v44 = vld [vmem:[#allocation66_spill] sm:$0xff] }
 0xc3b   : > { %v3220_v53 = vmul.f32 %v3219_v50, %v3199_v58  ;;  %3321 = vrot.lane.b32.xlu0 %v5790_v6, %s6530_s22  ;;  %v6584_v56 = vld [vmem:[#allocation74_spill] sm:$0xff]  ;;  %v6585_v50 = vld [vmem:[#allocation77_spill] sm:$0xff] }
 0xc3c   : > { %4606 = vset.pattern.permute.xlu0 %v6535_v19  ;;  %v3243_v19 = vsel %vm3234_vm13, %v6570_v18, %v5818_v48  ;;  %v6571_v48 = vld [vmem:[#allocation59_spill] sm:$0xff]  ;;  %vm2322_vm13 = vcmp.eq.f32.partialorder %v5977_v14, %v6578_v15 }
 0xc3d   : > { %v3221_v13 = vsel %vm6127_vm11, %v3220_v53, 0.0  ;;  %vm2254_vm8 = vcmp.eq.f32.partialorder %v5990_v12, %v6571_v48  ;;  %vm2327_vm11 = vcmp.eq.f32.partialorder %v5977_v14, %v6576_v2  ;;  %vm2245_vm15 = vcmp.ge.f32.partialorder %v5990_v12, %v6571_v48  ;;  %v6586_v53 = vld [vmem:[#allocation69_spill] sm:$0xff]  ;;  %v6591_v18 = vld [vmem:[#allocation79_spill] sm:$0xff]  ;;  %v2438_v2 = vpop.permute.xlu0 %2437 }
 0xc3e   : > { %v3261_v31 = vpop.permute.xlu1 %3260  ;;  %v2265_v59 = vsel %vm2254_vm8, %v6574_v3, %v6573_v34  ;;  %vm2253_vm3 = vmand %vm2245_vm15, %vm2252_vm10  ;;  %vm2372_vm8 = vcmp.eq.f32.partialorder %v5977_v14, %v6582_v28  ;;  %vm2367_vm10 = vcmp.eq.f32.partialorder %v5977_v14, %v6584_v56  ;;  %vm2395_vm15 = vcmp.le.f32.partialorder %v5990_v12, %v6591_v18  ;;  %v6602_v56 = vld [vmem:[#allocation80_spill] sm:$0xff] }
 0xc3f   : > { %v3263_v27 = vsel %vm3248_vm14, %v3261_v31, %v3258_v4  ;;  %3319 = vrot.lane.b32.xlu0 %v5797_v43, %s6530_s22  ;;  %vm2306_vm14 = vcmp.le.f32.partialorder %v5990_v12, %v6579_v60  ;;  %v6589_v4 = vld [vmem:[#allocation67_spill] sm:$0xff]  ;;  %v6590_v31 = vld [vmem:[#allocation76_spill] sm:$0xff] }
 0xc40   : > { %v3264_v38 = vmul.f32 %v3263_v27, %v3243_v19 }
 0xc42   : > { %v3265_v39 = vsel %vm3233_vm6, %v3264_v38, 0.0  ;;  %vm2301_vm6 = vcmp.ge.f32.partialorder %v5990_v12, %v6577_v26  ;;  %v6592_v38 = vld [vmem:[#allocation78_spill] sm:$0xff]  ;;  %v6597_v26 = vld [vmem:[#allocation83_spill] sm:$0xff] }
 0xc43   : > { %v3266_v9 = vadd.f32 %v3265_v39, %v3221_v13  ;;  %3317 = vrot.lane.b32.xlu0 %v5805_v24, %s6530_s22  ;;  %v2285_v16 = vpop.permute.xlu1 %2284  ;;  %v6593_v39 = vld [vmem:[#allocation71_spill] sm:$0xff] }
 0xc44   : > { %v2287_v29 = vsel %vm2281_vm7, %v2285_v16, 0.0  ;;  %vm2307_vm7 = vmand %vm2301_vm6, %vm2306_vm14  ;;  %vm2411_vm14 = vcmp.eq.f32.partialorder %v5977_v14, %v6590_v31 }
 0xc45   : > { %v3267_v7 = vpack.c.bf16 %v3266_v9, %v3266_v9 }
 0xc47   : > { %3269 = vrot.lane.b32.xlu1 %v3267_v7, %s5012_s1 }
 0xc48   : > { %v2330_v0 = vpop.permute.xlu1 %2329 }
 0xc49   : > { %v2332_v25 = vsel %vm2327_vm11, %v2330_v0, 0.0  ;;  %vm2351_vm11 = vcmp.le.f32.partialorder %v5990_v12, %v6587_v23 }
 0xc4b   : > { %3128 = vrot.lane.b32.xlu1 %v5790_v6, %s6509_s26 }
 0xc4d   : > { %v2291_v20 = vpop.permute.xlu1 %2290 }
 0xc4e   : > { %v2293_v62 = vsel %vm2276_vm9, %v2291_v20, %v2287_v29  ;;  %vm2353_vm9 = vcmp.eq.f32.partialorder %v5990_v12, %v6583_v44 }
 0xc4f   : > { %v2294_v41 = vmul.f32 %v2293_v62, %v2265_v59  ;;  %3126 = vrot.lane.b32.xlu1 %v5797_v43, %s6509_s26  ;;  %v2362_v51 = vsel %vm2353_vm9, %v6586_v53, %v6585_v50  ;;  %vm2461_vm9 = vcmp.eq.f32.partialorder %v5977_v14, %v6594_v33  ;;  %v6595_v59 = vld [vmem:[#allocation84_spill] sm:$0xff]  ;;  %v6603_v50 = vld [vmem:[#allocation81_spill] sm:$0xff] }
 0xc51   : > { %v2295_v11 = vsel %vm2253_vm3, %v2294_v41, 0.0  ;;  %vm2346_vm3 = vcmp.ge.f32.partialorder %v5990_v12, %v6583_v44  ;;  %v6596_v41 = vmov 0.0  }
 0xc52   : > { %v2335_v55 = vpop.permute.xlu1 %2334  ;;  %vm2352_vm6 = vmand %vm2346_vm3, %vm2351_vm11  ;;  %vm2505_vm11 = vcmp.eq.f32.partialorder %v5977_v14, %v6001_v32  ;;  %vm2500_vm3 = vcmp.eq.f32.partialorder %v5977_v14, %v6016_v63 }
 0xc53   : > { %v2337_v46 = vsel %vm2322_vm13, %v2335_v55, %v2332_v25  ;;  %3124 = vrot.lane.b32.xlu1 %v5805_v24, %s6509_s26  ;;  %vm2397_vm13 = vcmp.eq.f32.partialorder %v5990_v12, %v6589_v4  ;;  %s1105_s26 = sand.u32 1, %s4918_s23  }
 0xc54   : > { %v2338_v1 = vmul.f32 %v2337_v46, %v2317_v42  ;;  %v2406_v9 = vsel %vm2397_vm13, %v6593_v39, %v6592_v38  ;;  %vm2440_vm13 = vcmp.le.f32.partialorder %v5990_v12, %v2438_v2  ;;  %s3948_s22 = sshll.u32 %s1105_s26, 3 }
 0xc55   : > { %s1107_s28 = scalar_lea.vmem [#allocation14], %s3948_s22 }
 0xc56   : > { %v2339_v45 = vsel %vm2307_vm7, %v2338_v1, 0.0  ;;  %vm2390_vm7 = vcmp.ge.f32.partialorder %v5990_v12, %v6589_v4  ;;  %v6600_v1 = vld [vmem:[#allocation58_spill] sm:$0xff]  ;;  %s3684_s1 = sshll.u32 %s1107_s28, 4  ;;  %s3685_s1 = int_to_ptr.vmem [resolvable:$true] %s3684_s1 }
 0xc57   : > { %v6181_v40 = vadd.f32 %v2339_v45, %v2295_v11  ;;  %v2375_v37 = vpop.permute.xlu1 %2374  ;;  %s4850_s2 = scalar_lea.vmem %s3685_s1, 128 }
 0xc58   : > { %v2377_v52 = vsel %vm2372_vm8, %v2375_v37, 0.0  ;;  %vm2396_vm8 = vmand %vm2390_vm7, %vm2395_vm15  ;;  %vm2479_vm7 = vcmp.ge.f32.partialorder %v5990_v12, %v6022_v35  ;;  %p4851_p7 = scmp.ne.s32.totalorder %s3685_s1, %s4850_s2 }
 0xc59   : > { %v2341_v45 = vpack.c.bf16 %v6181_v40, %v6181_v40 }
 0xc5a   : > { %p4852_p11 = pnand %p4851_p7, %p6612_p8 }
 0xc5c   : > { %v2419_v21 = vpop.permute.xlu1 %2418  ;;  %p4853_p0 = pneg %p4852_p11 }
 0xc5d   : > { %v2421_v19 = vsel %vm2416_vm12, %v2419_v21, 0.0  ;;  %vm2456_vm12 = vcmp.eq.f32.partialorder %v5977_v14, %v6597_v26  ;;  %v6601_v21 = vld [vmem:[#allocation64_spill] sm:$0xff] }
 0xc61   : > { %v2380_v58 = vpop.permute.xlu1 %2379 }
 0xc62   : > { %v2382_v5 = vsel %vm2367_vm10, %v2380_v58, %v2377_v52  ;;  %vm2744_vm10 = vcmask 523264  }
 0xc63   : > { %v2383_v13 = vmul.f32 %v2382_v5, %v2362_v51 }
 0xc65   : > { %v2384_v0 = vsel %vm2352_vm6, %v2383_v13, 0.0  ;;  %vm2550_vm6 = vcmp.eq.f32.partialorder %v5977_v14, %v6028_v47  ;;  %v2522_v47 = vpop.permute.xlu0 %2521 }
 0xc66   : > { %v2424_v27 = vpop.permute.xlu1 %2423 }
 0xc67   : > { %v2426_v16 = vsel %vm2411_vm14, %v2424_v27, %v2421_v19  ;;  %vm2435_vm14 = vcmp.ge.f32.partialorder %v5990_v12, %v6004_v36 }
 0xc68   : > { %v2427_v7 = vmul.f32 %v2426_v16, %v2406_v9  ;;  %vm6222_vm15 = vmand %vm2435_vm14, %vm2440_vm13 }
 0xc6a   : > { %v2428_v48 = vsel %vm2396_vm8, %v2427_v7, 0.0 }
 0xc6b   : > { %v2429_v29 = vadd.f32 %v2428_v48, %v2384_v0  ;;  %v2464_v20 = vpop.permute.xlu1 %2463 }
 0xc6c   : > { %v2466_v34 = vsel %vm2461_vm9, %v2464_v20, 0.0 }
 0xc6d   : > { %v2430_v3 = vpack.c.bf16 %v2429_v29, %v2429_v29 }
 0xc6f   : > { %4238 = vmatmul.mubr.msk.bf16.vlgmr.msra.gmra.mxu1 %vm2744_vm10, %v2430_v3 }
 0xc70   : > { %4248 = vmatpush3.bf16.msra.mxu1 %v6595_v59  ;;  %v2508_v62 = vpop.permute.xlu1 %2507  ;;  %4255 = vmatprep.mubr.msk.bf16.mxu1 %vm4967_vm0, %v6596_v41 }
 0xc71   : > { %v2510_v57 = vsel %vm2505_vm11, %v2508_v62, 0.0  ;;  %4249 = vmatprep.subr.bf16.mxu1 %v6596_v41  ;;  %vm2545_vm11 = vcmp.eq.f32.partialorder %v5977_v14, %v6066_v22 }
 0xc75   : > { %v2469_v15 = vpop.permute.xlu1 %2468 }
 0xc76   : > { %v2471_v60 = vsel %vm2456_vm12, %v2469_v15, %v2466_v34  ;;  %vm2594_vm12 = vcmp.eq.f32.partialorder %v5977_v14, %v6024_v61  ;;  %v4622_v15 = vld [vmem:[%s6606_s10 + $0x8] sm:$0xff]  }
 0xc77   : > { %v2472_v32 = vmul.f32 %v2471_v60, %v6037_v30 }
 0xc79   : > { %v2473_v55 = vsel %vm6222_vm15, %v2472_v32, 0.0 }
 0xc7a   : > { %v2513_v8 = vpop.permute.xlu1 %2512 }
 0xc7b   : > { %v2515_v17 = vsel %vm2500_vm3, %v2513_v8, %v2510_v57 }
 0xc7c   : > { %v2516_v42 = vmul.f32 %v2515_v17, %v6047_v54 }
 0xc7f   : > { %v2553_v36 = vpop.permute.xlu1 %2552 }
 0xc80   : > { %v2555_v46 = vsel %vm2550_vm6, %v2553_v36, 0.0 }
 0xc83   : > { %v2700_v30 = vpop.permute.xlu1 %2699 }
 0xc84   : > { %4208 = vmatmul.mubr.msk.bf16.vlgmr.msra.gmra.mxu0 %vm1742_vm4, %v2700_v30 }
 0xc85   : > { %4212 = vmatpush3.bf16.msra.mxu0 %v6600_v1  ;;  %4219 = vmatprep.mubr.msk.bf16.mxu0 %vm4967_vm0, %v6596_v41 }
 0xc86   : > { %4213 = vmatprep.subr.bf16.mxu0 %v6596_v41 }
 0xc87   : > { %v2587_v63 = vpop.permute.xlu1 %2586 }
 0xc88   : > { %vm2589_vm13 = vcmp.eq.f32.partialorder %v5977_v14, %v2587_v63 }
 0xc89   : > { %4214 = vmatpush3.bf16.msra.mxu0 %v5790_v6 }
 0xc8a   : > { %4215 = vmatprep.subr.bf16.mxu0 %v6596_v41 }
 0xc8b   : > { %v2597_v54 = vpop.permute.xlu1 %2596 }
 0xc8c   : > { %v2599_v10 = vsel %vm2594_vm12, %v2597_v54, 0.0 }
 0xc8d   : > { %4216 = vmatpush3.bf16.msra.mxu0 %v5797_v43  ;;  %v2538_v43 = vpop.permute.xlu0 %2537 }
 0xc8e   : > { %4217 = vmatprep.subr.bf16.mxu0 %v6596_v41 }
 0xc90   : > { %v2482_v11 = vpop.permute.xlu1 %2481 }
 0xc91   : > { %vm2484_vm8 = vcmp.le.f32.partialorder %v5990_v12, %v2482_v11  ;;  %4218 = vmatpush3.bf16.msra.mxu0 %v5805_v24  ;;  %v2566_v35 = vpop.permute.xlu0 %2565 }
 0xc92   : > { %vm2485_vm9 = vmand %vm2479_vm7, %vm2484_vm8  ;;  %4223 = vmatprep.subr.bf16.mxu0 %v6596_v41  ;;  %vm2568_vm15 = vcmp.ge.f32.partialorder %v5990_v12, %v2566_v35  ;;  %vm2575_vm3 = vcmp.eq.f32.partialorder %v5990_v12, %v2566_v35  ;;  %vm2524_vm8 = vcmp.ge.f32.partialorder %v5990_v12, %v2522_v47 }
 0xc93   : > { %v2517_v6 = vsel %vm2485_vm9, %v2516_v42, 0.0  ;;  %vm2531_vm9 = vcmp.eq.f32.partialorder %v5990_v12, %v2522_v47 }
 0xc94   : > { %v6249_v37 = vadd.f32 %v2517_v6, %v2473_v55  ;;  %4220 = vmatmul.mubr.msk.bf16.vlgmr.msra.gmra.mxu0 %vm2744_vm10, %v2341_v45  ;;  %v4623_v45 = vld [vmem:[%s6606_s10] sm:$0xff]  }
 0xc95   : > { %4224 = vmatpush3.bf16.msra.mxu0 %v6601_v21  ;;  %v2534_v28 = vpop.permute.xlu1 %2533  ;;  %4225 = vmatprep.mubr.msk.bf16.mxu0 %vm4967_vm0, %v6596_v41  ;;  %v2582_v52 = vpop.permute.xlu0 %2581 }
 0xc96   : > { %4241 = vmatprep.subr.bf16.mxu0 %v6596_v41  ;;  %v2540_v18 = vsel %vm2531_vm9, %v2534_v28, %v2538_v43  ;;  %v2519_v0 = vpack.c.bf16 %v6249_v37, %v6249_v37 }
 0xc9a   : > { %v2558_v24 = vpop.permute.xlu1 %2557 }
 0xc9b   : > { %v2560_v40 = vsel %vm2545_vm11, %v2558_v24, %v2555_v46 }
 0xc9c   : > { %v2561_v27 = vmul.f32 %v2560_v40, %v2540_v18 }
 0xc9e   : > { %v2879_v44 = vpop.permute.xlu1 %2878 }
 0xc9f   : > { %4226 = vmatmul.mubr.msk.bf16.vlgmr.msra.gmra.mxu0 %vm1742_vm4, %v2879_v44 }
 0xca0   : > { %4242 = vmatpush3.bf16.msra.mxu0 %v6602_v56  ;;  %4243 = vmatprep.mubr.msk.bf16.mxu0 %vm4967_vm0, %v6596_v41 }
 0xca1   : > { %4259 = vmatprep.subr.bf16.mxu0 %v6596_v41 }
 0xca2   : > { %v2578_v22 = vpop.permute.xlu1 %2577 }
 0xca3   : > { %v2584_v31 = vsel %vm2575_vm3, %v2578_v22, %v2582_v52 }
 0xca5   : > { %v3077_v58 = vpop.permute.xlu0 %3076 }
 0xca7   : > { %4244 = vmatmul.mubr.msk.bf16.vlgmr.msra.gmra.mxu0 %vm1742_vm4, %v3077_v58  ;;  %v2602_v53 = vpop.permute.xlu1 %2601 }
 0xca8   : > { %4260 = vmatpush3.bf16.msra.mxu0 %v6603_v50  ;;  %4261 = vmatprep.mubr.msk.bf16.mxu0 %vm4967_vm0, %v6596_v41  ;;  %v2604_v4 = vsel %vm2589_vm13, %v2602_v53, %v2599_v10 }
 0xca9   : > { %4265 = vmatprep.subr.bf16.mxu0 %v6596_v41 }
 0xcac   : > { %v2527_v5 = vpop.permute.xlu1 %2526 }
 0xcad   : > { %vm2529_vm6 = vcmp.le.f32.partialorder %v5990_v12, %v2527_v5 }
 0xcae   : > { %vm2530_vm11 = vmand %vm2524_vm8, %vm2529_vm6 }
 0xcaf   : > { %v2562_v9 = vsel %vm2530_vm11, %v2561_v27, 0.0 }
 0xcb2   : > { %v2571_v51 = vpop.permute.xlu0 %2570 }
 0xcb3   : > { %vm2573_vm14 = vcmp.le.f32.partialorder %v5990_v12, %v2571_v51 }
 0xcb4   : > { %vm6280_vm7 = vmand %vm2568_vm15, %vm2573_vm14 }
 0xcb6   : > { %v3322_v23 = vpop.permute.xlu0 %3321 }
 0xcb9   : > { %v3270_v13 = vpop.permute.xlu1 %3269 }
 0xcba   : > { %4262 = vmatmul.mubr.msk.bf16.vlgmr.msra.gmra.mxu0 %vm1742_vm4, %v3270_v13  ;;  %v3320_v19 = vpop.permute.xlu0 %3319 }
 0xcbb   : > { %4266 = vmatpush3.bf16.msra.mxu0 %v6031_v49  ;;  %4273 = vmatprep.mubr.msk.bf16.mxu0 %vm4967_vm0, %v6596_v41  ;;  %v2605_v49 = vmul.f32 %v2604_v4, %v2584_v31  ;;  %v6610_v31 = vld [vmem:[#allocation44_spill] sm:$0xff] }
 0xcbc   : > { %4267 = vmatprep.subr.bf16.mxu0 %v6596_v41 }
 0xcbd   : > { %v3129_v61 = vpop.permute.xlu1 %3128  ;;  %v2606_v38 = vsel %vm6280_vm7, %v2605_v49, 0.0 }
 0xcbe   : > { %4250 = vmatpush3.bf16.msra.mxu1 %v3129_v61  ;;  %v2607_v12 = vadd.f32 %v2606_v38, %v2562_v9  ;;  %v3318_v7 = vpop.permute.xlu0 %3317 }
 0xcbf   : > { %4268 = vmatpush3.bf16.msra.mxu0 %v3322_v23  ;;  %4251 = vmatprep.subr.bf16.mxu1 %v6596_v41  ;;  %v4005_v23 = vld [vmem:[#allocation2] ss:$0 sm:$0xff] }
 0xcc0   : > { %4269 = vmatprep.subr.bf16.mxu0 %v6596_v41  ;;  %v2608_v48 = vpack.c.bf16 %v2607_v12, %v2607_v12 }
 0xcc1   : > { %v3127_v39 = vpop.permute.xlu1 %3126 }
 0xcc2   : > { %4252 = vmatpush3.bf16.msra.mxu1 %v3127_v39 }
 0xcc3   : > { %4270 = vmatpush3.bf16.msra.mxu0 %v3320_v19  ;;  %4253 = vmatprep.subr.bf16.mxu1 %v6596_v41 }
 0xcc4   : > { %4271 = vmatprep.subr.bf16.mxu0 %v6596_v41 }
 0xcc5   : > { %v3125_v16 = vpop.permute.xlu1 %3124 }
 0xcc6   : > { %4254 = vmatpush3.bf16.msra.mxu1 %v3125_v16  ;;  %v4624_v16 = vld [vmem:[%s6609_s4 + $0x8] sm:$0xff]  }
 0xcc7   : > { %4272 = vmatpush3.bf16.msra.mxu0 %v3318_v7  ;;  %4277 = vmatprep.subr.bf16.mxu1 %v6596_v41  ;;  %v4625_v7 = vld [vmem:[%s6609_s4] sm:$0xff]   ;;  %s4854_s4 = sshll.u32 %s5013_s3, 4  ;;  %s4855_s4 = int_to_ptr.vmem [resolvable:$false] %s4854_s4 }
 0xcc8   : > { %4293 = vmatprep.subr.bf16.mxu0 %v6596_v41  ;;  %s4856_s5 = scalar_lea.vmem %s4855_s4, 256  ;;  %p4857_p1 = scmp.lt.s32.totalorder %s3685_s1, %s4855_s4 }
 0xcc9   : > { %4256 = vmatmul.mubr.msk.bf16.vlgmr.msra.gmra.mxu1 %vm2744_vm10, %v2519_v0  ;;  %p4858_p2 = scmp.lt.s32.totalorder %s4856_s5, %s4850_s2 }
 0xcca   : > { %4274 = vmatmul.mubr.msk.bf16.vlgmr.msra.gmra.mxu0 %vm2744_vm10, %v2608_v48  ;;  %4281 = vmatprep.mubr.msk.bf16.mxu1 %vm4967_vm0, %v6596_v41 }
 0xccb   : > { %4301 = vmatprep.mubr.msk.bf16.mxu0 %vm4967_vm0, %v6596_v41  ;;  %4278 = vmatpush3.bf16.msra.mxu1 %v4622_v15  ;;  %p4859_p3 = por %p4858_p2, %p4857_p1 }
 0xccc   : > { %4279 = vmatprep.subr.bf16.mxu1 %v6596_v41 }
 0xccd   : > { %p4860_p13 = pnand %p4859_p3, %p4853_p0 }
 0xccf   : > { %4280 = vmatpush3.bf16.msra.mxu1 %v4623_v45 }
 0xcd0   : > { %4285 = vmatprep.subr.bf16.mxu1 %v6596_v41 }
 0xd2f   : > { %v2980_v33 = vpop.f32.mrf.mxu1 }
 0xd31   : > { %v4239_v29 = vpop.f32.mrf.mxu1 }
 0xd33   : > { %v2983_v20 = vpop.f32.mrf.mxu1 }
 0xd35   : > { %v4240_v34 = vpop.f32.mrf.mxu1 }
 0xd44   : > { %v2738_v3 = vpop.f32.mrf.mxu0 }
 0xd46   : > { %v4209_v59 = vpop.f32.mrf.mxu0 }
 0xd48   : > { %v2741_v62 = vpop.f32.mrf.mxu0 }
 0xd49   : > { %v4010_v62 = vld [vmem:[#allocation7] ss:$0 sm:$0xff] }
 0xd4a   : > { %v4210_v57 = vpop.f32.mrf.mxu0 }
 0xd54   : > { %v2782_v2 = vpop.f32.mrf.mxu0 }
 0xd55   : > { %v2783_v26 = vadd.f32 %v2782_v2, %v2738_v3  ;;  %v4009_v3 = vld [vmem:[#allocation5] ss:$0 sm:$0xff] }
 0xd56   : > { %v4221_v60 = vpop.f32.mrf.mxu0 }
 0xd58   : > { %v2785_v32 = vpop.f32.mrf.mxu0 }
 0xd59   : > { %v4011_v32 = vld [vmem:[#allocation8] ss:$0 sm:$0xff] }
 0xd5a   : > { %v4222_v25 = vpop.f32.mrf.mxu0 }
 0xd5f   : > { %v2921_v55 = vpop.f32.mrf.mxu0 }
 0xd60   : > { %v2981_v8 = vadd.f32 %v2980_v33, %v2921_v55 }
 0xd61   : > { %v4227_v17 = vpop.f32.mrf.mxu0 }
 0xd62   : > { %3373 = vrot.lane.b32.xlu1 %v2981_v8, %s6607_s7  ;;  %s3682_s7 = scalar_lea.hbm %s5172_s27, %s4024_s13 }
 0xd63   : > { %v2924_v42 = vpop.f32.mrf.mxu0 }
 0xd65   : > { %v4228_v36 = vpop.f32.mrf.mxu0 }
 0xd67   : > { %v3118_v46 = vpop.f32.mrf.mxu0 }
 0xd69   : > { %v4245_v30 = vpop.f32.mrf.mxu0 }
 0xd6a   : > { %v4015_v30 = vld [vmem:[#allocation10] ss:$0 sm:$0xff] }
 0xd6b   : > { %v3121_v1 = vpop.f32.mrf.mxu0 }
 0xd6d   : > { %v4246_v63 = vpop.f32.mrf.mxu0 }
 0xd7a   : > { %v3311_v54 = vpop.f32.mrf.mxu0 }
 0xd7c   : > { %v4263_v47 = vpop.f32.mrf.mxu0 }
 0xd7e   : > { %v3314_v11 = vpop.f32.mrf.mxu0 }
 0xd80   : > { %v4264_v6 = vpop.f32.mrf.mxu0 }
 0xd89   : > { %v3173_v37 = vpop.f32.mrf.mxu1 }
 0xd8a   : > { %v3174_v43 = vadd.f32 %v3173_v37, %v3118_v46  ;;  %v3366_v21 = vpop.f32.mrf.mxu0 }
 0xd8b   : > { %v3367_v28 = vadd.f32 %v3366_v21, %v3311_v54  ;;  %v4257_v24 = vpop.f32.mrf.mxu1 }
 0xd8c   : > { %v4275_v35 = vpop.f32.mrf.mxu0  ;;  %3377 = vrot.lane.b32.xlu0 %v3174_v43, %s6506_s11  ;;  %s6611_s11 = sld [smem:[#allocation37_spill]] }
 0xd8d   : > { %3381 = vrot.lane.b32.xlu1 %v3367_v28, %s6608_s18  ;;  %v3176_v40 = vpop.f32.mrf.mxu1  ;;  %s3667_s18 = scalar_lea.sflag [#allocation4], %s1105_s26 }
 0xd8e   : > { %v3369_v44 = vpop.f32.mrf.mxu0 }
 0xd8f   : > { %v4258_v56 = vpop.f32.mrf.mxu1 }
 0xd90   : > { %v4276_v52 = vpop.f32.mrf.mxu0  ;;  %v4021_v56 = vld [vmem:[#allocation11] ss:$0 sm:$0xff] }
 0xd92   : > { %v4626_v0 = vld [vmem:[%s6611_s11 + $0x18] sm:$0xff]   ;;  %v4627_v48 = vld [vmem:[%s6611_s11 + $0x10] sm:$0xff]   ;;  %v4628_v15 = vld [vmem:[%s6611_s11 + $0x8] sm:$0xff]  }
 0xd93   : > { %4294 = vmatpush3.bf16.msra.mxu0 %v4626_v0  ;;  %v4629_v60 = vld [vmem:[%s6611_s11] sm:$0xff]  }
 0xd94   : > { %4295 = vmatprep.subr.bf16.mxu0 %v6596_v41 }
 0xd97   : > { %4296 = vmatpush3.bf16.msra.mxu0 %v4627_v48 }
 0xd98   : > { %4297 = vmatprep.subr.bf16.mxu0 %v6596_v41 }
 0xd9b   : > { %4298 = vmatpush3.bf16.msra.mxu0 %v4628_v15 }
 0xd9c   : > { %4299 = vmatprep.subr.bf16.mxu0 %v6596_v41 }
 0xd9f   : > { %4300 = vmatpush3.bf16.msra.mxu0 %v4629_v60 }
 0xdd4   : > { %v3374_v58 = vpop.permute.xlu1 %3373 }
 0xdd5   : > { %v3384_v50 = vsel %vm1288_vm2, %v2783_v26, %v3374_v58  ;;  %v4022_v58 = vld [vmem:[#allocation13] ss:$0 sm:$0xff] }
 0xdfe   : > { %v3378_v22 = vpop.permute.xlu0 %3377 }
 0xdff   : > { %v3382_v53 = vpop.permute.xlu1 %3381  ;;  %v3385_v51 = vsel %vm1742_vm4, %v3384_v50, %v3378_v22 }
 0xe00   : > { %v3386_v5 = vsel %vm1744_vm5, %v3385_v51, %v3382_v53 }
 0xe01   : > { %v3387_v13 = vpack.c.bf16 %v3386_v5, %v3386_v5 }
 0xe03   : > { %4282 = vmatmul.mubr.msk.bf16.vlgmr.msra.gmra.mxu1 %vm1172_vm1, %v3387_v13 }
 0xe04   : > { %4289 = vmatprep.mubr.msk.bf16.mxu1 %vm4967_vm0, %v6596_v41  ;;  %4286 = vmatpush3.bf16.msra.mxu1 %v4624_v16 }
 0xe05   : > { %4287 = vmatprep.subr.bf16.mxu1 %v6596_v41 }
 0xe08   : > { %4288 = vmatpush3.bf16.msra.mxu1 %v4625_v7 }
 0xec3   : > { %v3448_v10 = vpop.f32.mrf.mxu1 }
 0xec4   : > { %v3449_v4 = vadd.f32 %v4005_v23, %v3448_v10 }
 0xec5   : > { %v4283_v61 = vpop.f32.mrf.mxu1 }
 0xec6   : > { %v3454_v14 = vadd.f32 %v3449_v4, %v6610_v31 }
 0xec7   : > { %v3451_v49 = vpop.f32.mrf.mxu1 }
 0xec8   : > { %v3455_v18 = vsel %vm1172_vm1, %v3454_v14, 0.0 }
 0xec9   : > { %3456 = vadd.xlane.f32.xlu0 %v3455_v18  ;;  %v4284_v19 = vpop.f32.mrf.mxu1 }
 0xf52   : > { %v3457_v27 = vpop.xlane.xlu0 %3456 }
 0xf53   : > { %v3458_v38 = vmul.f32 0.03125, %v3457_v27 }
 0xf55   : > { %v3459_v39 = vsub.f32 %v3454_v14, %v3458_v38 }
 0xf57   : > { %v3460_v9 = vmul.f32 %v3459_v39, %v3459_v39 }
 0xf59   : > { %v3461_v12 = vsel %vm1172_vm1, %v3460_v9, 0.0 }
 0xf5a   : > { %3462 = vadd.xlane.f32.xlu1 %v3461_v12 }
 0xfe3   : > { %v3463_v33 = vpop.xlane.xlu1 %3462 }
 0xfe4   : > { %v3464_v29 = vmul.f32 0.03125, %v3463_v33 }
 0xfe6   : > { %v3465_v20 = vadd.f32 1e-05, %v3464_v29 }
 0xfe8   : > { %4664 = vrsqrt.f32 %v3465_v20 }
 0xff5   : > { %v4665_v34 = vpop.eup %4664 }
 0xff6   : > { %v3467_v59 = vmul.f32 %v4665_v34, %v3459_v39 }
 0xff8   : > { %v3475_v57 = vmul.f32 %v4009_v3, %v3467_v59 }
 0xffa   : > { %v3483_v2 = vadd.f32 %v4010_v62, %v3475_v57 }
 0xffc   : > { %v3484_v26 = vpack.c.bf16 %v3483_v2, %v3483_v2 }
 0xffe   : > { %4290 = vmatmul.mubr.msk.bf16.vlgmr.msra.gmra.mxu1 %vm1172_vm1, %v3484_v26 }
0x10be   : > { %v3545_v25 = vpop.f32.mrf.mxu1 }
0x10bf   : > { %v3546_v55 = vadd.f32 %v4011_v32, %v3545_v25 }
0x10c0   : > { %v4291_v8 = vpop.f32.mrf.mxu1 }
0x10c1   : > { %v3551_v17 = vmax.f32 %v3546_v55, 0.0 }
0x10c2   : > { %v3548_v42 = vpop.f32.mrf.mxu1 }
0x10c3   : > { %v3552_v36 = vpack.c.bf16 %v3551_v17, %v3551_v17 }
0x10c4   : > { %v4292_v46 = vpop.f32.mrf.mxu1 }
0x10c5   : > { %4302 = vmatmul.mubr.msk.bf16.vlgmr.msra.gmra.mxu0 %vm2744_vm10, %v3552_v36 }
0x1185   : > { %v3629_v1 = vpop.f32.mrf.mxu0 }
0x1186   : > { %v3630_v63 = vadd.f32 %v4015_v30, %v3629_v1 }
0x1187   : > { %v4303_v54 = vpop.f32.mrf.mxu0 }
0x1188   : > { %v3635_v47 = vadd.f32 %v3630_v63, %v3483_v2 }
0x1189   : > { %v3632_v11 = vpop.f32.mrf.mxu0 }
0x118a   : > { %v3636_v41 = vsel %vm1172_vm1, %v3635_v47, 0.0 }
0x118b   : > { %3637 = vadd.xlane.f32.xlu0 %v3636_v41  ;;  %v4304_v45 = vpop.f32.mrf.mxu0 }
0x1214   : > { %v3638_v6 = vpop.xlane.xlu0 %3637 }
0x1215   : > { %v3639_v37 = vmul.f32 0.03125, %v3638_v6 }
0x1217   : > { %v3640_v43 = vsub.f32 %v3635_v47, %v3639_v37 }
0x1219   : > { %v3641_v21 = vmul.f32 %v3640_v43, %v3640_v43 }
0x121b   : > { %v3642_v28 = vsel %vm1172_vm1, %v3641_v21, 0.0 }
0x121c   : > { %3643 = vadd.xlane.f32.xlu0 %v3642_v28 }
0x12a5   : > { %v3644_v24 = vpop.xlane.xlu0 %3643 }
0x12a6   : > { %v3645_v35 = vmul.f32 0.03125, %v3644_v24 }
0x12a8   : > { %v3646_v40 = vadd.f32 1e-05, %v3645_v35 }
0x12aa   : > { %4666 = vrsqrt.f32 %v3646_v40 }
0x12b7   : > { %v4667_v44 = vpop.eup %4666 }
0x12b8   : > { %v3648_v52 = vmul.f32 %v4667_v44, %v3640_v43 }
0x12ba   : > { %v3656_v50 = vmul.f32 %v4021_v56, %v3648_v52 }
0x12bc   : > { %v3664_v22 = vadd.f32 %v4022_v58, %v3656_v50 }
0x12be   : > { %3665 = vst.msk [vmem:[%s1107_s28] sm:$0xff] %vm1172_vm1, %v3664_v22 }
0x12bf   : > { %4863 = shalt.err (!%p4860_p13)
}
0x12c0   : > { %s4864_s0 = scalar_lea.hbm %s3682_s7, 128  ;;  %s4868_s26 = scalar_lea.hbm %s5172_s27, 256 }
0x12c1   : > { %p4865_p9 = scmp.ne.s32.totalorder %s3682_s7, %s4864_s0  ;;  %p4869_p5 = scmp.lt.s32.totalorder %s3682_s7, %s5172_s27 }
0x12c2   : > { %p4870_p6 = scmp.lt.s32.totalorder %s4868_s26, %s4864_s0 }
0x12c3   : > { %p4866_p4 = pnand %p4865_p9, %p6612_p8 }
0x12c4   : > { %p4871_p10 = por %p4870_p6, %p4869_p5 }
0x12c5   : > { %p4867_p12 = pneg %p4866_p4 }
0x12c7   : > { %p4872_p7 = pnand %p4871_p10, %p4867_p12 }
0x12c9   : > { %4875 = shalt.err (!%p4872_p7)
}
0x12ca   : > { %4335 = dma.vmem_to_hbm [thread:$0]  (%p6612_p8), %s3685_s1, 128, %s3682_s7, %s3667_s18  }
0x12cb PF: > { %s6613_s5 = sld [smem:[#allocation40_spill]] }
0x12cc   : > { %s6614_s3 = sld [smem:[#allocation38_spill]] }
0x12cd   : > { %s6615_s2 = sld [smem:[#allocation43_spill]] }
0x12d1   : > { %p4377_p11 = scmp.ge.s32.totalorder %s6613_s5, 2 }
0x12d2   : > { %s3699_s4 = sand.u32 1, %s6614_s3  }
0x12d3   : > { %p6616_p0 = scmp.ne.s32.totalorder %s6615_s2, 0  ;;  %s3700_s22 = scalar_lea.sflag [#allocation4], %s3699_s4 }
0x12d5   : > { %p4360_p1 = pnand %p4377_p11, %p6616_p0 }
0x12d7   : > { %p4361_p2 = pneg %p4360_p1 }
0x12d9   : > { %4909 = dma.done.wait (%p4361_p2), %s3700_s22, 128  }
0x12da   : > { %4911 = vsyncadd (%p4361_p2), %s3700_s22, 4294967168  ;;  %s6617_s28 = sld [smem:[#allocation41_spill]]  ;;  %s6620_s22 = smov %s4918_s23 }
0x12db   : > { %s6618_s13 = sld [smem:[#allocation39_spill]] }
0x12dc   : > { %s6619_s26 = sld [smem:[#allocation42_spill]] }
0x12e0   : > { %p78_p3 = scmp.ge.s32.totalorder %s6617_s28, 4  }
0x12e1   : > { %s6621_s23 = smov %s6618_s13 }
0x12e2   :  { %80 = sbr.rel (!%p78_p3) target bundleno = 58 (0x3a), region = 262 }
0x12e7   :  { %3712 = vsyncpa [#allocation3], 1 }
0x12e8   :  { %3714 = vsyncpa [#allocation3 + $0x1], 1 }
0x12e9   :  { %3715 = vsyncpa [#allocation6], 1 }
0x12ea   :  { %3716 = vsyncpa [#allocation9], 1 }
0x12eb   :  { %3717 = vsyncpa [#allocation12], 1 }
0x12ec   :  { %3718 = vsyncpa [#allocation4], 1 }
0x12ed   :  { %3720 = vsyncpa [#allocation4 + $0x1], 1 }

</bundles_post_ra>
